<compile_context>
chip_gen: v7x
topology: tpu7x:2x2x1
jax: 0.10.0
libtpu: 0.0.40
codegen_flags: <defaults>
</compile_context>

<pallas_src>
import math

import jax
import jax.numpy as jnp
import numpy as np
from jax.experimental import pallas as pl
from jax.experimental.pallas import tpu as pltpu

D_MODEL = 32          # self.d_model
SEQ = 64              # self.seq_len == len_q == len_k == len_v
Z_DIM = 64            # z_dim
IN_CH = 6             # raw force channels
IN_CH_PAD = 8         # padded channel count (sublane friendly)
TEMP = float(math.sqrt(D_MODEL))   # ScaledDotProductAttention temperature = d_k ** 0.5
VMEM_LIMIT = 32 * 1024 * 1024


def _tiling(B):
    """Batch tile (multiple of 8, <= 128) and padded batch size."""
    if B <= 64:
        bt = ((B + 7) // 8) * 8          # one grid step
    elif B <= 256:
        bt = ((B + 15) // 16) * 8        # two grid steps (megacore friendly on v7x)
    else:
        bt = 128
    return bt, ((B + bt - 1) // bt) * bt


# ---------------------------------------------------------------------------
# Fused kernel: embed -> packed qkv -> softmax attention -> (fc ∘ head) + ReLU
# ---------------------------------------------------------------------------
def _encoder_kernel(x_ref, we_ref, be_ref, wqkv_ref, bqkv_ref, w2_ref, b2_ref, z_ref):
    m = x_ref.shape[0]            # b_tile * SEQ
    bt = m // SEQ

    # embed: 1x1 conv (+ folded BN) + ReLU (act=True)
    e = jnp.dot(x_ref[...], we_ref[...], preferred_element_type=jnp.float32)
    e = jnp.maximum(e + be_ref[...], 0.0)                                  # (m, 32) f32

    # packed q|k|v projection (act=False); 1/temperature pre-folded into the q columns
    qkv = jnp.dot(e.astype(jnp.bfloat16), wqkv_ref[...],
                  preferred_element_type=jnp.float32) + bqkv_ref[...]      # (m, 96) f32

    q3 = qkv[:, 0 * D_MODEL:1 * D_MODEL].astype(jnp.bfloat16).reshape(bt, SEQ, D_MODEL)
    k3 = qkv[:, 1 * D_MODEL:2 * D_MODEL].astype(jnp.bfloat16).reshape(bt, SEQ, D_MODEL)
    v3 = qkv[:, 2 * D_MODEL:3 * D_MODEL].astype(jnp.bfloat16).reshape(bt, SEQ, D_MODEL)

    # single-head scaled-dot-product attention (softmax kept in f32)
    s = jnp.einsum("btd,bsd->bts", q3, k3,
                   preferred_element_type=jnp.float32)                     # (bt, SEQ, SEQ)
    s = s - jnp.max(s, axis=-1, keepdims=True)
    p = jnp.exp(s)
    inv = pl.reciprocal(jnp.sum(p, axis=-1, keepdims=True), approx=True)   # EUP slot
    a = (p * inv).astype(jnp.bfloat16)
    o = jnp.einsum("bts,bsd->btd", a, v3,
                   preferred_element_type=jnp.float32)                     # (bt, SEQ, 32)
    ob = o.astype(jnp.bfloat16)

    # fused (fc ∘ head-conv): z = relu(flatten(o) @ W2 + b2), W2 fed as (SEQ, 32, 64).
    # Unrolled accumulation over seq positions keeps every op a plain 2-D MXU matmul
    # (no lane-merging reshape inside the kernel).
    acc = jnp.zeros((bt, Z_DIM), jnp.float32)
    for t in range(SEQ):
        acc = acc + jnp.dot(ob[:, t, :], w2_ref[t],
                            preferred_element_type=jnp.float32)
    z_ref[...] = jnp.maximum(acc + b2_ref[...], 0.0)


# ---------------------------------------------------------------------------
# One-time host-side transform: module params -> fused kernel params
# ---------------------------------------------------------------------------
def prepare_params(p):
    we = jnp.pad(p["we"], ((0, IN_CH_PAD - IN_CH), (0, 0)))                # (8, 32)
    wqkv = jnp.concatenate([p["wq"] / TEMP, p["wk"], p["wv"]], axis=1)     # (32, 96)
    bqkv = jnp.concatenate([p["bq"] / TEMP, p["bk"], p["bv"]],
                           axis=0).reshape(1, 3 * D_MODEL)

    # Fold the (act=False, purely linear) MHA output projection `fc` into the head conv:
    #   flat[b, s*32+e] = (o[b,s,:] @ wf)[e] + bf[e]
    #   z = relu(flat @ wo + bo) = relu( sum_s o[b,s,:] @ W2[s] + b2 )
    wo_r = p["wo"].reshape(SEQ, D_MODEL, Z_DIM)                            # [s, e, z]
    w2 = jnp.einsum("de,sez->sdz", p["wf"], wo_r)                          # (SEQ, 32, 64)
    b2 = (p["bo"] + jnp.einsum("e,sez->z", p["bf"], wo_r)).reshape(1, Z_DIM)

    return dict(
        we=we.astype(jnp.bfloat16),
        be=p["be"].reshape(1, D_MODEL).astype(jnp.float32),
        wqkv=wqkv.astype(jnp.bfloat16),
        bqkv=bqkv.astype(jnp.float32),
        w2=w2.astype(jnp.bfloat16),
        b2=b2.astype(jnp.float32),
    )


# ---------------------------------------------------------------------------
# Wrapper
# ---------------------------------------------------------------------------
def cnn_force_encoder_forward(x, kp):
    B = x.shape[0]
    b_tile, b_pad = _tiling(B)
    grid = b_pad // b_tile

    # pad batch to a tile multiple and force channels 6 -> 8 (matching zero rows are in
    # we); present a plain 2-D contiguous bf16 (B_pad*SEQ, 8) matmul operand.
    x_p = jnp.pad(x, ((0, b_pad - B), (0, 0), (0, IN_CH_PAD - IN_CH)))
    x2 = x_p.astype(jnp.bfloat16).reshape(b_pad * SEQ, IN_CH_PAD)

    def w_spec(shape):                                   # resident weights
        return pl.BlockSpec(shape, lambda b: (0,) * len(shape))

    z = pl.pallas_call(
        _encoder_kernel,
        out_shape=jax.ShapeDtypeStruct((b_pad, Z_DIM), jnp.float32),
        grid_spec=pltpu.PrefetchScalarGridSpec(
            num_scalar_prefetch=0,
            grid=(grid,),
            in_specs=[
                pl.BlockSpec((b_tile * SEQ, IN_CH_PAD), lambda b: (b, 0)),
                w_spec((IN_CH_PAD, D_MODEL)), w_spec((1, D_MODEL)),         # embed
                w_spec((D_MODEL, 3 * D_MODEL)), w_spec((1, 3 * D_MODEL)),   # packed q|k|v
                w_spec((SEQ, D_MODEL, Z_DIM)), w_spec((1, Z_DIM)),          # fused head
            ],
            out_specs=pl.BlockSpec((b_tile, Z_DIM), lambda b: (b, 0)),
        ),
        compiler_params=pltpu.CompilerParams(
            dimension_semantics=("parallel",),
            vmem_limit_bytes=VMEM_LIMIT),
    )(x2, kp["we"], kp["be"], kp["wqkv"], kp["bqkv"], kp["w2"], kp["b2"])

    return z[:B].reshape(B, Z_DIM, 1, 1)


# ---------------------------------------------------------------------------
# Deterministic parameter init (synthetic): Conv2d(1x1) + BatchNorm2d(eval) folded
# ---------------------------------------------------------------------------
def _fold_conv_bn(w, b, gamma, beta, mean, var, eps=1e-5):
    scale = gamma / jnp.sqrt(var + eps)
    return w * scale[None, :], (b - mean) * scale + beta


def init_params(key):
    def conv_bn(k, cin, cout):
        k1, k2, k3, k4 = jax.random.split(k, 4)
        w = jax.random.normal(k1, (cin, cout), jnp.float32) / math.sqrt(cin)
        b = 0.02 * jax.random.normal(k2, (cout,), jnp.float32)
        gamma = 1.0 + 0.1 * jax.random.normal(k3, (cout,), jnp.float32)
        beta = 0.1 * jax.random.normal(k4, (cout,), jnp.float32)
        mean = jnp.zeros((cout,), jnp.float32)   # BN running stats at init (eval mode)
        var = jnp.ones((cout,), jnp.float32)
        return _fold_conv_bn(w, b, gamma, beta, mean, var)

    ks = jax.random.split(key, 6)
    we, be = conv_bn(ks[0], IN_CH, D_MODEL)                 # embed (act=True)
    wq, bq = conv_bn(ks[1], D_MODEL, D_MODEL)               # w_qs  (act=False)
    wk, bk = conv_bn(ks[2], D_MODEL, D_MODEL)               # w_ks  (act=False)
    wv, bv = conv_bn(ks[3], D_MODEL, D_MODEL)               # w_vs  (act=False)
    wf, bf = conv_bn(ks[4], D_MODEL, D_MODEL)               # fc    (act=False)
    wo, bo = conv_bn(ks[5], SEQ * D_MODEL, Z_DIM)           # conv  (act=True)
    return dict(we=we, be=be, wq=wq, bq=bq, wk=wk, bk=bk,
                wv=wv, bv=bv, wf=wf, bf=bf, wo=wo, bo=bo)


# ---------------------------------------------------------------------------
# Pure-JAX f32 reference (module semantics, unfused parameters)
# ---------------------------------------------------------------------------
def reference_forward(x, p):
    B = x.shape[0]
    e = jnp.maximum(x @ p["we"] + p["be"], 0.0)
    q = e @ p["wq"] + p["bq"]
    k = e @ p["wk"] + p["bk"]
    v = e @ p["wv"] + p["bv"]
    s = jnp.einsum("btd,bsd->bts", q / TEMP, k)
    a = jax.nn.softmax(s, axis=-1)
    o = jnp.einsum("bts,bsd->btd", a, v)
    f = o @ p["wf"] + p["bf"]
    z = jnp.maximum(f.reshape(B, -1) @ p["wo"] + p["bo"], 0.0)
    return z.reshape(B, Z_DIM, 1, 1)


if __name__ == "__main__":
    key = jax.random.PRNGKey(0)
    kx, kparam = jax.random.split(key)
    B = 2
    x = jax.random.normal(kx, (B, SEQ, IN_CH), jnp.float32)   # batch=2, seq=64, ch=6
    params = init_params(kparam)
    kernel_params = prepare_params(params)                    # one-time host transform

    fwd = jax.jit(cnn_force_encoder_forward)
    out = jax.block_until_ready(fwd(x, kernel_params))

    assert out.shape == (B, Z_DIM, 1, 1) and out.dtype == jnp.float32
    ref = reference_forward(x, params)
    # bf16 MXU operands (f32 accumulate) + approx (EUP) softmax reciprocal: expect a few
    # 1e-3 relative error vs the exact-f32 reference.
    np.testing.assert_allclose(np.asarray(out), np.asarray(ref), rtol=3e-2, atol=3e-2)
    print("KERNEL_OK")
</pallas_src>

<mosaic_0001>
module attributes {stable_mosaic.version = 11 : i64} {
  func.func @_encoder_kernel(%arg0: i32, %arg1: memref<512x8xbf16, #tpu.memory_space<vmem>>, %arg2: memref<8x32xbf16, #tpu.memory_space<vmem>>, %arg3: memref<1x32xf32, #tpu.memory_space<vmem>>, %arg4: memref<32x96xbf16, #tpu.memory_space<vmem>>, %arg5: memref<1x96xf32, #tpu.memory_space<vmem>>, %arg6: memref<64x32x64xbf16, #tpu.memory_space<vmem>>, %arg7: memref<1x64xf32, #tpu.memory_space<vmem>>, %arg8: memref<8x64xf32, #tpu.memory_space<vmem>>) attributes {dimension_semantics = [#tpu.dimension_semantics<parallel>], iteration_bounds = array<i64: 1>, scalar_prefetch = 0 : i64, scratch_operands = 0 : i64, tpu.core_type = #tpu.core_type<tc>, window_params = [{transform_indices = @transform_0, window_bounds = array<i64: 512, 8>}, {pipeline_mode = #tpu.pipeline_mode<synchronous>, transform_indices = @transform_1, window_bounds = array<i64: 8, 32>}, {pipeline_mode = #tpu.pipeline_mode<synchronous>, transform_indices = @transform_2, window_bounds = array<i64: 1, 32>}, {pipeline_mode = #tpu.pipeline_mode<synchronous>, transform_indices = @transform_3, window_bounds = array<i64: 32, 96>}, {pipeline_mode = #tpu.pipeline_mode<synchronous>, transform_indices = @transform_4, window_bounds = array<i64: 1, 96>}, {pipeline_mode = #tpu.pipeline_mode<synchronous>, transform_indices = @transform_5, window_bounds = array<i64: 64, 32, 64>}, {pipeline_mode = #tpu.pipeline_mode<synchronous>, transform_indices = @transform_6, window_bounds = array<i64: 1, 64>}, {transform_indices = @transform_7, window_bounds = array<i64: 8, 64>}]} {
    %c0 = arith.constant 0 : index
    %c0_0 = arith.constant 0 : index
    %0 = vector.load %arg1[%c0, %c0_0] : memref<512x8xbf16, #tpu.memory_space<vmem>>, vector<512x8xbf16>
    %c0_1 = arith.constant 0 : index
    %c0_2 = arith.constant 0 : index
    %1 = vector.load %arg2[%c0_1, %c0_2] : memref<8x32xbf16, #tpu.memory_space<vmem>>, vector<8x32xbf16>
    %cst = arith.constant dense<0.000000e+00> : vector<512x32xf32>
    %2 = tpu.matmul %0, %1, %cst {dimension_numbers = #tpu.dot_dimension_numbers<[1], [0], [0], [1], [0, 0, 1, 1], [], []>} : vector<512x8xbf16>, vector<8x32xbf16>, vector<512x32xf32> -> vector<512x32xf32>
    %c0_3 = arith.constant 0 : index
    %c0_4 = arith.constant 0 : index
    %3 = vector.load %arg3[%c0_3, %c0_4] : memref<1x32xf32, #tpu.memory_space<vmem>>, vector<1x32xf32>
    %4 = vector.broadcast %3 : vector<1x32xf32> to vector<512x32xf32>
    %5 = arith.addf %2, %4 : vector<512x32xf32>
    %cst_5 = arith.constant 0.000000e+00 : f32
    %6 = vector.broadcast %cst_5 : f32 to vector<512x32xf32>
    %7 = arith.maximumf %5, %6 : vector<512x32xf32>
    %8 = arith.truncf %7 : vector<512x32xf32> to vector<512x32xbf16>
    %c0_6 = arith.constant 0 : index
    %c0_7 = arith.constant 0 : index
    %9 = vector.load %arg4[%c0_6, %c0_7] : memref<32x96xbf16, #tpu.memory_space<vmem>>, vector<32x96xbf16>
    %cst_8 = arith.constant dense<0.000000e+00> : vector<512x96xf32>
    %10 = tpu.matmul %8, %9, %cst_8 {dimension_numbers = #tpu.dot_dimension_numbers<[1], [0], [0], [1], [0, 0, 1, 1], [], []>} : vector<512x32xbf16>, vector<32x96xbf16>, vector<512x96xf32> -> vector<512x96xf32>
    %c0_9 = arith.constant 0 : index
    %c0_10 = arith.constant 0 : index
    %11 = vector.load %arg5[%c0_9, %c0_10] : memref<1x96xf32, #tpu.memory_space<vmem>>, vector<1x96xf32>
    %12 = vector.broadcast %11 : vector<1x96xf32> to vector<512x96xf32>
    %13 = arith.addf %10, %12 : vector<512x96xf32>
    %14 = vector.extract_strided_slice %13 {offsets = [0, 0], sizes = [512, 32], strides = [1, 1]} : vector<512x96xf32> to vector<512x32xf32>
    %15 = arith.truncf %14 : vector<512x32xf32> to vector<512x32xbf16>
    %16 = vector.shape_cast %15 : vector<512x32xbf16> to vector<8x64x32xbf16>
    %17 = vector.extract_strided_slice %13 {offsets = [0, 32], sizes = [512, 32], strides = [1, 1]} : vector<512x96xf32> to vector<512x32xf32>
    %18 = arith.truncf %17 : vector<512x32xf32> to vector<512x32xbf16>
    %19 = vector.shape_cast %18 : vector<512x32xbf16> to vector<8x64x32xbf16>
    %20 = vector.extract_strided_slice %13 {offsets = [0, 64], sizes = [512, 32], strides = [1, 1]} : vector<512x96xf32> to vector<512x32xf32>
    %21 = arith.truncf %20 : vector<512x32xf32> to vector<512x32xbf16>
    %22 = vector.shape_cast %21 : vector<512x32xbf16> to vector<8x64x32xbf16>
    "tpu.trace_start"() <{level = 10 : i32, message = "btd,bsd->bts"}> : () -> ()
    %cst_11 = arith.constant dense<0.000000e+00> : vector<8x64x64xf32>
    %23 = tpu.matmul %16, %19, %cst_11 {dimension_numbers = #tpu.dot_dimension_numbers<[2], [2], [1], [1], [0, 0, 0, 1, 1, 1], [0], [0]>} : vector<8x64x32xbf16>, vector<8x64x32xbf16>, vector<8x64x64xf32> -> vector<8x64x64xf32>
    "tpu.trace_stop"() : () -> ()
    %cst_12 = arith.constant dense<0xFF800000> : vector<8x64xf32>
    %24 = vector.multi_reduction <maximumf>, %23, %cst_12 [2] : vector<8x64x64xf32> to vector<8x64xf32>
    %25 = vector.shape_cast %24 : vector<8x64xf32> to vector<8x64x1xf32>
    %26 = vector.broadcast %25 : vector<8x64x1xf32> to vector<8x64x64xf32>
    %27 = arith.subf %23, %26 : vector<8x64x64xf32>
    %28 = math.exp %27 : vector<8x64x64xf32>
    %cst_13 = arith.constant dense<0.000000e+00> : vector<8x64xf32>
    %29 = vector.multi_reduction <add>, %28, %cst_13 [2] : vector<8x64x64xf32> to vector<8x64xf32>
    %30 = vector.shape_cast %29 : vector<8x64xf32> to vector<8x64x1xf32>
    %31 = tpu.reciprocal %30 {approx = true} : vector<8x64x1xf32> -> vector<8x64x1xf32>
    %32 = vector.broadcast %31 : vector<8x64x1xf32> to vector<8x64x64xf32>
    %33 = arith.mulf %28, %32 : vector<8x64x64xf32>
    %34 = arith.truncf %33 : vector<8x64x64xf32> to vector<8x64x64xbf16>
    "tpu.trace_start"() <{level = 10 : i32, message = "bts,bsd->btd"}> : () -> ()
    %cst_14 = arith.constant dense<0.000000e+00> : vector<8x64x32xf32>
    %35 = tpu.matmul %34, %22, %cst_14 {dimension_numbers = #tpu.dot_dimension_numbers<[2], [1], [1], [2], [0, 0, 0, 1, 1, 2], [0], [0]>} : vector<8x64x64xbf16>, vector<8x64x32xbf16>, vector<8x64x32xf32> -> vector<8x64x32xf32>
    "tpu.trace_stop"() : () -> ()
    %36 = arith.truncf %35 : vector<8x64x32xf32> to vector<8x64x32xbf16>
    %cst_15 = arith.constant 0.000000e+00 : f32
    %37 = vector.broadcast %cst_15 : f32 to vector<8x64xf32>
    %38 = vector.extract_strided_slice %36 {offsets = [0, 0, 0], sizes = [8, 1, 32], strides = [1, 1, 1]} : vector<8x64x32xbf16> to vector<8x1x32xbf16>
    %39 = vector.shape_cast %38 : vector<8x1x32xbf16> to vector<8x32xbf16>
    %c0_16 = arith.constant 0 : index
    %c0_17 = arith.constant 0 : index
    %c0_18 = arith.constant 0 : index
    %40 = vector.load %arg6[%c0_16, %c0_17, %c0_18] : memref<64x32x64xbf16, #tpu.memory_space<vmem>>, vector<1x32x64xbf16>
    %41 = vector.shape_cast %40 : vector<1x32x64xbf16> to vector<32x64xbf16>
    %cst_19 = arith.constant dense<0.000000e+00> : vector<8x64xf32>
    %42 = tpu.matmul %39, %41, %cst_19 {dimension_numbers = #tpu.dot_dimension_numbers<[1], [0], [0], [1], [0, 0, 1, 1], [], []>} : vector<8x32xbf16>, vector<32x64xbf16>, vector<8x64xf32> -> vector<8x64xf32>
    %43 = arith.addf %37, %42 : vector<8x64xf32>
    %44 = vector.extract_strided_slice %36 {offsets = [0, 1, 0], sizes = [8, 1, 32], strides = [1, 1, 1]} : vector<8x64x32xbf16> to vector<8x1x32xbf16>
    %45 = vector.shape_cast %44 : vector<8x1x32xbf16> to vector<8x32xbf16>
    %c1 = arith.constant 1 : index
    %c0_20 = arith.constant 0 : index
    %c0_21 = arith.constant 0 : index
    %46 = vector.load %arg6[%c1, %c0_20, %c0_21] : memref<64x32x64xbf16, #tpu.memory_space<vmem>>, vector<1x32x64xbf16>
    %47 = vector.shape_cast %46 : vector<1x32x64xbf16> to vector<32x64xbf16>
    %cst_22 = arith.constant dense<0.000000e+00> : vector<8x64xf32>
    %48 = tpu.matmul %45, %47, %cst_22 {dimension_numbers = #tpu.dot_dimension_numbers<[1], [0], [0], [1], [0, 0, 1, 1], [], []>} : vector<8x32xbf16>, vector<32x64xbf16>, vector<8x64xf32> -> vector<8x64xf32>
    %49 = arith.addf %43, %48 : vector<8x64xf32>
    %50 = vector.extract_strided_slice %36 {offsets = [0, 2, 0], sizes = [8, 1, 32], strides = [1, 1, 1]} : vector<8x64x32xbf16> to vector<8x1x32xbf16>
    %51 = vector.shape_cast %50 : vector<8x1x32xbf16> to vector<8x32xbf16>
    %c2 = arith.constant 2 : index
    %c0_23 = arith.constant 0 : index
    %c0_24 = arith.constant 0 : index
    %52 = vector.load %arg6[%c2, %c0_23, %c0_24] : memref<64x32x64xbf16, #tpu.memory_space<vmem>>, vector<1x32x64xbf16>
    %53 = vector.shape_cast %52 : vector<1x32x64xbf16> to vector<32x64xbf16>
    %cst_25 = arith.constant dense<0.000000e+00> : vector<8x64xf32>
    %54 = tpu.matmul %51, %53, %cst_25 {dimension_numbers = #tpu.dot_dimension_numbers<[1], [0], [0], [1], [0, 0, 1, 1], [], []>} : vector<8x32xbf16>, vector<32x64xbf16>, vector<8x64xf32> -> vector<8x64xf32>
    %55 = arith.addf %49, %54 : vector<8x64xf32>
    %56 = vector.extract_strided_slice %36 {offsets = [0, 3, 0], sizes = [8, 1, 32], strides = [1, 1, 1]} : vector<8x64x32xbf16> to vector<8x1x32xbf16>
    %57 = vector.shape_cast %56 : vector<8x1x32xbf16> to vector<8x32xbf16>
    %c3 = arith.constant 3 : index
    %c0_26 = arith.constant 0 : index
    %c0_27 = arith.constant 0 : index
    %58 = vector.load %arg6[%c3, %c0_26, %c0_27] : memref<64x32x64xbf16, #tpu.memory_space<vmem>>, vector<1x32x64xbf16>
    %59 = vector.shape_cast %58 : vector<1x32x64xbf16> to vector<32x64xbf16>
    %cst_28 = arith.constant dense<0.000000e+00> : vector<8x64xf32>
    %60 = tpu.matmul %57, %59, %cst_28 {dimension_numbers = #tpu.dot_dimension_numbers<[1], [0], [0], [1], [0, 0, 1, 1], [], []>} : vector<8x32xbf16>, vector<32x64xbf16>, vector<8x64xf32> -> vector<8x64xf32>
    %61 = arith.addf %55, %60 : vector<8x64xf32>
    %62 = vector.extract_strided_slice %36 {offsets = [0, 4, 0], sizes = [8, 1, 32], strides = [1, 1, 1]} : vector<8x64x32xbf16> to vector<8x1x32xbf16>
    %63 = vector.shape_cast %62 : vector<8x1x32xbf16> to vector<8x32xbf16>
    %c4 = arith.constant 4 : index
    %c0_29 = arith.constant 0 : index
    %c0_30 = arith.constant 0 : index
    %64 = vector.load %arg6[%c4, %c0_29, %c0_30] : memref<64x32x64xbf16, #tpu.memory_space<vmem>>, vector<1x32x64xbf16>
    %65 = vector.shape_cast %64 : vector<1x32x64xbf16> to vector<32x64xbf16>
    %cst_31 = arith.constant dense<0.000000e+00> : vector<8x64xf32>
    %66 = tpu.matmul %63, %65, %cst_31 {dimension_numbers = #tpu.dot_dimension_numbers<[1], [0], [0], [1], [0, 0, 1, 1], [], []>} : vector<8x32xbf16>, vector<32x64xbf16>, vector<8x64xf32> -> vector<8x64xf32>
    %67 = arith.addf %61, %66 : vector<8x64xf32>
    %68 = vector.extract_strided_slice %36 {offsets = [0, 5, 0], sizes = [8, 1, 32], strides = [1, 1, 1]} : vector<8x64x32xbf16> to vector<8x1x32xbf16>
    %69 = vector.shape_cast %68 : vector<8x1x32xbf16> to vector<8x32xbf16>
    %c5 = arith.constant 5 : index
    %c0_32 = arith.constant 0 : index
    %c0_33 = arith.constant 0 : index
    %70 = vector.load %arg6[%c5, %c0_32, %c0_33] : memref<64x32x64xbf16, #tpu.memory_space<vmem>>, vector<1x32x64xbf16>
    %71 = vector.shape_cast %70 : vector<1x32x64xbf16> to vector<32x64xbf16>
    %cst_34 = arith.constant dense<0.000000e+00> : vector<8x64xf32>
    %72 = tpu.matmul %69, %71, %cst_34 {dimension_numbers = #tpu.dot_dimension_numbers<[1], [0], [0], [1], [0, 0, 1, 1], [], []>} : vector<8x32xbf16>, vector<32x64xbf16>, vector<8x64xf32> -> vector<8x64xf32>
    %73 = arith.addf %67, %72 : vector<8x64xf32>
    %74 = vector.extract_strided_slice %36 {offsets = [0, 6, 0], sizes = [8, 1, 32], strides = [1, 1, 1]} : vector<8x64x32xbf16> to vector<8x1x32xbf16>
    %75 = vector.shape_cast %74 : vector<8x1x32xbf16> to vector<8x32xbf16>
    %c6 = arith.constant 6 : index
    %c0_35 = arith.constant 0 : index
    %c0_36 = arith.constant 0 : index
    %76 = vector.load %arg6[%c6, %c0_35, %c0_36] : memref<64x32x64xbf16, #tpu.memory_space<vmem>>, vector<1x32x64xbf16>
    %77 = vector.shape_cast %76 : vector<1x32x64xbf16> to vector<32x64xbf16>
    %cst_37 = arith.constant dense<0.000000e+00> : vector<8x64xf32>
    %78 = tpu.matmul %75, %77, %cst_37 {dimension_numbers = #tpu.dot_dimension_numbers<[1], [0], [0], [1], [0, 0, 1, 1], [], []>} : vector<8x32xbf16>, vector<32x64xbf16>, vector<8x64xf32> -> vector<8x64xf32>
    %79 = arith.addf %73, %78 : vector<8x64xf32>
    %80 = vector.extract_strided_slice %36 {offsets = [0, 7, 0], sizes = [8, 1, 32], strides = [1, 1, 1]} : vector<8x64x32xbf16> to vector<8x1x32xbf16>
    %81 = vector.shape_cast %80 : vector<8x1x32xbf16> to vector<8x32xbf16>
    %c7 = arith.constant 7 : index
    %c0_38 = arith.constant 0 : index
    %c0_39 = arith.constant 0 : index
    %82 = vector.load %arg6[%c7, %c0_38, %c0_39] : memref<64x32x64xbf16, #tpu.memory_space<vmem>>, vector<1x32x64xbf16>
    %83 = vector.shape_cast %82 : vector<1x32x64xbf16> to vector<32x64xbf16>
    %cst_40 = arith.constant dense<0.000000e+00> : vector<8x64xf32>
    %84 = tpu.matmul %81, %83, %cst_40 {dimension_numbers = #tpu.dot_dimension_numbers<[1], [0], [0], [1], [0, 0, 1, 1], [], []>} : vector<8x32xbf16>, vector<32x64xbf16>, vector<8x64xf32> -> vector<8x64xf32>
    %85 = arith.addf %79, %84 : vector<8x64xf32>
    %86 = vector.extract_strided_slice %36 {offsets = [0, 8, 0], sizes = [8, 1, 32], strides = [1, 1, 1]} : vector<8x64x32xbf16> to vector<8x1x32xbf16>
    %87 = vector.shape_cast %86 : vector<8x1x32xbf16> to vector<8x32xbf16>
    %c8 = arith.constant 8 : index
    %c0_41 = arith.constant 0 : index
    %c0_42 = arith.constant 0 : index
    %88 = vector.load %arg6[%c8, %c0_41, %c0_42] : memref<64x32x64xbf16, #tpu.memory_space<vmem>>, vector<1x32x64xbf16>
    %89 = vector.shape_cast %88 : vector<1x32x64xbf16> to vector<32x64xbf16>
    %cst_43 = arith.constant dense<0.000000e+00> : vector<8x64xf32>
    %90 = tpu.matmul %87, %89, %cst_43 {dimension_numbers = #tpu.dot_dimension_numbers<[1], [0], [0], [1], [0, 0, 1, 1], [], []>} : vector<8x32xbf16>, vector<32x64xbf16>, vector<8x64xf32> -> vector<8x64xf32>
    %91 = arith.addf %85, %90 : vector<8x64xf32>
    %92 = vector.extract_strided_slice %36 {offsets = [0, 9, 0], sizes = [8, 1, 32], strides = [1, 1, 1]} : vector<8x64x32xbf16> to vector<8x1x32xbf16>
    %93 = vector.shape_cast %92 : vector<8x1x32xbf16> to vector<8x32xbf16>
    %c9 = arith.constant 9 : index
    %c0_44 = arith.constant 0 : index
    %c0_45 = arith.constant 0 : index
    %94 = vector.load %arg6[%c9, %c0_44, %c0_45] : memref<64x32x64xbf16, #tpu.memory_space<vmem>>, vector<1x32x64xbf16>
    %95 = vector.shape_cast %94 : vector<1x32x64xbf16> to vector<32x64xbf16>
    %cst_46 = arith.constant dense<0.000000e+00> : vector<8x64xf32>
    %96 = tpu.matmul %93, %95, %cst_46 {dimension_numbers = #tpu.dot_dimension_numbers<[1], [0], [0], [1], [0, 0, 1, 1], [], []>} : vector<8x32xbf16>, vector<32x64xbf16>, vector<8x64xf32> -> vector<8x64xf32>
    %97 = arith.addf %91, %96 : vector<8x64xf32>
    %98 = vector.extract_strided_slice %36 {offsets = [0, 10, 0], sizes = [8, 1, 32], strides = [1, 1, 1]} : vector<8x64x32xbf16> to vector<8x1x32xbf16>
    %99 = vector.shape_cast %98 : vector<8x1x32xbf16> to vector<8x32xbf16>
    %c10 = arith.constant 10 : index
    %c0_47 = arith.constant 0 : index
    %c0_48 = arith.constant 0 : index
    %100 = vector.load %arg6[%c10, %c0_47, %c0_48] : memref<64x32x64xbf16, #tpu.memory_space<vmem>>, vector<1x32x64xbf16>
    %101 = vector.shape_cast %100 : vector<1x32x64xbf16> to vector<32x64xbf16>
    %cst_49 = arith.constant dense<0.000000e+00> : vector<8x64xf32>
    %102 = tpu.matmul %99, %101, %cst_49 {dimension_numbers = #tpu.dot_dimension_numbers<[1], [0], [0], [1], [0, 0, 1, 1], [], []>} : vector<8x32xbf16>, vector<32x64xbf16>, vector<8x64xf32> -> vector<8x64xf32>
    %103 = arith.addf %97, %102 : vector<8x64xf32>
    %104 = vector.extract_strided_slice %36 {offsets = [0, 11, 0], sizes = [8, 1, 32], strides = [1, 1, 1]} : vector<8x64x32xbf16> to vector<8x1x32xbf16>
    %105 = vector.shape_cast %104 : vector<8x1x32xbf16> to vector<8x32xbf16>
    %c11 = arith.constant 11 : index
    %c0_50 = arith.constant 0 : index
    %c0_51 = arith.constant 0 : index
    %106 = vector.load %arg6[%c11, %c0_50, %c0_51] : memref<64x32x64xbf16, #tpu.memory_space<vmem>>, vector<1x32x64xbf16>
    %107 = vector.shape_cast %106 : vector<1x32x64xbf16> to vector<32x64xbf16>
    %cst_52 = arith.constant dense<0.000000e+00> : vector<8x64xf32>
    %108 = tpu.matmul %105, %107, %cst_52 {dimension_numbers = #tpu.dot_dimension_numbers<[1], [0], [0], [1], [0, 0, 1, 1], [], []>} : vector<8x32xbf16>, vector<32x64xbf16>, vector<8x64xf32> -> vector<8x64xf32>
    %109 = arith.addf %103, %108 : vector<8x64xf32>
    %110 = vector.extract_strided_slice %36 {offsets = [0, 12, 0], sizes = [8, 1, 32], strides = [1, 1, 1]} : vector<8x64x32xbf16> to vector<8x1x32xbf16>
    %111 = vector.shape_cast %110 : vector<8x1x32xbf16> to vector<8x32xbf16>
    %c12 = arith.constant 12 : index
    %c0_53 = arith.constant 0 : index
    %c0_54 = arith.constant 0 : index
    %112 = vector.load %arg6[%c12, %c0_53, %c0_54] : memref<64x32x64xbf16, #tpu.memory_space<vmem>>, vector<1x32x64xbf16>
    %113 = vector.shape_cast %112 : vector<1x32x64xbf16> to vector<32x64xbf16>
    %cst_55 = arith.constant dense<0.000000e+00> : vector<8x64xf32>
    %114 = tpu.matmul %111, %113, %cst_55 {dimension_numbers = #tpu.dot_dimension_numbers<[1], [0], [0], [1], [0, 0, 1, 1], [], []>} : vector<8x32xbf16>, vector<32x64xbf16>, vector<8x64xf32> -> vector<8x64xf32>
    %115 = arith.addf %109, %114 : vector<8x64xf32>
    %116 = vector.extract_strided_slice %36 {offsets = [0, 13, 0], sizes = [8, 1, 32], strides = [1, 1, 1]} : vector<8x64x32xbf16> to vector<8x1x32xbf16>
    %117 = vector.shape_cast %116 : vector<8x1x32xbf16> to vector<8x32xbf16>
    %c13 = arith.constant 13 : index
    %c0_56 = arith.constant 0 : index
    %c0_57 = arith.constant 0 : index
    %118 = vector.load %arg6[%c13, %c0_56, %c0_57] : memref<64x32x64xbf16, #tpu.memory_space<vmem>>, vector<1x32x64xbf16>
    %119 = vector.shape_cast %118 : vector<1x32x64xbf16> to vector<32x64xbf16>
    %cst_58 = arith.constant dense<0.000000e+00> : vector<8x64xf32>
    %120 = tpu.matmul %117, %119, %cst_58 {dimension_numbers = #tpu.dot_dimension_numbers<[1], [0], [0], [1], [0, 0, 1, 1], [], []>} : vector<8x32xbf16>, vector<32x64xbf16>, vector<8x64xf32> -> vector<8x64xf32>
    %121 = arith.addf %115, %120 : vector<8x64xf32>
    %122 = vector.extract_strided_slice %36 {offsets = [0, 14, 0], sizes = [8, 1, 32], strides = [1, 1, 1]} : vector<8x64x32xbf16> to vector<8x1x32xbf16>
    %123 = vector.shape_cast %122 : vector<8x1x32xbf16> to vector<8x32xbf16>
    %c14 = arith.constant 14 : index
    %c0_59 = arith.constant 0 : index
    %c0_60 = arith.constant 0 : index
    %124 = vector.load %arg6[%c14, %c0_59, %c0_60] : memref<64x32x64xbf16, #tpu.memory_space<vmem>>, vector<1x32x64xbf16>
    %125 = vector.shape_cast %124 : vector<1x32x64xbf16> to vector<32x64xbf16>
    %cst_61 = arith.constant dense<0.000000e+00> : vector<8x64xf32>
    %126 = tpu.matmul %123, %125, %cst_61 {dimension_numbers = #tpu.dot_dimension_numbers<[1], [0], [0], [1], [0, 0, 1, 1], [], []>} : vector<8x32xbf16>, vector<32x64xbf16>, vector<8x64xf32> -> vector<8x64xf32>
    %127 = arith.addf %121, %126 : vector<8x64xf32>
    %128 = vector.extract_strided_slice %36 {offsets = [0, 15, 0], sizes = [8, 1, 32], strides = [1, 1, 1]} : vector<8x64x32xbf16> to vector<8x1x32xbf16>
    %129 = vector.shape_cast %128 : vector<8x1x32xbf16> to vector<8x32xbf16>
    %c15 = arith.constant 15 : index
    %c0_62 = arith.constant 0 : index
    %c0_63 = arith.constant 0 : index
    %130 = vector.load %arg6[%c15, %c0_62, %c0_63] : memref<64x32x64xbf16, #tpu.memory_space<vmem>>, vector<1x32x64xbf16>
    %131 = vector.shape_cast %130 : vector<1x32x64xbf16> to vector<32x64xbf16>
    %cst_64 = arith.constant dense<0.000000e+00> : vector<8x64xf32>
    %132 = tpu.matmul %129, %131, %cst_64 {dimension_numbers = #tpu.dot_dimension_numbers<[1], [0], [0], [1], [0, 0, 1, 1], [], []>} : vector<8x32xbf16>, vector<32x64xbf16>, vector<8x64xf32> -> vector<8x64xf32>
    %133 = arith.addf %127, %132 : vector<8x64xf32>
    %134 = vector.extract_strided_slice %36 {offsets = [0, 16, 0], sizes = [8, 1, 32], strides = [1, 1, 1]} : vector<8x64x32xbf16> to vector<8x1x32xbf16>
    %135 = vector.shape_cast %134 : vector<8x1x32xbf16> to vector<8x32xbf16>
    %c16 = arith.constant 16 : index
    %c0_65 = arith.constant 0 : index
    %c0_66 = arith.constant 0 : index
    %136 = vector.load %arg6[%c16, %c0_65, %c0_66] : memref<64x32x64xbf16, #tpu.memory_space<vmem>>, vector<1x32x64xbf16>
    %137 = vector.shape_cast %136 : vector<1x32x64xbf16> to vector<32x64xbf16>
    %cst_67 = arith.constant dense<0.000000e+00> : vector<8x64xf32>
    %138 = tpu.matmul %135, %137, %cst_67 {dimension_numbers = #tpu.dot_dimension_numbers<[1], [0], [0], [1], [0, 0, 1, 1], [], []>} : vector<8x32xbf16>, vector<32x64xbf16>, vector<8x64xf32> -> vector<8x64xf32>
    %139 = arith.addf %133, %138 : vector<8x64xf32>
    %140 = vector.extract_strided_slice %36 {offsets = [0, 17, 0], sizes = [8, 1, 32], strides = [1, 1, 1]} : vector<8x64x32xbf16> to vector<8x1x32xbf16>
    %141 = vector.shape_cast %140 : vector<8x1x32xbf16> to vector<8x32xbf16>
    %c17 = arith.constant 17 : index
    %c0_68 = arith.constant 0 : index
    %c0_69 = arith.constant 0 : index
    %142 = vector.load %arg6[%c17, %c0_68, %c0_69] : memref<64x32x64xbf16, #tpu.memory_space<vmem>>, vector<1x32x64xbf16>
    %143 = vector.shape_cast %142 : vector<1x32x64xbf16> to vector<32x64xbf16>
    %cst_70 = arith.constant dense<0.000000e+00> : vector<8x64xf32>
    %144 = tpu.matmul %141, %143, %cst_70 {dimension_numbers = #tpu.dot_dimension_numbers<[1], [0], [0], [1], [0, 0, 1, 1], [], []>} : vector<8x32xbf16>, vector<32x64xbf16>, vector<8x64xf32> -> vector<8x64xf32>
    %145 = arith.addf %139, %144 : vector<8x64xf32>
    %146 = vector.extract_strided_slice %36 {offsets = [0, 18, 0], sizes = [8, 1, 32], strides = [1, 1, 1]} : vector<8x64x32xbf16> to vector<8x1x32xbf16>
    %147 = vector.shape_cast %146 : vector<8x1x32xbf16> to vector<8x32xbf16>
    %c18 = arith.constant 18 : index
    %c0_71 = arith.constant 0 : index
    %c0_72 = arith.constant 0 : index
    %148 = vector.load %arg6[%c18, %c0_71, %c0_72] : memref<64x32x64xbf16, #tpu.memory_space<vmem>>, vector<1x32x64xbf16>
    %149 = vector.shape_cast %148 : vector<1x32x64xbf16> to vector<32x64xbf16>
    %cst_73 = arith.constant dense<0.000000e+00> : vector<8x64xf32>
    %150 = tpu.matmul %147, %149, %cst_73 {dimension_numbers = #tpu.dot_dimension_numbers<[1], [0], [0], [1], [0, 0, 1, 1], [], []>} : vector<8x32xbf16>, vector<32x64xbf16>, vector<8x64xf32> -> vector<8x64xf32>
    %151 = arith.addf %145, %150 : vector<8x64xf32>
    %152 = vector.extract_strided_slice %36 {offsets = [0, 19, 0], sizes = [8, 1, 32], strides = [1, 1, 1]} : vector<8x64x32xbf16> to vector<8x1x32xbf16>
    %153 = vector.shape_cast %152 : vector<8x1x32xbf16> to vector<8x32xbf16>
    %c19 = arith.constant 19 : index
    %c0_74 = arith.constant 0 : index
    %c0_75 = arith.constant 0 : index
    %154 = vector.load %arg6[%c19, %c0_74, %c0_75] : memref<64x32x64xbf16, #tpu.memory_space<vmem>>, vector<1x32x64xbf16>
    %155 = vector.shape_cast %154 : vector<1x32x64xbf16> to vector<32x64xbf16>
    %cst_76 = arith.constant dense<0.000000e+00> : vector<8x64xf32>
    %156 = tpu.matmul %153, %155, %cst_76 {dimension_numbers = #tpu.dot_dimension_numbers<[1], [0], [0], [1], [0, 0, 1, 1], [], []>} : vector<8x32xbf16>, vector<32x64xbf16>, vector<8x64xf32> -> vector<8x64xf32>
    %157 = arith.addf %151, %156 : vector<8x64xf32>
    %158 = vector.extract_strided_slice %36 {offsets = [0, 20, 0], sizes = [8, 1, 32], strides = [1, 1, 1]} : vector<8x64x32xbf16> to vector<8x1x32xbf16>
    %159 = vector.shape_cast %158 : vector<8x1x32xbf16> to vector<8x32xbf16>
    %c20 = arith.constant 20 : index
    %c0_77 = arith.constant 0 : index
    %c0_78 = arith.constant 0 : index
    %160 = vector.load %arg6[%c20, %c0_77, %c0_78] : memref<64x32x64xbf16, #tpu.memory_space<vmem>>, vector<1x32x64xbf16>
    %161 = vector.shape_cast %160 : vector<1x32x64xbf16> to vector<32x64xbf16>
    %cst_79 = arith.constant dense<0.000000e+00> : vector<8x64xf32>
    %162 = tpu.matmul %159, %161, %cst_79 {dimension_numbers = #tpu.dot_dimension_numbers<[1], [0], [0], [1], [0, 0, 1, 1], [], []>} : vector<8x32xbf16>, vector<32x64xbf16>, vector<8x64xf32> -> vector<8x64xf32>
    %163 = arith.addf %157, %162 : vector<8x64xf32>
    %164 = vector.extract_strided_slice %36 {offsets = [0, 21, 0], sizes = [8, 1, 32], strides = [1, 1, 1]} : vector<8x64x32xbf16> to vector<8x1x32xbf16>
    %165 = vector.shape_cast %164 : vector<8x1x32xbf16> to vector<8x32xbf16>
    %c21 = arith.constant 21 : index
    %c0_80 = arith.constant 0 : index
    %c0_81 = arith.constant 0 : index
    %166 = vector.load %arg6[%c21, %c0_80, %c0_81] : memref<64x32x64xbf16, #tpu.memory_space<vmem>>, vector<1x32x64xbf16>
    %167 = vector.shape_cast %166 : vector<1x32x64xbf16> to vector<32x64xbf16>
    %cst_82 = arith.constant dense<0.000000e+00> : vector<8x64xf32>
    %168 = tpu.matmul %165, %167, %cst_82 {dimension_numbers = #tpu.dot_dimension_numbers<[1], [0], [0], [1], [0, 0, 1, 1], [], []>} : vector<8x32xbf16>, vector<32x64xbf16>, vector<8x64xf32> -> vector<8x64xf32>
    %169 = arith.addf %163, %168 : vector<8x64xf32>
    %170 = vector.extract_strided_slice %36 {offsets = [0, 22, 0], sizes = [8, 1, 32], strides = [1, 1, 1]} : vector<8x64x32xbf16> to vector<8x1x32xbf16>
    %171 = vector.shape_cast %170 : vector<8x1x32xbf16> to vector<8x32xbf16>
    %c22 = arith.constant 22 : index
    %c0_83 = arith.constant 0 : index
    %c0_84 = arith.constant 0 : index
    %172 = vector.load %arg6[%c22, %c0_83, %c0_84] : memref<64x32x64xbf16, #tpu.memory_space<vmem>>, vector<1x32x64xbf16>
    %173 = vector.shape_cast %172 : vector<1x32x64xbf16> to vector<32x64xbf16>
    %cst_85 = arith.constant dense<0.000000e+00> : vector<8x64xf32>
    %174 = tpu.matmul %171, %173, %cst_85 {dimension_numbers = #tpu.dot_dimension_numbers<[1], [0], [0], [1], [0, 0, 1, 1], [], []>} : vector<8x32xbf16>, vector<32x64xbf16>, vector<8x64xf32> -> vector<8x64xf32>
    %175 = arith.addf %169, %174 : vector<8x64xf32>
    %176 = vector.extract_strided_slice %36 {offsets = [0, 23, 0], sizes = [8, 1, 32], strides = [1, 1, 1]} : vector<8x64x32xbf16> to vector<8x1x32xbf16>
    %177 = vector.shape_cast %176 : vector<8x1x32xbf16> to vector<8x32xbf16>
    %c23 = arith.constant 23 : index
    %c0_86 = arith.constant 0 : index
    %c0_87 = arith.constant 0 : index
    %178 = vector.load %arg6[%c23, %c0_86, %c0_87] : memref<64x32x64xbf16, #tpu.memory_space<vmem>>, vector<1x32x64xbf16>
    %179 = vector.shape_cast %178 : vector<1x32x64xbf16> to vector<32x64xbf16>
    %cst_88 = arith.constant dense<0.000000e+00> : vector<8x64xf32>
    %180 = tpu.matmul %177, %179, %cst_88 {dimension_numbers = #tpu.dot_dimension_numbers<[1], [0], [0], [1], [0, 0, 1, 1], [], []>} : vector<8x32xbf16>, vector<32x64xbf16>, vector<8x64xf32> -> vector<8x64xf32>
    %181 = arith.addf %175, %180 : vector<8x64xf32>
    %182 = vector.extract_strided_slice %36 {offsets = [0, 24, 0], sizes = [8, 1, 32], strides = [1, 1, 1]} : vector<8x64x32xbf16> to vector<8x1x32xbf16>
    %183 = vector.shape_cast %182 : vector<8x1x32xbf16> to vector<8x32xbf16>
    %c24 = arith.constant 24 : index
    %c0_89 = arith.constant 0 : index
    %c0_90 = arith.constant 0 : index
    %184 = vector.load %arg6[%c24, %c0_89, %c0_90] : memref<64x32x64xbf16, #tpu.memory_space<vmem>>, vector<1x32x64xbf16>
    %185 = vector.shape_cast %184 : vector<1x32x64xbf16> to vector<32x64xbf16>
    %cst_91 = arith.constant dense<0.000000e+00> : vector<8x64xf32>
    %186 = tpu.matmul %183, %185, %cst_91 {dimension_numbers = #tpu.dot_dimension_numbers<[1], [0], [0], [1], [0, 0, 1, 1], [], []>} : vector<8x32xbf16>, vector<32x64xbf16>, vector<8x64xf32> -> vector<8x64xf32>
    %187 = arith.addf %181, %186 : vector<8x64xf32>
    %188 = vector.extract_strided_slice %36 {offsets = [0, 25, 0], sizes = [8, 1, 32], strides = [1, 1, 1]} : vector<8x64x32xbf16> to vector<8x1x32xbf16>
    %189 = vector.shape_cast %188 : vector<8x1x32xbf16> to vector<8x32xbf16>
    %c25 = arith.constant 25 : index
    %c0_92 = arith.constant 0 : index
    %c0_93 = arith.constant 0 : index
    %190 = vector.load %arg6[%c25, %c0_92, %c0_93] : memref<64x32x64xbf16, #tpu.memory_space<vmem>>, vector<1x32x64xbf16>
    %191 = vector.shape_cast %190 : vector<1x32x64xbf16> to vector<32x64xbf16>
    %cst_94 = arith.constant dense<0.000000e+00> : vector<8x64xf32>
    %192 = tpu.matmul %189, %191, %cst_94 {dimension_numbers = #tpu.dot_dimension_numbers<[1], [0], [0], [1], [0, 0, 1, 1], [], []>} : vector<8x32xbf16>, vector<32x64xbf16>, vector<8x64xf32> -> vector<8x64xf32>
    %193 = arith.addf %187, %192 : vector<8x64xf32>
    %194 = vector.extract_strided_slice %36 {offsets = [0, 26, 0], sizes = [8, 1, 32], strides = [1, 1, 1]} : vector<8x64x32xbf16> to vector<8x1x32xbf16>
    %195 = vector.shape_cast %194 : vector<8x1x32xbf16> to vector<8x32xbf16>
    %c26 = arith.constant 26 : index
    %c0_95 = arith.constant 0 : index
    %c0_96 = arith.constant 0 : index
    %196 = vector.load %arg6[%c26, %c0_95, %c0_96] : memref<64x32x64xbf16, #tpu.memory_space<vmem>>, vector<1x32x64xbf16>
    %197 = vector.shape_cast %196 : vector<1x32x64xbf16> to vector<32x64xbf16>
    %cst_97 = arith.constant dense<0.000000e+00> : vector<8x64xf32>
    %198 = tpu.matmul %195, %197, %cst_97 {dimension_numbers = #tpu.dot_dimension_numbers<[1], [0], [0], [1], [0, 0, 1, 1], [], []>} : vector<8x32xbf16>, vector<32x64xbf16>, vector<8x64xf32> -> vector<8x64xf32>
    %199 = arith.addf %193, %198 : vector<8x64xf32>
    %200 = vector.extract_strided_slice %36 {offsets = [0, 27, 0], sizes = [8, 1, 32], strides = [1, 1, 1]} : vector<8x64x32xbf16> to vector<8x1x32xbf16>
    %201 = vector.shape_cast %200 : vector<8x1x32xbf16> to vector<8x32xbf16>
    %c27 = arith.constant 27 : index
    %c0_98 = arith.constant 0 : index
    %c0_99 = arith.constant 0 : index
    %202 = vector.load %arg6[%c27, %c0_98, %c0_99] : memref<64x32x64xbf16, #tpu.memory_space<vmem>>, vector<1x32x64xbf16>
    %203 = vector.shape_cast %202 : vector<1x32x64xbf16> to vector<32x64xbf16>
    %cst_100 = arith.constant dense<0.000000e+00> : vector<8x64xf32>
    %204 = tpu.matmul %201, %203, %cst_100 {dimension_numbers = #tpu.dot_dimension_numbers<[1], [0], [0], [1], [0, 0, 1, 1], [], []>} : vector<8x32xbf16>, vector<32x64xbf16>, vector<8x64xf32> -> vector<8x64xf32>
    %205 = arith.addf %199, %204 : vector<8x64xf32>
    %206 = vector.extract_strided_slice %36 {offsets = [0, 28, 0], sizes = [8, 1, 32], strides = [1, 1, 1]} : vector<8x64x32xbf16> to vector<8x1x32xbf16>
    %207 = vector.shape_cast %206 : vector<8x1x32xbf16> to vector<8x32xbf16>
    %c28 = arith.constant 28 : index
    %c0_101 = arith.constant 0 : index
    %c0_102 = arith.constant 0 : index
    %208 = vector.load %arg6[%c28, %c0_101, %c0_102] : memref<64x32x64xbf16, #tpu.memory_space<vmem>>, vector<1x32x64xbf16>
    %209 = vector.shape_cast %208 : vector<1x32x64xbf16> to vector<32x64xbf16>
    %cst_103 = arith.constant dense<0.000000e+00> : vector<8x64xf32>
    %210 = tpu.matmul %207, %209, %cst_103 {dimension_numbers = #tpu.dot_dimension_numbers<[1], [0], [0], [1], [0, 0, 1, 1], [], []>} : vector<8x32xbf16>, vector<32x64xbf16>, vector<8x64xf32> -> vector<8x64xf32>
    %211 = arith.addf %205, %210 : vector<8x64xf32>
    %212 = vector.extract_strided_slice %36 {offsets = [0, 29, 0], sizes = [8, 1, 32], strides = [1, 1, 1]} : vector<8x64x32xbf16> to vector<8x1x32xbf16>
    %213 = vector.shape_cast %212 : vector<8x1x32xbf16> to vector<8x32xbf16>
    %c29 = arith.constant 29 : index
    %c0_104 = arith.constant 0 : index
    %c0_105 = arith.constant 0 : index
    %214 = vector.load %arg6[%c29, %c0_104, %c0_105] : memref<64x32x64xbf16, #tpu.memory_space<vmem>>, vector<1x32x64xbf16>
    %215 = vector.shape_cast %214 : vector<1x32x64xbf16> to vector<32x64xbf16>
    %cst_106 = arith.constant dense<0.000000e+00> : vector<8x64xf32>
    %216 = tpu.matmul %213, %215, %cst_106 {dimension_numbers = #tpu.dot_dimension_numbers<[1], [0], [0], [1], [0, 0, 1, 1], [], []>} : vector<8x32xbf16>, vector<32x64xbf16>, vector<8x64xf32> -> vector<8x64xf32>
    %217 = arith.addf %211, %216 : vector<8x64xf32>
    %218 = vector.extract_strided_slice %36 {offsets = [0, 30, 0], sizes = [8, 1, 32], strides = [1, 1, 1]} : vector<8x64x32xbf16> to vector<8x1x32xbf16>
    %219 = vector.shape_cast %218 : vector<8x1x32xbf16> to vector<8x32xbf16>
    %c30 = arith.constant 30 : index
    %c0_107 = arith.constant 0 : index
    %c0_108 = arith.constant 0 : index
    %220 = vector.load %arg6[%c30, %c0_107, %c0_108] : memref<64x32x64xbf16, #tpu.memory_space<vmem>>, vector<1x32x64xbf16>
    %221 = vector.shape_cast %220 : vector<1x32x64xbf16> to vector<32x64xbf16>
    %cst_109 = arith.constant dense<0.000000e+00> : vector<8x64xf32>
    %222 = tpu.matmul %219, %221, %cst_109 {dimension_numbers = #tpu.dot_dimension_numbers<[1], [0], [0], [1], [0, 0, 1, 1], [], []>} : vector<8x32xbf16>, vector<32x64xbf16>, vector<8x64xf32> -> vector<8x64xf32>
    %223 = arith.addf %217, %222 : vector<8x64xf32>
    %224 = vector.extract_strided_slice %36 {offsets = [0, 31, 0], sizes = [8, 1, 32], strides = [1, 1, 1]} : vector<8x64x32xbf16> to vector<8x1x32xbf16>
    %225 = vector.shape_cast %224 : vector<8x1x32xbf16> to vector<8x32xbf16>
    %c31 = arith.constant 31 : index
    %c0_110 = arith.constant 0 : index
    %c0_111 = arith.constant 0 : index
    %226 = vector.load %arg6[%c31, %c0_110, %c0_111] : memref<64x32x64xbf16, #tpu.memory_space<vmem>>, vector<1x32x64xbf16>
    %227 = vector.shape_cast %226 : vector<1x32x64xbf16> to vector<32x64xbf16>
    %cst_112 = arith.constant dense<0.000000e+00> : vector<8x64xf32>
    %228 = tpu.matmul %225, %227, %cst_112 {dimension_numbers = #tpu.dot_dimension_numbers<[1], [0], [0], [1], [0, 0, 1, 1], [], []>} : vector<8x32xbf16>, vector<32x64xbf16>, vector<8x64xf32> -> vector<8x64xf32>
    %229 = arith.addf %223, %228 : vector<8x64xf32>
    %230 = vector.extract_strided_slice %36 {offsets = [0, 32, 0], sizes = [8, 1, 32], strides = [1, 1, 1]} : vector<8x64x32xbf16> to vector<8x1x32xbf16>
    %231 = vector.shape_cast %230 : vector<8x1x32xbf16> to vector<8x32xbf16>
    %c32 = arith.constant 32 : index
    %c0_113 = arith.constant 0 : index
    %c0_114 = arith.constant 0 : index
    %232 = vector.load %arg6[%c32, %c0_113, %c0_114] : memref<64x32x64xbf16, #tpu.memory_space<vmem>>, vector<1x32x64xbf16>
    %233 = vector.shape_cast %232 : vector<1x32x64xbf16> to vector<32x64xbf16>
    %cst_115 = arith.constant dense<0.000000e+00> : vector<8x64xf32>
    %234 = tpu.matmul %231, %233, %cst_115 {dimension_numbers = #tpu.dot_dimension_numbers<[1], [0], [0], [1], [0, 0, 1, 1], [], []>} : vector<8x32xbf16>, vector<32x64xbf16>, vector<8x64xf32> -> vector<8x64xf32>
    %235 = arith.addf %229, %234 : vector<8x64xf32>
    %236 = vector.extract_strided_slice %36 {offsets = [0, 33, 0], sizes = [8, 1, 32], strides = [1, 1, 1]} : vector<8x64x32xbf16> to vector<8x1x32xbf16>
    %237 = vector.shape_cast %236 : vector<8x1x32xbf16> to vector<8x32xbf16>
    %c33 = arith.constant 33 : index
    %c0_116 = arith.constant 0 : index
    %c0_117 = arith.constant 0 : index
    %238 = vector.load %arg6[%c33, %c0_116, %c0_117] : memref<64x32x64xbf16, #tpu.memory_space<vmem>>, vector<1x32x64xbf16>
    %239 = vector.shape_cast %238 : vector<1x32x64xbf16> to vector<32x64xbf16>
    %cst_118 = arith.constant dense<0.000000e+00> : vector<8x64xf32>
    %240 = tpu.matmul %237, %239, %cst_118 {dimension_numbers = #tpu.dot_dimension_numbers<[1], [0], [0], [1], [0, 0, 1, 1], [], []>} : vector<8x32xbf16>, vector<32x64xbf16>, vector<8x64xf32> -> vector<8x64xf32>
    %241 = arith.addf %235, %240 : vector<8x64xf32>
    %242 = vector.extract_strided_slice %36 {offsets = [0, 34, 0], sizes = [8, 1, 32], strides = [1, 1, 1]} : vector<8x64x32xbf16> to vector<8x1x32xbf16>
    %243 = vector.shape_cast %242 : vector<8x1x32xbf16> to vector<8x32xbf16>
    %c34 = arith.constant 34 : index
    %c0_119 = arith.constant 0 : index
    %c0_120 = arith.constant 0 : index
    %244 = vector.load %arg6[%c34, %c0_119, %c0_120] : memref<64x32x64xbf16, #tpu.memory_space<vmem>>, vector<1x32x64xbf16>
    %245 = vector.shape_cast %244 : vector<1x32x64xbf16> to vector<32x64xbf16>
    %cst_121 = arith.constant dense<0.000000e+00> : vector<8x64xf32>
    %246 = tpu.matmul %243, %245, %cst_121 {dimension_numbers = #tpu.dot_dimension_numbers<[1], [0], [0], [1], [0, 0, 1, 1], [], []>} : vector<8x32xbf16>, vector<32x64xbf16>, vector<8x64xf32> -> vector<8x64xf32>
    %247 = arith.addf %241, %246 : vector<8x64xf32>
    %248 = vector.extract_strided_slice %36 {offsets = [0, 35, 0], sizes = [8, 1, 32], strides = [1, 1, 1]} : vector<8x64x32xbf16> to vector<8x1x32xbf16>
    %249 = vector.shape_cast %248 : vector<8x1x32xbf16> to vector<8x32xbf16>
    %c35 = arith.constant 35 : index
    %c0_122 = arith.constant 0 : index
    %c0_123 = arith.constant 0 : index
    %250 = vector.load %arg6[%c35, %c0_122, %c0_123] : memref<64x32x64xbf16, #tpu.memory_space<vmem>>, vector<1x32x64xbf16>
    %251 = vector.shape_cast %250 : vector<1x32x64xbf16> to vector<32x64xbf16>
    %cst_124 = arith.constant dense<0.000000e+00> : vector<8x64xf32>
    %252 = tpu.matmul %249, %251, %cst_124 {dimension_numbers = #tpu.dot_dimension_numbers<[1], [0], [0], [1], [0, 0, 1, 1], [], []>} : vector<8x32xbf16>, vector<32x64xbf16>, vector<8x64xf32> -> vector<8x64xf32>
    %253 = arith.addf %247, %252 : vector<8x64xf32>
    %254 = vector.extract_strided_slice %36 {offsets = [0, 36, 0], sizes = [8, 1, 32], strides = [1, 1, 1]} : vector<8x64x32xbf16> to vector<8x1x32xbf16>
    %255 = vector.shape_cast %254 : vector<8x1x32xbf16> to vector<8x32xbf16>
    %c36 = arith.constant 36 : index
    %c0_125 = arith.constant 0 : index
    %c0_126 = arith.constant 0 : index
    %256 = vector.load %arg6[%c36, %c0_125, %c0_126] : memref<64x32x64xbf16, #tpu.memory_space<vmem>>, vector<1x32x64xbf16>
    %257 = vector.shape_cast %256 : vector<1x32x64xbf16> to vector<32x64xbf16>
    %cst_127 = arith.constant dense<0.000000e+00> : vector<8x64xf32>
    %258 = tpu.matmul %255, %257, %cst_127 {dimension_numbers = #tpu.dot_dimension_numbers<[1], [0], [0], [1], [0, 0, 1, 1], [], []>} : vector<8x32xbf16>, vector<32x64xbf16>, vector<8x64xf32> -> vector<8x64xf32>
    %259 = arith.addf %253, %258 : vector<8x64xf32>
    %260 = vector.extract_strided_slice %36 {offsets = [0, 37, 0], sizes = [8, 1, 32], strides = [1, 1, 1]} : vector<8x64x32xbf16> to vector<8x1x32xbf16>
    %261 = vector.shape_cast %260 : vector<8x1x32xbf16> to vector<8x32xbf16>
    %c37 = arith.constant 37 : index
    %c0_128 = arith.constant 0 : index
    %c0_129 = arith.constant 0 : index
    %262 = vector.load %arg6[%c37, %c0_128, %c0_129] : memref<64x32x64xbf16, #tpu.memory_space<vmem>>, vector<1x32x64xbf16>
    %263 = vector.shape_cast %262 : vector<1x32x64xbf16> to vector<32x64xbf16>
    %cst_130 = arith.constant dense<0.000000e+00> : vector<8x64xf32>
    %264 = tpu.matmul %261, %263, %cst_130 {dimension_numbers = #tpu.dot_dimension_numbers<[1], [0], [0], [1], [0, 0, 1, 1], [], []>} : vector<8x32xbf16>, vector<32x64xbf16>, vector<8x64xf32> -> vector<8x64xf32>
    %265 = arith.addf %259, %264 : vector<8x64xf32>
    %266 = vector.extract_strided_slice %36 {offsets = [0, 38, 0], sizes = [8, 1, 32], strides = [1, 1, 1]} : vector<8x64x32xbf16> to vector<8x1x32xbf16>
    %267 = vector.shape_cast %266 : vector<8x1x32xbf16> to vector<8x32xbf16>
    %c38 = arith.constant 38 : index
    %c0_131 = arith.constant 0 : index
    %c0_132 = arith.constant 0 : index
    %268 = vector.load %arg6[%c38, %c0_131, %c0_132] : memref<64x32x64xbf16, #tpu.memory_space<vmem>>, vector<1x32x64xbf16>
    %269 = vector.shape_cast %268 : vector<1x32x64xbf16> to vector<32x64xbf16>
    %cst_133 = arith.constant dense<0.000000e+00> : vector<8x64xf32>
    %270 = tpu.matmul %267, %269, %cst_133 {dimension_numbers = #tpu.dot_dimension_numbers<[1], [0], [0], [1], [0, 0, 1, 1], [], []>} : vector<8x32xbf16>, vector<32x64xbf16>, vector<8x64xf32> -> vector<8x64xf32>
    %271 = arith.addf %265, %270 : vector<8x64xf32>
    %272 = vector.extract_strided_slice %36 {offsets = [0, 39, 0], sizes = [8, 1, 32], strides = [1, 1, 1]} : vector<8x64x32xbf16> to vector<8x1x32xbf16>
    %273 = vector.shape_cast %272 : vector<8x1x32xbf16> to vector<8x32xbf16>
    %c39 = arith.constant 39 : index
    %c0_134 = arith.constant 0 : index
    %c0_135 = arith.constant 0 : index
    %274 = vector.load %arg6[%c39, %c0_134, %c0_135] : memref<64x32x64xbf16, #tpu.memory_space<vmem>>, vector<1x32x64xbf16>
    %275 = vector.shape_cast %274 : vector<1x32x64xbf16> to vector<32x64xbf16>
    %cst_136 = arith.constant dense<0.000000e+00> : vector<8x64xf32>
    %276 = tpu.matmul %273, %275, %cst_136 {dimension_numbers = #tpu.dot_dimension_numbers<[1], [0], [0], [1], [0, 0, 1, 1], [], []>} : vector<8x32xbf16>, vector<32x64xbf16>, vector<8x64xf32> -> vector<8x64xf32>
    %277 = arith.addf %271, %276 : vector<8x64xf32>
    %278 = vector.extract_strided_slice %36 {offsets = [0, 40, 0], sizes = [8, 1, 32], strides = [1, 1, 1]} : vector<8x64x32xbf16> to vector<8x1x32xbf16>
    %279 = vector.shape_cast %278 : vector<8x1x32xbf16> to vector<8x32xbf16>
    %c40 = arith.constant 40 : index
    %c0_137 = arith.constant 0 : index
    %c0_138 = arith.constant 0 : index
    %280 = vector.load %arg6[%c40, %c0_137, %c0_138] : memref<64x32x64xbf16, #tpu.memory_space<vmem>>, vector<1x32x64xbf16>
    %281 = vector.shape_cast %280 : vector<1x32x64xbf16> to vector<32x64xbf16>
    %cst_139 = arith.constant dense<0.000000e+00> : vector<8x64xf32>
    %282 = tpu.matmul %279, %281, %cst_139 {dimension_numbers = #tpu.dot_dimension_numbers<[1], [0], [0], [1], [0, 0, 1, 1], [], []>} : vector<8x32xbf16>, vector<32x64xbf16>, vector<8x64xf32> -> vector<8x64xf32>
    %283 = arith.addf %277, %282 : vector<8x64xf32>
    %284 = vector.extract_strided_slice %36 {offsets = [0, 41, 0], sizes = [8, 1, 32], strides = [1, 1, 1]} : vector<8x64x32xbf16> to vector<8x1x32xbf16>
    %285 = vector.shape_cast %284 : vector<8x1x32xbf16> to vector<8x32xbf16>
    %c41 = arith.constant 41 : index
    %c0_140 = arith.constant 0 : index
    %c0_141 = arith.constant 0 : index
    %286 = vector.load %arg6[%c41, %c0_140, %c0_141] : memref<64x32x64xbf16, #tpu.memory_space<vmem>>, vector<1x32x64xbf16>
    %287 = vector.shape_cast %286 : vector<1x32x64xbf16> to vector<32x64xbf16>
    %cst_142 = arith.constant dense<0.000000e+00> : vector<8x64xf32>
    %288 = tpu.matmul %285, %287, %cst_142 {dimension_numbers = #tpu.dot_dimension_numbers<[1], [0], [0], [1], [0, 0, 1, 1], [], []>} : vector<8x32xbf16>, vector<32x64xbf16>, vector<8x64xf32> -> vector<8x64xf32>
    %289 = arith.addf %283, %288 : vector<8x64xf32>
    %290 = vector.extract_strided_slice %36 {offsets = [0, 42, 0], sizes = [8, 1, 32], strides = [1, 1, 1]} : vector<8x64x32xbf16> to vector<8x1x32xbf16>
    %291 = vector.shape_cast %290 : vector<8x1x32xbf16> to vector<8x32xbf16>
    %c42 = arith.constant 42 : index
    %c0_143 = arith.constant 0 : index
    %c0_144 = arith.constant 0 : index
    %292 = vector.load %arg6[%c42, %c0_143, %c0_144] : memref<64x32x64xbf16, #tpu.memory_space<vmem>>, vector<1x32x64xbf16>
    %293 = vector.shape_cast %292 : vector<1x32x64xbf16> to vector<32x64xbf16>
    %cst_145 = arith.constant dense<0.000000e+00> : vector<8x64xf32>
    %294 = tpu.matmul %291, %293, %cst_145 {dimension_numbers = #tpu.dot_dimension_numbers<[1], [0], [0], [1], [0, 0, 1, 1], [], []>} : vector<8x32xbf16>, vector<32x64xbf16>, vector<8x64xf32> -> vector<8x64xf32>
    %295 = arith.addf %289, %294 : vector<8x64xf32>
    %296 = vector.extract_strided_slice %36 {offsets = [0, 43, 0], sizes = [8, 1, 32], strides = [1, 1, 1]} : vector<8x64x32xbf16> to vector<8x1x32xbf16>
    %297 = vector.shape_cast %296 : vector<8x1x32xbf16> to vector<8x32xbf16>
    %c43 = arith.constant 43 : index
    %c0_146 = arith.constant 0 : index
    %c0_147 = arith.constant 0 : index
    %298 = vector.load %arg6[%c43, %c0_146, %c0_147] : memref<64x32x64xbf16, #tpu.memory_space<vmem>>, vector<1x32x64xbf16>
    %299 = vector.shape_cast %298 : vector<1x32x64xbf16> to vector<32x64xbf16>
    %cst_148 = arith.constant dense<0.000000e+00> : vector<8x64xf32>
    %300 = tpu.matmul %297, %299, %cst_148 {dimension_numbers = #tpu.dot_dimension_numbers<[1], [0], [0], [1], [0, 0, 1, 1], [], []>} : vector<8x32xbf16>, vector<32x64xbf16>, vector<8x64xf32> -> vector<8x64xf32>
    %301 = arith.addf %295, %300 : vector<8x64xf32>
    %302 = vector.extract_strided_slice %36 {offsets = [0, 44, 0], sizes = [8, 1, 32], strides = [1, 1, 1]} : vector<8x64x32xbf16> to vector<8x1x32xbf16>
    %303 = vector.shape_cast %302 : vector<8x1x32xbf16> to vector<8x32xbf16>
    %c44 = arith.constant 44 : index
    %c0_149 = arith.constant 0 : index
    %c0_150 = arith.constant 0 : index
    %304 = vector.load %arg6[%c44, %c0_149, %c0_150] : memref<64x32x64xbf16, #tpu.memory_space<vmem>>, vector<1x32x64xbf16>
    %305 = vector.shape_cast %304 : vector<1x32x64xbf16> to vector<32x64xbf16>
    %cst_151 = arith.constant dense<0.000000e+00> : vector<8x64xf32>
    %306 = tpu.matmul %303, %305, %cst_151 {dimension_numbers = #tpu.dot_dimension_numbers<[1], [0], [0], [1], [0, 0, 1, 1], [], []>} : vector<8x32xbf16>, vector<32x64xbf16>, vector<8x64xf32> -> vector<8x64xf32>
    %307 = arith.addf %301, %306 : vector<8x64xf32>
    %308 = vector.extract_strided_slice %36 {offsets = [0, 45, 0], sizes = [8, 1, 32], strides = [1, 1, 1]} : vector<8x64x32xbf16> to vector<8x1x32xbf16>
    %309 = vector.shape_cast %308 : vector<8x1x32xbf16> to vector<8x32xbf16>
    %c45 = arith.constant 45 : index
    %c0_152 = arith.constant 0 : index
    %c0_153 = arith.constant 0 : index
    %310 = vector.load %arg6[%c45, %c0_152, %c0_153] : memref<64x32x64xbf16, #tpu.memory_space<vmem>>, vector<1x32x64xbf16>
    %311 = vector.shape_cast %310 : vector<1x32x64xbf16> to vector<32x64xbf16>
    %cst_154 = arith.constant dense<0.000000e+00> : vector<8x64xf32>
    %312 = tpu.matmul %309, %311, %cst_154 {dimension_numbers = #tpu.dot_dimension_numbers<[1], [0], [0], [1], [0, 0, 1, 1], [], []>} : vector<8x32xbf16>, vector<32x64xbf16>, vector<8x64xf32> -> vector<8x64xf32>
    %313 = arith.addf %307, %312 : vector<8x64xf32>
    %314 = vector.extract_strided_slice %36 {offsets = [0, 46, 0], sizes = [8, 1, 32], strides = [1, 1, 1]} : vector<8x64x32xbf16> to vector<8x1x32xbf16>
    %315 = vector.shape_cast %314 : vector<8x1x32xbf16> to vector<8x32xbf16>
    %c46 = arith.constant 46 : index
    %c0_155 = arith.constant 0 : index
    %c0_156 = arith.constant 0 : index
    %316 = vector.load %arg6[%c46, %c0_155, %c0_156] : memref<64x32x64xbf16, #tpu.memory_space<vmem>>, vector<1x32x64xbf16>
    %317 = vector.shape_cast %316 : vector<1x32x64xbf16> to vector<32x64xbf16>
    %cst_157 = arith.constant dense<0.000000e+00> : vector<8x64xf32>
    %318 = tpu.matmul %315, %317, %cst_157 {dimension_numbers = #tpu.dot_dimension_numbers<[1], [0], [0], [1], [0, 0, 1, 1], [], []>} : vector<8x32xbf16>, vector<32x64xbf16>, vector<8x64xf32> -> vector<8x64xf32>
    %319 = arith.addf %313, %318 : vector<8x64xf32>
    %320 = vector.extract_strided_slice %36 {offsets = [0, 47, 0], sizes = [8, 1, 32], strides = [1, 1, 1]} : vector<8x64x32xbf16> to vector<8x1x32xbf16>
    %321 = vector.shape_cast %320 : vector<8x1x32xbf16> to vector<8x32xbf16>
    %c47 = arith.constant 47 : index
    %c0_158 = arith.constant 0 : index
    %c0_159 = arith.constant 0 : index
    %322 = vector.load %arg6[%c47, %c0_158, %c0_159] : memref<64x32x64xbf16, #tpu.memory_space<vmem>>, vector<1x32x64xbf16>
    %323 = vector.shape_cast %322 : vector<1x32x64xbf16> to vector<32x64xbf16>
    %cst_160 = arith.constant dense<0.000000e+00> : vector<8x64xf32>
    %324 = tpu.matmul %321, %323, %cst_160 {dimension_numbers = #tpu.dot_dimension_numbers<[1], [0], [0], [1], [0, 0, 1, 1], [], []>} : vector<8x32xbf16>, vector<32x64xbf16>, vector<8x64xf32> -> vector<8x64xf32>
    %325 = arith.addf %319, %324 : vector<8x64xf32>
    %326 = vector.extract_strided_slice %36 {offsets = [0, 48, 0], sizes = [8, 1, 32], strides = [1, 1, 1]} : vector<8x64x32xbf16> to vector<8x1x32xbf16>
    %327 = vector.shape_cast %326 : vector<8x1x32xbf16> to vector<8x32xbf16>
    %c48 = arith.constant 48 : index
    %c0_161 = arith.constant 0 : index
    %c0_162 = arith.constant 0 : index
    %328 = vector.load %arg6[%c48, %c0_161, %c0_162] : memref<64x32x64xbf16, #tpu.memory_space<vmem>>, vector<1x32x64xbf16>
    %329 = vector.shape_cast %328 : vector<1x32x64xbf16> to vector<32x64xbf16>
    %cst_163 = arith.constant dense<0.000000e+00> : vector<8x64xf32>
    %330 = tpu.matmul %327, %329, %cst_163 {dimension_numbers = #tpu.dot_dimension_numbers<[1], [0], [0], [1], [0, 0, 1, 1], [], []>} : vector<8x32xbf16>, vector<32x64xbf16>, vector<8x64xf32> -> vector<8x64xf32>
    %331 = arith.addf %325, %330 : vector<8x64xf32>
    %332 = vector.extract_strided_slice %36 {offsets = [0, 49, 0], sizes = [8, 1, 32], strides = [1, 1, 1]} : vector<8x64x32xbf16> to vector<8x1x32xbf16>
    %333 = vector.shape_cast %332 : vector<8x1x32xbf16> to vector<8x32xbf16>
    %c49 = arith.constant 49 : index
    %c0_164 = arith.constant 0 : index
    %c0_165 = arith.constant 0 : index
    %334 = vector.load %arg6[%c49, %c0_164, %c0_165] : memref<64x32x64xbf16, #tpu.memory_space<vmem>>, vector<1x32x64xbf16>
    %335 = vector.shape_cast %334 : vector<1x32x64xbf16> to vector<32x64xbf16>
    %cst_166 = arith.constant dense<0.000000e+00> : vector<8x64xf32>
    %336 = tpu.matmul %333, %335, %cst_166 {dimension_numbers = #tpu.dot_dimension_numbers<[1], [0], [0], [1], [0, 0, 1, 1], [], []>} : vector<8x32xbf16>, vector<32x64xbf16>, vector<8x64xf32> -> vector<8x64xf32>
    %337 = arith.addf %331, %336 : vector<8x64xf32>
    %338 = vector.extract_strided_slice %36 {offsets = [0, 50, 0], sizes = [8, 1, 32], strides = [1, 1, 1]} : vector<8x64x32xbf16> to vector<8x1x32xbf16>
    %339 = vector.shape_cast %338 : vector<8x1x32xbf16> to vector<8x32xbf16>
    %c50 = arith.constant 50 : index
    %c0_167 = arith.constant 0 : index
    %c0_168 = arith.constant 0 : index
    %340 = vector.load %arg6[%c50, %c0_167, %c0_168] : memref<64x32x64xbf16, #tpu.memory_space<vmem>>, vector<1x32x64xbf16>
    %341 = vector.shape_cast %340 : vector<1x32x64xbf16> to vector<32x64xbf16>
    %cst_169 = arith.constant dense<0.000000e+00> : vector<8x64xf32>
    %342 = tpu.matmul %339, %341, %cst_169 {dimension_numbers = #tpu.dot_dimension_numbers<[1], [0], [0], [1], [0, 0, 1, 1], [], []>} : vector<8x32xbf16>, vector<32x64xbf16>, vector<8x64xf32> -> vector<8x64xf32>
    %343 = arith.addf %337, %342 : vector<8x64xf32>
    %344 = vector.extract_strided_slice %36 {offsets = [0, 51, 0], sizes = [8, 1, 32], strides = [1, 1, 1]} : vector<8x64x32xbf16> to vector<8x1x32xbf16>
    %345 = vector.shape_cast %344 : vector<8x1x32xbf16> to vector<8x32xbf16>
    %c51 = arith.constant 51 : index
    %c0_170 = arith.constant 0 : index
    %c0_171 = arith.constant 0 : index
    %346 = vector.load %arg6[%c51, %c0_170, %c0_171] : memref<64x32x64xbf16, #tpu.memory_space<vmem>>, vector<1x32x64xbf16>
    %347 = vector.shape_cast %346 : vector<1x32x64xbf16> to vector<32x64xbf16>
    %cst_172 = arith.constant dense<0.000000e+00> : vector<8x64xf32>
    %348 = tpu.matmul %345, %347, %cst_172 {dimension_numbers = #tpu.dot_dimension_numbers<[1], [0], [0], [1], [0, 0, 1, 1], [], []>} : vector<8x32xbf16>, vector<32x64xbf16>, vector<8x64xf32> -> vector<8x64xf32>
    %349 = arith.addf %343, %348 : vector<8x64xf32>
    %350 = vector.extract_strided_slice %36 {offsets = [0, 52, 0], sizes = [8, 1, 32], strides = [1, 1, 1]} : vector<8x64x32xbf16> to vector<8x1x32xbf16>
    %351 = vector.shape_cast %350 : vector<8x1x32xbf16> to vector<8x32xbf16>
    %c52 = arith.constant 52 : index
    %c0_173 = arith.constant 0 : index
    %c0_174 = arith.constant 0 : index
    %352 = vector.load %arg6[%c52, %c0_173, %c0_174] : memref<64x32x64xbf16, #tpu.memory_space<vmem>>, vector<1x32x64xbf16>
    %353 = vector.shape_cast %352 : vector<1x32x64xbf16> to vector<32x64xbf16>
    %cst_175 = arith.constant dense<0.000000e+00> : vector<8x64xf32>
    %354 = tpu.matmul %351, %353, %cst_175 {dimension_numbers = #tpu.dot_dimension_numbers<[1], [0], [0], [1], [0, 0, 1, 1], [], []>} : vector<8x32xbf16>, vector<32x64xbf16>, vector<8x64xf32> -> vector<8x64xf32>
    %355 = arith.addf %349, %354 : vector<8x64xf32>
    %356 = vector.extract_strided_slice %36 {offsets = [0, 53, 0], sizes = [8, 1, 32], strides = [1, 1, 1]} : vector<8x64x32xbf16> to vector<8x1x32xbf16>
    %357 = vector.shape_cast %356 : vector<8x1x32xbf16> to vector<8x32xbf16>
    %c53 = arith.constant 53 : index
    %c0_176 = arith.constant 0 : index
    %c0_177 = arith.constant 0 : index
    %358 = vector.load %arg6[%c53, %c0_176, %c0_177] : memref<64x32x64xbf16, #tpu.memory_space<vmem>>, vector<1x32x64xbf16>
    %359 = vector.shape_cast %358 : vector<1x32x64xbf16> to vector<32x64xbf16>
    %cst_178 = arith.constant dense<0.000000e+00> : vector<8x64xf32>
    %360 = tpu.matmul %357, %359, %cst_178 {dimension_numbers = #tpu.dot_dimension_numbers<[1], [0], [0], [1], [0, 0, 1, 1], [], []>} : vector<8x32xbf16>, vector<32x64xbf16>, vector<8x64xf32> -> vector<8x64xf32>
    %361 = arith.addf %355, %360 : vector<8x64xf32>
    %362 = vector.extract_strided_slice %36 {offsets = [0, 54, 0], sizes = [8, 1, 32], strides = [1, 1, 1]} : vector<8x64x32xbf16> to vector<8x1x32xbf16>
    %363 = vector.shape_cast %362 : vector<8x1x32xbf16> to vector<8x32xbf16>
    %c54 = arith.constant 54 : index
    %c0_179 = arith.constant 0 : index
    %c0_180 = arith.constant 0 : index
    %364 = vector.load %arg6[%c54, %c0_179, %c0_180] : memref<64x32x64xbf16, #tpu.memory_space<vmem>>, vector<1x32x64xbf16>
    %365 = vector.shape_cast %364 : vector<1x32x64xbf16> to vector<32x64xbf16>
    %cst_181 = arith.constant dense<0.000000e+00> : vector<8x64xf32>
    %366 = tpu.matmul %363, %365, %cst_181 {dimension_numbers = #tpu.dot_dimension_numbers<[1], [0], [0], [1], [0, 0, 1, 1], [], []>} : vector<8x32xbf16>, vector<32x64xbf16>, vector<8x64xf32> -> vector<8x64xf32>
    %367 = arith.addf %361, %366 : vector<8x64xf32>
    %368 = vector.extract_strided_slice %36 {offsets = [0, 55, 0], sizes = [8, 1, 32], strides = [1, 1, 1]} : vector<8x64x32xbf16> to vector<8x1x32xbf16>
    %369 = vector.shape_cast %368 : vector<8x1x32xbf16> to vector<8x32xbf16>
    %c55 = arith.constant 55 : index
    %c0_182 = arith.constant 0 : index
    %c0_183 = arith.constant 0 : index
    %370 = vector.load %arg6[%c55, %c0_182, %c0_183] : memref<64x32x64xbf16, #tpu.memory_space<vmem>>, vector<1x32x64xbf16>
    %371 = vector.shape_cast %370 : vector<1x32x64xbf16> to vector<32x64xbf16>
    %cst_184 = arith.constant dense<0.000000e+00> : vector<8x64xf32>
    %372 = tpu.matmul %369, %371, %cst_184 {dimension_numbers = #tpu.dot_dimension_numbers<[1], [0], [0], [1], [0, 0, 1, 1], [], []>} : vector<8x32xbf16>, vector<32x64xbf16>, vector<8x64xf32> -> vector<8x64xf32>
    %373 = arith.addf %367, %372 : vector<8x64xf32>
    %374 = vector.extract_strided_slice %36 {offsets = [0, 56, 0], sizes = [8, 1, 32], strides = [1, 1, 1]} : vector<8x64x32xbf16> to vector<8x1x32xbf16>
    %375 = vector.shape_cast %374 : vector<8x1x32xbf16> to vector<8x32xbf16>
    %c56 = arith.constant 56 : index
    %c0_185 = arith.constant 0 : index
    %c0_186 = arith.constant 0 : index
    %376 = vector.load %arg6[%c56, %c0_185, %c0_186] : memref<64x32x64xbf16, #tpu.memory_space<vmem>>, vector<1x32x64xbf16>
    %377 = vector.shape_cast %376 : vector<1x32x64xbf16> to vector<32x64xbf16>
    %cst_187 = arith.constant dense<0.000000e+00> : vector<8x64xf32>
    %378 = tpu.matmul %375, %377, %cst_187 {dimension_numbers = #tpu.dot_dimension_numbers<[1], [0], [0], [1], [0, 0, 1, 1], [], []>} : vector<8x32xbf16>, vector<32x64xbf16>, vector<8x64xf32> -> vector<8x64xf32>
    %379 = arith.addf %373, %378 : vector<8x64xf32>
    %380 = vector.extract_strided_slice %36 {offsets = [0, 57, 0], sizes = [8, 1, 32], strides = [1, 1, 1]} : vector<8x64x32xbf16> to vector<8x1x32xbf16>
    %381 = vector.shape_cast %380 : vector<8x1x32xbf16> to vector<8x32xbf16>
    %c57 = arith.constant 57 : index
    %c0_188 = arith.constant 0 : index
    %c0_189 = arith.constant 0 : index
    %382 = vector.load %arg6[%c57, %c0_188, %c0_189] : memref<64x32x64xbf16, #tpu.memory_space<vmem>>, vector<1x32x64xbf16>
    %383 = vector.shape_cast %382 : vector<1x32x64xbf16> to vector<32x64xbf16>
    %cst_190 = arith.constant dense<0.000000e+00> : vector<8x64xf32>
    %384 = tpu.matmul %381, %383, %cst_190 {dimension_numbers = #tpu.dot_dimension_numbers<[1], [0], [0], [1], [0, 0, 1, 1], [], []>} : vector<8x32xbf16>, vector<32x64xbf16>, vector<8x64xf32> -> vector<8x64xf32>
    %385 = arith.addf %379, %384 : vector<8x64xf32>
    %386 = vector.extract_strided_slice %36 {offsets = [0, 58, 0], sizes = [8, 1, 32], strides = [1, 1, 1]} : vector<8x64x32xbf16> to vector<8x1x32xbf16>
    %387 = vector.shape_cast %386 : vector<8x1x32xbf16> to vector<8x32xbf16>
    %c58 = arith.constant 58 : index
    %c0_191 = arith.constant 0 : index
    %c0_192 = arith.constant 0 : index
    %388 = vector.load %arg6[%c58, %c0_191, %c0_192] : memref<64x32x64xbf16, #tpu.memory_space<vmem>>, vector<1x32x64xbf16>
    %389 = vector.shape_cast %388 : vector<1x32x64xbf16> to vector<32x64xbf16>
    %cst_193 = arith.constant dense<0.000000e+00> : vector<8x64xf32>
    %390 = tpu.matmul %387, %389, %cst_193 {dimension_numbers = #tpu.dot_dimension_numbers<[1], [0], [0], [1], [0, 0, 1, 1], [], []>} : vector<8x32xbf16>, vector<32x64xbf16>, vector<8x64xf32> -> vector<8x64xf32>
    %391 = arith.addf %385, %390 : vector<8x64xf32>
    %392 = vector.extract_strided_slice %36 {offsets = [0, 59, 0], sizes = [8, 1, 32], strides = [1, 1, 1]} : vector<8x64x32xbf16> to vector<8x1x32xbf16>
    %393 = vector.shape_cast %392 : vector<8x1x32xbf16> to vector<8x32xbf16>
    %c59 = arith.constant 59 : index
    %c0_194 = arith.constant 0 : index
    %c0_195 = arith.constant 0 : index
    %394 = vector.load %arg6[%c59, %c0_194, %c0_195] : memref<64x32x64xbf16, #tpu.memory_space<vmem>>, vector<1x32x64xbf16>
    %395 = vector.shape_cast %394 : vector<1x32x64xbf16> to vector<32x64xbf16>
    %cst_196 = arith.constant dense<0.000000e+00> : vector<8x64xf32>
    %396 = tpu.matmul %393, %395, %cst_196 {dimension_numbers = #tpu.dot_dimension_numbers<[1], [0], [0], [1], [0, 0, 1, 1], [], []>} : vector<8x32xbf16>, vector<32x64xbf16>, vector<8x64xf32> -> vector<8x64xf32>
    %397 = arith.addf %391, %396 : vector<8x64xf32>
    %398 = vector.extract_strided_slice %36 {offsets = [0, 60, 0], sizes = [8, 1, 32], strides = [1, 1, 1]} : vector<8x64x32xbf16> to vector<8x1x32xbf16>
    %399 = vector.shape_cast %398 : vector<8x1x32xbf16> to vector<8x32xbf16>
    %c60 = arith.constant 60 : index
    %c0_197 = arith.constant 0 : index
    %c0_198 = arith.constant 0 : index
    %400 = vector.load %arg6[%c60, %c0_197, %c0_198] : memref<64x32x64xbf16, #tpu.memory_space<vmem>>, vector<1x32x64xbf16>
    %401 = vector.shape_cast %400 : vector<1x32x64xbf16> to vector<32x64xbf16>
    %cst_199 = arith.constant dense<0.000000e+00> : vector<8x64xf32>
    %402 = tpu.matmul %399, %401, %cst_199 {dimension_numbers = #tpu.dot_dimension_numbers<[1], [0], [0], [1], [0, 0, 1, 1], [], []>} : vector<8x32xbf16>, vector<32x64xbf16>, vector<8x64xf32> -> vector<8x64xf32>
    %403 = arith.addf %397, %402 : vector<8x64xf32>
    %404 = vector.extract_strided_slice %36 {offsets = [0, 61, 0], sizes = [8, 1, 32], strides = [1, 1, 1]} : vector<8x64x32xbf16> to vector<8x1x32xbf16>
    %405 = vector.shape_cast %404 : vector<8x1x32xbf16> to vector<8x32xbf16>
    %c61 = arith.constant 61 : index
    %c0_200 = arith.constant 0 : index
    %c0_201 = arith.constant 0 : index
    %406 = vector.load %arg6[%c61, %c0_200, %c0_201] : memref<64x32x64xbf16, #tpu.memory_space<vmem>>, vector<1x32x64xbf16>
    %407 = vector.shape_cast %406 : vector<1x32x64xbf16> to vector<32x64xbf16>
    %cst_202 = arith.constant dense<0.000000e+00> : vector<8x64xf32>
    %408 = tpu.matmul %405, %407, %cst_202 {dimension_numbers = #tpu.dot_dimension_numbers<[1], [0], [0], [1], [0, 0, 1, 1], [], []>} : vector<8x32xbf16>, vector<32x64xbf16>, vector<8x64xf32> -> vector<8x64xf32>
    %409 = arith.addf %403, %408 : vector<8x64xf32>
    %410 = vector.extract_strided_slice %36 {offsets = [0, 62, 0], sizes = [8, 1, 32], strides = [1, 1, 1]} : vector<8x64x32xbf16> to vector<8x1x32xbf16>
    %411 = vector.shape_cast %410 : vector<8x1x32xbf16> to vector<8x32xbf16>
    %c62 = arith.constant 62 : index
    %c0_203 = arith.constant 0 : index
    %c0_204 = arith.constant 0 : index
    %412 = vector.load %arg6[%c62, %c0_203, %c0_204] : memref<64x32x64xbf16, #tpu.memory_space<vmem>>, vector<1x32x64xbf16>
    %413 = vector.shape_cast %412 : vector<1x32x64xbf16> to vector<32x64xbf16>
    %cst_205 = arith.constant dense<0.000000e+00> : vector<8x64xf32>
    %414 = tpu.matmul %411, %413, %cst_205 {dimension_numbers = #tpu.dot_dimension_numbers<[1], [0], [0], [1], [0, 0, 1, 1], [], []>} : vector<8x32xbf16>, vector<32x64xbf16>, vector<8x64xf32> -> vector<8x64xf32>
    %415 = arith.addf %409, %414 : vector<8x64xf32>
    %416 = vector.extract_strided_slice %36 {offsets = [0, 63, 0], sizes = [8, 1, 32], strides = [1, 1, 1]} : vector<8x64x32xbf16> to vector<8x1x32xbf16>
    %417 = vector.shape_cast %416 : vector<8x1x32xbf16> to vector<8x32xbf16>
    %c63 = arith.constant 63 : index
    %c0_206 = arith.constant 0 : index
    %c0_207 = arith.constant 0 : index
    %418 = vector.load %arg6[%c63, %c0_206, %c0_207] : memref<64x32x64xbf16, #tpu.memory_space<vmem>>, vector<1x32x64xbf16>
    %419 = vector.shape_cast %418 : vector<1x32x64xbf16> to vector<32x64xbf16>
    %cst_208 = arith.constant dense<0.000000e+00> : vector<8x64xf32>
    %420 = tpu.matmul %417, %419, %cst_208 {dimension_numbers = #tpu.dot_dimension_numbers<[1], [0], [0], [1], [0, 0, 1, 1], [], []>} : vector<8x32xbf16>, vector<32x64xbf16>, vector<8x64xf32> -> vector<8x64xf32>
    %421 = arith.addf %415, %420 : vector<8x64xf32>
    %c0_209 = arith.constant 0 : index
    %c0_210 = arith.constant 0 : index
    %422 = vector.load %arg7[%c0_209, %c0_210] : memref<1x64xf32, #tpu.memory_space<vmem>>, vector<1x64xf32>
    %423 = vector.broadcast %422 : vector<1x64xf32> to vector<8x64xf32>
    %424 = arith.addf %421, %423 : vector<8x64xf32>
    %cst_211 = arith.constant 0.000000e+00 : f32
    %425 = vector.broadcast %cst_211 : f32 to vector<8x64xf32>
    %426 = arith.maximumf %424, %425 : vector<8x64xf32>
    %c0_212 = arith.constant 0 : index
    %c0_213 = arith.constant 0 : index
    %427 = vector.load %arg8[%c0_212, %c0_213] : memref<8x64xf32, #tpu.memory_space<vmem>>, vector<8x64xf32>
    tpu.vector_store %arg8[%c0_212, %c0_213], %426 {strides = array<i32>} : memref<8x64xf32, #tpu.memory_space<vmem>>, vector<8x64xf32>,
    return
  }
  func.func @transform_0(%arg0: i32) -> (i32, i32) {
    %c0_i32 = arith.constant 0 : i32
    %c0_i32_0 = arith.constant 0 : i32
    return %arg0, %c0_i32 : i32, i32
  }
  func.func @transform_1(%arg0: i32) -> (i32, i32) {
    %c0_i32 = arith.constant 0 : i32
    %c0_i32_0 = arith.constant 0 : i32
    %c0_i32_1 = arith.constant 0 : i32
    return %c0_i32, %c0_i32_0 : i32, i32
  }
  func.func @transform_2(%arg0: i32) -> (i32, i32) {
    %c0_i32 = arith.constant 0 : i32
    %c0_i32_0 = arith.constant 0 : i32
    %c0_i32_1 = arith.constant 0 : i32
    return %c0_i32, %c0_i32_0 : i32, i32
  }
  func.func @transform_3(%arg0: i32) -> (i32, i32) {
    %c0_i32 = arith.constant 0 : i32
    %c0_i32_0 = arith.constant 0 : i32
    %c0_i32_1 = arith.constant 0 : i32
    return %c0_i32, %c0_i32_0 : i32, i32
  }
  func.func @transform_4(%arg0: i32) -> (i32, i32) {
    %c0_i32 = arith.constant 0 : i32
    %c0_i32_0 = arith.constant 0 : i32
    %c0_i32_1 = arith.constant 0 : i32
    return %c0_i32, %c0_i32_0 : i32, i32
  }
  func.func @transform_5(%arg0: i32) -> (i32, i32, i32) {
    %c0_i32 = arith.constant 0 : i32
    %c0_i32_0 = arith.constant 0 : i32
    %c0_i32_1 = arith.constant 0 : i32
    %c0_i32_2 = arith.constant 0 : i32
    return %c0_i32, %c0_i32_0, %c0_i32_1 : i32, i32, i32
  }
  func.func @transform_6(%arg0: i32) -> (i32, i32) {
    %c0_i32 = arith.constant 0 : i32
    %c0_i32_0 = arith.constant 0 : i32
    %c0_i32_1 = arith.constant 0 : i32
    return %c0_i32, %c0_i32_0 : i32, i32
  }
  func.func @transform_7(%arg0: i32) -> (i32, i32) {
    %c0_i32 = arith.constant 0 : i32
    %c0_i32_0 = arith.constant 0 : i32
    return %arg0, %c0_i32 : i32, i32
  }
}

</mosaic_0001>

<bundles_post_ra>
// kernel: cnn_force_encoder_forward.1
= control target key start
LH: loop header
LB: loop body
LE: loop exit
PB: predicated region body
PF: predicated region fallthrough
CT: control target
= control target key end

     0   :  { %12 = vsyncpa [#allocation3], 0  ;;  %s10595_s24 = smov [#allocation2]   ;;  %s14287_s0 = inlined_call_operand.vmem [shape: bf16[512,8], index: 0, kind: input, shape index: {}]   ;;  %s14288_s1 = inlined_call_operand.vmem [shape: bf16[8,32], index: 1, kind: input, shape index: {}]   ;;  %s14289_s2 = inlined_call_operand.vmem [shape: f32[1,32], index: 2, kind: input, shape index: {}]   ;;  %s14290_s3 = inlined_call_operand.vmem [shape: bf16[32,96], index: 3, kind: input, shape index: {}]   ;;  %s14291_s4 = inlined_call_operand.vmem [shape: f32[1,96], index: 4, kind: input, shape index: {}]   ;;  %s14292_s5 = inlined_call_operand.hbm [shape: bf16[64,32,64], index: 5, kind: input, shape index: {}]   ;;  %s14293_s6 = inlined_call_operand.vmem [shape: f32[1,64], index: 6, kind: input, shape index: {}]   ;;  %s14294_s7 = inlined_call_operand.vmem [shape: f32[8,64], index: 7, kind: output, shape index: {}]  }
   0x1   :  { %s28_s25 = sshll.u32 %s10595_s24, 4  ;;  %s10571_s28 = scalar_lea.hbm %s14292_s5, 16384  ;;  %s29_s25 = int_to_ptr.vmem [resolvable:$true] %s28_s25 }
   0x2   :  { %p10572_p0 = scmp.ne.s32.totalorder %s14292_s5, %s10571_s28  ;;  %p10575_p1 = scmp.lt.u32.totalorder %s10571_s28, %s14292_s5 }
   0x4   :  { %p10577_p2 = pnand %p10575_p1, %p10572_p0 }
   0x6   :  { %10580 = shalt.err (!%p10577_p2)
}
   0x7   :  { %s10581_s10 = scalar_lea.vmem %s29_s25, 16384  ;;  %p10586_p4 = scmp.lt.s32.totalorder %s29_s25, %s29_s25 }
   0x8   :  { %p10582_p3 = scmp.ne.s32.totalorder %s29_s25, %s10581_s10  ;;  %p10587_p5 = scmp.lt.s32.totalorder %s10581_s10, %s10581_s10 }
   0xa   :  { %p10588_p6 = por %p10587_p5, %p10586_p4 }
   0xc   :  { %p10589_p7 = pnand %p10588_p6, %p10582_p3 }
   0xe   :  { %10592 = shalt.err (!%p10589_p7)
}
   0xf   :  { %s10596_s11 = smov 64   ;;  %s10597_s12 = smov 4  }
  0x10   :  { %34 = dma.hbm_to_vmem [thread:$0]  %s14292_s5, 16384, %s29_s25, [#allocation3], %s10596_s11, %s10596_s11, %s10597_s12  }
  0x11   :  { %10593 = dma.done.wait [#allocation3], 16384  }
  0x12   :  { %10594 = vsyncadd [#allocation3], 4294950912  ;;  %vm370_vm0 = vcmask 1043456   ;;  %vm273_vm1 = vcmask 64512   ;;  %v105_v0 = vld [vmem:[%s14288_s1] sm:$0xf] }
  0x13   :  { %10114 = vmatprep.subr.msk.bf16.mxu0 %vm370_vm0, %v105_v0  ;;  %v372_v1 = vsel %vm370_vm0, %v105_v0, 0  ;;  %v10153_v2 = vld [vmem:[%s14287_s0] sm:$0xff]   ;;  %v10154_v3 = vld [vmem:[%s14287_s0 + $0x8] sm:$0xff]   ;;  %v10155_v4 = vld [vmem:[%s14287_s0 + $0x10] sm:$0xff]   ;;  %vm782_vm2 = vcmask 261120   ;;  %s10598_s14 = smov 96  }
  0x14   :  { %9213 = vmatpush3.bf16.msra.mxu0 %v372_v1  ;;  %9214 = vmatprep.mubr.msk.bf16.mxu0 %vm273_vm1, %v10153_v2  ;;  %v10156_v5 = vld [vmem:[%s14287_s0 + $0x18] sm:$0xff]   ;;  %v10157_v6 = vld [vmem:[%s14287_s0 + $0x20] sm:$0xff]   ;;  %v10158_v7 = vld [vmem:[%s14287_s0 + $0x28] sm:$0xff]   ;;  %vm2008_vm3 = vcmask 523264   ;;  %vm3515_vm4 = vcmask 1041409   ;;  %vm3518_vm5 = vcmask 1042434  }
  0x15   :  { %v10159_v8 = vld [vmem:[%s14287_s0 + $0x30] sm:$0xff]   ;;  %v10160_v9 = vld [vmem:[%s14287_s0 + $0x38] sm:$0xff]   ;;  %v10161_v10 = vld [vmem:[%s14287_s0 + $0x40] sm:$0xff]   ;;  %vm3521_vm6 = vcmask 1043459   ;;  %vm3524_vm7 = vcmask 1044484   ;;  %vm3527_vm8 = vcmask 1045509  }
  0x16   :  { %v10162_v11 = vld [vmem:[%s14287_s0 + $0x48] sm:$0xff]   ;;  %v10163_v12 = vld [vmem:[%s14287_s0 + $0x50] sm:$0xff]   ;;  %v10164_v13 = vld [vmem:[%s14287_s0 + $0x58] sm:$0xff]   ;;  %vm3530_vm9 = vcmask 1046534   ;;  %vm3533_vm10 = vcmask 1047559   ;;  %vm10600_vm11 = vmmov 0  }
  0x17   :  { %9215 = vmatmul.mubr.msk.bf16.vlgmr.msra.gmra.mrb[0].mxu0 %vm273_vm1, %v10154_v3  ;;  %v10165_v14 = vld [vmem:[%s14287_s0 + $0x60] sm:$0xff]   ;;  %v10166_v15 = vld [vmem:[%s14287_s0 + $0x68] sm:$0xff]   ;;  %v10167_v16 = vld [vmem:[%s14287_s0 + $0x70] sm:$0xff]  }
  0x18   :  { %9218 = vmatprep.mubr.msk.bf16.mxu0 %vm273_vm1, %v10155_v4  ;;  %v10168_v17 = vld [vmem:[%s14287_s0 + $0x78] sm:$0xff]   ;;  %v10169_v18 = vld [vmem:[%s14287_s0 + $0x80] sm:$0xff]   ;;  %v10170_v19 = vld [vmem:[%s14287_s0 + $0x88] sm:$0xff]  }
  0x19   :  { %v10171_v20 = vld [vmem:[%s14287_s0 + $0x90] sm:$0xff]   ;;  %v10172_v21 = vld [vmem:[%s14287_s0 + $0x98] sm:$0xff]   ;;  %v10173_v22 = vld [vmem:[%s14287_s0 + $0xa0] sm:$0xff]  }
  0x1a   :  { %v10174_v23 = vld [vmem:[%s14287_s0 + $0xa8] sm:$0xff]   ;;  %v10175_v24 = vld [vmem:[%s14287_s0 + $0xb0] sm:$0xff]   ;;  %v10176_v25 = vld [vmem:[%s14287_s0 + $0xb8] sm:$0xff]  }
  0x1b   :  { %v10177_v26 = vld [vmem:[%s14287_s0 + $0xc0] sm:$0xff]   ;;  %v10186_v28 = vld [vmem:[%s14290_s3 + $0x8] sm:$0xff]   ;;  %v10179_v30 = vld [vmem:[%s14287_s0 + $0xd0] sm:$0xff]  }
  0x1c   :  { %v10185_v27 = vld [vmem:[%s14290_s3] sm:$0xff]   ;;  %v10178_v29 = vld [vmem:[%s14287_s0 + $0xc8] sm:$0xff]   ;;  %v10180_v31 = vld [vmem:[%s14287_s0 + $0xd8] sm:$0xff]  }
  0x1d   :  { %9278 = vmatprep.subr.bf16.mxu1 %v10185_v27  ;;  %v10181_v32 = vld [vmem:[%s14287_s0 + $0xe0] sm:$0xff]   ;;  %v10182_v33 = vld [vmem:[%s14287_s0 + $0xe8] sm:$0xff]   ;;  %v10183_v34 = vld [vmem:[%s14287_s0 + $0xf0] sm:$0xff]  }
  0x1e   :  { %9279 = vmatpush3.bf16.msra.mxu1 %v10185_v27  ;;  %v10184_v35 = vld [vmem:[%s14287_s0 + $0xf8] sm:$0xff]   ;;  %v10795_v36 = vld [vmem:[%s14289_s2] ss:$0 sm:$0xff] }
  0x1f   :  { %9219 = vmatmul.mubr.msk.bf16.gmra.mrb[4].mxu0 %vm273_vm1, %v10156_v5  ;;  %9280 = vmatprep.subr.bf16.mxu1 %v10186_v28 }
  0x20   :  { %9222 = vmatprep.mubr.msk.bf16.mxu0 %vm273_vm1, %v10157_v6 }
  0x22   :  { %9281 = vmatpush3.bf16.msra.mxu1 %v10186_v28 }
  0x27   :  { %9223 = vmatmul.mubr.msk.bf16.gmra.mrb[8].mxu0 %vm273_vm1, %v10158_v7 }
  0x28   :  { %9226 = vmatprep.mubr.msk.bf16.mxu0 %vm273_vm1, %v10159_v8 }
  0x2f   :  { %9227 = vmatmul.mubr.msk.bf16.gmra.mrb[12].mxu0 %vm273_vm1, %v10160_v9 }
  0x30   :  { %9230 = vmatprep.mubr.msk.bf16.mxu0 %vm273_vm1, %v10161_v10 }
  0x37   :  { %9231 = vmatmul.mubr.msk.bf16.gmra.mrb[16].mxu0 %vm273_vm1, %v10162_v11 }
  0x38   :  { %9234 = vmatprep.mubr.msk.bf16.mxu0 %vm273_vm1, %v10163_v12 }
  0x3f   :  { %9235 = vmatmul.mubr.msk.bf16.gmra.mrb[20].mxu0 %vm273_vm1, %v10164_v13 }
  0x40   :  { %9238 = vmatprep.mubr.msk.bf16.mxu0 %vm273_vm1, %v10165_v14 }
  0x47   :  { %9239 = vmatmul.mubr.msk.bf16.gmra.mrb[24].mxu0 %vm273_vm1, %v10166_v15 }
  0x48   :  { %9242 = vmatprep.mubr.msk.bf16.mxu0 %vm273_vm1, %v10167_v16 }
  0x4f   :  { %9243 = vmatmul.mubr.msk.bf16.gmra.mrb[28].mxu0 %vm273_vm1, %v10168_v17 }
  0x50   :  { %9246 = vmatprep.mubr.msk.bf16.mxu0 %vm273_vm1, %v10169_v18 }
  0x57   :  { %9247 = vmatmul.mubr.msk.bf16.gmra.mrb[32].mxu0 %vm273_vm1, %v10170_v19 }
  0x58   :  { %9250 = vmatprep.mubr.msk.bf16.mxu0 %vm273_vm1, %v10171_v20 }
  0x5f   :  { %9251 = vmatmul.mubr.msk.bf16.gmra.mrb[36].mxu0 %vm273_vm1, %v10172_v21 }
  0x60   :  { %9254 = vmatprep.mubr.msk.bf16.mxu0 %vm273_vm1, %v10173_v22 }
  0x67   :  { %9255 = vmatmul.mubr.msk.bf16.gmra.mrb[40].mxu0 %vm273_vm1, %v10174_v23 }
  0x68   :  { %9258 = vmatprep.mubr.msk.bf16.mxu0 %vm273_vm1, %v10175_v24 }
  0x6f   :  { %9259 = vmatmul.mubr.msk.bf16.gmra.mrb[44].mxu0 %vm273_vm1, %v10176_v25 }
  0x70   :  { %9262 = vmatprep.mubr.msk.bf16.mxu0 %vm273_vm1, %v10177_v26 }
  0x77   :  { %9263 = vmatmul.mubr.msk.bf16.gmra.mrb[48].mxu0 %vm273_vm1, %v10178_v29 }
  0x78   :  { %9266 = vmatprep.mubr.msk.bf16.mxu0 %vm273_vm1, %v10179_v30 }
  0x7f   :  { %9267 = vmatmul.mubr.msk.bf16.gmra.mrb[52].mxu0 %vm273_vm1, %v10180_v31 }
  0x80   :  { %9270 = vmatprep.mubr.msk.bf16.mxu0 %vm273_vm1, %v10181_v32 }
  0x87   :  { %9271 = vmatmul.mubr.msk.bf16.gmra.mrb[56].mxu0 %vm273_vm1, %v10182_v33 }
  0x88   :  { %9274 = vmatprep.mubr.msk.bf16.mxu0 %vm273_vm1, %v10183_v34 }
  0x8f   :  { %9275 = vmatmul.mubr.msk.bf16.gmra.mrb[60].mxu0 %vm273_vm1, %v10184_v35 }
  0xea   :  { %v9216_v37 = vpop.f32.mrb[0].mxu0 }
  0xeb   :  { %v417_v38 = vadd.f32 %v9216_v37, %v10795_v36  ;;  %v408_v39 = vpop.f32.mrb[1].mxu0 }
  0xec   :  { %v409_v40 = vadd.f32 %v10795_v36, %v408_v39  ;;  %v9217_v41 = vpop.f32.mrb[2].mxu0 }
  0xed   :  { %v420_v42 = vadd.f32 %v9217_v41, %v10795_v36  ;;  %v411_v43 = vpop.f32.mrb[3].mxu0  ;;  %v665_v45 = vmax.f32 %v417_v38, 0.0 }
  0xee   :  { %v412_v44 = vadd.f32 %v10795_v36, %v411_v43  ;;  %v663_v47 = vmax.f32 %v409_v40, 0.0 }
  0xef   :  { %v666_v46 = vmax.f32 %v420_v42, 0.0 }
  0xf0   :  { %v664_v48 = vmax.f32 %v412_v44, 0.0 }
  0xf1   :  { %v728_v49 = vpack.c.bf16 %v666_v46, %v665_v45 }
  0xf2   :  { %v9220_v50 = vpop.f32.mrb[4].mxu0  ;;  %v727_v51 = vpack.c.bf16 %v664_v48, %v663_v47 }
  0xf3   :  { %v433_v52 = vadd.f32 %v9220_v50, %v10795_v36  ;;  %v424_v53 = vpop.f32.mrb[5].mxu0 }
  0xf4   :  { %v425_v54 = vadd.f32 %v10795_v36, %v424_v53  ;;  %v9221_v55 = vpop.f32.mrb[6].mxu0  ;;  %9282 = vmatprep.mubr.msk.bf16.mxu1 %vm782_vm2, %v727_v51 }
  0xf5   :  { %v436_v56 = vadd.f32 %v9221_v55, %v10795_v36  ;;  %v427_v57 = vpop.f32.mrb[7].mxu0  ;;  %9283 = vmatmul.mubr.msk.bf16.vlgmr.msra.gmra.mrb[0].mxu1 %vm782_vm2, %v728_v49  ;;  %v669_v59 = vmax.f32 %v433_v52, 0.0 }
  0xf6   :  { %v428_v58 = vadd.f32 %v10795_v36, %v427_v57  ;;  %v667_v61 = vmax.f32 %v425_v54, 0.0 }
  0xf7   :  { %v670_v60 = vmax.f32 %v436_v56, 0.0 }
  0xf8   :  { %v668_v62 = vmax.f32 %v428_v58, 0.0 }
  0xf9   :  { %v730_v63 = vpack.c.bf16 %v670_v60, %v669_v59 }
  0xfa   :  { %v729_v0 = vpack.c.bf16 %v668_v62, %v667_v61  ;;  %v9224_v1 = vpop.f32.mrb[8].mxu0 }
  0xfb   :  { %v449_v2 = vadd.f32 %v9224_v1, %v10795_v36  ;;  %v440_v3 = vpop.f32.mrb[9].mxu0 }
  0xfc   :  { %v441_v4 = vadd.f32 %v10795_v36, %v440_v3  ;;  %v9225_v5 = vpop.f32.mrb[10].mxu0  ;;  %9286 = vmatprep.mubr.msk.bf16.mxu1 %vm782_vm2, %v729_v0 }
  0xfd   :  { %v452_v6 = vadd.f32 %v9225_v5, %v10795_v36  ;;  %v443_v7 = vpop.f32.mrb[11].mxu0  ;;  %9287 = vmatmul.mubr.msk.bf16.gmra.mrb[4].mxu1 %vm782_vm2, %v730_v63  ;;  %v673_v9 = vmax.f32 %v449_v2, 0.0 }
  0xfe   :  { %v444_v8 = vadd.f32 %v10795_v36, %v443_v7  ;;  %v671_v11 = vmax.f32 %v441_v4, 0.0 }
  0xff   :  { %v674_v10 = vmax.f32 %v452_v6, 0.0 }
 0x100   :  { %v672_v12 = vmax.f32 %v444_v8, 0.0 }
 0x101   :  { %v732_v13 = vpack.c.bf16 %v674_v10, %v673_v9 }
 0x102   :  { %v731_v14 = vpack.c.bf16 %v672_v12, %v671_v11  ;;  %v9228_v15 = vpop.f32.mrb[12].mxu0 }
 0x103   :  { %v465_v16 = vadd.f32 %v9228_v15, %v10795_v36  ;;  %v456_v17 = vpop.f32.mrb[13].mxu0 }
 0x104   :  { %v457_v18 = vadd.f32 %v10795_v36, %v456_v17  ;;  %v9229_v19 = vpop.f32.mrb[14].mxu0  ;;  %9290 = vmatprep.mubr.msk.bf16.mxu1 %vm782_vm2, %v731_v14 }
 0x105   :  { %v677_v20 = vmax.f32 %v465_v16, 0.0  ;;  %v468_v21 = vadd.f32 %v9229_v19, %v10795_v36  ;;  %v459_v22 = vpop.f32.mrb[15].mxu0  ;;  %9291 = vmatmul.mubr.msk.bf16.gmra.mrb[8].mxu1 %vm782_vm2, %v732_v13 }
 0x106   :  { %v675_v23 = vmax.f32 %v457_v18, 0.0  ;;  %v460_v24 = vadd.f32 %v10795_v36, %v459_v22 }
 0x107   :  { %v678_v25 = vmax.f32 %v468_v21, 0.0 }
 0x108   :  { %v676_v26 = vmax.f32 %v460_v24, 0.0 }
 0x109   :  { %v734_v27 = vpack.c.bf16 %v678_v25, %v677_v20 }
 0x10a   :  { %v733_v28 = vpack.c.bf16 %v676_v26, %v675_v23  ;;  %v9232_v29 = vpop.f32.mrb[16].mxu0 }
 0x10b   :  { %v481_v30 = vadd.f32 %v9232_v29, %v10795_v36  ;;  %v472_v31 = vpop.f32.mrb[17].mxu0 }
 0x10c   :  { %v473_v32 = vadd.f32 %v10795_v36, %v472_v31  ;;  %v9233_v33 = vpop.f32.mrb[18].mxu0  ;;  %9294 = vmatprep.mubr.msk.bf16.mxu1 %vm782_vm2, %v733_v28 }
 0x10d   :  { %v681_v34 = vmax.f32 %v481_v30, 0.0  ;;  %v484_v35 = vadd.f32 %v9233_v33, %v10795_v36  ;;  %v475_v37 = vpop.f32.mrb[19].mxu0  ;;  %9295 = vmatmul.mubr.msk.bf16.gmra.mrb[12].mxu1 %vm782_vm2, %v734_v27 }
 0x10e   :  { %v679_v38 = vmax.f32 %v473_v32, 0.0  ;;  %v476_v39 = vadd.f32 %v10795_v36, %v475_v37 }
 0x10f   :  { %v682_v40 = vmax.f32 %v484_v35, 0.0 }
 0x110   :  { %v680_v41 = vmax.f32 %v476_v39, 0.0 }
 0x111   :  { %v736_v42 = vpack.c.bf16 %v682_v40, %v681_v34 }
 0x112   :  { %v735_v43 = vpack.c.bf16 %v680_v41, %v679_v38  ;;  %v9236_v44 = vpop.f32.mrb[20].mxu0 }
 0x113   :  { %v497_v45 = vadd.f32 %v9236_v44, %v10795_v36  ;;  %v488_v46 = vpop.f32.mrb[21].mxu0 }
 0x114   :  { %v489_v47 = vadd.f32 %v10795_v36, %v488_v46  ;;  %v9237_v48 = vpop.f32.mrb[22].mxu0  ;;  %9298 = vmatprep.mubr.msk.bf16.mxu1 %vm782_vm2, %v735_v43 }
 0x115   :  { %v685_v49 = vmax.f32 %v497_v45, 0.0  ;;  %v500_v50 = vadd.f32 %v9237_v48, %v10795_v36  ;;  %v491_v51 = vpop.f32.mrb[23].mxu0  ;;  %9299 = vmatmul.mubr.msk.bf16.gmra.mrb[16].mxu1 %vm782_vm2, %v736_v42 }
 0x116   :  { %v683_v52 = vmax.f32 %v489_v47, 0.0  ;;  %v492_v53 = vadd.f32 %v10795_v36, %v491_v51 }
 0x117   :  { %v686_v54 = vmax.f32 %v500_v50, 0.0 }
 0x118   :  { %v684_v55 = vmax.f32 %v492_v53, 0.0 }
 0x119   :  { %v738_v56 = vpack.c.bf16 %v686_v54, %v685_v49 }
 0x11a   :  { %v737_v57 = vpack.c.bf16 %v684_v55, %v683_v52  ;;  %v9240_v58 = vpop.f32.mrb[24].mxu0 }
 0x11b   :  { %v513_v59 = vadd.f32 %v9240_v58, %v10795_v36  ;;  %v504_v60 = vpop.f32.mrb[25].mxu0 }
 0x11c   :  { %v505_v61 = vadd.f32 %v10795_v36, %v504_v60  ;;  %v9241_v62 = vpop.f32.mrb[26].mxu0  ;;  %9302 = vmatprep.mubr.msk.bf16.mxu1 %vm782_vm2, %v737_v57 }
 0x11d   :  { %v689_v63 = vmax.f32 %v513_v59, 0.0  ;;  %v516_v0 = vadd.f32 %v9241_v62, %v10795_v36  ;;  %v507_v1 = vpop.f32.mrb[27].mxu0  ;;  %9303 = vmatmul.mubr.msk.bf16.gmra.mrb[20].mxu1 %vm782_vm2, %v738_v56 }
 0x11e   :  { %v687_v2 = vmax.f32 %v505_v61, 0.0  ;;  %v508_v3 = vadd.f32 %v10795_v36, %v507_v1 }
 0x11f   :  { %v690_v4 = vmax.f32 %v516_v0, 0.0 }
 0x120   :  { %v688_v5 = vmax.f32 %v508_v3, 0.0 }
 0x121   :  { %v740_v6 = vpack.c.bf16 %v690_v4, %v689_v63 }
 0x122   :  { %v739_v7 = vpack.c.bf16 %v688_v5, %v687_v2  ;;  %v9244_v8 = vpop.f32.mrb[28].mxu0 }
 0x123   :  { %v529_v9 = vadd.f32 %v9244_v8, %v10795_v36  ;;  %v520_v10 = vpop.f32.mrb[29].mxu0 }
 0x124   :  { %v521_v11 = vadd.f32 %v10795_v36, %v520_v10  ;;  %v9245_v12 = vpop.f32.mrb[30].mxu0  ;;  %9306 = vmatprep.mubr.msk.bf16.mxu1 %vm782_vm2, %v739_v7 }
 0x125   :  { %v693_v13 = vmax.f32 %v529_v9, 0.0  ;;  %v532_v14 = vadd.f32 %v9245_v12, %v10795_v36  ;;  %v523_v15 = vpop.f32.mrb[31].mxu0  ;;  %9307 = vmatmul.mubr.msk.bf16.gmra.mrb[24].mxu1 %vm782_vm2, %v740_v6 }
 0x126   :  { %v691_v16 = vmax.f32 %v521_v11, 0.0  ;;  %v524_v17 = vadd.f32 %v10795_v36, %v523_v15 }
 0x127   :  { %v694_v18 = vmax.f32 %v532_v14, 0.0 }
 0x128   :  { %v692_v19 = vmax.f32 %v524_v17, 0.0 }
 0x129   :  { %v742_v20 = vpack.c.bf16 %v694_v18, %v693_v13 }
 0x12a   :  { %v741_v21 = vpack.c.bf16 %v692_v19, %v691_v16  ;;  %v9248_v22 = vpop.f32.mrb[32].mxu0 }
 0x12b   :  { %v545_v23 = vadd.f32 %v9248_v22, %v10795_v36  ;;  %v536_v24 = vpop.f32.mrb[33].mxu0 }
 0x12c   :  { %v537_v25 = vadd.f32 %v10795_v36, %v536_v24  ;;  %v9249_v26 = vpop.f32.mrb[34].mxu0  ;;  %9310 = vmatprep.mubr.msk.bf16.mxu1 %vm782_vm2, %v741_v21 }
 0x12d   :  { %v697_v27 = vmax.f32 %v545_v23, 0.0  ;;  %v548_v28 = vadd.f32 %v9249_v26, %v10795_v36  ;;  %v539_v29 = vpop.f32.mrb[35].mxu0  ;;  %9311 = vmatmul.mubr.msk.bf16.gmra.mrb[28].mxu1 %vm782_vm2, %v742_v20 }
 0x12e   :  { %v695_v30 = vmax.f32 %v537_v25, 0.0  ;;  %v540_v31 = vadd.f32 %v10795_v36, %v539_v29 }
 0x12f   :  { %v698_v32 = vmax.f32 %v548_v28, 0.0 }
 0x130   :  { %v696_v33 = vmax.f32 %v540_v31, 0.0 }
 0x131   :  { %v744_v34 = vpack.c.bf16 %v698_v32, %v697_v27 }
 0x132   :  { %v743_v35 = vpack.c.bf16 %v696_v33, %v695_v30  ;;  %v9252_v37 = vpop.f32.mrb[36].mxu0 }
 0x133   :  { %v561_v38 = vadd.f32 %v9252_v37, %v10795_v36  ;;  %v552_v39 = vpop.f32.mrb[37].mxu0 }
 0x134   :  { %v553_v40 = vadd.f32 %v10795_v36, %v552_v39  ;;  %v9253_v41 = vpop.f32.mrb[38].mxu0  ;;  %9314 = vmatprep.mubr.msk.bf16.mxu1 %vm782_vm2, %v743_v35 }
 0x135   :  { %v701_v42 = vmax.f32 %v561_v38, 0.0  ;;  %v564_v43 = vadd.f32 %v9253_v41, %v10795_v36  ;;  %v555_v44 = vpop.f32.mrb[39].mxu0  ;;  %9315 = vmatmul.mubr.msk.bf16.gmra.mrb[32].mxu1 %vm782_vm2, %v744_v34 }
 0x136   :  { %v699_v45 = vmax.f32 %v553_v40, 0.0  ;;  %v556_v46 = vadd.f32 %v10795_v36, %v555_v44 }
 0x137   :  { %v702_v47 = vmax.f32 %v564_v43, 0.0 }
 0x138   :  { %v700_v48 = vmax.f32 %v556_v46, 0.0 }
 0x139   :  { %v746_v49 = vpack.c.bf16 %v702_v47, %v701_v42 }
 0x13a   :  { %v745_v50 = vpack.c.bf16 %v700_v48, %v699_v45  ;;  %v9256_v51 = vpop.f32.mrb[40].mxu0 }
 0x13b   :  { %v577_v52 = vadd.f32 %v9256_v51, %v10795_v36  ;;  %v568_v53 = vpop.f32.mrb[41].mxu0 }
 0x13c   :  { %v569_v54 = vadd.f32 %v10795_v36, %v568_v53  ;;  %v9257_v55 = vpop.f32.mrb[42].mxu0  ;;  %9318 = vmatprep.mubr.msk.bf16.mxu1 %vm782_vm2, %v745_v50 }
 0x13d   :  { %v705_v56 = vmax.f32 %v577_v52, 0.0  ;;  %v580_v57 = vadd.f32 %v9257_v55, %v10795_v36  ;;  %v571_v58 = vpop.f32.mrb[43].mxu0  ;;  %9319 = vmatmul.mubr.msk.bf16.gmra.mrb[36].mxu1 %vm782_vm2, %v746_v49 }
 0x13e   :  { %v703_v59 = vmax.f32 %v569_v54, 0.0  ;;  %v572_v60 = vadd.f32 %v10795_v36, %v571_v58 }
 0x13f   :  { %v706_v61 = vmax.f32 %v580_v57, 0.0 }
 0x140   :  { %v704_v62 = vmax.f32 %v572_v60, 0.0 }
 0x141   :  { %v748_v63 = vpack.c.bf16 %v706_v61, %v705_v56 }
 0x142   :  { %v747_v0 = vpack.c.bf16 %v704_v62, %v703_v59  ;;  %v9260_v1 = vpop.f32.mrb[44].mxu0 }
 0x143   :  { %v593_v2 = vadd.f32 %v9260_v1, %v10795_v36  ;;  %v584_v3 = vpop.f32.mrb[45].mxu0 }
 0x144   :  { %v585_v4 = vadd.f32 %v10795_v36, %v584_v3  ;;  %v9261_v5 = vpop.f32.mrb[46].mxu0  ;;  %9322 = vmatprep.mubr.msk.bf16.mxu1 %vm782_vm2, %v747_v0 }
 0x145   :  { %v709_v6 = vmax.f32 %v593_v2, 0.0  ;;  %v596_v7 = vadd.f32 %v9261_v5, %v10795_v36  ;;  %v587_v8 = vpop.f32.mrb[47].mxu0  ;;  %9323 = vmatmul.mubr.msk.bf16.gmra.mrb[40].mxu1 %vm782_vm2, %v748_v63 }
 0x146   :  { %v707_v9 = vmax.f32 %v585_v4, 0.0  ;;  %v588_v10 = vadd.f32 %v10795_v36, %v587_v8 }
 0x147   :  { %v710_v11 = vmax.f32 %v596_v7, 0.0 }
 0x148   :  { %v708_v12 = vmax.f32 %v588_v10, 0.0 }
 0x149   :  { %v750_v13 = vpack.c.bf16 %v710_v11, %v709_v6 }
 0x14a   :  { %v749_v14 = vpack.c.bf16 %v708_v12, %v707_v9  ;;  %v9264_v15 = vpop.f32.mrb[48].mxu0  ;;  %v10896_v9 = vld [vmem:[%s14291_s4] ss:$0 sm:$0xff] }
 0x14b   :  { %v609_v16 = vadd.f32 %v9264_v15, %v10795_v36  ;;  %v600_v17 = vpop.f32.mrb[49].mxu0 }
 0x14c   :  { %v601_v18 = vadd.f32 %v10795_v36, %v600_v17  ;;  %v9265_v19 = vpop.f32.mrb[50].mxu0  ;;  %9326 = vmatprep.mubr.msk.bf16.mxu1 %vm782_vm2, %v749_v14 }
 0x14d   :  { %v713_v20 = vmax.f32 %v609_v16, 0.0  ;;  %v612_v21 = vadd.f32 %v9265_v19, %v10795_v36  ;;  %v603_v22 = vpop.f32.mrb[51].mxu0  ;;  %9327 = vmatmul.mubr.msk.bf16.gmra.mrb[44].mxu1 %vm782_vm2, %v750_v13 }
 0x14e   :  { %v711_v23 = vmax.f32 %v601_v18, 0.0  ;;  %v604_v24 = vadd.f32 %v10795_v36, %v603_v22 }
 0x14f   :  { %v714_v25 = vmax.f32 %v612_v21, 0.0 }
 0x150   :  { %v712_v26 = vmax.f32 %v604_v24, 0.0 }
 0x151   :  { %v752_v27 = vpack.c.bf16 %v714_v25, %v713_v20 }
 0x152   :  { %v751_v28 = vpack.c.bf16 %v712_v26, %v711_v23  ;;  %v9268_v29 = vpop.f32.mrb[52].mxu0 }
 0x153   :  { %v625_v30 = vadd.f32 %v9268_v29, %v10795_v36  ;;  %v616_v31 = vpop.f32.mrb[53].mxu0 }
 0x154   :  { %v617_v32 = vadd.f32 %v10795_v36, %v616_v31  ;;  %v9269_v33 = vpop.f32.mrb[54].mxu0  ;;  %9330 = vmatprep.mubr.msk.bf16.mxu1 %vm782_vm2, %v751_v28 }
 0x155   :  { %v717_v34 = vmax.f32 %v625_v30, 0.0  ;;  %v628_v35 = vadd.f32 %v9269_v33, %v10795_v36  ;;  %v619_v37 = vpop.f32.mrb[55].mxu0  ;;  %9331 = vmatmul.mubr.msk.bf16.gmra.mrb[48].mxu1 %vm782_vm2, %v752_v27 }
 0x156   :  { %v715_v38 = vmax.f32 %v617_v32, 0.0  ;;  %v620_v39 = vadd.f32 %v10795_v36, %v619_v37 }
 0x157   :  { %v718_v40 = vmax.f32 %v628_v35, 0.0 }
 0x158   :  { %v716_v41 = vmax.f32 %v620_v39, 0.0 }
 0x159   :  { %v754_v42 = vpack.c.bf16 %v718_v40, %v717_v34 }
 0x15a   :  { %v753_v43 = vpack.c.bf16 %v716_v41, %v715_v38  ;;  %v9272_v44 = vpop.f32.mrb[56].mxu0 }
 0x15b   :  { %v641_v45 = vadd.f32 %v9272_v44, %v10795_v36  ;;  %v632_v46 = vpop.f32.mrb[57].mxu0 }
 0x15c   :  { %v633_v47 = vadd.f32 %v10795_v36, %v632_v46  ;;  %v9273_v48 = vpop.f32.mrb[58].mxu0  ;;  %9334 = vmatprep.mubr.msk.bf16.mxu1 %vm782_vm2, %v753_v43 }
 0x15d   :  { %v721_v49 = vmax.f32 %v641_v45, 0.0  ;;  %v644_v50 = vadd.f32 %v9273_v48, %v10795_v36  ;;  %v635_v51 = vpop.f32.mrb[59].mxu0  ;;  %9335 = vmatmul.mubr.msk.bf16.gmra.mrb[52].mxu1 %vm782_vm2, %v754_v42 }
 0x15e   :  { %v719_v52 = vmax.f32 %v633_v47, 0.0  ;;  %v636_v53 = vadd.f32 %v10795_v36, %v635_v51 }
 0x15f   :  { %v722_v54 = vmax.f32 %v644_v50, 0.0 }
 0x160   :  { %v720_v55 = vmax.f32 %v636_v53, 0.0 }
 0x161   :  { %v756_v56 = vpack.c.bf16 %v722_v54, %v721_v49 }
 0x162   :  { %v755_v57 = vpack.c.bf16 %v720_v55, %v719_v52  ;;  %v9276_v58 = vpop.f32.mrb[60].mxu0 }
 0x163   :  { %v657_v59 = vadd.f32 %v9276_v58, %v10795_v36  ;;  %v648_v60 = vpop.f32.mrb[61].mxu0 }
 0x164   :  { %v649_v61 = vadd.f32 %v10795_v36, %v648_v60  ;;  %v9277_v62 = vpop.f32.mrb[62].mxu0  ;;  %9338 = vmatprep.mubr.msk.bf16.mxu1 %vm782_vm2, %v755_v57 }
 0x165   :  { %v725_v63 = vmax.f32 %v657_v59, 0.0  ;;  %v660_v0 = vadd.f32 %v9277_v62, %v10795_v36  ;;  %v651_v1 = vpop.f32.mrb[63].mxu0  ;;  %9339 = vmatmul.mubr.msk.bf16.gmra.mrb[56].mxu1 %vm782_vm2, %v756_v56 }
 0x166   :  { %v723_v2 = vmax.f32 %v649_v61, 0.0  ;;  %v652_v3 = vadd.f32 %v10795_v36, %v651_v1 }
 0x167   :  { %v726_v4 = vmax.f32 %v660_v0, 0.0 }
 0x168   :  { %v724_v5 = vmax.f32 %v652_v3, 0.0 }
 0x169   :  { %v758_v6 = vpack.c.bf16 %v726_v4, %v725_v63 }
 0x16a   :  { %v757_v7 = vpack.c.bf16 %v724_v5, %v723_v2 }
 0x16c   :  { %9342 = vmatprep.mubr.msk.bf16.mxu1 %vm782_vm2, %v757_v7 }
 0x16d   :  { %9343 = vmatmul.mubr.msk.bf16.gmra.mrb[60].mxu1 %vm782_vm2, %v758_v6 }
 0x1c8   :  { %v9284_v8 = vpop.f32.mrb[0].mxu1 }
 0x1c9   :  { %v913_v10 = vpop.f32.mrb[1].mxu1  ;;  %v922_v12 = vadd.f32 %v9284_v8, %v10896_v9 }
 0x1ca   :  { %v9285_v11 = vpop.f32.mrb[2].mxu1  ;;  %v914_v14 = vadd.f32 %v10896_v9, %v913_v10 }
 0x1cb   :  { %v925_v36 = vadd.f32 %v9285_v11, %v10896_v9  ;;  %v916_v13 = vpop.f32.mrb[3].mxu1 }
 0x1cc   :  { %v917_v15 = vadd.f32 %v10896_v9, %v916_v13 }
 0x1cd   :  { %v10902_v16 = vpack.c.bf16 %v925_v36, %v922_v12 }
 0x1ce   :  { %v10904_v17 = vpack.c.bf16 %v917_v15, %v914_v14 }
 0x1cf   :  { %1206 = vrot.lane.b32.xlu1 %v10902_v16, %s10598_s14 }
 0x1d0   :  { %v9288_v18 = vpop.f32.mrb[4].mxu1  ;;  %1204 = vrot.lane.b32.xlu0 %v10904_v17, %s10598_s14  ;;  %9354 = vmatprep.mubr.msk.bf16.mxu0 %vm782_vm2, %v10904_v17 }
 0x1d1   :  { %v929_v19 = vpop.f32.mrb[5].mxu1  ;;  %v938_v21 = vadd.f32 %v9288_v18, %v10896_v9 }
 0x1d2   :  { %v9289_v20 = vpop.f32.mrb[6].mxu1  ;;  %v930_v24 = vadd.f32 %v10896_v9, %v929_v19 }
 0x1d3   :  { %v941_v22 = vadd.f32 %v9289_v20, %v10896_v9  ;;  %v932_v23 = vpop.f32.mrb[7].mxu1 }
 0x1d4   :  { %v933_v25 = vadd.f32 %v10896_v9, %v932_v23 }
 0x1d5   :  { %v10916_v26 = vpack.c.bf16 %v941_v22, %v938_v21 }
 0x1d6   :  { %v10918_v27 = vpack.c.bf16 %v933_v25, %v930_v24 }
 0x1d8   :  { %v9292_v28 = vpop.f32.mrb[8].mxu1 }
 0x1d9   :  { %v945_v29 = vpop.f32.mrb[9].mxu1  ;;  %v954_v31 = vadd.f32 %v9292_v28, %v10896_v9 }
 0x1da   :  { %v9293_v30 = vpop.f32.mrb[10].mxu1  ;;  %v946_v34 = vadd.f32 %v10896_v9, %v945_v29 }
 0x1db   :  { %v957_v32 = vadd.f32 %v9293_v30, %v10896_v9  ;;  %v948_v33 = vpop.f32.mrb[11].mxu1 }
 0x1dc   :  { %v949_v35 = vadd.f32 %v10896_v9, %v948_v33 }
 0x1dd   :  { %v10924_v37 = vpack.c.bf16 %v957_v32, %v954_v31 }
 0x1de   :  { %v10926_v38 = vpack.c.bf16 %v949_v35, %v946_v34 }
 0x1df   :  { %1307 = vrot.lane.b32.xlu1 %v10924_v37, %s10598_s14 }
 0x1e0   :  { %9370 = vmatprep.mubr.msk.bf16.mxu1 %vm782_vm2, %v10926_v38  ;;  %1305 = vrot.lane.b32.xlu0 %v10926_v38, %s10598_s14  ;;  %v9296_v39 = vpop.f32.mrb[12].mxu1 }
 0x1e1   :  { %v970_v40 = vadd.f32 %v9296_v39, %v10896_v9  ;;  %v961_v41 = vpop.f32.mrb[13].mxu1 }
 0x1e2   :  { %v962_v42 = vadd.f32 %v10896_v9, %v961_v41  ;;  %v9297_v43 = vpop.f32.mrb[14].mxu1 }
 0x1e3   :  { %v973_v44 = vadd.f32 %v9297_v43, %v10896_v9  ;;  %v964_v45 = vpop.f32.mrb[15].mxu1 }
 0x1e4   :  { %1208 = vrot.lane.b32.xlu0 %v10918_v27, %s10598_s14  ;;  %v965_v46 = vadd.f32 %v10896_v9, %v964_v45 }
 0x1e5   :  { %v10940_v47 = vpack.c.bf16 %v973_v44, %v970_v40 }
 0x1e6   :  { %v10942_v48 = vpack.c.bf16 %v965_v46, %v962_v42 }
 0x1e8   :  { %1210 = vrot.lane.b32.xlu0 %v10916_v26, %s10598_s14  ;;  %v9300_v49 = vpop.f32.mrb[16].mxu1  ;;  %1309 = vrot.lane.b32.xlu1 %v10942_v48, %s10598_s14 }
 0x1e9   :  { %v986_v50 = vadd.f32 %v9300_v49, %v10896_v9  ;;  %v977_v51 = vpop.f32.mrb[17].mxu1 }
 0x1ea   :  { %v978_v52 = vadd.f32 %v10896_v9, %v977_v51  ;;  %v9301_v53 = vpop.f32.mrb[18].mxu1 }
 0x1eb   :  { %v989_v54 = vadd.f32 %v9301_v53, %v10896_v9  ;;  %v980_v55 = vpop.f32.mrb[19].mxu1 }
 0x1ec   :  { %v981_v56 = vadd.f32 %v10896_v9, %v980_v55  ;;  %1311 = vrot.lane.b32.xlu1 %v10940_v47, %s10598_s14 }
 0x1ed   :  { %v10954_v57 = vpack.c.bf16 %v989_v54, %v986_v50 }
 0x1ee   :  { %v10956_v58 = vpack.c.bf16 %v981_v56, %v978_v52 }
 0x1f0   :  { %v9304_v59 = vpop.f32.mrb[20].mxu1  ;;  %1406 = vrot.lane.b32.xlu0 %v10956_v58, %s10598_s14 }
 0x1f1   :  { %v1002_v60 = vadd.f32 %v9304_v59, %v10896_v9  ;;  %v993_v61 = vpop.f32.mrb[21].mxu1 }
 0x1f2   :  { %v994_v62 = vadd.f32 %v10896_v9, %v993_v61  ;;  %v9305_v63 = vpop.f32.mrb[22].mxu1 }
 0x1f3   :  { %v1005_v0 = vadd.f32 %v9305_v63, %v10896_v9  ;;  %v996_v1 = vpop.f32.mrb[23].mxu1 }
 0x1f4   :  { %v997_v2 = vadd.f32 %v10896_v9, %v996_v1  ;;  %1408 = vrot.lane.b32.xlu0 %v10954_v57, %s10598_s14 }
 0x1f5   :  { %v10966_v3 = vpack.c.bf16 %v1005_v0, %v1002_v60 }
 0x1f6   :  { %v10968_v4 = vpack.c.bf16 %v997_v2, %v994_v62 }
 0x1f8   :  { %v9308_v5 = vpop.f32.mrb[24].mxu1  ;;  %1410 = vrot.lane.b32.xlu0 %v10968_v4, %s10598_s14 }
 0x1f9   :  { %v1018_v6 = vadd.f32 %v9308_v5, %v10896_v9  ;;  %v1009_v7 = vpop.f32.mrb[25].mxu1 }
 0x1fa   :  { %v1010_v8 = vadd.f32 %v10896_v9, %v1009_v7  ;;  %v9309_v10 = vpop.f32.mrb[26].mxu1 }
 0x1fb   :  { %v1021_v11 = vadd.f32 %v9309_v10, %v10896_v9  ;;  %v1012_v12 = vpop.f32.mrb[27].mxu1 }
 0x1fc   :  { %v1013_v36 = vadd.f32 %v10896_v9, %v1012_v12  ;;  %1412 = vrot.lane.b32.xlu0 %v10966_v3, %s10598_s14 }
 0x1fd   :  { %v10978_v13 = vpack.c.bf16 %v1021_v11, %v1018_v6 }
 0x1fe   :  { %v10980_v14 = vpack.c.bf16 %v1013_v36, %v1010_v8 }
 0x200   :  { %1507 = vrot.lane.b32.xlu1 %v10980_v14, %s10598_s14  ;;  %v9312_v15 = vpop.f32.mrb[28].mxu1 }
 0x201   :  { %v1034_v18 = vadd.f32 %v9312_v15, %v10896_v9  ;;  %v1025_v19 = vpop.f32.mrb[29].mxu1 }
 0x202   :  { %v1026_v20 = vadd.f32 %v10896_v9, %v1025_v19  ;;  %v9313_v21 = vpop.f32.mrb[30].mxu1 }
 0x203   :  { %v1037_v22 = vadd.f32 %v9313_v21, %v10896_v9  ;;  %v1028_v23 = vpop.f32.mrb[31].mxu1 }
 0x204   :  { %1509 = vrot.lane.b32.xlu1 %v10978_v13, %s10598_s14  ;;  %v1029_v24 = vadd.f32 %v10896_v9, %v1028_v23 }
 0x205   :  { %v10990_v25 = vpack.c.bf16 %v1037_v22, %v1034_v18 }
 0x206   :  { %v10992_v28 = vpack.c.bf16 %v1029_v24, %v1026_v20 }
 0x208   :  { %v9316_v29 = vpop.f32.mrb[32].mxu1  ;;  %1511 = vrot.lane.b32.xlu1 %v10992_v28, %s10598_s14 }
 0x209   :  { %v1050_v30 = vadd.f32 %v9316_v29, %v10896_v9  ;;  %v1041_v31 = vpop.f32.mrb[33].mxu1 }
 0x20a   :  { %v1042_v32 = vadd.f32 %v10896_v9, %v1041_v31  ;;  %v9317_v33 = vpop.f32.mrb[34].mxu1 }
 0x20b   :  { %v1053_v34 = vadd.f32 %v9317_v33, %v10896_v9  ;;  %v1044_v35 = vpop.f32.mrb[35].mxu1 }
 0x20c   :  { %v1045_v39 = vadd.f32 %v10896_v9, %v1044_v35  ;;  %1513 = vrot.lane.b32.xlu1 %v10990_v25, %s10598_s14 }
 0x20d   :  { %v11002_v40 = vpack.c.bf16 %v1053_v34, %v1050_v30 }
 0x20e   :  { %v11004_v41 = vpack.c.bf16 %v1045_v39, %v1042_v32 }
 0x210   :  { %v9320_v42 = vpop.f32.mrb[36].mxu1  ;;  %1608 = vrot.lane.b32.xlu0 %v11004_v41, %s10598_s14 }
 0x211   :  { %v1066_v43 = vadd.f32 %v9320_v42, %v10896_v9  ;;  %v1057_v44 = vpop.f32.mrb[37].mxu1 }
 0x212   :  { %v1058_v45 = vadd.f32 %v10896_v9, %v1057_v44  ;;  %v9321_v46 = vpop.f32.mrb[38].mxu1 }
 0x213   :  { %v1069_v49 = vadd.f32 %v9321_v46, %v10896_v9  ;;  %v1060_v50 = vpop.f32.mrb[39].mxu1 }
 0x214   :  { %v1061_v51 = vadd.f32 %v10896_v9, %v1060_v50  ;;  %1610 = vrot.lane.b32.xlu0 %v11002_v40, %s10598_s14 }
 0x215   :  { %v11014_v52 = vpack.c.bf16 %v1069_v49, %v1066_v43 }
 0x216   :  { %v11016_v53 = vpack.c.bf16 %v1061_v51, %v1058_v45 }
 0x218   :  { %v9324_v54 = vpop.f32.mrb[40].mxu1  ;;  %1612 = vrot.lane.b32.xlu0 %v11016_v53, %s10598_s14 }
 0x219   :  { %v1082_v55 = vadd.f32 %v9324_v54, %v10896_v9  ;;  %v1073_v56 = vpop.f32.mrb[41].mxu1 }
 0x21a   :  { %v1074_v59 = vadd.f32 %v10896_v9, %v1073_v56  ;;  %v9325_v60 = vpop.f32.mrb[42].mxu1 }
 0x21b   :  { %v1085_v61 = vadd.f32 %v9325_v60, %v10896_v9  ;;  %v1076_v62 = vpop.f32.mrb[43].mxu1 }
 0x21c   :  { %v1077_v63 = vadd.f32 %v10896_v9, %v1076_v62  ;;  %1614 = vrot.lane.b32.xlu0 %v11014_v52, %s10598_s14 }
 0x21d   :  { %v11026_v0 = vpack.c.bf16 %v1085_v61, %v1082_v55 }
 0x21e   :  { %v11028_v1 = vpack.c.bf16 %v1077_v63, %v1074_v59 }
 0x220   :  { %1709 = vrot.lane.b32.xlu1 %v11028_v1, %s10598_s14  ;;  %v9328_v2 = vpop.f32.mrb[44].mxu1 }
 0x221   :  { %v1098_v5 = vadd.f32 %v9328_v2, %v10896_v9  ;;  %v1089_v6 = vpop.f32.mrb[45].mxu1 }
 0x222   :  { %v1090_v7 = vadd.f32 %v10896_v9, %v1089_v6  ;;  %v9329_v8 = vpop.f32.mrb[46].mxu1 }
 0x223   :  { %v1101_v10 = vadd.f32 %v9329_v8, %v10896_v9  ;;  %v1092_v11 = vpop.f32.mrb[47].mxu1 }
 0x224   :  { %v1093_v12 = vadd.f32 %v10896_v9, %v1092_v11  ;;  %1711 = vrot.lane.b32.xlu1 %v11026_v0, %s10598_s14 }
 0x225   :  { %v11038_v36 = vpack.c.bf16 %v1101_v10, %v1098_v5 }
 0x226   :  { %v11040_v15 = vpack.c.bf16 %v1093_v12, %v1090_v7 }
 0x228   :  { %v9332_v18 = vpop.f32.mrb[48].mxu1  ;;  %1713 = vrot.lane.b32.xlu1 %v11040_v15, %s10598_s14 }
 0x229   :  { %v1114_v19 = vadd.f32 %v9332_v18, %v10896_v9  ;;  %v1105_v20 = vpop.f32.mrb[49].mxu1 }
 0x22a   :  { %v1106_v21 = vadd.f32 %v10896_v9, %v1105_v20  ;;  %v9333_v22 = vpop.f32.mrb[50].mxu1 }
 0x22b   :  { %v1117_v23 = vadd.f32 %v9333_v22, %v10896_v9  ;;  %v1108_v24 = vpop.f32.mrb[51].mxu1 }
 0x22c   :  { %v1109_v29 = vadd.f32 %v10896_v9, %v1108_v24  ;;  %1715 = vrot.lane.b32.xlu1 %v11038_v36, %s10598_s14 }
 0x22d   :  { %v11050_v30 = vpack.c.bf16 %v1117_v23, %v1114_v19 }
 0x22e   :  { %v11052_v31 = vpack.c.bf16 %v1109_v29, %v1106_v21 }
 0x230   :  { %v9336_v32 = vpop.f32.mrb[52].mxu1  ;;  %1810 = vrot.lane.b32.xlu0 %v11052_v31, %s10598_s14 }
 0x231   :  { %v1130_v33 = vadd.f32 %v9336_v32, %v10896_v9  ;;  %v1121_v34 = vpop.f32.mrb[53].mxu1 }
 0x232   :  { %v1122_v35 = vadd.f32 %v10896_v9, %v1121_v34  ;;  %v9337_v39 = vpop.f32.mrb[54].mxu1 }
 0x233   :  { %v1133_v42 = vadd.f32 %v9337_v39, %v10896_v9  ;;  %v1124_v43 = vpop.f32.mrb[55].mxu1 }
 0x234   :  { %v1125_v44 = vadd.f32 %v10896_v9, %v1124_v43  ;;  %1812 = vrot.lane.b32.xlu0 %v11050_v30, %s10598_s14 }
 0x235   :  { %v11062_v45 = vpack.c.bf16 %v1133_v42, %v1130_v33 }
 0x236   :  { %v11064_v46 = vpack.c.bf16 %v1125_v44, %v1122_v35 }
 0x237   :  { %14379 = vst [vmem:[#allocation5_spill] sm:$0xff] %v11062_v45 }
 0x238   :  { %v9340_v49 = vpop.f32.mrb[56].mxu1  ;;  %1814 = vrot.lane.b32.xlu0 %v11064_v46, %s10598_s14 }
 0x239   :  { %v1146_v50 = vadd.f32 %v9340_v49, %v10896_v9  ;;  %v1137_v51 = vpop.f32.mrb[57].mxu1 }
 0x23a   :  { %v1138_v54 = vadd.f32 %v10896_v9, %v1137_v51  ;;  %v9341_v55 = vpop.f32.mrb[58].mxu1 }
 0x23b   :  { %v1149_v56 = vadd.f32 %v9341_v55, %v10896_v9  ;;  %v1140_v59 = vpop.f32.mrb[59].mxu1 }
 0x23c   :  { %v1141_v60 = vadd.f32 %v10896_v9, %v1140_v59  ;;  %1816 = vrot.lane.b32.xlu0 %v11062_v45, %s10598_s14 }
 0x23d   :  { %v11074_v61 = vpack.c.bf16 %v1149_v56, %v1146_v50 }
 0x23e   :  { %v11076_v62 = vpack.c.bf16 %v1141_v60, %v1138_v54 }
 0x240   :  { %v9344_v63 = vpop.f32.mrb[60].mxu1  ;;  %1911 = vrot.lane.b32.xlu1 %v11076_v62, %s10598_s14  ;;  %2834 = vrot.lane.b32.xlu0 %v10926_v38, %s10596_s11 }
 0x241   :  { %v1162_v2 = vadd.f32 %v9344_v63, %v10896_v9  ;;  %v1153_v5 = vpop.f32.mrb[61].mxu1  ;;  %v1207_v38 = vpop.permute.xlu1 %1206 }
 0x242   :  { %v1154_v6 = vadd.f32 %v10896_v9, %v1153_v5  ;;  %v9345_v7 = vpop.f32.mrb[62].mxu1  ;;  %v1205_v8 = vpop.permute.xlu0 %1204 }
 0x243   :  { %v1165_v10 = vadd.f32 %v9345_v7, %v10896_v9  ;;  %v1156_v11 = vpop.f32.mrb[63].mxu1  ;;  %10115 = vmatprep.subr.msk.bf16.mxu0 %vm782_vm2, %v1205_v8  ;;  %v1225_v12 = vsel %vm782_vm2, %v1205_v8, 0 }
 0x244   :  { %v1157_v18 = vadd.f32 %v10896_v9, %v1156_v11  ;;  %1913 = vrot.lane.b32.xlu1 %v11074_v61, %s10598_s14  ;;  %2836 = vrot.lane.b32.xlu0 %v10924_v37, %s10596_s11  ;;  %v1228_v9 = vsel %vm782_vm2, %v1207_v38, 0 }
 0x245   :  { %v11092_v19 = vpack.c.bf16 %v1165_v10, %v1162_v2  ;;  %9347 = vmatpush3.bf16.xpose.msra.mxu0 %v1225_v12 }
 0x246   :  { %v11094_v20 = vpack.c.bf16 %v1157_v18, %v1154_v6  ;;  %10116 = vmatprep.subr.msk.bf16.mxu0 %vm782_vm2, %v1207_v38 }
 0x247   :  { %14380 = vst [vmem:[#allocation6_spill] sm:$0xff] %v11092_v19 }
 0x248   :  { %1915 = vrot.lane.b32.xlu1 %v11094_v20, %s10598_s14  ;;  %2840 = vrot.lane.b32.xlu0 %v10940_v47, %s10596_s11 }
 0x24c   :  { %1917 = vrot.lane.b32.xlu1 %v11092_v19, %s10598_s14  ;;  %3014 = vrot.lane.b32.xlu0 %v10978_v13, %s10596_s11 }
 0x24d   :  { %9349 = vmatpush3.bf16.xpose.msra.mxu0 %v1228_v9 }
 0x250   :  { %2745 = vrot.lane.b32.xlu1 %v10904_v17, %s10596_s11  ;;  %3018 = vrot.lane.b32.xlu0 %v10990_v25, %s10596_s11 }
 0x251   :  { %v1308_v23 = vpop.permute.xlu1 %1307 }
 0x252   :  { %v1306_v21 = vpop.permute.xlu0 %1305  ;;  %v1329_v32 = vsel %vm782_vm2, %v1308_v23, 0 }
 0x253   :  { %10119 = vmatprep.subr.msk.bf16.mxu1 %vm782_vm2, %v1306_v21  ;;  %v1326_v22 = vsel %vm782_vm2, %v1306_v21, 0 }
 0x254   :  { %2747 = vrot.lane.b32.xlu1 %v10902_v16, %s10596_s11  ;;  %9363 = vmatpush3.bf16.xpose.msra.mxu1 %v1326_v22 }
 0x255   :  { %10120 = vmatprep.subr.msk.bf16.mxu1 %vm782_vm2, %v1308_v23  ;;  %3192 = vrot.lane.b32.xlu0 %v11026_v0, %s10596_s11 }
 0x256   :  { %v1209_v24 = vpop.permute.xlu0 %1208 }
 0x257   :  { %10117 = vmatprep.subr.msk.bf16.mxu0 %vm782_vm2, %v1209_v24  ;;  %v1231_v17 = vsel %vm782_vm2, %v1209_v24, 0 }
 0x258   :  { %2749 = vrot.lane.b32.xlu1 %v10918_v27, %s10596_s11  ;;  %9351 = vmatpush3.bf16.xpose.msra.mxu0 %v1231_v17 }
 0x259   :  { %3107 = vrot.lane.b32.xlu0 %v11014_v52, %s10596_s11 }
 0x25a   :  { %v1211_v29 = vpop.permute.xlu0 %1210  ;;  %v1310_v33 = vpop.permute.xlu1 %1309 }
 0x25b   :  { %10118 = vmatprep.subr.msk.bf16.mxu0 %vm782_vm2, %v1211_v29  ;;  %v1234_v34 = vsel %vm782_vm2, %v1211_v29, 0  ;;  %v1332_v39 = vsel %vm782_vm2, %v1310_v33, 0 }
 0x25c   :  { %2838 = vrot.lane.b32.xlu1 %v10942_v48, %s10596_s11  ;;  %9365 = vmatpush3.bf16.xpose.msra.mxu1 %v1329_v32 }
 0x25d   :  { %10121 = vmatprep.subr.msk.bf16.mxu1 %vm782_vm2, %v1310_v33  ;;  %3279 = vrot.lane.b32.xlu0 %v11052_v31, %s10596_s11 }
 0x25e   :  { %v1312_v42 = vpop.permute.xlu1 %1311 }
 0x25f   :  { %v1335_v49 = vsel %vm782_vm2, %v1312_v42, 0 }
 0x260   :  { %2751 = vrot.lane.b32.xlu1 %v10916_v26, %s10596_s11  ;;  %9353 = vmatpush3.bf16.xpose.msra.mxu0 %v1234_v34 }
 0x261   :  { %3281 = vrot.lane.b32.xlu0 %v11050_v30, %s10596_s11 }
 0x262   :  { %v1407_v35 = vpop.permute.xlu0 %1406 }
 0x263   :  { %10123 = vmatprep.subr.msk.bf16.mxu0 %vm782_vm2, %v1407_v35  ;;  %v1427_v43 = vsel %vm782_vm2, %v1407_v35, 0 }
 0x264   :  { %2923 = vrot.lane.b32.xlu1 %v10956_v58, %s10596_s11  ;;  %9367 = vmatpush3.bf16.xpose.msra.mxu1 %v1332_v39 }
 0x265   :  { %10122 = vmatprep.subr.msk.bf16.mxu1 %vm782_vm2, %v1312_v42  ;;  %3283 = vrot.lane.b32.xlu0 %v11064_v46, %s10596_s11 }
 0x266   :  { %v1409_v44 = vpop.permute.xlu0 %1408 }
 0x267   :  { %9355 = vmatmul.mubr.msk.bf16.vlgmr.msra.gmra.mrb[64].mxu0 %vm782_vm2, %v10902_v16  ;;  %v1430_v16 = vsel %vm782_vm2, %v1409_v44, 0 }
 0x268   :  { %3012 = vrot.lane.b32.xlu1 %v10980_v14, %s10596_s11  ;;  %9358 = vmatprep.mubr.msk.bf16.mxu0 %vm782_vm2, %v10918_v27 }
 0x269   :  { %9379 = vmatpush3.bf16.xpose.msra.mxu0 %v1427_v43 }
 0x26a   :  { %10124 = vmatprep.subr.msk.bf16.mxu0 %vm782_vm2, %v1409_v44  ;;  %v1411_v27 = vpop.permute.xlu0 %1410 }
 0x26b   :  { %v1433_v51 = vsel %vm782_vm2, %v1411_v27, 0 }
 0x26c   :  { %2925 = vrot.lane.b32.xlu1 %v10954_v57, %s10596_s11  ;;  %9369 = vmatpush3.bf16.xpose.msra.mxu1 %v1335_v49 }
 0x26f   :  { %9359 = vmatmul.mubr.msk.bf16.gmra.mrb[68].mxu0 %vm782_vm2, %v10916_v26 }
 0x270   :  { %2927 = vrot.lane.b32.xlu1 %v10968_v4, %s10596_s11  ;;  %9386 = vmatprep.mubr.msk.bf16.mxu0 %vm782_vm2, %v10956_v58 }
 0x271   :  { %9381 = vmatpush3.bf16.xpose.msra.mxu0 %v1430_v16 }
 0x272   :  { %v1508_v50 = vpop.permute.xlu1 %1507  ;;  %10125 = vmatprep.subr.msk.bf16.mxu0 %vm782_vm2, %v1411_v27 }
 0x273   :  { %9371 = vmatmul.mubr.msk.bf16.vlgmr.msra.gmra.mrb[64].mxu1 %vm782_vm2, %v10924_v37  ;;  %10127 = vmatprep.subr.msk.bf16.mxu1 %vm782_vm2, %v1508_v50  ;;  %v1528_v26 = vsel %vm782_vm2, %v1508_v50, 0  ;;  %v1413_v37 = vpop.permute.xlu0 %1412 }
 0x274   :  { %3016 = vrot.lane.b32.xlu1 %v10992_v28, %s10596_s11  ;;  %9374 = vmatprep.mubr.msk.bf16.mxu1 %vm782_vm2, %v10942_v48  ;;  %v1436_v55 = vsel %vm782_vm2, %v1413_v37, 0 }
 0x275   :  { %9395 = vmatpush3.bf16.xpose.msra.mxu1 %v1528_v26 }
 0x276   :  { %v1510_v58 = vpop.permute.xlu1 %1509 }
 0x277   :  { %10128 = vmatprep.subr.msk.bf16.mxu1 %vm782_vm2, %v1510_v58  ;;  %v1531_v54 = vsel %vm782_vm2, %v1510_v58, 0 }
 0x278   :  { %2929 = vrot.lane.b32.xlu1 %v10966_v3, %s10596_s11 }
 0x279   :  { %9383 = vmatpush3.bf16.xpose.msra.mxu0 %v1433_v51 }
 0x27a   :  { %10126 = vmatprep.subr.msk.bf16.mxu0 %vm782_vm2, %v1413_v37  ;;  %v1512_v48 = vpop.permute.xlu1 %1511 }
 0x27b   :  { %9375 = vmatmul.mubr.msk.bf16.gmra.mrb[68].mxu1 %vm782_vm2, %v10940_v47  ;;  %v1534_v56 = vsel %vm782_vm2, %v1512_v48, 0 }
 0x27c   :  { %3101 = vrot.lane.b32.xlu1 %v11004_v41, %s10596_s11  ;;  %9402 = vmatprep.mubr.msk.bf16.mxu1 %vm782_vm2, %v10980_v14 }
 0x27d   :  { %9397 = vmatpush3.bf16.xpose.msra.mxu1 %v1531_v54 }
 0x27e   :  { %10129 = vmatprep.subr.msk.bf16.mxu1 %vm782_vm2, %v1512_v48  ;;  %v1514_v47 = vpop.permute.xlu1 %1513 }
 0x27f   :  { %v1537_v63 = vsel %vm782_vm2, %v1514_v47, 0 }
 0x280   :  { %3190 = vrot.lane.b32.xlu1 %v11028_v1, %s10596_s11 }
 0x281   :  { %9385 = vmatpush3.bf16.xpose.msra.mxu0 %v1436_v55 }
 0x282   :  { %v1609_v59 = vpop.permute.xlu0 %1608 }
 0x283   :  { %10131 = vmatprep.subr.msk.bf16.mxu0 %vm782_vm2, %v1609_v59  ;;  %v1629_v14 = vsel %vm782_vm2, %v1609_v59, 0 }
 0x284   :  { %3103 = vrot.lane.b32.xlu1 %v11002_v40, %s10596_s11 }
 0x285   :  { %9399 = vmatpush3.bf16.xpose.msra.mxu1 %v1534_v56 }
 0x286   :  { %10130 = vmatprep.subr.msk.bf16.mxu1 %vm782_vm2, %v1514_v47  ;;  %v1611_v60 = vpop.permute.xlu0 %1610 }
 0x288   :  { %9387 = vmatmul.mubr.msk.bf16.vlgmr.msra.gmra.mrb[72].mxu0 %vm782_vm2, %v10954_v57  ;;  %3105 = vrot.lane.b32.xlu1 %v11016_v53, %s10596_s11  ;;  %v1632_v57 = vsel %vm782_vm2, %v1611_v60, 0 }
 0x289   :  { %9390 = vmatprep.mubr.msk.bf16.mxu0 %vm782_vm2, %v10968_v4  ;;  %9411 = vmatpush3.bf16.xpose.msra.mxu0 %v1629_v14 }
 0x28a   :  { %10132 = vmatprep.subr.msk.bf16.mxu0 %vm782_vm2, %v1611_v60  ;;  %v1613_v4 = vpop.permute.xlu0 %1612 }
 0x28c   :  { %3194 = vrot.lane.b32.xlu1 %v11040_v15, %s10596_s11 }
 0x28d   :  { %9401 = vmatpush3.bf16.xpose.msra.mxu1 %v1537_v63 }
 0x28e   :  { %v1615_v6 = vpop.permute.xlu0 %1614 }
 0x290   :  { %9391 = vmatmul.mubr.msk.bf16.gmra.mrb[76].mxu0 %vm782_vm2, %v10966_v3  ;;  %3196 = vrot.lane.b32.xlu1 %v11038_v36, %s10596_s11  ;;  %v1635_v3 = vsel %vm782_vm2, %v1613_v4, 0 }
 0x291   :  { %9413 = vmatpush3.bf16.xpose.msra.mxu0 %v1632_v57  ;;  %9418 = vmatprep.mubr.msk.bf16.mxu0 %vm782_vm2, %v11004_v41 }
 0x292   :  { %v1710_v2 = vpop.permute.xlu1 %1709  ;;  %10133 = vmatprep.subr.msk.bf16.mxu0 %vm782_vm2, %v1613_v4 }
 0x293   :  { %10135 = vmatprep.subr.msk.bf16.mxu1 %vm782_vm2, %v1710_v2  ;;  %v1730_v5 = vsel %vm782_vm2, %v1710_v2, 0 }
 0x294   :  { %9403 = vmatmul.mubr.msk.bf16.vlgmr.msra.gmra.mrb[72].mxu1 %vm782_vm2, %v10978_v13  ;;  %3368 = vrot.lane.b32.xlu1 %v11076_v62, %s10596_s11 }
 0x295   :  { %9406 = vmatprep.mubr.msk.bf16.mxu1 %vm782_vm2, %v10992_v28  ;;  %9427 = vmatpush3.bf16.xpose.msra.mxu1 %v1730_v5  ;;  %v1638_v28 = vsel %vm782_vm2, %v1615_v6, 0 }
 0x296   :  { %v1712_v41 = vpop.permute.xlu1 %1711 }
 0x297   :  { %10136 = vmatprep.subr.msk.bf16.mxu1 %vm782_vm2, %v1712_v41  ;;  %v1733_v7 = vsel %vm782_vm2, %v1712_v41, 0 }
 0x298   :  { %3370 = vrot.lane.b32.xlu1 %v11074_v61, %s10596_s11 }
 0x299   :  { %9415 = vmatpush3.bf16.xpose.msra.mxu0 %v1635_v3 }
 0x29a   :  { %10134 = vmatprep.subr.msk.bf16.mxu0 %vm782_vm2, %v1615_v6  ;;  %v1714_v13 = vpop.permute.xlu1 %1713 }
 0x29b   :  { %v1736_v10 = vsel %vm782_vm2, %v1714_v13, 0 }
 0x29c   :  { %9407 = vmatmul.mubr.msk.bf16.gmra.mrb[76].mxu1 %vm782_vm2, %v10990_v25  ;;  %3372 = vrot.lane.b32.xlu1 %v11094_v20, %s10596_s11 }
 0x29d   :  { %9429 = vmatpush3.bf16.xpose.msra.mxu1 %v1733_v7  ;;  %9434 = vmatprep.mubr.msk.bf16.mxu1 %vm782_vm2, %v11028_v1 }
 0x29e   :  { %10137 = vmatprep.subr.msk.bf16.mxu1 %vm782_vm2, %v1714_v13  ;;  %v1716_v11 = vpop.permute.xlu1 %1715 }
 0x29f   :  { %v1739_v12 = vsel %vm782_vm2, %v1716_v11, 0 }
 0x2a1   :  { %9417 = vmatpush3.bf16.xpose.msra.mxu0 %v1638_v28 }
 0x2a2   :  { %v1811_v8 = vpop.permute.xlu0 %1810 }
 0x2a3   :  { %10139 = vmatprep.subr.msk.bf16.mxu0 %vm782_vm2, %v1811_v8  ;;  %v1831_v25 = vsel %vm782_vm2, %v1811_v8, 0 }
 0x2a5   :  { %9431 = vmatpush3.bf16.xpose.msra.mxu1 %v1736_v10 }
 0x2a6   :  { %10138 = vmatprep.subr.msk.bf16.mxu1 %vm782_vm2, %v1716_v11  ;;  %v1813_v1 = vpop.permute.xlu0 %1812 }
 0x2a7   :  { %v1834_v18 = vsel %vm782_vm2, %v1813_v1, 0 }
 0x2a8   :  { %9419 = vmatmul.mubr.msk.bf16.vlgmr.msra.gmra.mrb[80].mxu0 %vm782_vm2, %v11002_v40 }
 0x2a9   :  { %9422 = vmatprep.mubr.msk.bf16.mxu0 %vm782_vm2, %v11016_v53  ;;  %9443 = vmatpush3.bf16.xpose.msra.mxu0 %v1831_v25 }
 0x2aa   :  { %10140 = vmatprep.subr.msk.bf16.mxu0 %vm782_vm2, %v1813_v1  ;;  %v1815_v38 = vpop.permute.xlu0 %1814 }
 0x2ab   :  { %v1837_v9 = vsel %vm782_vm2, %v1815_v38, 0 }
 0x2ad   :  { %9433 = vmatpush3.bf16.xpose.msra.mxu1 %v1739_v12 }
 0x2b0   :  { %9423 = vmatmul.mubr.msk.bf16.gmra.mrb[84].mxu0 %vm782_vm2, %v11014_v52 }
 0x2b1   :  { %9445 = vmatpush3.bf16.xpose.msra.mxu0 %v1834_v18  ;;  %9450 = vmatprep.mubr.msk.bf16.mxu0 %vm782_vm2, %v11052_v31  ;;  %v1817_v31 = vpop.permute.xlu0 %1816 }
 0x2b2   :  { %v1912_v40 = vpop.permute.xlu1 %1911  ;;  %10141 = vmatprep.subr.msk.bf16.mxu0 %vm782_vm2, %v1815_v38 }
 0x2b3   :  { %10143 = vmatprep.subr.msk.bf16.mxu1 %vm782_vm2, %v1912_v40  ;;  %v1932_v53 = vsel %vm782_vm2, %v1912_v40, 0 }
 0x2b4   :  { %9435 = vmatmul.mubr.msk.bf16.vlgmr.msra.gmra.mrb[80].mxu1 %vm782_vm2, %v11026_v0 }
 0x2b5   :  { %9438 = vmatprep.mubr.msk.bf16.mxu1 %vm782_vm2, %v11040_v15  ;;  %9459 = vmatpush3.bf16.xpose.msra.mxu1 %v1932_v53  ;;  %v1840_v15 = vsel %vm782_vm2, %v1817_v31, 0  ;;  %v2835_v29 = vpop.permute.xlu0 %2834 }
 0x2b6   :  { %v1914_v52 = vpop.permute.xlu1 %1913 }
 0x2b7   :  { %10144 = vmatprep.subr.msk.bf16.mxu1 %vm782_vm2, %v1914_v52  ;;  %v1935_v22 = vsel %vm782_vm2, %v1914_v52, 0 }
 0x2b9   :  { %9447 = vmatpush3.bf16.xpose.msra.mxu0 %v1837_v9 }
 0x2ba   :  { %v1916_v21 = vpop.permute.xlu1 %1915  ;;  %10142 = vmatprep.subr.msk.bf16.mxu0 %vm782_vm2, %v1817_v31 }
 0x2bb   :  { %v1938_v24 = vsel %vm782_vm2, %v1916_v21, 0 }
 0x2bc   :  { %9439 = vmatmul.mubr.msk.bf16.gmra.mrb[84].mxu1 %vm782_vm2, %v11038_v36 }
 0x2bd   :  { %9461 = vmatpush3.bf16.xpose.msra.mxu1 %v1935_v22  ;;  %9466 = vmatprep.mubr.msk.bf16.mxu1 %vm782_vm2, %v11076_v62 }
 0x2be   :  { %v1918_v0 = vpop.permute.xlu1 %1917  ;;  %10145 = vmatprep.subr.msk.bf16.mxu1 %vm782_vm2, %v1916_v21 }
 0x2bf   :  { %v1941_v62 = vsel %vm782_vm2, %v1918_v0, 0 }
 0x2c1   :  { %9449 = vmatpush3.bf16.xpose.msra.mxu0 %v1840_v15 }
 0x2c2   :  { %v2746_v23 = vpop.permute.xlu1 %2745 }
 0x2c3   :  { %9474 = vmatprep.subr.bf16.mxu0 %v2746_v23 }
 0x2c5   :  { %9463 = vmatpush3.bf16.xpose.msra.mxu1 %v1938_v24 }
 0x2c6   :  { %v2748_v17 = vpop.permute.xlu1 %2747  ;;  %10146 = vmatprep.subr.msk.bf16.mxu1 %vm782_vm2, %v1918_v0 }
 0x2c8   :  { %9451 = vmatmul.mubr.msk.bf16.vlgmr.msra.gmra.mrb[88].mxu0 %vm782_vm2, %v11050_v30  ;;  %v2837_v30 = vpop.permute.xlu0 %2836 }
 0x2c9   :  { %9454 = vmatprep.mubr.msk.bf16.mxu0 %vm782_vm2, %v11064_v46  ;;  %9475 = vmatpush3.bf16.msra.mxu0 %v2746_v23 }
 0x2ca   :  { %9476 = vmatprep.subr.bf16.mxu0 %v2748_v17  ;;  %v2750_v36 = vpop.permute.xlu1 %2749 }
 0x2cc   :  { %v2841_v34 = vpop.permute.xlu0 %2840 }
 0x2cd   :  { %9465 = vmatpush3.bf16.xpose.msra.mxu1 %v1941_v62  ;;  %9477 = vmatpush3.bf16.msra.mxu0 %v2748_v17 }
 0x2ce   :  { %9478 = vmatprep.subr.bf16.mxu0 %v2750_v36  ;;  %9490 = vmatprep.subr.bf16.mxu1 %v2835_v29  ;;  %v2839_v32 = vpop.permute.xlu1 %2838 }
 0x2d0   :  { %9455 = vmatmul.mubr.msk.bf16.gmra.mrb[92].mxu0 %vm782_vm2, %v11062_v45 }
 0x2d1   :  { %9479 = vmatpush3.bf16.msra.mxu0 %v2750_v36 }
 0x2d2   :  { %v2752_v33 = vpop.permute.xlu1 %2751 }
 0x2d3   :  { %9480 = vmatprep.subr.bf16.mxu0 %v2752_v33 }
 0x2d4   :  { %9467 = vmatmul.mubr.msk.bf16.vlgmr.msra.gmra.mrb[88].mxu1 %vm782_vm2, %v11074_v61 }
 0x2d5   :  { %9470 = vmatprep.mubr.msk.bf16.mxu1 %vm782_vm2, %v11094_v20  ;;  %9481 = vmatpush3.bf16.msra.mxu0 %v2752_v33 }
 0x2d6   :  { %9491 = vmatpush3.bf16.msra.mxu1 %v2835_v29  ;;  %v11276_v46 = vpop.permute.xlu1 %2923 }
 0x2d7   :  { %14381 = vst [vmem:[#allocation7_spill] sm:$0xff] %v11276_v46  ;;  %9492 = vmatprep.subr.bf16.mxu1 %v2837_v30  ;;  %9506 = vmatprep.subr.bf16.mxu0 %v11276_v46 }
 0x2da   :  { %9493 = vmatpush3.bf16.msra.mxu1 %v2837_v30  ;;  %v11281_v61 = vpop.permute.xlu1 %3012 }
 0x2db   :  { %9494 = vmatprep.subr.bf16.mxu1 %v2839_v32  ;;  %14382 = vst [vmem:[#allocation8_spill] sm:$0xff] %v11281_v61 }
 0x2dc   :  { %9471 = vmatmul.mubr.msk.bf16.gmra.mrb[92].mxu1 %vm782_vm2, %v11092_v19 }
 0x2de   :  { %9495 = vmatpush3.bf16.msra.mxu1 %v2839_v32 }
 0x2df   :  { %9496 = vmatprep.subr.bf16.mxu1 %v2841_v34 }
 0x2e2   :  { %9497 = vmatpush3.bf16.msra.mxu1 %v2841_v34 }
 0x2e3   :  { %9522 = vmatprep.subr.bf16.mxu1 %v11281_v61 }
 0x33a   :  { %v11284_v20 = vpop.f32.mrb[64].mxu0 }
 0x33b   :  { %v11286_v35 = vpop.f32.mrb[65].mxu0  ;;  %v2015_v39 = vsel %vm2008_vm3, %v11284_v20, -inf }
 0x33c   :  { %2016 = vmax.xlane.f32.xlu0 %v2015_v39  ;;  %v11290_v42 = vpop.f32.mrb[66].mxu0  ;;  %v2009_v49 = vsel %vm2008_vm3, %v11286_v35, -inf }
 0x33d   :  { %v11292_v43 = vpop.f32.mrb[67].mxu0  ;;  %v2018_v50 = vsel %vm2008_vm3, %v11290_v42, -inf }
 0x33e   :  { %v2012_v44 = vsel %vm2008_vm3, %v11292_v43, -inf }
 0x33f   :  { %2013 = vmax.xlane.f32.xlu1 %v2012_v44 }
 0x340   :  { %2010 = vmax.xlane.f32.xlu0 %v2009_v49 }
 0x342   :  { %v11298_v16 = vpop.f32.mrb[68].mxu0 }
 0x343   :  { %v11300_v27 = vpop.f32.mrb[69].mxu0  ;;  %v2027_v26 = vsel %vm2008_vm3, %v11298_v16, -inf }
 0x344   :  { %2019 = vmax.xlane.f32.xlu0 %v2018_v50  ;;  %2028 = vmax.xlane.f32.xlu1 %v2027_v26  ;;  %v11306_v58 = vpop.f32.mrb[70].mxu0  ;;  %v2021_v48 = vsel %vm2008_vm3, %v11300_v27, -inf }
 0x345   :  { %v11308_v51 = vpop.f32.mrb[71].mxu0  ;;  %v2030_v55 = vsel %vm2008_vm3, %v11306_v58, -inf }
 0x346   :  { %v11310_v37 = vpop.f32.mrb[64].mxu1  ;;  %v2024_v14 = vsel %vm2008_vm3, %v11308_v51, -inf }
 0x347   :  { %v11312_v54 = vpop.f32.mrb[65].mxu1  ;;  %v2039_v47 = vsel %vm2008_vm3, %v11310_v37, -inf }
 0x348   :  { %v11318_v56 = vpop.f32.mrb[66].mxu1  ;;  %2022 = vmax.xlane.f32.xlu1 %v2021_v48  ;;  %2031 = vmax.xlane.f32.xlu0 %v2030_v55  ;;  %v2033_v57 = vsel %vm2008_vm3, %v11312_v54, -inf }
 0x349   :  { %v11320_v59 = vpop.f32.mrb[67].mxu1  ;;  %v2042_v4 = vsel %vm2008_vm3, %v11318_v56, -inf }
 0x34a   :  { %v2036_v41 = vsel %vm2008_vm3, %v11320_v59, -inf }
 0x34c   :  { %2040 = vmax.xlane.f32.xlu1 %v2039_v47  ;;  %2025 = vmax.xlane.f32.xlu0 %v2024_v14 }
 0x34e   :  { %v11326_v60 = vpop.f32.mrb[68].mxu1 }
 0x34f   :  { %v11328_v63 = vpop.f32.mrb[69].mxu1  ;;  %v2051_v3 = vsel %vm2008_vm3, %v11326_v60, -inf }
 0x350   :  { %v11334_v2 = vpop.f32.mrb[70].mxu1  ;;  %2034 = vmax.xlane.f32.xlu1 %v2033_v57  ;;  %2043 = vmax.xlane.f32.xlu0 %v2042_v4  ;;  %v2045_v6 = vsel %vm2008_vm3, %v11328_v63, -inf  ;;  %v11424_v4 = vpop.permute.xlu1 %2925 }
 0x351   :  { %v11336_v5 = vpop.f32.mrb[71].mxu1  ;;  %v2054_v7 = vsel %vm2008_vm3, %v11334_v2, -inf  ;;  %14383 = vst [vmem:[#allocation9_spill] sm:$0xff] %v11424_v4 }
 0x352   :  { %v2048_v28 = vsel %vm2008_vm3, %v11336_v5, -inf }
 0x354   :  { %2052 = vmax.xlane.f32.xlu1 %v2051_v3  ;;  %2037 = vmax.xlane.f32.xlu0 %v2036_v41 }
 0x358   :  { %2046 = vmax.xlane.f32.xlu1 %v2045_v6  ;;  %2055 = vmax.xlane.f32.xlu0 %v2054_v7 }
 0x35b   :  { %v11346_v13 = vpop.f32.mrb[72].mxu0 }
 0x35c   :  { %v11350_v8 = vpop.f32.mrb[73].mxu0  ;;  %2049 = vmax.xlane.f32.xlu0 %v2048_v28  ;;  %v2063_v10 = vsel %vm2008_vm3, %v11346_v13, -inf }
 0x35d   :  { %2064 = vmax.xlane.f32.xlu1 %v2063_v10  ;;  %v11354_v11 = vpop.f32.mrb[74].mxu0  ;;  %v2057_v12 = vsel %vm2008_vm3, %v11350_v8, -inf }
 0x35e   :  { %v11356_v25 = vpop.f32.mrb[75].mxu0  ;;  %v2066_v1 = vsel %vm2008_vm3, %v11354_v11, -inf }
 0x35f   :  { %v2060_v38 = vsel %vm2008_vm3, %v11356_v25, -inf }
 0x360   :  { %2067 = vmax.xlane.f32.xlu0 %v2066_v1  ;;  %v11438_v1 = vpop.permute.xlu1 %2927 }
 0x361   :  { %2058 = vmax.xlane.f32.xlu1 %v2057_v12  ;;  %14384 = vst [vmem:[#allocation10_spill] sm:$0xff] %v11438_v1 }
 0x363   :  { %v11362_v18 = vpop.f32.mrb[76].mxu0 }
 0x364   :  { %v11366_v40 = vpop.f32.mrb[77].mxu0  ;;  %2061 = vmax.xlane.f32.xlu0 %v2060_v38  ;;  %v2075_v53 = vsel %vm2008_vm3, %v11362_v18, -inf }
 0x365   :  { %2076 = vmax.xlane.f32.xlu1 %v2075_v53  ;;  %v11370_v52 = vpop.f32.mrb[78].mxu0  ;;  %v2069_v0 = vsel %vm2008_vm3, %v11366_v40, -inf }
 0x366   :  { %v11372_v9 = vpop.f32.mrb[79].mxu0  ;;  %v2078_v21 = vsel %vm2008_vm3, %v11370_v52, -inf }
 0x367   :  { %v11374_v31 = vpop.f32.mrb[72].mxu1  ;;  %v2072_v24 = vsel %vm2008_vm3, %v11372_v9, -inf }
 0x368   :  { %v11378_v22 = vpop.f32.mrb[73].mxu1  ;;  %2079 = vmax.xlane.f32.xlu0 %v2078_v21  ;;  %v2087_v17 = vsel %vm2008_vm3, %v11374_v31, -inf }
 0x369   :  { %v11382_v15 = vpop.f32.mrb[74].mxu1  ;;  %2070 = vmax.xlane.f32.xlu1 %v2069_v0  ;;  %v2081_v32 = vsel %vm2008_vm3, %v11378_v22, -inf }
 0x36a   :  { %v11384_v23 = vpop.f32.mrb[75].mxu1  ;;  %v2090_v62 = vsel %vm2008_vm3, %v11382_v15, -inf }
 0x36b   :  { %v2084_v34 = vsel %vm2008_vm3, %v11384_v23, -inf }
 0x36c   :  { %2073 = vmax.xlane.f32.xlu0 %v2072_v24 }
 0x36d   :  { %2088 = vmax.xlane.f32.xlu1 %v2087_v17 }
 0x36f   :  { %v11390_v36 = vpop.f32.mrb[76].mxu1 }
 0x370   :  { %v11394_v29 = vpop.f32.mrb[77].mxu1  ;;  %2091 = vmax.xlane.f32.xlu0 %v2090_v62  ;;  %v2099_v39 = vsel %vm2008_vm3, %v11390_v36, -inf }
 0x371   :  { %v11398_v33 = vpop.f32.mrb[78].mxu1  ;;  %2082 = vmax.xlane.f32.xlu1 %v2081_v32  ;;  %v2093_v49 = vsel %vm2008_vm3, %v11394_v29, -inf  ;;  %v11456_v32 = vpop.permute.xlu1 %3016 }
 0x372   :  { %v11400_v30 = vpop.f32.mrb[79].mxu1  ;;  %v2102_v44 = vsel %vm2008_vm3, %v11398_v33, -inf  ;;  %14385 = vst [vmem:[#allocation11_spill] sm:$0xff] %v11456_v32 }
 0x373   :  { %v2096_v26 = vsel %vm2008_vm3, %v11400_v30, -inf }
 0x374   :  { %2085 = vmax.xlane.f32.xlu0 %v2084_v34 }
 0x375   :  { %2100 = vmax.xlane.f32.xlu1 %v2099_v39 }
 0x378   :  { %2103 = vmax.xlane.f32.xlu0 %v2102_v44 }
 0x379   :  { %2094 = vmax.xlane.f32.xlu1 %v2093_v49 }
 0x37b   :  { %v11410_v50 = vpop.f32.mrb[80].mxu0 }
 0x37c   :  { %v11414_v48 = vpop.f32.mrb[81].mxu0  ;;  %2097 = vmax.xlane.f32.xlu0 %v2096_v26  ;;  %v2111_v55 = vsel %vm2008_vm3, %v11410_v50, -inf }
 0x37d   :  { %2112 = vmax.xlane.f32.xlu1 %v2111_v55  ;;  %v11418_v47 = vpop.f32.mrb[82].mxu0  ;;  %v2105_v3 = vsel %vm2008_vm3, %v11414_v48, -inf }
 0x37e   :  { %v11420_v14 = vpop.f32.mrb[83].mxu0  ;;  %v2114_v57 = vsel %vm2008_vm3, %v11418_v47, -inf }
 0x37f   :  { %v2108_v6 = vsel %vm2008_vm3, %v11420_v14, -inf }
 0x380   :  { %2115 = vmax.xlane.f32.xlu0 %v2114_v57  ;;  %v11470_v57 = vpop.permute.xlu1 %2929 }
 0x381   :  { %2106 = vmax.xlane.f32.xlu1 %v2105_v3  ;;  %14386 = vst [vmem:[#allocation12_spill] sm:$0xff] %v11470_v57 }
 0x383   :  { %v11428_v41 = vpop.f32.mrb[84].mxu0 }
 0x384   :  { %v11432_v7 = vpop.f32.mrb[85].mxu0  ;;  %2109 = vmax.xlane.f32.xlu0 %v2108_v6  ;;  %v2123_v28 = vsel %vm2008_vm3, %v11428_v41, -inf }
 0x385   :  { %2124 = vmax.xlane.f32.xlu1 %v2123_v28  ;;  %v11436_v10 = vpop.f32.mrb[86].mxu0  ;;  %v2117_v0 = vsel %vm2008_vm3, %v11432_v7, -inf }
 0x386   :  { %v11440_v12 = vpop.f32.mrb[87].mxu0  ;;  %v2126_v53 = vsel %vm2008_vm3, %v11436_v10, -inf }
 0x387   :  { %v11442_v38 = vpop.f32.mrb[80].mxu1  ;;  %v2120_v62 = vsel %vm2008_vm3, %v11440_v12, -inf }
 0x388   :  { %v11446_v21 = vpop.f32.mrb[81].mxu1  ;;  %2127 = vmax.xlane.f32.xlu0 %v2126_v53  ;;  %v2135_v34 = vsel %vm2008_vm3, %v11442_v38, -inf }
 0x389   :  { %v11450_v24 = vpop.f32.mrb[82].mxu1  ;;  %2118 = vmax.xlane.f32.xlu1 %v2117_v0  ;;  %v2129_v26 = vsel %vm2008_vm3, %v11446_v21, -inf  ;;  %v11480_v0 = vpop.permute.xlu1 %3101 }
 0x38a   :  { %v11452_v17 = vpop.f32.mrb[83].mxu1  ;;  %v2138_v44 = vsel %vm2008_vm3, %v11450_v24, -inf  ;;  %14387 = vst [vmem:[#allocation13_spill] sm:$0xff] %v11480_v0  ;;  %v11502_v0 = vpop.permute.xlu0 %3014 }
 0x38b   :  { %v2132_v6 = vsel %vm2008_vm3, %v11452_v17, -inf  ;;  %14392 = vst [vmem:[#allocation18_spill] sm:$0xff] %v11502_v0 }
 0x38c   :  { %2121 = vmax.xlane.f32.xlu0 %v2120_v62 }
 0x38d   :  { %2136 = vmax.xlane.f32.xlu1 %v2135_v34  ;;  %v11494_v32 = vpop.permute.xlu1 %3190 }
 0x38e   :  { %14391 = vst [vmem:[#allocation17_spill] sm:$0xff] %v11494_v32  ;;  %v11516_v46 = vpop.permute.xlu0 %3018 }
 0x38f   :  { %v11460_v39 = vpop.f32.mrb[84].mxu1  ;;  %14398 = vst [vmem:[#allocation24_spill] sm:$0xff] %v11516_v46 }
 0x390   :  { %v11464_v49 = vpop.f32.mrb[85].mxu1  ;;  %2139 = vmax.xlane.f32.xlu0 %v2138_v44  ;;  %v2147_v28 = vsel %vm2008_vm3, %v11460_v39, -inf }
 0x391   :  { %v11468_v55 = vpop.f32.mrb[86].mxu1  ;;  %2130 = vmax.xlane.f32.xlu1 %v2129_v26  ;;  %v2141_v62 = vsel %vm2008_vm3, %v11464_v49, -inf  ;;  %v11508_v57 = vpop.permute.xlu1 %3103 }
 0x392   :  { %v11472_v3 = vpop.f32.mrb[87].mxu1  ;;  %v2150_v53 = vsel %vm2008_vm3, %v11468_v55, -inf  ;;  %14394 = vst [vmem:[#allocation20_spill] sm:$0xff] %v11508_v57 }
 0x393   :  { %v2144_v44 = vsel %vm2008_vm3, %v11472_v3, -inf }
 0x394   :  { %2133 = vmax.xlane.f32.xlu0 %v2132_v6 }
 0x395   :  { %2148 = vmax.xlane.f32.xlu1 %v2147_v28  ;;  %v11526_v57 = vpop.permute.xlu1 %3105 }
 0x396   :  { %14402 = vst [vmem:[#allocation28_spill] sm:$0xff] %v11526_v57 }
 0x398   :  { %2151 = vmax.xlane.f32.xlu0 %v2150_v53 }
 0x399   :  { %2142 = vmax.xlane.f32.xlu1 %v2141_v62 }
 0x39b   :  { %v11484_v34 = vpop.f32.mrb[88].mxu0 }
 0x39c   :  { %14388 = vst [vmem:[#allocation14_spill] sm:$0xff] %v11484_v34  ;;  %v11488_v26 = vpop.f32.mrb[89].mxu0  ;;  %2145 = vmax.xlane.f32.xlu0 %v2144_v44  ;;  %v2159_v6 = vsel %vm2008_vm3, %v11484_v34, -inf }
 0x39d   :  { %14389 = vst [vmem:[#allocation15_spill] sm:$0xff] %v11488_v26  ;;  %2160 = vmax.xlane.f32.xlu1 %v2159_v6  ;;  %v11492_v28 = vpop.f32.mrb[90].mxu0  ;;  %v2153_v62 = vsel %vm2008_vm3, %v11488_v26, -inf }
 0x39e   :  { %14390 = vst [vmem:[#allocation16_spill] sm:$0xff] %v11492_v28  ;;  %v11496_v61 = vpop.f32.mrb[91].mxu0  ;;  %v2162_v53 = vsel %vm2008_vm3, %v11492_v28, -inf }
 0x39f   :  { %v2156_v6 = vsel %vm2008_vm3, %v11496_v61, -inf }
 0x3a0   :  { %2163 = vmax.xlane.f32.xlu0 %v2162_v53 }
 0x3a1   :  { %2154 = vmax.xlane.f32.xlu1 %v2153_v62 }
 0x3a3   :  { %v11504_v44 = vpop.f32.mrb[92].mxu0 }
 0x3a4   :  { %14393 = vst [vmem:[#allocation19_spill] sm:$0xff] %v11504_v44  ;;  %v11510_v32 = vpop.f32.mrb[93].mxu0  ;;  %2157 = vmax.xlane.f32.xlu0 %v2156_v6 }
 0x3a5   :  { %14395 = vst [vmem:[#allocation21_spill] sm:$0xff] %v11510_v32  ;;  %v11512_v1 = vpop.f32.mrb[94].mxu0 }
 0x3a6   :  { %14396 = vst [vmem:[#allocation22_spill] sm:$0xff] %v11512_v1  ;;  %v11514_v4 = vpop.f32.mrb[95].mxu0  ;;  %v11534_v1 = vpop.permute.xlu0 %3192 }
 0x3a7   :  { %14397 = vst [vmem:[#allocation23_spill] sm:$0xff] %v11514_v4  ;;  %v11518_v53 = vpop.f32.mrb[88].mxu1  ;;  %14404 = vst [vmem:[#allocation30_spill] sm:$0xff] %v11534_v1 }
 0x3a8   :  { %14399 = vst [vmem:[#allocation25_spill] sm:$0xff] %v11518_v53  ;;  %v11520_v0 = vpop.f32.mrb[89].mxu1  ;;  %v2183_v62 = vsel %vm2008_vm3, %v11518_v53, -inf }
 0x3a9   :  { %14400 = vst [vmem:[#allocation26_spill] sm:$0xff] %v11520_v0  ;;  %v11524_v44 = vpop.f32.mrb[90].mxu1  ;;  %2184 = vmax.xlane.f32.xlu1 %v2183_v62  ;;  %v2177_v46 = vsel %vm2008_vm3, %v11520_v0, -inf  ;;  %v11540_v62 = vpop.permute.xlu1 %3194 }
 0x3aa   :  { %14401 = vst [vmem:[#allocation27_spill] sm:$0xff] %v11524_v44  ;;  %v11528_v32 = vpop.f32.mrb[91].mxu1  ;;  %v2186_v6 = vsel %vm2008_vm3, %v11524_v44, -inf  ;;  %14406 = vst [vmem:[#allocation32_spill] sm:$0xff] %v11540_v62 }
 0x3ab   :  { %14403 = vst [vmem:[#allocation29_spill] sm:$0xff] %v11528_v32  ;;  %2187 = vmax.xlane.f32.xlu0 %v2186_v6  ;;  %v2180_v4 = vsel %vm2008_vm3, %v11528_v32, -inf  ;;  %v11548_v6 = vpop.permute.xlu0 %3107 }
 0x3ac   :  { %14410 = vst [vmem:[#allocation36_spill] sm:$0xff] %v11548_v6 }
 0x3ad   :  { %2178 = vmax.xlane.f32.xlu1 %v2177_v46  ;;  %v11550_v28 = vpop.permute.xlu1 %3196 }
 0x3ae   :  { %14411 = vst [vmem:[#allocation37_spill] sm:$0xff] %v11550_v28 }
 0x3af   :  { %v11538_v45 = vpop.f32.mrb[92].mxu1  ;;  %2181 = vmax.xlane.f32.xlu0 %v2180_v4  ;;  %v11552_v1 = vpop.permute.xlu0 %3279 }
 0x3b0   :  { %14405 = vst [vmem:[#allocation31_spill] sm:$0xff] %v11538_v45  ;;  %v11542_v57 = vpop.f32.mrb[93].mxu1  ;;  %14412 = vst [vmem:[#allocation38_spill] sm:$0xff] %v11552_v1 }
 0x3b1   :  { %14407 = vst [vmem:[#allocation33_spill] sm:$0xff] %v11542_v57  ;;  %v11544_v19 = vpop.f32.mrb[94].mxu1  ;;  %v11554_v46 = vpop.permute.xlu1 %3368 }
 0x3b2   :  { %14408 = vst [vmem:[#allocation34_spill] sm:$0xff] %v11544_v19  ;;  %v11546_v44 = vpop.f32.mrb[95].mxu1  ;;  %14413 = vst [vmem:[#allocation39_spill] sm:$0xff] %v11554_v46 }
 0x3b3   :  { %14409 = vst [vmem:[#allocation35_spill] sm:$0xff] %v11546_v44  ;;  %v11556_v32 = vpop.permute.xlu0 %3281 }
 0x3b4   :  { %14414 = vst [vmem:[#allocation40_spill] sm:$0xff] %v11556_v32 }
 0x3b5   :  { %v11558_v45 = vpop.permute.xlu1 %3370 }
 0x3b6   :  { %14415 = vst [vmem:[#allocation41_spill] sm:$0xff] %v11558_v45 }
 0x3b7   :  { %v11560_v4 = vpop.permute.xlu0 %3283 }
 0x3b8   :  { %14416 = vst [vmem:[#allocation42_spill] sm:$0xff] %v11560_v4 }
 0x3b9   :  { %v11562_v62 = vpop.permute.xlu1 %3372 }
 0x3ba   :  { %14417 = vst [vmem:[#allocation43_spill] sm:$0xff] %v11562_v62 }
 0x3c9   :  { %v2017_v57 = vpop.xlane.xlu0 %2016 }
 0x3ca   :  { %v2203_v19 = vsub.f32 %v11284_v20, %v2017_v57 }
 0x3cc   :  { %v2269_v44 = vmul.f32 1.442695, %v2203_v19  ;;  %v2014_v26 = vpop.xlane.xlu1 %2013 }
 0x3cd   :  { %v2011_v6 = vpop.xlane.xlu0 %2010  ;;  %v2202_v1 = vsub.f32 %v11292_v43, %v2014_v26 }
 0x3ce   :  { %10315 = vpow2.f32 %v2269_v44  ;;  %v2201_v28 = vsub.f32 %v11286_v35, %v2011_v6 }
 0x3cf   :  { %v2267_v62 = vmul.f32 1.442695, %v2202_v1 }
 0x3d0   :  { %v2265_v46 = vmul.f32 1.442695, %v2201_v28 }
 0x3d1   :  { %v2020_v0 = vpop.xlane.xlu0 %2019  ;;  %v2029_v32 = vpop.xlane.xlu1 %2028 }
 0x3d2   :  { %10317 = vpow2.f32 %v2265_v46  ;;  %v2204_v45 = vsub.f32 %v11290_v42, %v2020_v0  ;;  %v2207_v4 = vsub.f32 %v11298_v16, %v2029_v32 }
 0x3d4   :  { %v2271_v34 = vmul.f32 1.442695, %v2204_v45  ;;  %v2277_v53 = vmul.f32 1.442695, %v2207_v4 }
 0x3d5   :  { %v2023_v20 = vpop.xlane.xlu1 %2022  ;;  %v2032_v19 = vpop.xlane.xlu0 %2031 }
 0x3d6   :  { %10319 = vpow2.f32 %v2271_v34  ;;  %v2205_v57 = vsub.f32 %v11300_v27, %v2023_v20  ;;  %v2208_v35 = vsub.f32 %v11306_v58, %v2032_v19 }
 0x3d7   :  { %10321 = vpow2.f32 %v2277_v53 }
 0x3d8   :  { %v11571_v43 = vpop.eup %10315  ;;  %10323 = vpow2.f32 %v2267_v62  ;;  %v2273_v26 = vmul.f32 1.442695, %v2205_v57  ;;  %v2279_v28 = vmul.f32 1.442695, %v2208_v35 }
 0x3d9   :  { %v2041_v44 = vpop.xlane.xlu1 %2040  ;;  %v2026_v42 = vpop.xlane.xlu0 %2025  ;;  %v2399_v16 = vsel %vm2008_vm3, %v11571_v43, 0.0 }
 0x3da   :  { %10325 = vpow2.f32 %v2273_v26  ;;  %v2211_v45 = vsub.f32 %v11310_v37, %v2041_v44  ;;  %v2206_v1 = vsub.f32 %v11308_v51, %v2026_v42  ;;  %2400 = vadd.xlane.f32.xlu1 %v2399_v16 }
 0x3db   :  { %10327 = vpow2.f32 %v2279_v28 }
 0x3dc   :  { %v11577_v27 = vpop.eup %10317  ;;  %v2285_v58 = vmul.f32 1.442695, %v2211_v45  ;;  %v2275_v32 = vmul.f32 1.442695, %v2206_v1 }
 0x3dd   :  { %v2035_v0 = vpop.xlane.xlu1 %2034  ;;  %v2044_v34 = vpop.xlane.xlu0 %2043  ;;  %v2393_v53 = vsel %vm2008_vm3, %v11577_v27, 0.0 }
 0x3de   :  { %10329 = vpow2.f32 %v2285_v58  ;;  %v2209_v62 = vsub.f32 %v11312_v54, %v2035_v0  ;;  %v2212_v6 = vsub.f32 %v11318_v56, %v2044_v34  ;;  %2394 = vadd.xlane.f32.xlu1 %v2393_v53 }
 0x3df   :  { %10331 = vpow2.f32 %v2275_v32 }
 0x3e0   :  { %v11583_v37 = vpop.eup %10319  ;;  %v2281_v51 = vmul.f32 1.442695, %v2209_v62  ;;  %v2287_v46 = vmul.f32 1.442695, %v2212_v6 }
 0x3e1   :  { %v11585_v4 = vpop.eup %10321  ;;  %v2053_v20 = vpop.xlane.xlu1 %2052  ;;  %v2402_v57 = vsel %vm2008_vm3, %v11583_v37, 0.0 }
 0x3e2   :  { %v2038_v19 = vpop.xlane.xlu0 %2037  ;;  %v11589_v35 = vpop.eup %10323  ;;  %10333 = vpow2.f32 %v2281_v51  ;;  %v2215_v54 = vsub.f32 %v11326_v60, %v2053_v20  ;;  %v2411_v26 = vsel %vm2008_vm3, %v11585_v4, 0.0  ;;  %2403 = vadd.xlane.f32.xlu0 %v2402_v57 }
 0x3e3   :  { %v2210_v56 = vsub.f32 %v11320_v59, %v2038_v19  ;;  %2412 = vadd.xlane.f32.xlu1 %v2411_v26  ;;  %10335 = vpow2.f32 %v2287_v46  ;;  %v2396_v60 = vsel %vm2008_vm3, %v11589_v35, 0.0 }
 0x3e4   :  { %v11595_v28 = vpop.eup %10325  ;;  %v2293_v44 = vmul.f32 1.442695, %v2215_v54 }
 0x3e5   :  { %v2283_v42 = vmul.f32 1.442695, %v2210_v56  ;;  %v2047_v16 = vpop.xlane.xlu1 %2046  ;;  %v2405_v1 = vsel %vm2008_vm3, %v11595_v28, 0.0  ;;  %v11601_v58 = vpop.eup %10327 }
 0x3e6   :  { %v2056_v45 = vpop.xlane.xlu0 %2055  ;;  %10337 = vpow2.f32 %v2293_v44  ;;  %v2213_v59 = vsub.f32 %v11328_v63, %v2047_v16  ;;  %2397 = vadd.xlane.f32.xlu0 %v2396_v60  ;;  %v2414_v51 = vsel %vm2008_vm3, %v11601_v58, 0.0 }
 0x3e7   :  { %v2216_v32 = vsub.f32 %v11334_v2, %v2056_v45  ;;  %2406 = vadd.xlane.f32.xlu1 %v2405_v1  ;;  %10339 = vpow2.f32 %v2283_v42 }
 0x3e8   :  { %v11605_v0 = vpop.eup %10329  ;;  %v2289_v34 = vmul.f32 1.442695, %v2213_v59 }
 0x3e9   :  { %v2295_v53 = vmul.f32 1.442695, %v2216_v32  ;;  %v2423_v6 = vsel %vm2008_vm3, %v11605_v0, 0.0  ;;  %v11611_v46 = vpop.eup %10331 }
 0x3ea   :  { %v2050_v62 = vpop.xlane.xlu0 %2049  ;;  %10341 = vpow2.f32 %v2289_v34  ;;  %v2065_v2 = vpop.xlane.xlu1 %2064  ;;  %2415 = vadd.xlane.f32.xlu0 %v2414_v51  ;;  %v2408_v44 = vsel %vm2008_vm3, %v11611_v46, 0.0 }
 0x3eb   :  { %v2214_v63 = vsub.f32 %v11336_v5, %v2050_v62  ;;  %v2219_v20 = vsub.f32 %v11346_v13, %v2065_v2  ;;  %2424 = vadd.xlane.f32.xlu1 %v2423_v6  ;;  %10343 = vpow2.f32 %v2295_v53 }
 0x3ec   :  { %v11615_v19 = vpop.eup %10333 }
 0x3ed   :  { %v2291_v57 = vmul.f32 1.442695, %v2214_v63  ;;  %v2301_v54 = vmul.f32 1.442695, %v2219_v20  ;;  %v2417_v26 = vsel %vm2008_vm3, %v11615_v19, 0.0  ;;  %v11621_v42 = vpop.eup %10335 }
 0x3ee   :  { %v2068_v56 = vpop.xlane.xlu0 %2067  ;;  %v2059_v5 = vpop.xlane.xlu1 %2058  ;;  %2409 = vadd.xlane.f32.xlu0 %v2408_v44  ;;  %v2426_v34 = vsel %vm2008_vm3, %v11621_v42, 0.0 }
 0x3ef   :  { %v2220_v16 = vsub.f32 %v11354_v11, %v2068_v56  ;;  %10345 = vpow2.f32 %v2301_v54  ;;  %v2217_v13 = vsub.f32 %v11350_v8, %v2059_v5  ;;  %2418 = vadd.xlane.f32.xlu1 %v2417_v26 }
 0x3f0   :  { %v11625_v45 = vpop.eup %10337  ;;  %10347 = vpow2.f32 %v2291_v57 }
 0x3f1   :  { %v2303_v1 = vmul.f32 1.442695, %v2220_v16  ;;  %v2297_v60 = vmul.f32 1.442695, %v2217_v13  ;;  %v2435_v32 = vsel %vm2008_vm3, %v11625_v45, 0.0  ;;  %v11631_v53 = vpop.eup %10339 }
 0x3f2   :  { %v2062_v59 = vpop.xlane.xlu0 %2061  ;;  %v2077_v62 = vpop.xlane.xlu1 %2076  ;;  %2427 = vadd.xlane.f32.xlu0 %v2426_v34  ;;  %v2420_v20 = vsel %vm2008_vm3, %v11631_v53, 0.0 }
 0x3f3   :  { %v2218_v11 = vsub.f32 %v11356_v25, %v2062_v59  ;;  %10349 = vpow2.f32 %v2297_v60  ;;  %2436 = vadd.xlane.f32.xlu1 %v2435_v32  ;;  %v2223_v51 = vsub.f32 %v11362_v18, %v2077_v62 }
 0x3f4   :  { %v11634_v8 = vpop.eup %10341  ;;  %10351 = vpow2.f32 %v2303_v1 }
 0x3f5   :  { %v2299_v6 = vmul.f32 1.442695, %v2218_v11  ;;  %v2429_v2 = vsel %vm2008_vm3, %v11634_v8, 0.0  ;;  %v11641_v57 = vpop.eup %10343  ;;  %v2309_v56 = vmul.f32 1.442695, %v2223_v51 }
 0x3f6   :  { %v2080_v63 = vpop.xlane.xlu0 %2079  ;;  %v2071_v25 = vpop.xlane.xlu1 %2070  ;;  %2421 = vadd.xlane.f32.xlu0 %v2420_v20  ;;  %v2438_v18 = vsel %vm2008_vm3, %v11641_v57, 0.0 }
 0x3f7   :  { %v2221_v54 = vsub.f32 %v11366_v40, %v2071_v25  ;;  %2430 = vadd.xlane.f32.xlu1 %v2429_v2  ;;  %10353 = vpow2.f32 %v2299_v6  ;;  %v2224_v40 = vsub.f32 %v11370_v52, %v2080_v63 }
 0x3f8   :  { %10355 = vpow2.f32 %v2309_v56 }
 0x3f9   :  { %v11644_v26 = vpop.eup %10345  ;;  %v2305_v60 = vmul.f32 1.442695, %v2221_v54  ;;  %v2311_v52 = vmul.f32 1.442695, %v2224_v40 }
 0x3fa   :  { %v2074_v44 = vpop.xlane.xlu0 %2073  ;;  %v11648_v5 = vpop.eup %10347  ;;  %v2447_v1 = vsel %vm2008_vm3, %v11644_v26, 0.0  ;;  %2439 = vadd.xlane.f32.xlu0 %v2438_v18 }
 0x3fb   :  { %v2089_v16 = vpop.xlane.xlu1 %2088  ;;  %v2222_v13 = vsub.f32 %v11372_v9, %v2074_v44  ;;  %2448 = vadd.xlane.f32.xlu1 %v2447_v1  ;;  %v2432_v6 = vsel %vm2008_vm3, %v11648_v5, 0.0 }
 0x3fc   :  { %v2227_v59 = vsub.f32 %v11374_v31, %v2089_v16 }
 0x3fd   :  { %v2307_v32 = vmul.f32 1.442695, %v2222_v13  ;;  %v11655_v34 = vpop.eup %10349 }
 0x3fe   :  { %v2317_v11 = vmul.f32 1.442695, %v2227_v59  ;;  %v2092_v62 = vpop.xlane.xlu0 %2091  ;;  %v11659_v9 = vpop.eup %10351  ;;  %v2441_v2 = vsel %vm2008_vm3, %v11655_v34, 0.0  ;;  %2433 = vadd.xlane.f32.xlu0 %v2432_v6 }
 0x3ff   :  { %10357 = vpow2.f32 %v2307_v32  ;;  %v2083_v51 = vpop.xlane.xlu1 %2082  ;;  %v2228_v63 = vsub.f32 %v11382_v15, %v2092_v62  ;;  %2442 = vadd.xlane.f32.xlu1 %v2441_v2  ;;  %v2450_v54 = vsel %vm2008_vm3, %v11659_v9, 0.0 }
 0x400   :  { %10359 = vpow2.f32 %v2305_v60  ;;  %v2225_v31 = vsub.f32 %v11378_v22, %v2083_v51 }
 0x401   :  { %10361 = vpow2.f32 %v2317_v11  ;;  %v11667_v56 = vpop.eup %10353  ;;  %v2319_v18 = vmul.f32 1.442695, %v2228_v63 }
 0x402   :  { %v2313_v20 = vmul.f32 1.442695, %v2225_v31  ;;  %v2086_v25 = vpop.xlane.xlu0 %2085  ;;  %2451 = vadd.xlane.f32.xlu0 %v2450_v54  ;;  %10363 = vpow2.f32 %v2311_v52  ;;  %v2444_v1 = vsel %vm2008_vm3, %v11667_v56, 0.0  ;;  %v11673_v60 = vpop.eup %10355 }
 0x403   :  { %v2101_v44 = vpop.xlane.xlu1 %2100  ;;  %v2226_v13 = vsub.f32 %v11384_v23, %v2086_v25  ;;  %v2459_v2 = vsel %vm2008_vm3, %v11673_v60, 0.0 }
 0x404   :  { %v2231_v16 = vsub.f32 %v11390_v36, %v2101_v44  ;;  %10365 = vpow2.f32 %v2313_v20 }
 0x405   :  { %10367 = vpow2.f32 %v2319_v18  ;;  %v2315_v59 = vmul.f32 1.442695, %v2226_v13 }
 0x406   :  { %v2325_v22 = vmul.f32 1.442695, %v2231_v16  ;;  %v2104_v15 = vpop.xlane.xlu0 %2103  ;;  %2445 = vadd.xlane.f32.xlu0 %v2444_v1 }
 0x407   :  { %v2095_v40 = vpop.xlane.xlu1 %2094  ;;  %v2232_v36 = vsub.f32 %v11398_v33, %v2104_v15 }
 0x408   :  { %v2229_v32 = vsub.f32 %v11394_v29, %v2095_v40  ;;  %10369 = vpow2.f32 %v2325_v22 }
 0x409   :  { %v11676_v11 = vpop.eup %10357  ;;  %10371 = vpow2.f32 %v2315_v59  ;;  %v2327_v29 = vmul.f32 1.442695, %v2232_v36 }
 0x40a   :  { %v11679_v23 = vpop.eup %10359  ;;  %v2321_v62 = vmul.f32 1.442695, %v2229_v32  ;;  %v2098_v6 = vpop.xlane.xlu0 %2097  ;;  %v2456_v51 = vsel %vm2008_vm3, %v11676_v11, 0.0  ;;  %2460 = vadd.xlane.f32.xlu0 %v2459_v2 }
 0x40b   :  { %v11685_v52 = vpop.eup %10361  ;;  %v2113_v31 = vpop.xlane.xlu1 %2112  ;;  %2457 = vadd.xlane.f32.xlu1 %v2456_v51  ;;  %v2230_v33 = vsub.f32 %v11400_v30, %v2098_v6  ;;  %v2453_v54 = vsel %vm2008_vm3, %v11679_v23, 0.0 }
 0x40c   :  { %10373 = vpow2.f32 %v2321_v62  ;;  %v11688_v63 = vpop.eup %10363  ;;  %v2471_v25 = vsel %vm2008_vm3, %v11685_v52, 0.0  ;;  %v2235_v13 = vsub.f32 %v11410_v50, %v2113_v31 }
 0x40d   :  { %10375 = vpow2.f32 %v2327_v29  ;;  %v2323_v16 = vmul.f32 1.442695, %v2230_v33  ;;  %v2462_v1 = vsel %vm2008_vm3, %v11688_v63, 0.0 }
 0x40e   :  { %v2116_v20 = vpop.xlane.xlu0 %2115  ;;  %v11694_v44 = vpop.eup %10365  ;;  %2454 = vadd.xlane.f32.xlu0 %v2453_v54  ;;  %v2333_v36 = vmul.f32 1.442695, %v2235_v13 }
 0x40f   :  { %v2107_v18 = vpop.xlane.xlu1 %2106  ;;  %2472 = vadd.xlane.f32.xlu1 %v2471_v25  ;;  %v11697_v22 = vpop.eup %10367  ;;  %v2465_v15 = vsel %vm2008_vm3, %v11694_v44, 0.0  ;;  %10377 = vpow2.f32 %v2323_v16  ;;  %v2236_v33 = vsub.f32 %v11418_v47, %v2116_v20 }
 0x410   :  { %v2233_v50 = vsub.f32 %v11414_v48, %v2107_v18  ;;  %v2474_v31 = vsel %vm2008_vm3, %v11697_v22, 0.0 }
 0x412   :  { %v2110_v30 = vpop.xlane.xlu0 %2109  ;;  %v11703_v40 = vpop.eup %10369  ;;  %2463 = vadd.xlane.f32.xlu0 %v2462_v1  ;;  %v2329_v48 = vmul.f32 1.442695, %v2233_v50 }
 0x413   :  { %v2234_v59 = vsub.f32 %v11420_v14, %v2110_v30  ;;  %v2125_v32 = vpop.xlane.xlu1 %2124  ;;  %2466 = vadd.xlane.f32.xlu1 %v2465_v15  ;;  %v11707_v6 = vpop.eup %10371  ;;  %v2483_v2 = vsel %vm2008_vm3, %v11703_v40, 0.0  ;;  %v2335_v15 = vmul.f32 1.442695, %v2236_v33 }
 0x414   :  { %v2468_v18 = vsel %vm2008_vm3, %v11707_v6, 0.0  ;;  %v2239_v1 = vsub.f32 %v11428_v41, %v2125_v32 }
 0x415   :  { %v2331_v62 = vmul.f32 1.442695, %v2234_v59 }
 0x416   :  { %v2128_v51 = vpop.xlane.xlu0 %2127  ;;  %v11713_v29 = vpop.eup %10373  ;;  %2475 = vadd.xlane.f32.xlu0 %v2474_v31 }
 0x417   :  { %10379 = vpow2.f32 %v2331_v62  ;;  %v2119_v14 = vpop.xlane.xlu1 %2118  ;;  %2484 = vadd.xlane.f32.xlu1 %v2483_v2  ;;  %v2477_v54 = vsel %vm2008_vm3, %v11713_v29, 0.0  ;;  %v11720_v16 = vpop.eup %10375 }
 0x418   :  { %10381 = vpow2.f32 %v2333_v36  ;;  %v2486_v50 = vsel %vm2008_vm3, %v11720_v16, 0.0  ;;  %v2237_v31 = vsub.f32 %v11432_v7, %v2119_v14 }
 0x419   :  { %10383 = vpow2.f32 %v2329_v48  ;;  %v11727_v62 = vpop.eup %10377 }
 0x41a   :  { %v2122_v25 = vpop.xlane.xlu0 %2121  ;;  %2469 = vadd.xlane.f32.xlu0 %v2468_v18  ;;  %v2337_v7 = vmul.f32 1.442695, %v2237_v31 }
 0x41b   :  { %v2137_v13 = vpop.xlane.xlu1 %2136  ;;  %v2238_v30 = vsub.f32 %v11440_v12, %v2122_v25  ;;  %2478 = vadd.xlane.f32.xlu1 %v2477_v54  ;;  %v2341_v12 = vmul.f32 1.442695, %v2239_v1  ;;  %v2480_v25 = vsel %vm2008_vm3, %v11727_v62, 0.0 }
 0x41c   :  { %v2243_v47 = vsub.f32 %v11442_v38, %v2137_v13 }
 0x41d   :  { %v2339_v20 = vmul.f32 1.442695, %v2238_v30 }
 0x41e   :  { %v2349_v59 = vmul.f32 1.442695, %v2243_v47  ;;  %v2140_v36 = vpop.xlane.xlu0 %2139  ;;  %2487 = vadd.xlane.f32.xlu0 %v2486_v50 }
 0x41f   :  { %10385 = vpow2.f32 %v2339_v20  ;;  %v2131_v2 = vpop.xlane.xlu1 %2130 }
 0x420   :  { %10387 = vpow2.f32 %v2335_v15  ;;  %v2241_v41 = vsub.f32 %v11446_v21, %v2131_v2  ;;  %v2240_v21 = vsub.f32 %v11436_v10, %v2128_v51  ;;  %v2244_v10 = vsub.f32 %v11450_v24, %v2140_v36 }
 0x421   :  { %v11731_v32 = vpop.eup %10379  ;;  %10389 = vpow2.f32 %v2349_v59 }
 0x422   :  { %v2345_v38 = vmul.f32 1.442695, %v2241_v41  ;;  %v2134_v33 = vpop.xlane.xlu0 %2133  ;;  %v2492_v48 = vsel %vm2008_vm3, %v11731_v32, 0.0  ;;  %v11737_v54 = vpop.eup %10381  ;;  %2481 = vadd.xlane.f32.xlu0 %v2480_v25  ;;  %10391 = vpow2.f32 %v2341_v12  ;;  %v2343_v20 = vmul.f32 1.442695, %v2240_v21 }
 0x423   :  { %v2149_v18 = vpop.xlane.xlu1 %2148  ;;  %2493 = vadd.xlane.f32.xlu1 %v2492_v48  ;;  %v2495_v15 = vsel %vm2008_vm3, %v11737_v54, 0.0  ;;  %v11743_v1 = vpop.eup %10383 }
 0x424   :  { %v2247_v14 = vsub.f32 %v11460_v39, %v2149_v18  ;;  %10393 = vpow2.f32 %v2345_v38  ;;  %v2489_v31 = vsel %vm2008_vm3, %v11743_v1, 0.0  ;;  %v2242_v38 = vsub.f32 %v11452_v17, %v2134_v33 }
 0x425   :  { %10395 = vpow2.f32 %v2337_v7 }
 0x426   :  { %v2357_v13 = vmul.f32 1.442695, %v2247_v14  ;;  %v2152_v30 = vpop.xlane.xlu0 %2151  ;;  %2496 = vadd.xlane.f32.xlu0 %v2495_v15  ;;  %v2347_v21 = vmul.f32 1.442695, %v2242_v38 }
 0x427   :  { %v2143_v47 = vpop.xlane.xlu1 %2142  ;;  %v2248_v14 = vsub.f32 %v11468_v55, %v2152_v30 }
 0x428   :  { %v2245_v59 = vsub.f32 %v11464_v49, %v2143_v47  ;;  %10397 = vpow2.f32 %v2357_v13  ;;  %v2351_v49 = vmul.f32 1.442695, %v2244_v10 }
 0x429   :  { %v11746_v50 = vpop.eup %10385  ;;  %10399 = vpow2.f32 %v2343_v20  ;;  %v2359_v10 = vmul.f32 1.442695, %v2248_v14 }
 0x42a   :  { %v11749_v39 = vpop.eup %10387  ;;  %v2353_v51 = vmul.f32 1.442695, %v2245_v59  ;;  %v2146_v2 = vpop.xlane.xlu0 %2145  ;;  %v2504_v12 = vsel %vm2008_vm3, %v11746_v50, 0.0  ;;  %2490 = vadd.xlane.f32.xlu0 %v2489_v31 }
 0x42b   :  { %v11755_v41 = vpop.eup %10389  ;;  %2505 = vadd.xlane.f32.xlu1 %v2504_v12  ;;  %v2161_v24 = vpop.xlane.xlu1 %2160  ;;  %v2498_v18 = vsel %vm2008_vm3, %v11749_v39, 0.0  ;;  %v2246_v55 = vsub.f32 %v11472_v3, %v2146_v2  ;;  %v14420_v3 = vld [vmem:[#allocation14_spill] sm:$0xff] }
 0x42c   :  { %10401 = vpow2.f32 %v2353_v51  ;;  %v11758_v36 = vpop.eup %10391  ;;  %v2519_v25 = vsel %vm2008_vm3, %v11755_v41, 0.0  ;;  %v2251_v2 = vsub.f32 %v14420_v3, %v2161_v24 }
 0x42d   :  { %10403 = vpow2.f32 %v2351_v49  ;;  %v2507_v15 = vsel %vm2008_vm3, %v11758_v36, 0.0 }
 0x42e   :  { %v2164_v48 = vpop.xlane.xlu0 %2163  ;;  %v11764_v7 = vpop.eup %10393  ;;  %2499 = vadd.xlane.f32.xlu0 %v2498_v18  ;;  %10405 = vpow2.f32 %v2347_v21  ;;  %v2355_v18 = vmul.f32 1.442695, %v2246_v55  ;;  %v14422_v55 = vld [vmem:[#allocation15_spill] sm:$0xff] }
 0x42f   :  { %2520 = vadd.xlane.f32.xlu1 %v2519_v25  ;;  %v11767_v17 = vpop.eup %10395  ;;  %v2513_v13 = vsel %vm2008_vm3, %v11764_v7, 0.0  ;;  %v2155_v20 = vpop.xlane.xlu1 %2154 }
 0x430   :  { %v2501_v31 = vsel %vm2008_vm3, %v11767_v17, 0.0 }
 0x432   :  { %v2158_v33 = vpop.xlane.xlu0 %2157  ;;  %v11773_v47 = vpop.eup %10397  ;;  %2508 = vadd.xlane.f32.xlu0 %v2507_v15 }
 0x433   :  { %14418 = vst [vmem:[#allocation44_spill] sm:$0xff] %v11773_v47  ;;  %v2250_v59 = vsub.f32 %v11496_v61, %v2158_v33  ;;  %2514 = vadd.xlane.f32.xlu1 %v2513_v13  ;;  %v11777_v51 = vpop.eup %10399  ;;  %v2531_v12 = vsel %vm2008_vm3, %v11773_v47, 0.0  ;;  %v14419_v61 = vld [vmem:[#allocation25_spill] sm:$0xff] }
 0x434   :  { %v2510_v33 = vsel %vm2008_vm3, %v11777_v51, 0.0 }
 0x435   :  { %v2363_v30 = vmul.f32 1.442695, %v2250_v59  ;;  %v14421_v59 = vld [vmem:[#allocation26_spill] sm:$0xff] }
 0x436   :  { %v11783_v49 = vpop.eup %10401  ;;  %v2185_v38 = vpop.xlane.xlu1 %2184  ;;  %2502 = vadd.xlane.f32.xlu0 %v2501_v31 }
 0x437   :  { %10407 = vpow2.f32 %v2363_v30  ;;  %2532 = vadd.xlane.f32.xlu1 %v2531_v12  ;;  %v2259_v25 = vsub.f32 %v14419_v61, %v2185_v38  ;;  %v2525_v14 = vsel %vm2008_vm3, %v11783_v49, 0.0  ;;  %v11791_v13 = vpop.eup %10403  ;;  %v2249_v12 = vsub.f32 %v14422_v55, %v2155_v20 }
 0x438   :  { %10409 = vpow2.f32 %v2359_v10  ;;  %v2365_v10 = vmul.f32 1.442695, %v2251_v2  ;;  %v2522_v31 = vsel %vm2008_vm3, %v11791_v13, 0.0  ;;  %v11797_v38 = vpop.eup %10405  ;;  %v2188_v61 = vpop.xlane.xlu0 %2187 }
 0x439   :  { %v2381_v21 = vmul.f32 1.442695, %v2259_v25  ;;  %v2361_v3 = vmul.f32 1.442695, %v2249_v12 }
 0x43a   :  { %v2179_v15 = vpop.xlane.xlu1 %2178  ;;  %2511 = vadd.xlane.f32.xlu0 %v2510_v33 }
 0x43b   :  { %2526 = vadd.xlane.f32.xlu1 %v2525_v14  ;;  %10411 = vpow2.f32 %v2381_v21  ;;  %v2257_v30 = vsub.f32 %v14421_v59, %v2179_v15  ;;  %v14424_v21 = vld [vmem:[#allocation16_spill] sm:$0xff]  ;;  %v14426_v15 = vld [vmem:[#allocation27_spill] sm:$0xff] }
 0x43c   :  { %10413 = vpow2.f32 %v2355_v18  ;;  %v2252_v14 = vsub.f32 %v14424_v21, %v2164_v48  ;;  %v2516_v18 = vsel %vm2008_vm3, %v11797_v38, 0.0  ;;  %v2260_v59 = vsub.f32 %v14426_v15, %v2188_v61 }
 0x43d   :  { %v2377_v24 = vmul.f32 1.442695, %v2257_v30 }
 0x43e   :  { %2523 = vadd.xlane.f32.xlu0 %v2522_v31  ;;  %v2367_v33 = vmul.f32 1.442695, %v2252_v14  ;;  %v14428_v31 = vld [vmem:[#allocation29_spill] sm:$0xff] }
 0x43f   :  { %10415 = vpow2.f32 %v2377_v24  ;;  %v2383_v24 = vmul.f32 1.442695, %v2260_v59 }
 0x440   :  { %10417 = vpow2.f32 %v2365_v10  ;;  %v2182_v10 = vpop.xlane.xlu0 %2181 }
 0x441   :  { %v11799_v25 = vpop.eup %10407  ;;  %10419 = vpow2.f32 %v2361_v3  ;;  %v2258_v3 = vsub.f32 %v14428_v31, %v2182_v10 }
 0x442   :  { %14423 = vst [vmem:[#allocation25_spill] sm:$0xff] %v11799_v25  ;;  %v2540_v20 = vsel %vm2008_vm3, %v11799_v25, 0.0  ;;  %v11806_v2 = vpop.eup %10409  ;;  %2517 = vadd.xlane.f32.xlu0 %v2516_v18  ;;  %10421 = vpow2.f32 %v2367_v33  ;;  %v14437_v25 = vld [vmem:[#allocation23_spill] sm:$0xff] }
 0x443   :  { %14425 = vst [vmem:[#allocation14_spill] sm:$0xff] %v11806_v2  ;;  %2541 = vadd.xlane.f32.xlu1 %v2540_v20  ;;  %v2534_v48 = vsel %vm2008_vm3, %v11806_v2, 0.0  ;;  %10423 = vpow2.f32 %v2383_v24  ;;  %v2379_v20 = vmul.f32 1.442695, %v2258_v3  ;;  %v14435_v3 = vld [vmem:[#allocation6_spill] sm:$0xff] }
 0x445   :  { %v11809_v30 = vpop.eup %10411  ;;  %10425 = vpow2.f32 %v2379_v20 }
 0x446   :  { %14427 = vst [vmem:[#allocation26_spill] sm:$0xff] %v11809_v30  ;;  %v11813_v55 = vpop.eup %10413  ;;  %2535 = vadd.xlane.f32.xlu0 %v2534_v48  ;;  %v2567_v12 = vsel %vm2008_vm3, %v11809_v30, 0.0 }
 0x447   :  { %2568 = vadd.xlane.f32.xlu1 %v2567_v12  ;;  %v2528_v61 = vsel %vm2008_vm3, %v11813_v55, 0.0 }
 0x449   :  { %v11818_v21 = vpop.eup %10415 }
 0x44a   :  { %14429 = vst [vmem:[#allocation15_spill] sm:$0xff] %v11818_v21  ;;  %v11822_v14 = vpop.eup %10417  ;;  %2529 = vadd.xlane.f32.xlu0 %v2528_v61  ;;  %v2561_v18 = vsel %vm2008_vm3, %v11818_v21, 0.0  ;;  %v14436_v21 = vld [vmem:[#allocation5_spill] sm:$0xff] }
 0x44b   :  { %14430 = vst [vmem:[#allocation16_spill] sm:$0xff] %v11822_v14  ;;  %2562 = vadd.xlane.f32.xlu1 %v2561_v18  ;;  %v2543_v33 = vsel %vm2008_vm3, %v11822_v14, 0.0  ;;  %v11828_v15 = vpop.eup %10419 }
 0x44c   :  { %14431 = vst [vmem:[#allocation27_spill] sm:$0xff] %v11828_v15  ;;  %v2537_v59 = vsel %vm2008_vm3, %v11828_v15, 0.0  ;;  %v11832_v10 = vpop.eup %10421 }
 0x44d   :  { %14432 = vst [vmem:[#allocation29_spill] sm:$0xff] %v11832_v10  ;;  %v2546_v48 = vsel %vm2008_vm3, %v11832_v10, 0.0  ;;  %v11836_v12 = vpop.eup %10423 }
 0x44e   :  { %2544 = vadd.xlane.f32.xlu0 %v2543_v33  ;;  %14433 = vst [vmem:[#allocation45_spill] sm:$0xff] %v11836_v12  ;;  %v2570_v24 = vsel %vm2008_vm3, %v11836_v12, 0.0 }
 0x44f   :  { %v11840_v31 = vpop.eup %10425 }
 0x450   :  { %14434 = vst [vmem:[#allocation46_spill] sm:$0xff] %v11840_v31  ;;  %v2564_v61 = vsel %vm2008_vm3, %v11840_v31, 0.0 }
 0x452   :  { %2538 = vadd.xlane.f32.xlu0 %v2537_v59 }
 0x456   :  { %2547 = vadd.xlane.f32.xlu0 %v2546_v48 }
 0x45a   :  { %2571 = vadd.xlane.f32.xlu0 %v2570_v24 }
 0x45c   :  { %3374 = vrot.lane.b32.xlu1 %v14435_v3, %s10596_s11 }
 0x45e   :  { %2565 = vadd.xlane.f32.xlu0 %v2564_v61 }
 0x467   :  { %v2401_v18 = vpop.xlane.xlu1 %2400 }
 0x46b   :  { %v2395_v20 = vpop.xlane.xlu1 %2394 }
 0x46f   :  { %v2404_v33 = vpop.xlane.xlu0 %2403 }
 0x470   :  { %v2413_v59 = vpop.xlane.xlu1 %2412  ;;  %10427 = vrcp.f32 %v2404_v33 }
 0x471   :  { %10429 = vrcp.f32 %v2395_v20 }
 0x472   :  { %10431 = vrcp.f32 %v2401_v18 }
 0x473   :  { %v2398_v48 = vpop.xlane.xlu0 %2397 }
 0x474   :  { %v2407_v30 = vpop.xlane.xlu1 %2406  ;;  %10433 = vrcp.f32 %v2398_v48  ;;  %3285 = vrot.lane.b32.xlu0 %v14436_v21, %s10596_s11  ;;  %v2168_v48 = vsel %vm2008_vm3, %v14437_v25, -inf }
 0x477   :  { %v2416_v24 = vpop.xlane.xlu0 %2415 }
 0x478   :  { %v2425_v12 = vpop.xlane.xlu1 %2424  ;;  %10435 = vrcp.f32 %v2416_v24 }
 0x479   :  { %10437 = vrcp.f32 %v2407_v30 }
 0x47a   :  { %v10428_v3 = vpop.eup %10427  ;;  %10439 = vrcp.f32 %v2413_v59 }
 0x47b   :  { %v2410_v61 = vpop.xlane.xlu0 %2409  ;;  %v10430_v31 = vpop.eup %10429  ;;  %v2652_v18 = vmul.f32 %v10428_v3, %v11583_v37  ;;  %v14438_v3 = vld [vmem:[#allocation33_spill] sm:$0xff] }
 0x47c   :  { %v2419_v10 = vpop.xlane.xlu1 %2418  ;;  %10441 = vrcp.f32 %v2410_v61  ;;  %v10432_v14 = vpop.eup %10431  ;;  %v2649_v21 = vmul.f32 %v10430_v31, %v11577_v27  ;;  %v2189_v25 = vsel %vm2008_vm3, %v14438_v3, -inf  ;;  %v14441_v31 = vld [vmem:[#allocation31_spill] sm:$0xff] }
 0x47d   :  { %v2651_v30 = vmul.f32 %v10432_v14, %v11571_v43 }
 0x47e   :  { %v10434_v33 = vpop.eup %10433 }
 0x47f   :  { %v2428_v20 = vpop.xlane.xlu0 %2427  ;;  %v2650_v15 = vmul.f32 %v10434_v33, %v11589_v35  ;;  %v2714_v47 = vpack.c.bf16 %v2652_v18, %v2651_v30  ;;  %v14439_v35 = vld [vmem:[#allocation7_spill] sm:$0xff]  ;;  %v2195_v33 = vsel %vm2008_vm3, %v14441_v31, -inf }
 0x480   :  { %v2437_v24 = vpop.xlane.xlu1 %2436  ;;  %2169 = vmax.xlane.f32.xlu1 %v2168_v48  ;;  %10443 = vrcp.f32 %v2428_v20 }
 0x481   :  { %v2713_v59 = vpack.c.bf16 %v2650_v15, %v2649_v21  ;;  %10445 = vrcp.f32 %v2419_v10  ;;  %v14440_v15 = vld [vmem:[#allocation9_spill] sm:$0xff]  ;;  %v14442_v21 = vld [vmem:[#allocation10_spill] sm:$0xff] }
 0x482   :  { %v10436_v61 = vpop.eup %10435  ;;  %10447 = vrcp.f32 %v2425_v12 }
 0x483   :  { %9482 = vmatprep.mubr.msk.bf16.mxu0 %vm2008_vm3, %v2713_v59  ;;  %v2422_v37 = vpop.xlane.xlu0 %2421  ;;  %v10438_v2 = vpop.eup %10437  ;;  %v2656_v10 = vmul.f32 %v10436_v61, %v11601_v58  ;;  %v14443_v61 = vld [vmem:[#allocation12_spill] sm:$0xff] }
 0x484   :  { %v2431_v27 = vpop.xlane.xlu1 %2430  ;;  %10449 = vrcp.f32 %v2422_v37  ;;  %2190 = vmax.xlane.f32.xlu1 %v2189_v25  ;;  %9483 = vmatmul.mubr.msk.bf16.vlgmr.msra.gmra.mrb[96].mxu0 %vm2008_vm3, %v2714_v47  ;;  %v10440_v43 = vpop.eup %10439  ;;  %v2653_v18 = vmul.f32 %v10438_v2, %v11595_v28 }
 0x485   :  { %9507 = vmatpush3.bf16.msra.mxu0 %v14439_v35  ;;  %v2655_v25 = vmul.f32 %v10440_v43, %v11585_v4 }
 0x486   :  { %v10442_v14 = vpop.eup %10441  ;;  %9508 = vmatprep.subr.bf16.mxu0 %v14440_v15 }
 0x487   :  { %v2440_v12 = vpop.xlane.xlu0 %2439  ;;  %v2654_v20 = vmul.f32 %v10442_v14, %v11611_v46  ;;  %v2716_v58 = vpack.c.bf16 %v2656_v10, %v2655_v25  ;;  %v14444_v10 = vld [vmem:[#allocation13_spill] sm:$0xff]  ;;  %v14447_v25 = vld [vmem:[#allocation18_spill] sm:$0xff] }
 0x488   :  { %2196 = vmax.xlane.f32.xlu1 %v2195_v33  ;;  %v2449_v47 = vpop.xlane.xlu1 %2448  ;;  %10451 = vrcp.f32 %v2440_v12  ;;  %v14445_v12 = vld [vmem:[#allocation21_spill] sm:$0xff] }
 0x489   :  { %9509 = vmatpush3.bf16.msra.mxu0 %v14440_v15  ;;  %v2715_v48 = vpack.c.bf16 %v2654_v20, %v2653_v18  ;;  %10453 = vrcp.f32 %v2431_v27  ;;  %v14446_v18 = vld [vmem:[#allocation8_spill] sm:$0xff] }
 0x48a   :  { %9510 = vmatprep.subr.bf16.mxu0 %v14442_v21  ;;  %v10444_v30 = vpop.eup %10443  ;;  %10455 = vrcp.f32 %v2437_v24 }
 0x48b   :  { %9486 = vmatprep.mubr.msk.bf16.mxu0 %vm2008_vm3, %v2715_v48  ;;  %v2434_v59 = vpop.xlane.xlu0 %2433  ;;  %v10446_v28 = vpop.eup %10445  ;;  %v2660_v2 = vmul.f32 %v10444_v30, %v11621_v42  ;;  %v2165_v42 = vsel %vm2008_vm3, %v14445_v12, -inf  ;;  %v14448_v48 = vld [vmem:[#allocation19_spill] sm:$0xff] }
 0x48c   :  { %10457 = vrcp.f32 %v2434_v59  ;;  %9487 = vmatmul.mubr.msk.bf16.gmra.mrb[100].mxu0 %vm2008_vm3, %v2716_v58  ;;  %v10448_v46 = vpop.eup %10447  ;;  %v2443_v37 = vpop.xlane.xlu1 %2442  ;;  %v2657_v43 = vmul.f32 %v10446_v28, %v11615_v19 }
 0x48d   :  { %9511 = vmatpush3.bf16.msra.mxu0 %v14442_v21  ;;  %v2659_v35 = vmul.f32 %v10448_v46, %v11605_v0  ;;  %v2171_v21 = vsel %vm2008_vm3, %v14448_v48, -inf }
 0x48e   :  { %v10450_v4 = vpop.eup %10449  ;;  %9512 = vmatprep.subr.bf16.mxu0 %v14443_v61 }
 0x48f   :  { %v2452_v27 = vpop.xlane.xlu0 %2451  ;;  %v2658_v24 = vmul.f32 %v10450_v4, %v11631_v53  ;;  %v2718_v15 = vpack.c.bf16 %v2660_v2, %v2659_v35  ;;  %v14449_v2 = vld [vmem:[#allocation11_spill] sm:$0xff] }
 0x490   :  { %10459 = vrcp.f32 %v2452_v27 }
 0x491   :  { %9513 = vmatpush3.bf16.msra.mxu0 %v14443_v61  ;;  %v2717_v14 = vpack.c.bf16 %v2658_v24, %v2657_v43  ;;  %10461 = vrcp.f32 %v2443_v37  ;;  %v14450_v61 = vld [vmem:[#allocation22_spill] sm:$0xff] }
 0x492   :  { %9538 = vmatprep.subr.bf16.mxu0 %v14444_v10  ;;  %v10452_v33 = vpop.eup %10451  ;;  %10463 = vrcp.f32 %v2449_v47  ;;  %v2174_v37 = vsel %vm2008_vm3, %v14450_v61, -inf }
 0x493   :  { %9498 = vmatprep.mubr.msk.bf16.mxu1 %vm2008_vm3, %v2717_v14  ;;  %v2446_v19 = vpop.xlane.xlu0 %2445  ;;  %2166 = vmax.xlane.f32.xlu0 %v2165_v42  ;;  %v10454_v53 = vpop.eup %10453  ;;  %v2664_v58 = vmul.f32 %v10452_v33, %v11641_v57  ;;  %v14451_v14 = vld [vmem:[#allocation24_spill] sm:$0xff] }
 0x494   :  { %10465 = vrcp.f32 %v2446_v19  ;;  %9499 = vmatmul.mubr.msk.bf16.vlgmr.msra.gmra.mrb[96].mxu1 %vm2008_vm3, %v2718_v15  ;;  %v10456_v0 = vpop.eup %10455  ;;  %v2661_v59 = vmul.f32 %v10454_v53, %v11634_v8  ;;  %v14452_v15 = vld [vmem:[#allocation35_spill] sm:$0xff] }
 0x495   :  { %9523 = vmatpush3.bf16.msra.mxu1 %v14446_v18  ;;  %v2663_v46 = vmul.f32 %v10456_v0, %v11625_v45  ;;  %v2192_v42 = vsel %vm2008_vm3, %v14452_v15, -inf }
 0x496   :  { %v10458_v20 = vpop.eup %10457  ;;  %9524 = vmatprep.subr.bf16.mxu1 %v14447_v25 }
 0x497   :  { %v2461_v30 = vpop.xlane.xlu0 %2460  ;;  %2172 = vmax.xlane.f32.xlu0 %v2171_v21  ;;  %v2662_v28 = vmul.f32 %v10458_v20, %v11648_v5  ;;  %v2720_v27 = vpack.c.bf16 %v2664_v58, %v2663_v46  ;;  %v14454_v21 = vld [vmem:[#allocation34_spill] sm:$0xff] }
 0x498   :  { %v2458_v47 = vpop.xlane.xlu1 %2457  ;;  %v2198_v58 = vsel %vm2008_vm3, %v14454_v21, -inf }
 0x499   :  { %9525 = vmatpush3.bf16.msra.mxu1 %v14447_v25  ;;  %v2719_v4 = vpack.c.bf16 %v2662_v28, %v2661_v59  ;;  %10467 = vrcp.f32 %v2458_v47  ;;  %v14453_v25 = vld [vmem:[#allocation17_spill] sm:$0xff] }
 0x49a   :  { %9526 = vmatprep.subr.bf16.mxu1 %v14449_v2  ;;  %v10460_v43 = vpop.eup %10459 }
 0x49b   :  { %9502 = vmatprep.mubr.msk.bf16.mxu1 %vm2008_vm3, %v2719_v4  ;;  %v2455_v24 = vpop.xlane.xlu0 %2454  ;;  %2175 = vmax.xlane.f32.xlu0 %v2174_v37  ;;  %v10462_v8 = vpop.eup %10461  ;;  %v2668_v35 = vmul.f32 %v10460_v43, %v11659_v9 }
 0x49c   :  { %v2473_v57 = vpop.xlane.xlu1 %2472  ;;  %9503 = vmatmul.mubr.msk.bf16.gmra.mrb[100].mxu1 %vm2008_vm3, %v2720_v27  ;;  %v10464_v45 = vpop.eup %10463  ;;  %10469 = vrcp.f32 %v2455_v24  ;;  %v2665_v19 = vmul.f32 %v10462_v8, %v11655_v34 }
 0x49d   :  { %9527 = vmatpush3.bf16.msra.mxu1 %v14449_v2  ;;  %10471 = vrcp.f32 %v2461_v30  ;;  %v2667_v0 = vmul.f32 %v10464_v45, %v11644_v26  ;;  %v14456_v2 = vld [vmem:[#allocation28_spill] sm:$0xff] }
 0x49e   :  { %v10466_v5 = vpop.eup %10465  ;;  %9528 = vmatprep.subr.bf16.mxu1 %v14451_v14 }
 0x49f   :  { %v2464_v33 = vpop.xlane.xlu0 %2463  ;;  %2193 = vmax.xlane.f32.xlu0 %v2192_v42  ;;  %v2666_v53 = vmul.f32 %v10466_v5, %v11667_v56  ;;  %v2722_v9 = vpack.c.bf16 %v2668_v35, %v2667_v0  ;;  %v14455_v56 = vld [vmem:[#allocation20_spill] sm:$0xff] }
 0x4a0   :  { %v2467_v18 = vpop.xlane.xlu1 %2466  ;;  %10473 = vrcp.f32 %v2464_v33 }
 0x4a1   :  { %9529 = vmatpush3.bf16.msra.mxu1 %v14451_v14  ;;  %v2721_v20 = vpack.c.bf16 %v2666_v53, %v2665_v19 }
 0x4a2   :  { %9554 = vmatprep.subr.bf16.mxu1 %v14453_v25 }
 0x4a3   :  { %9514 = vmatprep.mubr.msk.bf16.mxu0 %vm2008_vm3, %v2721_v20  ;;  %v2476_v47 = vpop.xlane.xlu0 %2475  ;;  %2199 = vmax.xlane.f32.xlu0 %v2198_v58  ;;  %v10468_v34 = vpop.eup %10467 }
 0x4a4   :  { %9515 = vmatmul.mubr.msk.bf16.vlgmr.msra.gmra.mrb[104].mxu0 %vm2008_vm3, %v2722_v9  ;;  %v2485_v26 = vpop.xlane.xlu1 %2484  ;;  %10475 = vrcp.f32 %v2476_v47  ;;  %v2670_v46 = vmul.f32 %v10468_v34, %v11676_v11  ;;  %v14457_v11 = vld [vmem:[#allocation36_spill] sm:$0xff] }
 0x4a5   :  { %9539 = vmatpush3.bf16.msra.mxu0 %v14444_v10  ;;  %10477 = vrcp.f32 %v2467_v18 }
 0x4a6   :  { %9540 = vmatprep.subr.bf16.mxu0 %v14455_v56  ;;  %v10470_v30 = vpop.eup %10469  ;;  %10479 = vrcp.f32 %v2473_v57 }
 0x4a7   :  { %v2470_v59 = vpop.xlane.xlu0 %2469  ;;  %v2669_v28 = vmul.f32 %v10470_v30, %v11679_v23  ;;  %v10472_v4 = vpop.eup %10471 }
 0x4a8   :  { %10481 = vrcp.f32 %v2470_v59  ;;  %v2479_v43 = vpop.xlane.xlu1 %2478  ;;  %v2671_v24 = vmul.f32 %v10472_v4, %v11673_v60  ;;  %v14458_v60 = vld [vmem:[#allocation38_spill] sm:$0xff] }
 0x4a9   :  { %9541 = vmatpush3.bf16.msra.mxu0 %v14455_v56  ;;  %v2723_v37 = vpack.c.bf16 %v2670_v46, %v2669_v28  ;;  %v14460_v46 = vld [vmem:[#allocation32_spill] sm:$0xff] }
 0x4aa   :  { %9542 = vmatprep.subr.bf16.mxu0 %v14456_v2  ;;  %v10474_v10 = vpop.eup %10473 }
 0x4ab   :  { %v2488_v27 = vpop.xlane.xlu0 %2487  ;;  %9518 = vmatprep.mubr.msk.bf16.mxu0 %vm2008_vm3, %v2723_v37  ;;  %v2672_v57 = vmul.f32 %v10474_v10, %v11688_v63 }
 0x4ac   :  { %10483 = vrcp.f32 %v2488_v27 }
 0x4ad   :  { %9543 = vmatpush3.bf16.msra.mxu0 %v14456_v2  ;;  %v2724_v23 = vpack.c.bf16 %v2672_v57, %v2671_v24  ;;  %10485 = vrcp.f32 %v2479_v43 }
 0x4ae   :  { %9544 = vmatprep.subr.bf16.mxu0 %v14457_v11  ;;  %v10476_v45 = vpop.eup %10475  ;;  %10487 = vrcp.f32 %v2485_v26 }
 0x4af   :  { %v2482_v8 = vpop.xlane.xlu0 %2481  ;;  %9519 = vmatmul.mubr.msk.bf16.gmra.mrb[108].mxu0 %vm2008_vm3, %v2724_v23  ;;  %v10478_v5 = vpop.eup %10477  ;;  %v2676_v14 = vmul.f32 %v10476_v45, %v11697_v22 }
 0x4b0   :  { %10489 = vrcp.f32 %v2482_v8  ;;  %v10480_v35 = vpop.eup %10479  ;;  %v2494_v33 = vpop.xlane.xlu1 %2493  ;;  %v2673_v19 = vmul.f32 %v10478_v5, %v11694_v44 }
 0x4b1   :  { %9545 = vmatpush3.bf16.msra.mxu0 %v14457_v11  ;;  %v2675_v0 = vmul.f32 %v10480_v35, %v11685_v52  ;;  %10491 = vrcp.f32 %v2494_v33  ;;  %v14462_v11 = vld [vmem:[#allocation39_spill] sm:$0xff] }
 0x4b2   :  { %9570 = vmatprep.subr.bf16.mxu0 %v14458_v60  ;;  %v10482_v63 = vpop.eup %10481 }
 0x4b3   :  { %v2497_v42 = vpop.xlane.xlu0 %2496  ;;  %v2674_v53 = vmul.f32 %v10482_v63, %v11707_v6  ;;  %v2726_v20 = vpack.c.bf16 %v2676_v14, %v2675_v0  ;;  %v14459_v6 = vld [vmem:[#allocation30_spill] sm:$0xff]  ;;  %v14463_v63 = vld [vmem:[#allocation40_spill] sm:$0xff] }
 0x4b5   :  { %v2725_v18 = vpack.c.bf16 %v2674_v53, %v2673_v19  ;;  %v14464_v53 = vld [vmem:[#allocation42_spill] sm:$0xff] }
 0x4b6   :  { %v10484_v58 = vpop.eup %10483 }
 0x4b7   :  { %v2491_v9 = vpop.xlane.xlu0 %2490  ;;  %9530 = vmatprep.mubr.msk.bf16.mxu1 %vm2008_vm3, %v2725_v18  ;;  %v10486_v47 = vpop.eup %10485  ;;  %v2680_v26 = vmul.f32 %v10484_v58, %v11720_v16  ;;  %v14461_v16 = vld [vmem:[#allocation37_spill] sm:$0xff] }
 0x4b8   :  { %10493 = vrcp.f32 %v2491_v9  ;;  %9531 = vmatmul.mubr.msk.bf16.vlgmr.msra.gmra.mrb[104].mxu1 %vm2008_vm3, %v2726_v20  ;;  %v10488_v22 = vpop.eup %10487  ;;  %v2506_v34 = vpop.xlane.xlu1 %2505  ;;  %v2677_v56 = vmul.f32 %v10486_v47, %v11713_v29 }
 0x4b9   :  { %9555 = vmatpush3.bf16.msra.mxu1 %v14453_v25  ;;  %10495 = vrcp.f32 %v2497_v42  ;;  %v2679_v59 = vmul.f32 %v10488_v22, %v11703_v40 }
 0x4ba   :  { %v10490_v44 = vpop.eup %10489  ;;  %9556 = vmatprep.subr.bf16.mxu1 %v14459_v6 }
 0x4bb   :  { %v2500_v52 = vpop.xlane.xlu0 %2499  ;;  %v2678_v30 = vmul.f32 %v10490_v44, %v11727_v62  ;;  %v2728_v4 = vpack.c.bf16 %v2680_v26, %v2679_v59  ;;  %v10492_v37 = vpop.eup %10491 }
 0x4bc   :  { %10497 = vrcp.f32 %v2500_v52  ;;  %v2521_v2 = vpop.xlane.xlu1 %2520  ;;  %v2682_v10 = vmul.f32 %v10492_v37, %v11731_v32  ;;  %v14466_v37 = vld [vmem:[#allocation14_spill] sm:$0xff] }
 0x4bd   :  { %9557 = vmatpush3.bf16.msra.mxu1 %v14459_v6  ;;  %v2727_v28 = vpack.c.bf16 %v2678_v30, %v2677_v56  ;;  %10499 = vrcp.f32 %v2506_v34 }
 0x4be   :  { %9558 = vmatprep.subr.bf16.mxu1 %v14460_v46 }
 0x4bf   :  { %v2509_v25 = vpop.xlane.xlu0 %2508  ;;  %9534 = vmatprep.mubr.msk.bf16.mxu1 %vm2008_vm3, %v2727_v28 }
 0x4c0   :  { %9535 = vmatmul.mubr.msk.bf16.gmra.mrb[108].mxu1 %vm2008_vm3, %v2728_v4  ;;  %v2515_v43 = vpop.xlane.xlu1 %2514 }
 0x4c1   :  { %9559 = vmatpush3.bf16.msra.mxu1 %v14460_v46 }
 0x4c2   :  { %v10494_v29 = vpop.eup %10493  ;;  %9560 = vmatprep.subr.bf16.mxu1 %v14461_v16 }
 0x4c3   :  { %v2503_v40 = vpop.xlane.xlu0 %2502  ;;  %v2681_v62 = vmul.f32 %v10494_v29, %v11743_v1  ;;  %v10496_v27 = vpop.eup %10495 }
 0x4c4   :  { %10501 = vrcp.f32 %v2503_v40  ;;  %v2683_v8 = vmul.f32 %v10496_v27, %v11737_v54  ;;  %v2533_v5 = vpop.xlane.xlu1 %2532  ;;  %v14468_v27 = vld [vmem:[#allocation43_spill] sm:$0xff] }
 0x4c5   :  { %9561 = vmatpush3.bf16.msra.mxu1 %v14461_v16  ;;  %v2729_v24 = vpack.c.bf16 %v2682_v10, %v2681_v62  ;;  %10503 = vrcp.f32 %v2509_v25  ;;  %v14467_v62 = vld [vmem:[#allocation44_spill] sm:$0xff] }
 0x4c6   :  { %v10498_v57 = vpop.eup %10497  ;;  %9586 = vmatprep.subr.bf16.mxu1 %v14462_v11 }
 0x4c7   :  { %v2512_v23 = vpop.xlane.xlu0 %2511  ;;  %v2684_v45 = vmul.f32 %v10498_v57, %v11749_v39  ;;  %9546 = vmatprep.mubr.msk.bf16.mxu0 %vm2008_vm3, %v2729_v24  ;;  %v10500_v35 = vpop.eup %10499 }
 0x4c8   :  { %10505 = vrcp.f32 %v2512_v23  ;;  %v2686_v39 = vmul.f32 %v10500_v35, %v11746_v50  ;;  %v2527_v19 = vpop.xlane.xlu1 %2526  ;;  %v14469_v23 = vld [vmem:[#allocation27_spill] sm:$0xff] }
 0x4c9   :  { %v2730_v1 = vpack.c.bf16 %v2684_v45, %v2683_v8  ;;  %v14470_v45 = vld [vmem:[#allocation25_spill] sm:$0xff] }
 0x4cb   :  { %v2524_v32 = vpop.xlane.xlu0 %2523  ;;  %9547 = vmatmul.mubr.msk.bf16.vlgmr.msra.gmra.mrb[112].mxu0 %vm2008_vm3, %v2730_v1 }
 0x4cc   :  { %9571 = vmatpush3.bf16.msra.mxu0 %v14458_v60  ;;  %10507 = vrcp.f32 %v2524_v32 }
 0x4cd   :  { %9572 = vmatprep.subr.bf16.mxu0 %v14463_v63  ;;  %10509 = vrcp.f32 %v2515_v43 }
 0x4ce   :  { %v10502_v14 = vpop.eup %10501  ;;  %10511 = vrcp.f32 %v2521_v2 }
 0x4cf   :  { %v2518_v42 = vpop.xlane.xlu0 %2517  ;;  %v2685_v54 = vmul.f32 %v10502_v14, %v11767_v17  ;;  %v10504_v33 = vpop.eup %10503 }
 0x4d0   :  { %9573 = vmatpush3.bf16.msra.mxu0 %v14463_v63  ;;  %10513 = vrcp.f32 %v2518_v42  ;;  %v2687_v20 = vmul.f32 %v10504_v33, %v11758_v36  ;;  %v2542_v47 = vpop.xlane.xlu1 %2541  ;;  %v14471_v63 = vld [vmem:[#allocation16_spill] sm:$0xff]  ;;  %v14472_v42 = vld [vmem:[#allocation29_spill] sm:$0xff] }
 0x4d1   :  { %9574 = vmatprep.subr.bf16.mxu0 %v14464_v53  ;;  %v2731_v0 = vpack.c.bf16 %v2686_v39, %v2685_v54  ;;  %10515 = vrcp.f32 %v2527_v19 }
 0x4d2   :  { %v10506_v60 = vpop.eup %10505 }
 0x4d3   :  { %v2536_v18 = vpop.xlane.xlu0 %2535  ;;  %9550 = vmatprep.mubr.msk.bf16.mxu0 %vm2008_vm3, %v2731_v0  ;;  %v2688_v9 = vmul.f32 %v10506_v60, %v11777_v51 }
 0x4d4   :  { %9575 = vmatpush3.bf16.msra.mxu0 %v14464_v53  ;;  %10517 = vrcp.f32 %v2536_v18  ;;  %v2569_v56 = vpop.xlane.xlu1 %2568  ;;  %v14473_v18 = vld [vmem:[#allocation45_spill] sm:$0xff] }
 0x4d5   :  { %v2732_v50 = vpack.c.bf16 %v2688_v9, %v2687_v20  ;;  %10519 = vrcp.f32 %v2533_v5  ;;  %v14474_v9 = vld [vmem:[#allocation15_spill] sm:$0xff] }
 0x4d6   :  { %v10508_v58 = vpop.eup %10507 }
 0x4d7   :  { %v2530_v17 = vpop.xlane.xlu0 %2529  ;;  %9551 = vmatmul.mubr.msk.bf16.gmra.mrb[116].mxu0 %vm2008_vm3, %v2732_v50  ;;  %v10510_v22 = vpop.eup %10509  ;;  %v2692_v6 = vmul.f32 %v10508_v58, %v11791_v13 }
 0x4d8   :  { %10521 = vrcp.f32 %v2530_v17  ;;  %v10512_v34 = vpop.eup %10511  ;;  %v2689_v51 = vmul.f32 %v10510_v22, %v11764_v7  ;;  %v14465_v7 = vld [vmem:[#allocation41_spill] sm:$0xff]  ;;  %v2563_v16 = vpop.xlane.xlu1 %2562  ;;  %v14475_v17 = vld [vmem:[#allocation46_spill] sm:$0xff] }
 0x4d9   :  { %v2691_v26 = vmul.f32 %v10512_v34, %v11755_v41  ;;  %10523 = vrcp.f32 %v2542_v47  ;;  %v14476_v47 = vld [vmem:[#allocation26_spill] sm:$0xff] }
 0x4da   :  { %v10514_v44 = vpop.eup %10513 }
 0x4db   :  { %v2545_v36 = vpop.xlane.xlu0 %2544  ;;  %v2690_v52 = vmul.f32 %v10514_v44, %v11797_v38  ;;  %v10516_v59 = vpop.eup %10515  ;;  %v2734_v28 = vpack.c.bf16 %v2692_v6, %v2691_v26 }
 0x4dc   :  { %v2693_v38 = vmul.f32 %v10516_v59, %v11783_v49 }
 0x4dd   :  { %v2733_v30 = vpack.c.bf16 %v2690_v52, %v2689_v51 }
 0x4de   :  { %v10518_v25 = vpop.eup %10517 }
 0x4df   :  { %v2539_v46 = vpop.xlane.xlu0 %2538  ;;  %9562 = vmatprep.mubr.msk.bf16.mxu1 %vm2008_vm3, %v2733_v30  ;;  %v10520_v4 = vpop.eup %10519  ;;  %v2696_v29 = vmul.f32 %v10518_v25, %v14466_v37 }
 0x4e0   :  { %10525 = vrcp.f32 %v2539_v46  ;;  %9563 = vmatmul.mubr.msk.bf16.vlgmr.msra.gmra.mrb[112].mxu1 %vm2008_vm3, %v2734_v28  ;;  %v2695_v10 = vmul.f32 %v10520_v4, %v14467_v62 }
 0x4e1   :  { %10527 = vrcp.f32 %v2545_v36  ;;  %9587 = vmatpush3.bf16.msra.mxu1 %v14462_v11  ;;  %v14477_v36 = vld [vmem:[#allocation23_spill] sm:$0xff] }
 0x4e2   :  { %v10522_v13 = vpop.eup %10521  ;;  %9588 = vmatprep.subr.bf16.mxu1 %v14465_v7  ;;  %v2736_v24 = vpack.c.bf16 %v2696_v29, %v2695_v10 }
 0x4e3   :  { %v2548_v41 = vpop.xlane.xlu0 %2547  ;;  %v2694_v2 = vmul.f32 %v10522_v13, %v11813_v55  ;;  %v10524_v57 = vpop.eup %10523 }
 0x4e4   :  { %10529 = vrcp.f32 %v2548_v41  ;;  %v3375_v55 = vpop.permute.xlu1 %3374  ;;  %v2698_v1 = vmul.f32 %v10524_v57, %v14470_v45 }
 0x4e5   :  { %v2735_v40 = vpack.c.bf16 %v2694_v2, %v2693_v38  ;;  %9589 = vmatpush3.bf16.msra.mxu1 %v14465_v7 }
 0x4e6   :  { %9590 = vmatprep.subr.bf16.mxu1 %v14468_v27 }
 0x4e7   :  { %9566 = vmatprep.mubr.msk.bf16.mxu1 %vm2008_vm3, %v2735_v40  ;;  %v2572_v43 = vpop.xlane.xlu0 %2571 }
 0x4e8   :  { %10531 = vrcp.f32 %v2572_v43  ;;  %9567 = vmatmul.mubr.msk.bf16.gmra.mrb[116].mxu1 %vm2008_vm3, %v2736_v24 }
 0x4e9   :  { %10533 = vrcp.f32 %v2563_v16  ;;  %9591 = vmatpush3.bf16.msra.mxu1 %v14468_v27 }
 0x4ea   :  { %v10526_v49 = vpop.eup %10525  ;;  %10535 = vrcp.f32 %v2569_v56  ;;  %9592 = vmatprep.subr.bf16.mxu1 %v3375_v55 }
 0x4eb   :  { %v2566_v11 = vpop.xlane.xlu0 %2565  ;;  %v2697_v8 = vmul.f32 %v10526_v49, %v14469_v23  ;;  %v10528_v32 = vpop.eup %10527 }
 0x4ec   :  { %10537 = vrcp.f32 %v2566_v11  ;;  %v2699_v14 = vmul.f32 %v10528_v32, %v14471_v63  ;;  %v10187_v32 = vld [vmem:[#allocation2 + $0x10] sm:$0xff]  }
 0x4ed   :  { %v2737_v5 = vpack.c.bf16 %v2698_v1, %v2697_v8  ;;  %9593 = vmatpush3.bf16.msra.mxu1 %v3375_v55 }
 0x4ee   :  { %v10530_v35 = vpop.eup %10529 }
 0x4ef   :  { %v2700_v54 = vmul.f32 %v10530_v35, %v14472_v42  ;;  %9578 = vmatprep.mubr.msk.bf16.mxu0 %vm2008_vm3, %v2737_v5  ;;  %v3286_v39 = vpop.permute.xlu0 %3285  ;;  %v14344_v35 = vmov 0.0  }
 0x4f0   :  { %9576 = vmatprep.subr.bf16.mxu0 %v3286_v39  ;;  %9610 = vmatprep.subr.bf16.mxu1 %v14344_v35 }
 0x4f1   :  { %v2738_v33 = vpack.c.bf16 %v2700_v54, %v2699_v14  ;;  %9577 = vmatpush3.bf16.msra.mxu0 %v3286_v39  ;;  %v10188_v39 = vld [vmem:[#allocation2 + $0x18] sm:$0xff]  }
 0x4f2   :  { %v10532_v19 = vpop.eup %10531  ;;  %9602 = vmatprep.subr.bf16.mxu0 %v14344_v35 }
 0x4f3   :  { %v10534_v53 = vpop.eup %10533  ;;  %v2708_v20 = vmul.f32 %v10532_v19, %v14473_v18  ;;  %v10189_v19 = vld [vmem:[#allocation2] sm:$0xff]   ;;  %v10191_v18 = vld [vmem:[#allocation2 + $0x8] sm:$0xff]  }
 0x4f4   :  { %9579 = vmatmul.mubr.msk.bf16.vlgmr.msra.gmra.mrb[120].mxu0 %vm2008_vm3, %v2738_v33  ;;  %v10536_v0 = vpop.eup %10535  ;;  %v2705_v50 = vmul.f32 %v10534_v53, %v14474_v9 }
 0x4f5   :  { %v2707_v22 = vmul.f32 %v10536_v0, %v14476_v47  ;;  %9603 = vmatpush3.bf16.msra.mxu0 %v10187_v32 }
 0x4f6   :  { %v10538_v60 = vpop.eup %10537  ;;  %9604 = vmatprep.subr.bf16.mxu0 %v14344_v35 }
 0x4f7   :  { %v2706_v58 = vmul.f32 %v10538_v60, %v14475_v17  ;;  %v2742_v44 = vpack.c.bf16 %v2708_v20, %v2707_v22 }
 0x4f9   :  { %v2741_v34 = vpack.c.bf16 %v2706_v58, %v2705_v50  ;;  %9605 = vmatpush3.bf16.msra.mxu0 %v10188_v39 }
 0x4fa   :  { %9618 = vmatprep.subr.bf16.mxu0 %v14344_v35 }
 0x4fb   :  { %9594 = vmatprep.mubr.msk.bf16.mxu1 %vm2008_vm3, %v2741_v34 }
 0x4fc   :  { %9595 = vmatmul.mubr.msk.bf16.vlgmr.msra.gmra.mrb[120].mxu1 %vm2008_vm3, %v2742_v44 }
 0x4fd   :  { %9611 = vmatpush3.bf16.msra.mxu1 %v10189_v19 }
 0x4fe   :  { %9612 = vmatprep.subr.bf16.mxu1 %v14344_v35 }
 0x501   :  { %9613 = vmatpush3.bf16.msra.mxu1 %v10191_v18 }
 0x502   :  { %9626 = vmatprep.subr.bf16.mxu1 %v14344_v35 }
 0x50d   :  { %v2170_v6 = vpop.xlane.xlu1 %2169 }
 0x50e   :  { %v2254_v51 = vsub.f32 %v14477_v36, %v2170_v6 }
 0x510   :  { %v2371_v52 = vmul.f32 1.442695, %v2254_v51 }
 0x511   :  { %v2191_v30 = vpop.xlane.xlu1 %2190 }
 0x512   :  { %10539 = vpow2.f32 %v2371_v52  ;;  %v2261_v46 = vsub.f32 %v14438_v3, %v2191_v30 }
 0x514   :  { %v2385_v41 = vmul.f32 1.442695, %v2261_v46 }
 0x515   :  { %v2197_v4 = vpop.xlane.xlu1 %2196 }
 0x516   :  { %v2263_v38 = vsub.f32 %v14441_v31, %v2197_v4 }
 0x518   :  { %v2389_v16 = vmul.f32 1.442695, %v2263_v38 }
 0x51c   :  { %v11991_v26 = vpop.eup %10539 }
 0x51d   :  { %v2552_v56 = vsel %vm2008_vm3, %v11991_v26, 0.0 }
 0x51e   :  { %2553 = vadd.xlane.f32.xlu0 %v2552_v56 }
 0x520   :  { %v2167_v59 = vpop.xlane.xlu0 %2166 }
 0x521   :  { %v2253_v28 = vsub.f32 %v14445_v12, %v2167_v59 }
 0x523   :  { %v2369_v25 = vmul.f32 1.442695, %v2253_v28 }
 0x524   :  { %v2173_v13 = vpop.xlane.xlu0 %2172 }
 0x525   :  { %10541 = vpow2.f32 %v2369_v25  ;;  %v2255_v7 = vsub.f32 %v14448_v48, %v2173_v13 }
 0x527   :  { %v2373_v2 = vmul.f32 1.442695, %v2255_v7 }
 0x528   :  { %v2176_v37 = vpop.xlane.xlu0 %2175 }
 0x529   :  { %10543 = vpow2.f32 %v2373_v2  ;;  %v2256_v29 = vsub.f32 %v14450_v61, %v2176_v37 }
 0x52a   :  { %10545 = vpow2.f32 %v2385_v41 }
 0x52b   :  { %v2375_v40 = vmul.f32 1.442695, %v2256_v29 }
 0x52c   :  { %v2194_v12 = vpop.xlane.xlu0 %2193 }
 0x52d   :  { %10547 = vpow2.f32 %v2375_v40  ;;  %v2262_v3 = vsub.f32 %v14452_v15, %v2194_v12 }
 0x52e   :  { %10549 = vpow2.f32 %v2389_v16 }
 0x52f   :  { %v12001_v62 = vpop.eup %10541  ;;  %v2387_v10 = vmul.f32 1.442695, %v2262_v3 }
 0x530   :  { %14478 = vst [vmem:[#allocation6_spill] sm:$0xff] %v12001_v62  ;;  %v2200_v48 = vpop.xlane.xlu0 %2199  ;;  %v2549_v31 = vsel %vm2008_vm3, %v12001_v62, 0.0 }
 0x531   :  { %10551 = vpow2.f32 %v2387_v10  ;;  %v2264_v27 = vsub.f32 %v14454_v21, %v2200_v48  ;;  %2550 = vadd.xlane.f32.xlu1 %v2549_v31 }
 0x533   :  { %v12006_v61 = vpop.eup %10543  ;;  %v2391_v43 = vmul.f32 1.442695, %v2264_v27 }
 0x534   :  { %14479 = vst [vmem:[#allocation5_spill] sm:$0xff] %v12006_v61  ;;  %v2555_v24 = vsel %vm2008_vm3, %v12006_v61, 0.0  ;;  %v12010_v57 = vpop.eup %10545 }
 0x535   :  { %14480 = vst [vmem:[#allocation33_spill] sm:$0xff] %v12010_v57  ;;  %10553 = vpow2.f32 %v2391_v43  ;;  %2556 = vadd.xlane.f32.xlu1 %v2555_v24  ;;  %v2573_v55 = vsel %vm2008_vm3, %v12010_v57, 0.0 }
 0x537   :  { %v12012_v15 = vpop.eup %10547 }
 0x538   :  { %14481 = vst [vmem:[#allocation7_spill] sm:$0xff] %v12012_v15  ;;  %v2558_v49 = vsel %vm2008_vm3, %v12012_v15, 0.0  ;;  %v12018_v21 = vpop.eup %10549 }
 0x539   :  { %14482 = vst [vmem:[#allocation9_spill] sm:$0xff] %v12018_v21  ;;  %2559 = vadd.xlane.f32.xlu0 %v2558_v49  ;;  %2574 = vadd.xlane.f32.xlu1 %v2573_v55  ;;  %v2579_v8 = vsel %vm2008_vm3, %v12018_v21, 0.0 }
 0x53b   :  { %v12020_v11 = vpop.eup %10551 }
 0x53c   :  { %14483 = vst [vmem:[#allocation31_spill] sm:$0xff] %v12020_v11  ;;  %v2576_v23 = vsel %vm2008_vm3, %v12020_v11, 0.0 }
 0x53d   :  { %2577 = vadd.xlane.f32.xlu0 %v2576_v23  ;;  %2580 = vadd.xlane.f32.xlu1 %v2579_v8 }
 0x53f   :  { %v12026_v45 = vpop.eup %10553 }
 0x540   :  { %14484 = vst [vmem:[#allocation10_spill] sm:$0xff] %v12026_v45  ;;  %v2582_v1 = vsel %vm2008_vm3, %v12026_v45, 0.0 }
 0x541   :  { %2583 = vadd.xlane.f32.xlu0 %v2582_v1 }
 0x557   :  { %v9484_v5 = vpop.f32.mrb[96].mxu0 }
 0x558   :  { %v2803_v63 = vpop.f32.mrb[97].mxu0 }
 0x559   :  { %v9485_v14 = vpop.f32.mrb[98].mxu0 }
 0x55a   :  { %v3458_v42 = vpack.c.bf16 %v9485_v14, %v9484_v5  ;;  %v2806_v54 = vpop.f32.mrb[99].mxu0 }
 0x55b   :  { %v3457_v33 = vpack.c.bf16 %v2806_v54, %v2803_v63 }
 0x55c   :  { %v12034_v0 = vunpack.c.l.b16 %v3458_v42  ;;  %v12041_v22 = vunpack.c.h.b16 %v3458_v42 }
 0x55d   :  { %v12036_v20 = vunpack.c.l.b16 %v3457_v33  ;;  %v12039_v58 = vunpack.c.h.b16 %v3457_v33 }
 0x55e   :  { %v4830_v34 = vrot.slane %v12034_v0, 1  ;;  %v4906_v6 = vrot.slane %v12034_v0, 2  ;;  %v4982_v36 = vrot.slane %v12034_v0, 3  ;;  %v5058_v51 = vrot.slane %v12034_v0, 4 }
 0x55f   :  { %v9488_v53 = vpop.f32.mrb[100].mxu0  ;;  %v3514_v44 = vrot.slane %v12036_v20, 1  ;;  %v3666_v52 = vrot.slane %v12036_v20, 2  ;;  %v3742_v56 = vrot.slane %v12036_v20, 3  ;;  %v3818_v30 = vrot.slane %v12036_v20, 4 }
 0x560   :  { %v2819_v60 = vpop.f32.mrb[101].mxu0  ;;  %v3894_v59 = vrot.slane %v12036_v20, 5  ;;  %v3970_v46 = vrot.slane %v12036_v20, 6  ;;  %v4046_v25 = vrot.slane %v12036_v20, 7  ;;  %v4206_v4 = vrot.slane %v12039_v58, 1 }
 0x561   :  { %v9489_v9 = vpop.f32.mrb[102].mxu0  ;;  %v4282_v13 = vrot.slane %v12039_v58, 2  ;;  %v4358_v41 = vrot.slane %v12039_v58, 3  ;;  %v4434_v38 = vrot.slane %v12039_v58, 4  ;;  %v4510_v2 = vrot.slane %v12039_v58, 5 }
 0x562   :  { %v3460_v50 = vpack.c.bf16 %v9489_v9, %v9488_v53  ;;  %v2822_v17 = vpop.f32.mrb[103].mxu0  ;;  %v4586_v37 = vrot.slane %v12039_v58, 6  ;;  %v4662_v16 = vrot.slane %v12039_v58, 7  ;;  %v5134_v40 = vrot.slane %v12034_v0, 5 }
 0x563   :  { %v3459_v47 = vpack.c.bf16 %v2822_v17, %v2819_v60  ;;  %v5210_v12 = vrot.slane %v12034_v0, 6  ;;  %v5286_v3 = vrot.slane %v12034_v0, 7  ;;  %v5446_v55 = vrot.slane %v12041_v22, 1 }
 0x564   :  { %v12065_v10 = vunpack.c.l.b16 %v3460_v50  ;;  %v12067_v48 = vunpack.c.h.b16 %v3460_v50  ;;  %v5522_v23 = vrot.slane %v12041_v22, 2 }
 0x565   :  { %v12069_v31 = vunpack.c.l.b16 %v3459_v47  ;;  %v12071_v24 = vunpack.c.h.b16 %v3459_v47 }
 0x566   :  { %14485 = vst [vmem:[#allocation12_spill] sm:$0xff] %v12065_v10  ;;  %14486 = vst [vmem:[#allocation13_spill] sm:$0xff] %v12067_v48  ;;  %v14493_v10 = vrot.slane %v12041_v22, 6 }
 0x567   :  { %v9500_v28 = vpop.f32.mrb[96].mxu1  ;;  %14487 = vst [vmem:[#allocation21_spill] sm:$0xff] %v12069_v31  ;;  %14488 = vst [vmem:[#allocation8_spill] sm:$0xff] %v12071_v24 }
 0x568   :  { %v2892_v7 = vpop.f32.mrb[97].mxu1 }
 0x569   :  { %v9501_v29 = vpop.f32.mrb[98].mxu1 }
 0x56a   :  { %v3462_v27 = vpack.c.bf16 %v9501_v29, %v9500_v28  ;;  %v2895_v43 = vpop.f32.mrb[99].mxu1 }
 0x56b   :  { %v3461_v49 = vpack.c.bf16 %v2895_v43, %v2892_v7 }
 0x56c   :  { %v12075_v8 = vunpack.c.l.b16 %v3462_v27 }
 0x56d   :  { %v3507_v63 = vunpack.c.l.b16 %v3461_v49  ;;  %v4123_v14 = vunpack.c.h.b16 %v3461_v49 }
 0x56e   :  { %v4754_v39 = vrot.slane %v12075_v8, 7  ;;  %v12085_v33 = vsel %vm3515_vm4, %v12075_v8, %v4830_v34  ;;  %v4907_v19 = vrot.slane %v12075_v8, 1 }
 0x56f   :  { %v3591_v60 = vrot.slane %v3507_v63, 7  ;;  %v9504_v18 = vpop.f32.mrb[100].mxu1  ;;  %v12090_v9 = vsel %vm3515_vm4, %v3507_v63, %v3514_v44  ;;  %v3667_v50 = vrot.slane %v3507_v63, 1  ;;  %v3743_v17 = vrot.slane %v3507_v63, 2 }
 0x570   :  { %v2908_v47 = vpop.f32.mrb[101].mxu1  ;;  %v3819_v28 = vrot.slane %v3507_v63, 3  ;;  %v3895_v7 = vrot.slane %v3507_v63, 4  ;;  %v3971_v29 = vrot.slane %v3507_v63, 5  ;;  %v4047_v43 = vrot.slane %v3507_v63, 6 }
 0x571   :  { %v9505_v49 = vpop.f32.mrb[102].mxu1  ;;  %v12094_v34 = vsel %vm3515_vm4, %v3591_v60, %v12036_v20  ;;  %v12097_v35 = vsel %vm3515_vm4, %v3667_v50, %v3666_v52  ;;  %v12100_v53 = vsel %vm3515_vm4, %v3743_v17, %v3742_v56  ;;  %v4130_v44 = vrot.slane %v4123_v14, 7 }
 0x572   :  { %v12102_v54 = vpack.c.bf16 %v9505_v49, %v9504_v18  ;;  %v2911_v42 = vpop.f32.mrb[103].mxu1  ;;  %v12105_v5 = vsel %vm3515_vm4, %v3819_v28, %v3818_v30  ;;  %v12108_v63 = vsel %vm3515_vm4, %v3895_v7, %v3894_v59  ;;  %v12111_v32 = vsel %vm3515_vm4, %v3971_v29, %v3970_v46 }
 0x573   :  { %v12113_v20 = vpack.c.bf16 %v2911_v42, %v2908_v47  ;;  %v12116_v52 = vsel %vm3515_vm4, %v4047_v43, %v4046_v25  ;;  %v12120_v56 = vsel %vm3515_vm4, %v4130_v44, %v12039_v58  ;;  %v12123_v60 = vsel %vm3515_vm4, %v4123_v14, %v4206_v4 }
 0x574   :  { %v4283_v30 = vrot.slane %v4123_v14, 1  ;;  %v4359_v18 = vrot.slane %v4123_v14, 2  ;;  %v4983_v59 = vrot.slane %v12075_v8, 2  ;;  %v12127_v50 = vunpack.c.h.b16 %v3462_v27 }
 0x575   :  { %v4435_v42 = vrot.slane %v4123_v14, 3  ;;  %v4511_v17 = vrot.slane %v4123_v14, 4  ;;  %v4587_v28 = vrot.slane %v4123_v14, 5  ;;  %v4663_v7 = vrot.slane %v4123_v14, 6 }
 0x576   :  { %v4284_v47 = vsel %vm3515_vm4, %v4283_v30, %v4282_v13  ;;  %v12136_v4 = vsel %vm3515_vm4, %v4359_v18, %v4358_v41  ;;  %v12150_v13 = vsel %vm3515_vm4, %v4754_v39, %v12034_v0  ;;  %v4908_v41 = vsel %vm3515_vm4, %v4907_v19, %v4906_v6 }
 0x577   :  { %v9516_v29 = vpop.f32.mrb[104].mxu0  ;;  %v12141_v27 = vsel %vm3515_vm4, %v4435_v42, %v4434_v38  ;;  %v12146_v43 = vsel %vm3515_vm4, %v4511_v17, %v4510_v2  ;;  %v12158_v49 = vsel %vm3515_vm4, %v4587_v28, %v4586_v37  ;;  %v12163_v38 = vsel %vm3515_vm4, %v4663_v7, %v4662_v16 }
 0x578   :  { %v2981_v14 = vpop.f32.mrb[105].mxu0  ;;  %v12168_v2 = vsel %vm3515_vm4, %v4983_v59, %v4982_v36  ;;  %v5059_v39 = vrot.slane %v12075_v8, 3  ;;  %v5135_v6 = vrot.slane %v12075_v8, 4  ;;  %v5211_v19 = vrot.slane %v12075_v8, 5 }
 0x579   :  { %v9517_v44 = vpop.f32.mrb[106].mxu0  ;;  %v5287_v37 = vrot.slane %v12075_v8, 6  ;;  %v5370_v30 = vrot.slane %v12127_v50, 7  ;;  %v12184_v36 = vsel %vm3515_vm4, %v12127_v50, %v5446_v55  ;;  %v5523_v59 = vrot.slane %v12127_v50, 1 }
 0x57a   :  { %v3466_v58 = vpack.c.bf16 %v9517_v44, %v9516_v29  ;;  %v2984_v18 = vpop.f32.mrb[107].mxu0  ;;  %v12178_v16 = vsel %vm3515_vm4, %v5059_v39, %v5058_v51  ;;  %v12190_v8 = vsel %vm3515_vm4, %v5135_v6, %v5134_v40  ;;  %v12195_v17 = vsel %vm3515_vm4, %v5211_v19, %v5210_v12 }
 0x57b   :  { %v3465_v42 = vpack.c.bf16 %v2984_v18, %v2981_v14  ;;  %v12200_v51 = vsel %vm3515_vm4, %v5287_v37, %v5286_v3  ;;  %v12206_v28 = vsel %vm3515_vm4, %v5370_v30, %v12041_v22  ;;  %v12211_v40 = vsel %vm3515_vm4, %v5523_v59, %v5522_v23 }
 0x57c   :  { %v12202_v55 = vunpack.c.l.b16 %v3466_v58  ;;  %v12214_v12 = vunpack.c.h.b16 %v3466_v58  ;;  %v5599_v3 = vrot.slane %v12127_v50, 2 }
 0x57d   :  { %v3508_v29 = vunpack.c.l.b16 %v3465_v42  ;;  %v4124_v0 = vunpack.c.h.b16 %v3465_v42 }
 0x57e   :  { %v4756_v14 = vrot.slane %v12202_v55, 6  ;;  %v4832_v39 = vrot.slane %v12202_v55, 7  ;;  %v12221_v44 = vsel %vm3518_vm5, %v12202_v55, %v4908_v41  ;;  %v4985_v6 = vrot.slane %v12202_v55, 1 }
 0x57f   :  { %v3517_v23 = vrot.slane %v3508_v29, 7  ;;  %v3593_v19 = vrot.slane %v3508_v29, 6  ;;  %v12226_v37 = vsel %vm3518_vm5, %v3508_v29, %v12097_v35  ;;  %v3745_v30 = vrot.slane %v3508_v29, 1 }
 0x580   :  { %v3821_v58 = vrot.slane %v3508_v29, 2  ;;  %v3897_v18 = vrot.slane %v3508_v29, 3  ;;  %v3973_v59 = vrot.slane %v3508_v29, 4  ;;  %v4049_v42 = vrot.slane %v3508_v29, 5 }
 0x581   :  { %v12230_v7 = vsel %vm3518_vm5, %v3517_v23, %v12090_v9  ;;  %v12234_v41 = vsel %vm3518_vm5, %v3593_v19, %v12094_v34  ;;  %v12238_v25 = vsel %vm3518_vm5, %v3745_v30, %v12100_v53  ;;  %v4132_v46 = vrot.slane %v4124_v0, 6 }
 0x582   :  { %v12242_v35 = vsel %vm3518_vm5, %v3821_v58, %v12105_v5  ;;  %v12246_v29 = vsel %vm3518_vm5, %v3897_v18, %v12108_v63  ;;  %v12250_v9 = vsel %vm3518_vm5, %v3973_v59, %v12111_v32  ;;  %v12254_v34 = vsel %vm3518_vm5, %v4049_v42, %v12116_v52  ;;  %v9520_v23 = vpop.f32.mrb[108].mxu0 }
 0x583   :  { %v12258_v53 = vsel %vm3518_vm5, %v4132_v46, %v12120_v56  ;;  %v4208_v19 = vrot.slane %v4124_v0, 7  ;;  %v12261_v5 = vsel %vm3518_vm5, %v4124_v0, %v4284_v47  ;;  %v4361_v30 = vrot.slane %v4124_v0, 1  ;;  %v2997_v63 = vpop.f32.mrb[109].mxu0 }
 0x584   :  { %v4437_v58 = vrot.slane %v4124_v0, 2  ;;  %v4513_v18 = vrot.slane %v4124_v0, 3  ;;  %v4589_v1 = vrot.slane %v4124_v0, 4  ;;  %v4665_v32 = vrot.slane %v4124_v0, 5  ;;  %v9521_v59 = vpop.f32.mrb[110].mxu0 }
 0x585   :  { %v12265_v52 = vsel %vm3518_vm5, %v4208_v19, %v12123_v60  ;;  %v12269_v42 = vsel %vm3518_vm5, %v4361_v30, %v12136_v4  ;;  %v12273_v56 = vsel %vm3518_vm5, %v4756_v14, %v12150_v13  ;;  %v12277_v46 = vsel %vm3518_vm5, %v4832_v39, %v12085_v33  ;;  %v3000_v0 = vpop.f32.mrb[111].mxu0 }
 0x586   :  { %v12279_v47 = vpack.c.bf16 %v9521_v59, %v9520_v23  ;;  %v12283_v48 = vsel %vm3518_vm5, %v4437_v58, %v12141_v27  ;;  %v12287_v60 = vsel %vm3518_vm5, %v4513_v18, %v12146_v43  ;;  %v12291_v4 = vsel %vm3518_vm5, %v4589_v1, %v12158_v49 }
 0x587   :  { %v12293_v13 = vpack.c.bf16 %v3000_v0, %v2997_v63  ;;  %v12297_v33 = vsel %vm3518_vm5, %v4665_v32, %v12163_v38  ;;  %v4986_v14 = vsel %vm3518_vm5, %v4985_v6, %v12168_v2  ;;  %v5061_v27 = vrot.slane %v12202_v55, 2 }
 0x588   :  { %v5137_v39 = vrot.slane %v12202_v55, 3  ;;  %v5213_v43 = vrot.slane %v12202_v55, 4  ;;  %v5675_v23 = vrot.slane %v12127_v50, 3  ;;  %v12307_v49 = vunpack.c.l.b16 %v12102_v54 }
 0x589   :  { %v12310_v38 = vunpack.c.l.b16 %v12113_v20  ;;  %v12314_v2 = vsel %vm3518_vm5, %v5061_v27, %v12178_v16  ;;  %v5289_v6 = vrot.slane %v12202_v55, 5  ;;  %v5372_v63 = vrot.slane %v12214_v12, 6 }
 0x58a   :  { %14489 = vst [vmem:[#allocation18_spill] sm:$0xff] %v12307_v49  ;;  %v12319_v19 = vsel %vm3518_vm5, %v5137_v39, %v12190_v8  ;;  %v12323_v30 = vsel %vm3518_vm5, %v5213_v43, %v12195_v17  ;;  %v5448_v58 = vrot.slane %v12214_v12, 7  ;;  %v12334_v16 = vsel %vm3518_vm5, %v12214_v12, %v12211_v40 }
 0x58b   :  { %v12329_v18 = vsel %vm3518_vm5, %v5289_v6, %v12200_v51  ;;  %v14490_v8 = vrot.slane %v12041_v22, 3  ;;  %v5601_v17 = vrot.slane %v12214_v12, 1  ;;  %v9532_v32 = vpop.f32.mrb[104].mxu1  ;;  %v12342_v59 = vsel %vm3518_vm5, %v5372_v63, %v12206_v28 }
 0x58c   :  { %v12346_v51 = vsel %vm3518_vm5, %v5448_v58, %v12184_v36  ;;  %v14491_v0 = vrot.slane %v12041_v22, 4  ;;  %v5677_v27 = vrot.slane %v12214_v12, 2  ;;  %v3070_v39 = vpop.f32.mrb[105].mxu1  ;;  %v5751_v43 = vrot.slane %v12127_v50, 4 }
 0x58d   :  { %v5600_v55 = vsel %vm3515_vm4, %v5599_v3, %v14490_v8  ;;  %v5753_v6 = vrot.slane %v12214_v12, 3  ;;  %v5827_v28 = vrot.slane %v12127_v50, 5  ;;  %v9533_v63 = vpop.f32.mrb[106].mxu1  ;;  %v5829_v58 = vrot.slane %v12214_v12, 4 }
 0x58e   :  { %v5676_v40 = vsel %vm3515_vm4, %v5675_v23, %v14491_v0  ;;  %v12353_v3 = vsel %vm3518_vm5, %v5601_v17, %v5600_v55  ;;  %v5903_v23 = vrot.slane %v12127_v50, 6  ;;  %v5905_v8 = vrot.slane %v12214_v12, 5  ;;  %v3073_v1 = vpop.f32.mrb[107].mxu1 }
 0x58f   :  { %v12359_v36 = vsel %vm3518_vm5, %v5677_v27, %v5676_v40  ;;  %v3470_v0 = vpack.c.bf16 %v9533_v63, %v9532_v32  ;;  %v14492_v55 = vrot.slane %v12041_v22, 5  ;;  %v5828_v49 = vsel %vm3515_vm4, %v5827_v28, %v14493_v10 }
 0x590   :  { %v5994_v24 = vrot.slane %v12310_v38, 7  ;;  %v3469_v40 = vpack.c.bf16 %v3073_v1, %v3070_v39  ;;  %v12375_v50 = vsel %vm3518_vm5, %v5829_v58, %v5828_v49  ;;  %v14494_v12 = vrot.slane %v12041_v22, 7 }
 0x591   :  { %v5752_v17 = vsel %vm3515_vm4, %v5751_v43, %v14492_v55  ;;  %v12381_v63 = vunpack.c.h.b16 %v12102_v54  ;;  %v12383_v43 = vunpack.c.l.b16 %v3470_v0  ;;  %v12393_v39 = vunpack.c.l.b16 %v12293_v13 }
 0x592   :  { %v12372_v27 = vsel %vm3518_vm5, %v5753_v6, %v5752_v17  ;;  %v5904_v32 = vsel %vm3515_vm4, %v5903_v23, %v14494_v12  ;;  %v12390_v1 = vsel %vm3515_vm4, %v5994_v24, %v12069_v31  ;;  %v3509_v49 = vunpack.c.l.b16 %v3469_v40 }
 0x593   :  { %14495 = vst [vmem:[#allocation19_spill] sm:$0xff] %v12381_v63  ;;  %v12386_v10 = vsel %vm3518_vm5, %v5905_v8, %v5904_v32  ;;  %14496 = vst [vmem:[#allocation11_spill] sm:$0xff] %v12393_v39  ;;  %v4125_v6 = vunpack.c.h.b16 %v3469_v40  ;;  %v14497_v22 = vrot.slane %v12069_v31, 1  ;;  %v4758_v28 = vrot.slane %v12383_v43, 5  ;;  %v9536_v8 = vpop.f32.mrb[108].mxu1 }
 0x594   :  { %v4834_v58 = vrot.slane %v12383_v43, 6  ;;  %v4910_v23 = vrot.slane %v12383_v43, 7  ;;  %v12406_v24 = vsel %vm3521_vm6, %v12383_v43, %v4986_v14  ;;  %v3520_v55 = vrot.slane %v3509_v49, 6  ;;  %v3086_v32 = vpop.f32.mrb[109].mxu1 }
 0x595   :  { %v12399_v54 = vsel %vm3515_vm4, %v12310_v38, %v14497_v22  ;;  %v3595_v17 = vrot.slane %v3509_v49, 5  ;;  %v3670_v40 = vrot.slane %v3509_v49, 7  ;;  %v12410_v12 = vsel %vm3521_vm6, %v3509_v49, %v12238_v25  ;;  %v9537_v21 = vpop.f32.mrb[110].mxu1 }
 0x596   :  { %v3823_v22 = vrot.slane %v3509_v49, 1  ;;  %v3899_v63 = vrot.slane %v3509_v49, 2  ;;  %v3975_v31 = vrot.slane %v3509_v49, 3  ;;  %v4051_v45 = vrot.slane %v3509_v49, 4  ;;  %v3089_v61 = vpop.f32.mrb[111].mxu1 }
 0x597   :  { %v12414_v11 = vsel %vm3521_vm6, %v3520_v55, %v12230_v7  ;;  %v12418_v14 = vsel %vm3521_vm6, %v3595_v17, %v12234_v41  ;;  %v12422_v57 = vsel %vm3521_vm6, %v3670_v40, %v12226_v37  ;;  %v4134_v25 = vrot.slane %v4125_v6, 5 }
 0x598   :  { %v12424_v15 = vpack.c.bf16 %v9537_v21, %v9536_v8  ;;  %v12428_v49 = vsel %vm3521_vm6, %v3823_v22, %v12242_v35  ;;  %v12432_v7 = vsel %vm3521_vm6, %v3899_v63, %v12246_v29  ;;  %v12436_v41 = vsel %vm3521_vm6, %v3975_v31, %v12250_v9 }
 0x599   :  { %v12438_v55 = vpack.c.bf16 %v3089_v61, %v3086_v32  ;;  %v12442_v37 = vsel %vm3521_vm6, %v4051_v45, %v12254_v34  ;;  %v12446_v21 = vsel %vm3521_vm6, %v4134_v25, %v12258_v53  ;;  %v4210_v35 = vrot.slane %v4125_v6, 6 }
 0x59a   :  { %v12449_v8 = vunpack.c.h.b16 %v12113_v20  ;;  %v5365_v29 = vunpack.c.h.b16 %v3470_v0  ;;  %v4286_v63 = vrot.slane %v4125_v6, 7  ;;  %v12453_v31 = vsel %vm3521_vm6, %v4125_v6, %v12269_v42 }
 0x59b   :  { %v12456_v61 = vunpack.c.l.b16 %v12438_v55  ;;  %v12460_v45 = vsel %vm3521_vm6, %v4210_v35, %v12265_v52  ;;  %v4439_v9 = vrot.slane %v4125_v6, 1  ;;  %v5996_v34 = vrot.slane %v12393_v39, 6 }
 0x59c   :  { %14498 = vst [vmem:[#allocation22_spill] sm:$0xff] %v12449_v8  ;;  %v12465_v20 = vsel %vm3521_vm6, %v4286_v63, %v12261_v5  ;;  %v4515_v53 = vrot.slane %v4125_v6, 2  ;;  %v4591_v0 = vrot.slane %v4125_v6, 3  ;;  %v4667_v17 = vrot.slane %v4125_v6, 4 }
 0x59d   :  { %14499 = vst [vmem:[#allocation24_spill] sm:$0xff] %v12456_v61  ;;  %v12469_v42 = vsel %vm3521_vm6, %v4439_v9, %v12283_v48  ;;  %v12473_v40 = vsel %vm3521_vm6, %v4758_v28, %v12273_v56  ;;  %v12477_v52 = vsel %vm3521_vm6, %v4834_v58, %v12277_v46  ;;  %v12481_v32 = vsel %vm3521_vm6, %v4910_v23, %v12221_v44 }
 0x59e   :  { %v12485_v5 = vsel %vm3521_vm6, %v4515_v53, %v12287_v60  ;;  %v12489_v48 = vsel %vm3521_vm6, %v4591_v0, %v12291_v4  ;;  %v12493_v56 = vsel %vm3521_vm6, %v4667_v17, %v12297_v33  ;;  %v5063_v46 = vrot.slane %v12383_v43, 1  ;;  %v9548_v23 = vpop.f32.mrb[112].mxu0 }
 0x59f   :  { %v5139_v6 = vrot.slane %v12383_v43, 2  ;;  %v5215_v44 = vrot.slane %v12383_v43, 3  ;;  %v5291_v28 = vrot.slane %v12383_v43, 4  ;;  %v5374_v58 = vrot.slane %v5365_v29, 5  ;;  %v3159_v25 = vpop.f32.mrb[113].mxu0 }
 0x5a0   :  { %v12501_v60 = vsel %vm3521_vm6, %v5063_v46, %v12314_v2  ;;  %v5450_v4 = vrot.slane %v5365_v29, 6  ;;  %v5526_v22 = vrot.slane %v5365_v29, 7  ;;  %v12505_v33 = vsel %vm3521_vm6, %v5365_v29, %v12353_v3  ;;  %v9549_v9 = vpop.f32.mrb[114].mxu0 }
 0x5a1   :  { %v12509_v35 = vsel %vm3521_vm6, %v5139_v6, %v12319_v19  ;;  %v12513_v43 = vsel %vm3521_vm6, %v5215_v44, %v12323_v30  ;;  %v12517_v63 = vsel %vm3521_vm6, %v5291_v28, %v12329_v18  ;;  %v12521_v2 = vsel %vm3521_vm6, %v5374_v58, %v12342_v59  ;;  %v3162_v17 = vpop.f32.mrb[115].mxu0 }
 0x5a2   :  { %v12525_v3 = vsel %vm3521_vm6, %v5450_v4, %v12346_v51  ;;  %v12529_v19 = vsel %vm3521_vm6, %v5526_v22, %v12334_v16  ;;  %v5679_v53 = vrot.slane %v5365_v29, 1  ;;  %v5755_v30 = vrot.slane %v5365_v29, 2 }
 0x5a3   :  { %v3474_v0 = vpack.c.bf16 %v9549_v9, %v9548_v23  ;;  %v5831_v46 = vrot.slane %v5365_v29, 3  ;;  %v5907_v18 = vrot.slane %v5365_v29, 4  ;;  %v5997_v6 = vsel %vm3518_vm5, %v5996_v34, %v12390_v1 }
 0x5a4   :  { %v3473_v59 = vpack.c.bf16 %v3162_v17, %v3159_v25  ;;  %v12535_v44 = vsel %vm3521_vm6, %v5679_v53, %v12359_v36  ;;  %v12539_v51 = vsel %vm3521_vm6, %v5755_v30, %v12372_v27  ;;  %v5998_v16 = vrot.slane %v12456_v61, 5 }
 0x5a5   :  { %v12543_v28 = vunpack.c.l.b16 %v12279_v47  ;;  %v12545_v58 = vunpack.c.l.b16 %v3474_v0  ;;  %v12549_v29 = vsel %vm3521_vm6, %v5831_v46, %v12375_v50  ;;  %v12553_v1 = vsel %vm3521_vm6, %v5907_v18, %v12386_v10 }
 0x5a6   :  { %v12555_v36 = vunpack.c.h.b16 %v3474_v0  ;;  %v3510_v34 = vunpack.c.l.b16 %v3473_v59  ;;  %v4126_v27 = vunpack.c.h.b16 %v3473_v59  ;;  %v12558_v23 = vsel %vm3521_vm6, %v5998_v16, %v5997_v6 }
 0x5a7   :  { %14500 = vst [vmem:[#allocation35_spill] sm:$0xff] %v12543_v28  ;;  %v4760_v4 = vrot.slane %v12545_v58, 4  ;;  %v4836_v22 = vrot.slane %v12545_v58, 5  ;;  %v4912_v25 = vrot.slane %v12545_v58, 6  ;;  %v4988_v50 = vrot.slane %v12545_v58, 7 }
 0x5a8   :  { %v3523_v9 = vrot.slane %v3510_v34, 5  ;;  %v3597_v53 = vrot.slane %v3510_v34, 4  ;;  %v3672_v30 = vrot.slane %v3510_v34, 6  ;;  %v3748_v10 = vrot.slane %v3510_v34, 7 }
 0x5a9   :  { %v12566_v0 = vsel %vm3524_vm7, %v3510_v34, %v12428_v49  ;;  %v3901_v17 = vrot.slane %v3510_v34, 1  ;;  %v3977_v46 = vrot.slane %v3510_v34, 2  ;;  %v4053_v18 = vrot.slane %v3510_v34, 3 }
 0x5aa   :  { %v12570_v6 = vsel %vm3524_vm7, %v3523_v9, %v12414_v11  ;;  %v12574_v59 = vsel %vm3524_vm7, %v3597_v53, %v12418_v14  ;;  %v12578_v16 = vsel %vm3524_vm7, %v3672_v30, %v12422_v57  ;;  %v12582_v28 = vsel %vm3524_vm7, %v3748_v10, %v12410_v12  ;;  %v9552_v9 = vpop.f32.mrb[116].mxu0 }
 0x5ab   :  { %v12586_v49 = vsel %vm3524_vm7, %v3901_v17, %v12432_v7  ;;  %v12590_v11 = vsel %vm3524_vm7, %v3977_v46, %v12436_v41  ;;  %v12594_v14 = vsel %vm3524_vm7, %v4053_v18, %v12442_v37  ;;  %v4136_v34 = vrot.slane %v4126_v27, 4  ;;  %v2554_v57 = vpop.xlane.xlu0 %2553  ;;  %v3175_v7 = vpop.f32.mrb[117].mxu0 }
 0x5ac   :  { %v4212_v53 = vrot.slane %v4126_v27, 5  ;;  %v4288_v30 = vrot.slane %v4126_v27, 6  ;;  %v4364_v8 = vrot.slane %v4126_v27, 7  ;;  %v12598_v12 = vsel %vm3524_vm7, %v4126_v27, %v12469_v42  ;;  %v9553_v37 = vpop.f32.mrb[118].mxu0 }
 0x5ad   :  { %14501 = vst [vmem:[#allocation17_spill] sm:$0xff] %v12598_v12  ;;  %10555 = vrcp.f32 %v2554_v57  ;;  %v12602_v41 = vsel %vm3524_vm7, %v4136_v34, %v12446_v21  ;;  %v4517_v10 = vrot.slane %v4126_v27, 1  ;;  %v4593_v17 = vrot.slane %v4126_v27, 2  ;;  %v3178_v12 = vpop.f32.mrb[119].mxu0 }
 0x5ae   :  { %v12606_v46 = vsel %vm3524_vm7, %v4212_v53, %v12460_v45  ;;  %v12610_v18 = vsel %vm3524_vm7, %v4288_v30, %v12465_v20  ;;  %v12614_v42 = vsel %vm3524_vm7, %v4364_v8, %v12453_v31  ;;  %v4669_v57 = vrot.slane %v4126_v27, 3 }
 0x5af   :  { %v3476_v62 = vpack.c.bf16 %v9553_v37, %v9552_v9  ;;  %v12618_v21 = vsel %vm3524_vm7, %v4517_v10, %v12485_v5  ;;  %v12622_v34 = vsel %vm3524_vm7, %v4593_v17, %v12489_v48  ;;  %v12626_v45 = vsel %vm3524_vm7, %v4760_v4, %v12473_v40 }
 0x5b0   :  { %v3475_v20 = vpack.c.bf16 %v3178_v12, %v3175_v7  ;;  %v12630_v8 = vsel %vm3524_vm7, %v4669_v57, %v12493_v56  ;;  %v12634_v31 = vsel %vm3524_vm7, %v4836_v22, %v12477_v52  ;;  %v12638_v5 = vsel %vm3524_vm7, %v4912_v25, %v12481_v32 }
 0x5b1   :  { %v12641_v48 = vunpack.c.h.b16 %v12279_v47  ;;  %v12644_v27 = vunpack.c.h.b16 %v12293_v13  ;;  %v12648_v40 = vsel %vm3524_vm7, %v4988_v50, %v12406_v24  ;;  %v12653_v56 = vsel %vm3524_vm7, %v12545_v58, %v12501_v60 }
 0x5b2   :  { %v12655_v52 = vunpack.c.l.b16 %v3475_v20  ;;  %v5141_v32 = vrot.slane %v12545_v58, 1  ;;  %v5217_v4 = vrot.slane %v12545_v58, 2  ;;  %v6072_v47 = vrot.slane %v12393_v39, 7  ;;  %v14524_v39 = vld [vmem:[#allocation10_spill] sm:$0xff] }
 0x5b3   :  { %14502 = vst [vmem:[#allocation34_spill] sm:$0xff] %v12641_v48  ;;  %14503 = vst [vmem:[#allocation20_spill] sm:$0xff] %v12644_v27  ;;  %v5293_v13 = vrot.slane %v12545_v58, 3  ;;  %v5376_v22 = vrot.slane %v12555_v36, 4  ;;  %v5452_v24 = vrot.slane %v12555_v36, 5  ;;  %v5528_v25 = vrot.slane %v12555_v36, 6 }
 0x5b4   :  { %14504 = vst [vmem:[#allocation28_spill] sm:$0xff] %v12655_v52  ;;  %v12666_v60 = vsel %vm3524_vm7, %v5141_v32, %v12509_v35  ;;  %v12670_v50 = vsel %vm3524_vm7, %v5217_v4, %v12513_v43  ;;  %v5604_v9 = vrot.slane %v12555_v36, 7  ;;  %v12676_v58 = vsel %vm3524_vm7, %v12555_v36, %v12535_v44  ;;  %v9564_v53 = vpop.f32.mrb[112].mxu1  ;;  %v14518_v27 = vld [vmem:[#allocation7_spill] sm:$0xff] }
 0x5b5   :  { %v12680_v30 = vsel %vm3524_vm7, %v5293_v13, %v12517_v63  ;;  %v12684_v35 = vsel %vm3524_vm7, %v5376_v22, %v12521_v2  ;;  %v12688_v43 = vsel %vm3524_vm7, %v5452_v24, %v12525_v3  ;;  %v12692_v12 = vsel %vm3524_vm7, %v5528_v25, %v12529_v19  ;;  %v3248_v7 = vpop.f32.mrb[113].mxu1 }
 0x5b6   :  { %v12696_v44 = vsel %vm3524_vm7, %v5604_v9, %v12505_v33  ;;  %v5757_v63 = vrot.slane %v12555_v36, 1  ;;  %v5833_v10 = vrot.slane %v12555_v36, 2  ;;  %v5909_v2 = vrot.slane %v12555_v36, 3  ;;  %v9565_v37 = vpop.f32.mrb[114].mxu1 }
 0x5b7   :  { %v10556_v17 = vpop.eup %10555  ;;  %v6000_v3 = vrot.slane %v12655_v52, 4  ;;  %v6073_v57 = vsel %vm3518_vm5, %v6072_v47, %v12399_v54  ;;  %v6074_v19 = vrot.slane %v12456_v61, 6  ;;  %v6076_v32 = vrot.slane %v12655_v52, 5  ;;  %v3251_v13 = vpop.f32.mrb[115].mxu1 }
 0x5b8   :  { %v12707_v33 = vunpack.c.l.b16 %v12424_v15  ;;  %v3478_v4 = vpack.c.bf16 %v9565_v37, %v9564_v53  ;;  %v12711_v22 = vsel %vm3524_vm7, %v5757_v63, %v12539_v51  ;;  %v12715_v36 = vsel %vm3524_vm7, %v5833_v10, %v12549_v29 }
 0x5b9   :  { %v3477_v24 = vpack.c.bf16 %v3251_v13, %v3248_v7  ;;  %v12719_v54 = vsel %vm3524_vm7, %v5909_v2, %v12553_v1  ;;  %v12723_v47 = vsel %vm3524_vm7, %v6000_v3, %v12558_v23  ;;  %v6075_v25 = vsel %vm3521_vm6, %v6074_v19, %v6073_v57 }
 0x5ba   :  { %14505 = vst [vmem:[#allocation36_spill] sm:$0xff] %v12707_v33  ;;  %14506 = vst [vmem:[#allocation38_spill] sm:$0xff] %v12723_v47  ;;  %v12727_v9 = vunpack.c.h.b16 %v12424_v15  ;;  %v12730_v51 = vunpack.c.h.b16 %v12438_v55  ;;  %v12732_v53 = vunpack.c.l.b16 %v3478_v4  ;;  %v12735_v29 = vsel %vm3524_vm7, %v6076_v32, %v6075_v25  ;;  %v10190_v47 = vld [vmem:[#allocation2 + $0x20] sm:$0xff]  }
 0x5bb   :  { %14509 = vst [vmem:[#allocation37_spill] sm:$0xff] %v12735_v29  ;;  %v12737_v7 = vunpack.c.l.b16 %v3476_v62  ;;  %v12739_v1 = vunpack.c.h.b16 %v3476_v62  ;;  %v12741_v63 = vunpack.c.h.b16 %v3475_v20  ;;  %v3511_v23 = vunpack.c.l.b16 %v3477_v24  ;;  %v9568_v37 = vpop.f32.mrb[116].mxu1 }
 0x5bc   :  { %14507 = vst [vmem:[#allocation30_spill] sm:$0xff] %v12727_v9  ;;  %14508 = vst [vmem:[#allocation32_spill] sm:$0xff] %v12730_v51  ;;  %v4127_v10 = vunpack.c.h.b16 %v3477_v24  ;;  %v12744_v2 = vmul.f32 %v10556_v17, %v11991_v26  ;;  %v4762_v15 = vrot.slane %v12732_v53, 3  ;;  %v4838_v55 = vrot.slane %v12732_v53, 4  ;;  %v3264_v13 = vpop.f32.mrb[117].mxu1 }
 0x5bd   :  { %14510 = vst [vmem:[#allocation39_spill] sm:$0xff] %v12737_v7  ;;  %14511 = vst [vmem:[#allocation40_spill] sm:$0xff] %v12739_v1  ;;  %v3526_v3 = vrot.slane %v3511_v23, 4  ;;  %v3599_v57 = vrot.slane %v3511_v23, 3  ;;  %v3674_v19 = vrot.slane %v3511_v23, 5  ;;  %v3750_v32 = vrot.slane %v3511_v23, 6 }
 0x5be   :  { %14512 = vst [vmem:[#allocation42_spill] sm:$0xff] %v12741_v63  ;;  %v3826_v25 = vrot.slane %v3511_v23, 7  ;;  %v12750_v62 = vsel %vm3527_vm8, %v3511_v23, %v12586_v49  ;;  %v3979_v20 = vrot.slane %v3511_v23, 1  ;;  %v4055_v24 = vrot.slane %v3511_v23, 2  ;;  %v9569_v1 = vpop.f32.mrb[118].mxu1  ;;  %v2551_v26 = vpop.xlane.xlu1 %2550 }
 0x5bf   :  { %v12754_v17 = vsel %vm3527_vm8, %v3526_v3, %v12570_v6  ;;  %v12758_v9 = vsel %vm3527_vm8, %v3599_v57, %v12574_v59  ;;  %v12762_v48 = vsel %vm3527_vm8, %v3674_v19, %v12578_v16  ;;  %v12766_v49 = vsel %vm3527_vm8, %v3750_v32, %v12582_v28  ;;  %v3267_v23 = vpop.f32.mrb[119].mxu1 }
 0x5c0   :  { %v12768_v7 = vpack.c.bf16 %v9569_v1, %v9568_v37  ;;  %10557 = vrcp.f32 %v2551_v26  ;;  %v12772_v6 = vsel %vm3527_vm8, %v3826_v25, %v12566_v0  ;;  %v12776_v59 = vsel %vm3527_vm8, %v3979_v20, %v12590_v11 }
 0x5c1   :  { %v12778_v3 = vpack.c.bf16 %v3267_v23, %v3264_v13  ;;  %v12782_v16 = vsel %vm3527_vm8, %v4055_v24, %v12594_v14  ;;  %v4138_v28 = vrot.slane %v4127_v10, 3  ;;  %v4214_v57 = vrot.slane %v4127_v10, 4 }
 0x5c2   :  { %v4290_v1 = vrot.slane %v4127_v10, 5  ;;  %v4366_v37 = vrot.slane %v4127_v10, 6  ;;  %v4914_v19 = vrot.slane %v12732_v53, 5  ;;  %v4990_v32 = vrot.slane %v12732_v53, 6  ;;  %v2557_v25 = vpop.xlane.xlu1 %2556 }
 0x5c3   :  { %v12786_v0 = vunpack.c.h.b16 %v3478_v4  ;;  %v12790_v11 = vsel %vm3527_vm8, %v4138_v28, %v12602_v41  ;;  %v12794_v13 = vsel %vm3527_vm8, %v4214_v57, %v12606_v46  ;;  %10559 = vrcp.f32 %v2557_v25  ;;  %v14513_v28 = vld [vmem:[#allocation17_spill] sm:$0xff] }
 0x5c4   :  { %v12799_v20 = vsel %vm3527_vm8, %v4290_v1, %v12610_v18  ;;  %v12803_v4 = vsel %vm3527_vm8, %v4366_v37, %v12614_v42  ;;  %v4442_v24 = vrot.slane %v4127_v10, 7  ;;  %v12807_v41 = vsel %vm3527_vm8, %v4127_v10, %v12618_v21 }
 0x5c5   :  { %v4595_v26 = vrot.slane %v4127_v10, 1  ;;  %v4671_v23 = vrot.slane %v4127_v10, 2  ;;  %v12811_v46 = vsel %vm3527_vm8, %v4762_v15, %v12626_v45  ;;  %v12819_v42 = vsel %vm3527_vm8, %v4838_v55, %v12634_v31 }
 0x5c6   :  { %v12815_v18 = vsel %vm3527_vm8, %v4442_v24, %v14513_v28  ;;  %v12823_v57 = vsel %vm3527_vm8, %v4914_v19, %v12638_v5  ;;  %v12827_v21 = vsel %vm3527_vm8, %v4990_v32, %v12648_v40  ;;  %v2560_v10 = vpop.xlane.xlu0 %2559  ;;  %v2575_v45 = vpop.xlane.xlu1 %2574  ;;  %v5066_v31 = vrot.slane %v12732_v53, 7 }
 0x5c7   :  { %v12831_v15 = vsel %vm3527_vm8, %v4595_v26, %v12622_v34  ;;  %v12835_v1 = vsel %vm3527_vm8, %v4671_v23, %v12630_v8  ;;  %v12841_v5 = vsel %vm3527_vm8, %v12732_v53, %v12666_v60  ;;  %10561 = vrcp.f32 %v2560_v10  ;;  %v9580_v40 = vpop.f32.mrb[120].mxu0 }
 0x5c8   :  { %v5219_v55 = vrot.slane %v12732_v53, 1  ;;  %v5295_v37 = vrot.slane %v12732_v53, 2  ;;  %v5378_v34 = vrot.slane %v12786_v0, 3  ;;  %10563 = vrcp.f32 %v2575_v45  ;;  %v3337_v19 = vpop.f32.mrb[121].mxu0 }
 0x5c9   :  { %v12848_v8 = vsel %vm3527_vm8, %v5066_v31, %v12653_v56  ;;  %v5454_v32 = vrot.slane %v12786_v0, 4  ;;  %v5530_v25 = vrot.slane %v12786_v0, 5  ;;  %v9581_v24 = vpop.f32.mrb[122].mxu0  ;;  %v5606_v56 = vrot.slane %v12786_v0, 6  ;;  %v14514_v31 = vld [vmem:[#allocation6_spill] sm:$0xff] }
 0x5ca   :  { %v10558_v60 = vpop.eup %10557  ;;  %v12854_v26 = vsel %vm3527_vm8, %v5219_v55, %v12670_v50  ;;  %v12858_v53 = vsel %vm3527_vm8, %v5295_v37, %v12680_v30  ;;  %v12862_v23 = vsel %vm3527_vm8, %v5378_v34, %v12684_v35  ;;  %v3482_v28 = vpack.c.bf16 %v9581_v24, %v9580_v40  ;;  %v3340_v10 = vpop.f32.mrb[123].mxu0 }
 0x5cb   :  { %v2578_v45 = vpop.xlane.xlu0 %2577  ;;  %v2701_v14 = vmul.f32 %v10558_v60, %v14514_v31  ;;  %v12868_v33 = vsel %vm3527_vm8, %v5454_v32, %v12688_v43  ;;  %v12872_v50 = vsel %vm3527_vm8, %v5530_v25, %v12692_v12  ;;  %v3481_v30 = vpack.c.bf16 %v3340_v10, %v3337_v19  ;;  %v2581_v55 = vpop.xlane.xlu1 %2580 }
 0x5cc   :  { %10565 = vrcp.f32 %v2578_v45  ;;  %v12876_v35 = vsel %vm3527_vm8, %v5606_v56, %v12696_v44  ;;  %v5682_v40 = vrot.slane %v12786_v0, 7  ;;  %v12880_v37 = vunpack.c.l.b16 %v12768_v7  ;;  %v14517_v56 = vld [vmem:[#allocation5_spill] sm:$0xff] }
 0x5cd   :  { %v2739_v34 = vpack.c.bf16 %v12744_v2, %v2701_v14  ;;  %v10560_v12 = vpop.eup %10559  ;;  %v3512_v25 = vunpack.c.l.b16 %v3481_v30  ;;  %10567 = vrcp.f32 %v2581_v55  ;;  %v12892_v44 = vsel %vm3527_vm8, %v12786_v0, %v12711_v22 }
 0x5ce   :  { %14515 = vst [vmem:[#allocation41_spill] sm:$0xff] %v12880_v37  ;;  %v12887_v19 = vsel %vm3527_vm8, %v5682_v40, %v12676_v58  ;;  %v12895_v60 = vunpack.c.h.b16 %v12768_v7  ;;  %v12897_v2 = vunpack.c.l.b16 %v3482_v28  ;;  %v12899_v14 = vunpack.c.h.b16 %v3481_v30 }
 0x5cf   :  { %v2584_v24 = vpop.xlane.xlu0 %2583  ;;  %9582 = vmatprep.mubr.msk.bf16.mxu0 %vm2008_vm3, %v2739_v34  ;;  %v2703_v10 = vmul.f32 %v10560_v12, %v14517_v56  ;;  %v9596_v58 = vpop.f32.mrb[120].mxu1  ;;  %v3529_v45 = vrot.slane %v3512_v25, 3  ;;  %v3601_v31 = vrot.slane %v3512_v25, 2  ;;  %v3676_v55 = vrot.slane %v3512_v25, 4 }
 0x5d0   :  { %14516 = vst [vmem:[#allocation14_spill] sm:$0xff] %v12895_v60  ;;  %10569 = vrcp.f32 %v2584_v24  ;;  %v3426_v40 = vpop.f32.mrb[121].mxu1  ;;  %v3752_v22 = vrot.slane %v3512_v25, 5  ;;  %v3828_v32 = vrot.slane %v3512_v25, 6  ;;  %v3904_v7 = vrot.slane %v3512_v25, 7 }
 0x5d1   :  { %v3981_v43 = vsel %vm3530_vm9, %v3512_v25, %v12776_v59  ;;  %v10562_v30 = vpop.eup %10561  ;;  %v9597_v60 = vpop.f32.mrb[122].mxu1  ;;  %v3531_v34 = vsel %vm3530_vm9, %v3529_v45, %v12754_v17  ;;  %v3602_v12 = vsel %vm3530_vm9, %v3601_v31, %v12758_v9  ;;  %v3677_v24 = vsel %vm3530_vm9, %v3676_v55, %v12762_v48 }
 0x5d2   :  { %v4057_v56 = vrot.slane %v3512_v25, 1  ;;  %v10564_v37 = vpop.eup %10563  ;;  %v3486_v63 = vpack.c.bf16 %v9597_v60, %v9596_v58  ;;  %v3429_v51 = vpop.f32.mrb[123].mxu1  ;;  %v2704_v52 = vmul.f32 %v10562_v30, %v14518_v27  ;;  %v3753_v59 = vsel %vm3530_vm9, %v3752_v22, %v12766_v49 }
 0x5d3   :  { %v3829_v61 = vsel %vm3530_vm9, %v3828_v32, %v12772_v6  ;;  %v12917_v17 = vunpack.c.l.b16 %v12778_v3  ;;  %v3485_v45 = vpack.c.bf16 %v3429_v51, %v3426_v40  ;;  %v3905_v9 = vsel %vm3530_vm9, %v3904_v7, %v12750_v62  ;;  %v14520_v32 = vld [vmem:[#allocation33_spill] sm:$0xff] }
 0x5d4   :  { %v4058_v48 = vsel %vm3530_vm9, %v4057_v56, %v12782_v16  ;;  %v12924_v25 = vunpack.c.h.b16 %v12778_v3  ;;  %v12926_v27 = vunpack.c.h.b16 %v3482_v28  ;;  %v2740_v60 = vpack.c.bf16 %v2704_v52, %v2703_v10  ;;  %v14521_v16 = vld [vmem:[#allocation31_spill] sm:$0xff]  ;;  %v14523_v51 = vld [vmem:[#allocation9_spill] sm:$0xff] }
 0x5d5   :  { %v4140_v49 = vrot.slane %v12899_v14, 2  ;;  %v3513_v6 = vunpack.c.l.b16 %v3485_v45  ;;  %v2709_v31 = vmul.f32 %v10564_v37, %v14520_v32  ;;  %v12932_v62 = vunpack.c.h.b16 %v3485_v45 }
 0x5d6   :  { %14519 = vst [vmem:[#allocation44_spill] sm:$0xff] %v12924_v25  ;;  %v10566_v58 = vpop.eup %10565  ;;  %9583 = vmatmul.mubr.msk.bf16.gmra.mrb[124].mxu0 %vm2008_vm3, %v2740_v60  ;;  %v4216_v52 = vrot.slane %v12899_v14, 3  ;;  %v14522_v40 = vmov 0.0   ;;  %v4292_v30 = vrot.slane %v12899_v14, 4 }
 0x5d7   :  { %v2710_v3 = vmul.f32 %v10566_v58, %v14521_v16  ;;  %v4141_v28 = vsel %vm3530_vm9, %v4140_v49, %v12790_v11  ;;  %v10568_v10 = vpop.eup %10567  ;;  %9606 = vmatprep.mubr.msk.bf16.mxu0 %vm10600_vm11, %v14522_v40  ;;  %v3532_v37 = vrot.slane %v3513_v6, 2  ;;  %v3603_v22 = vrot.slane %v3513_v6, 1 }
 0x5d8   :  { %v3678_v7 = vrot.slane %v3513_v6, 3  ;;  %v3754_v45 = vrot.slane %v3513_v6, 4  ;;  %v3830_v60 = vrot.slane %v3513_v6, 5  ;;  %v3906_v32 = vrot.slane %v3513_v6, 6 }
 0x5d9   :  { %v2743_v56 = vpack.c.bf16 %v2710_v3, %v2709_v31  ;;  %v3534_v16 = vsel %vm3533_vm10, %v3532_v37, %v3531_v34  ;;  %v12944_v11 = vsel %vm3533_vm10, %v3603_v22, %v3602_v12  ;;  %v3982_v55 = vrot.slane %v3513_v6, 7 }
 0x5da   :  { %v10570_v58 = vpop.eup %10569  ;;  %v12947_v49 = vsel %vm3533_vm10, %v3678_v7, %v3677_v24  ;;  %v2711_v25 = vmul.f32 %v10568_v10, %v14523_v51  ;;  %v4368_v31 = vrot.slane %v12899_v14, 5  ;;  %v4444_v3 = vrot.slane %v12899_v14, 6 }
 0x5db   :  { %9598 = vmatprep.mubr.msk.bf16.mxu1 %vm2008_vm3, %v2743_v56  ;;  %v2712_v29 = vmul.f32 %v10570_v58, %v14524_v39  ;;  %v12955_v34 = vsel %vm3533_vm10, %v3754_v45, %v3753_v59  ;;  %v12958_v12 = vsel %vm3533_vm10, %v3830_v60, %v3829_v61  ;;  %v12961_v24 = vsel %vm3533_vm10, %v3906_v32, %v3905_v9 }
 0x5dc   :  { %v12964_v37 = vsel %vm3533_vm10, %v3982_v55, %v3981_v43  ;;  %v12966_v51 = vunpack.c.l.b16 %v3486_v63  ;;  %v3535_v10 = vpack.c.b16 %v3534_v16, %v3534_v16  ;;  %v4916_v22 = vrot.slane %v12897_v2, 4 }
 0x5dd   :  { %v2744_v39 = vpack.c.bf16 %v2712_v29, %v2711_v25  ;;  %v12969_v7 = vunpack.c.h.b16 %v3486_v63  ;;  %v12972_v59 = vsel %vm3533_vm10, %v3513_v6, %v4058_v48  ;;  %v4142_v61 = vrot.slane %v12932_v62, 1  ;;  %v10192_v25 = vld [vmem:[#allocation2 + $0x28] sm:$0xff]  }
 0x5de   :  { %v4217_v9 = vsel %vm3530_vm9, %v4216_v52, %v12794_v13  ;;  %9607 = vmatmul.mubr.msk.bf16.vlgmr.msra.gmra.mrb[128].mxu0 %vm782_vm2, %v3535_v10  ;;  %v3605_v29 = vpack.c.b16 %v12944_v11, %v12944_v11  ;;  %v4218_v43 = vrot.slane %v12932_v62, 2  ;;  %v4293_v63 = vsel %vm3530_vm9, %v4292_v30, %v12799_v20  ;;  %v10193_v11 = vld [vmem:[#allocation2 + $0x30] sm:$0xff]  }
 0x5df   :  { %9599 = vmatmul.mubr.msk.bf16.gmra.mrb[124].mxu1 %vm2008_vm3, %v2744_v39  ;;  %v4294_v48 = vrot.slane %v12932_v62, 3  ;;  %9619 = vmatpush3.bf16.msra.mxu0 %v10190_v47  ;;  %v12988_v13 = vsel %vm3533_vm10, %v4142_v61, %v4141_v28  ;;  %v4369_v6 = vsel %vm3530_vm9, %v4368_v31, %v12803_v4  ;;  %v4370_v55 = vrot.slane %v12932_v62, 4 }
 0x5e0   :  { %9614 = vmatprep.mubr.msk.bf16.mxu1 %vm10600_vm11, %v14522_v40  ;;  %v4445_v52 = vsel %vm3530_vm9, %v4444_v3, %v12815_v18  ;;  %9620 = vmatprep.subr.bf16.mxu0 %v14522_v40  ;;  %v3680_v47 = vpack.c.b16 %v12947_v49, %v12947_v49  ;;  %v13001_v20 = vsel %vm3533_vm10, %v4218_v43, %v4217_v9  ;;  %v4446_v4 = vrot.slane %v12932_v62, 5  ;;  %v10194_v49 = vld [vmem:[#allocation2 + $0x40] sm:$0xff]  }
 0x5e1   :  { %9622 = vmatprep.mubr.msk.bf16.mxu0 %vm10600_vm11, %v14522_v40  ;;  %v13004_v28 = vsel %vm3533_vm10, %v4294_v48, %v4293_v63  ;;  %v3756_v30 = vpack.c.b16 %v12955_v34, %v12955_v34  ;;  %v3832_v18 = vpack.c.b16 %v12958_v12, %v12958_v12  ;;  %v13012_v56 = vsel %vm3533_vm10, %v4370_v55, %v4369_v6  ;;  %v10199_v34 = vld [vmem:[#allocation2 + $0x58] sm:$0xff]  }
 0x5e2   :  { %v4520_v45 = vrot.slane %v12899_v14, 7  ;;  %v3908_v60 = vpack.c.b16 %v12961_v24, %v12961_v24  ;;  %v13018_v32 = vsel %vm3533_vm10, %v4446_v4, %v4445_v52  ;;  %v4522_v58 = vrot.slane %v12932_v62, 6  ;;  %v10196_v4 = vld [vmem:[#allocation2 + $0x48] sm:$0xff]   ;;  %v10203_v24 = vld [vmem:[#allocation2 + $0x78] sm:$0xff]  }
 0x5e3   :  { %v4597_v16 = vsel %vm3530_vm9, %v12899_v14, %v12831_v15  ;;  %9621 = vmatpush3.bf16.msra.mxu0 %v10192_v25  ;;  %v3984_v31 = vpack.c.b16 %v12964_v37, %v12964_v37  ;;  %v4598_v39 = vrot.slane %v12932_v62, 7  ;;  %v4673_v10 = vrot.slane %v12899_v14, 1 }
 0x5e4   :  { %v4521_v3 = vsel %vm3530_vm9, %v4520_v45, %v12807_v41  ;;  %9634 = vmatprep.subr.bf16.mxu0 %v14522_v40  ;;  %v14525_v15 = vrot.slane %v12897_v2, 2  ;;  %v4766_v43 = vrot.slane %v12966_v51, 1  ;;  %v14526_v63 = vrot.slane %v12897_v2, 3 }
 0x5e5   :  { %v13032_v61 = vsel %vm3533_vm10, %v4522_v58, %v4521_v3  ;;  %v4060_v14 = vpack.c.b16 %v12972_v59, %v12972_v59  ;;  %v13046_v48 = vsel %vm3533_vm10, %v4598_v39, %v4597_v16  ;;  %v4674_v25 = vsel %vm3530_vm9, %v4673_v10, %v12835_v1  ;;  %v10195_v1 = vld [vmem:[#allocation2 + $0x38] sm:$0xff]  }
 0x5e6   :  { %v4765_v9 = vsel %vm3530_vm9, %v14525_v15, %v12811_v46  ;;  %v4841_v41 = vsel %vm3530_vm9, %v14526_v63, %v12819_v42  ;;  %v4842_v6 = vrot.slane %v12966_v51, 2  ;;  %9623 = vmatmul.mubr.msk.bf16.vlgmr.msra.gmra.mrb[132].mxu0 %vm782_vm2, %v3680_v47  ;;  %v4144_v46 = vpack.c.b16 %v12988_v13, %v12988_v13  ;;  %v10197_v63 = vld [vmem:[#allocation2 + $0x50] sm:$0xff]   ;;  %v10207_v59 = vld [vmem:[#allocation2 + $0x98] sm:$0xff]  }
 0x5e7   :  { %9615 = vmatmul.mubr.msk.bf16.vlgmr.msra.gmra.mrb[128].mxu1 %vm782_vm2, %v3605_v29  ;;  %v13057_v42 = vsel %vm3533_vm10, %v12932_v62, %v4674_v25  ;;  %v13060_v55 = vsel %vm3533_vm10, %v4766_v43, %v4765_v9  ;;  %v4918_v52 = vrot.slane %v12966_v51, 3  ;;  %9635 = vmatpush3.bf16.msra.mxu0 %v10194_v49  ;;  %v4220_v29 = vpack.c.b16 %v13001_v20, %v13001_v20 }
 0x5e8   :  { %9627 = vmatpush3.bf16.msra.mxu1 %v10193_v11  ;;  %v4296_v47 = vpack.c.b16 %v13004_v28, %v13004_v28  ;;  %v13068_v45 = vsel %vm3533_vm10, %v4842_v6, %v4841_v41  ;;  %v4992_v62 = vrot.slane %v12897_v2, 5  ;;  %9636 = vmatprep.subr.bf16.mxu0 %v14522_v40  ;;  %v4372_v58 = vpack.c.b16 %v13012_v56, %v13012_v56  ;;  %v10198_v41 = vld [vmem:[#allocation2 + $0x60] sm:$0xff]   ;;  %v14542_v28 = vld [vmem:[#allocation32_spill] sm:$0xff]  ;;  %v10216_v56 = vld [vmem:[#allocation2 + $0xe8] sm:$0xff]  }
 0x5e9   :  { %9628 = vmatprep.subr.bf16.mxu1 %v14522_v40  ;;  %v4917_v16 = vsel %vm3530_vm9, %v4916_v22, %v12823_v57  ;;  %v4994_v11 = vrot.slane %v12966_v51, 4  ;;  %v5068_v49 = vrot.slane %v12897_v2, 6  ;;  %9630 = vmatprep.mubr.msk.bf16.mxu1 %vm10600_vm11, %v14522_v40  ;;  %v5070_v10 = vrot.slane %v12966_v51, 5 }
 0x5ea   :  { %9638 = vmatprep.mubr.msk.bf16.mxu0 %vm10600_vm11, %v14522_v40  ;;  %v13086_v3 = vsel %vm3533_vm10, %v4918_v52, %v4917_v16  ;;  %v4993_v39 = vsel %vm3530_vm9, %v4992_v62, %v12827_v21  ;;  %v5144_v57 = vrot.slane %v12897_v2, 7  ;;  %v4448_v22 = vpack.c.b16 %v13018_v32, %v13018_v32 }
 0x5eb   :  { %v13095_v15 = vsel %vm3533_vm10, %v4994_v11, %v4993_v39  ;;  %v5069_v9 = vsel %vm3530_vm9, %v5068_v49, %v12848_v8  ;;  %v5146_v43 = vrot.slane %v12966_v51, 6  ;;  %9637 = vmatpush3.bf16.msra.mxu0 %v10196_v4  ;;  %v4524_v21 = vpack.c.b16 %v13032_v61, %v13032_v61  ;;  %v10220_v61 = vld [vmem:[#allocation2 + $0x108] sm:$0xff]  }
 0x5ec   :  { %9629 = vmatpush3.bf16.msra.mxu1 %v10195_v1  ;;  %v13103_v25 = vsel %vm3533_vm10, %v5070_v10, %v5069_v9  ;;  %v5145_v6 = vsel %vm3530_vm9, %v5144_v57, %v12841_v5  ;;  %v5222_v52 = vrot.slane %v12966_v51, 7  ;;  %9650 = vmatprep.subr.bf16.mxu0 %v14522_v40  ;;  %v4600_v8 = vpack.c.b16 %v13046_v48, %v13046_v48  ;;  %v10200_v57 = vld [vmem:[#allocation2 + $0x68] sm:$0xff]  }
 0x5ed   :  { %9642 = vmatprep.subr.bf16.mxu1 %v14522_v40  ;;  %v13113_v1 = vsel %vm3533_vm10, %v5146_v43, %v5145_v6  ;;  %v5221_v4 = vsel %vm3530_vm9, %v12897_v2, %v12854_v26  ;;  %v5297_v62 = vrot.slane %v12897_v2, 1  ;;  %v4676_v5 = vpack.c.b16 %v13057_v42, %v13057_v42  ;;  %v10224_v42 = vld [vmem:[#allocation2 + $0x128] sm:$0xff]  }
 0x5ee   :  { %v13122_v16 = vsel %vm3533_vm10, %v5222_v52, %v5221_v4  ;;  %v5380_v11 = vrot.slane %v12926_v27, 2  ;;  %v5382_v49 = vrot.slane %v12969_v7, 1  ;;  %9639 = vmatmul.mubr.msk.bf16.vlgmr.msra.gmra.mrb[136].mxu0 %vm782_vm2, %v3832_v18  ;;  %v4768_v26 = vpack.c.b16 %v13060_v55, %v13060_v55 }
 0x5ef   :  { %9631 = vmatmul.mubr.msk.bf16.vlgmr.msra.gmra.mrb[132].mxu1 %vm782_vm2, %v3756_v30  ;;  %v5298_v2 = vsel %vm3530_vm9, %v5297_v62, %v12858_v53  ;;  %v5456_v39 = vrot.slane %v12926_v27, 3  ;;  %v5458_v10 = vrot.slane %v12969_v7, 2  ;;  %9651 = vmatpush3.bf16.msra.mxu0 %v10198_v41  ;;  %v5532_v18 = vrot.slane %v12926_v27, 4 }
 0x5f0   :  { %9643 = vmatpush3.bf16.msra.mxu1 %v10197_v63  ;;  %v13142_v30 = vsel %vm3533_vm10, %v12966_v51, %v5298_v2  ;;  %v5381_v12 = vsel %vm3530_vm9, %v5380_v11, %v12862_v23  ;;  %v5534_v9 = vrot.slane %v12969_v7, 3  ;;  %9652 = vmatprep.subr.bf16.mxu0 %v14522_v40  ;;  %v4844_v53 = vpack.c.b16 %v13068_v45, %v13068_v45  ;;  %v10202_v2 = vld [vmem:[#allocation2 + $0x80] sm:$0xff]   ;;  %v10227_v45 = vld [vmem:[#allocation2 + $0x138] sm:$0xff]  }
 0x5f1   :  { %9644 = vmatprep.subr.bf16.mxu1 %v14522_v40  ;;  %v13153_v43 = vsel %vm3533_vm10, %v5382_v49, %v5381_v12  ;;  %v5457_v51 = vsel %vm3530_vm9, %v5456_v39, %v12868_v33  ;;  %v5608_v63 = vrot.slane %v12926_v27, 5  ;;  %9646 = vmatprep.mubr.msk.bf16.mxu1 %vm10600_vm11, %v14522_v40  ;;  %v4920_v23 = vpack.c.b16 %v13086_v3, %v13086_v3  ;;  %v10201_v49 = vld [vmem:[#allocation2 + $0x70] sm:$0xff]  }
 0x5f2   :  { %9654 = vmatprep.mubr.msk.bf16.mxu0 %vm10600_vm11, %v14522_v40  ;;  %v13165_v41 = vsel %vm3533_vm10, %v5458_v10, %v5457_v51  ;;  %v5533_v6 = vsel %vm3530_vm9, %v5532_v18, %v12872_v50  ;;  %v5610_v52 = vrot.slane %v12969_v7, 4  ;;  %v5684_v11 = vrot.slane %v12926_v27, 6 }
 0x5f3   :  { %v13173_v4 = vsel %vm3533_vm10, %v5534_v9, %v5533_v6  ;;  %v5609_v62 = vsel %vm3530_vm9, %v5608_v63, %v12876_v35  ;;  %9653 = vmatpush3.bf16.msra.mxu0 %v10200_v57  ;;  %v5686_v10 = vrot.slane %v12969_v7, 5  ;;  %v5760_v12 = vrot.slane %v12926_v27, 7 }
 0x5f4   :  { %9645 = vmatpush3.bf16.msra.mxu1 %v10199_v34  ;;  %v13181_v39 = vsel %vm3533_vm10, %v5610_v52, %v5609_v62  ;;  %9666 = vmatprep.subr.bf16.mxu0 %v14522_v40  ;;  %v5685_v34 = vsel %vm3530_vm9, %v5684_v11, %v12887_v19  ;;  %v5762_v57 = vrot.slane %v12969_v7, 6  ;;  %v5835_v18 = vrot.slane %v12786_v0, 1 }
 0x5f5   :  { %9658 = vmatprep.subr.bf16.mxu1 %v14522_v40  ;;  %v13194_v9 = vsel %vm3533_vm10, %v5686_v10, %v5685_v34  ;;  %v5761_v51 = vsel %vm3530_vm9, %v5760_v12, %v12892_v44  ;;  %v5838_v63 = vrot.slane %v12969_v7, 7  ;;  %v5911_v6 = vrot.slane %v12786_v0, 2  ;;  %v14527_v10 = vld [vmem:[#allocation21_spill] sm:$0xff] }
 0x5f6   :  { %9655 = vmatmul.mubr.msk.bf16.vlgmr.msra.gmra.mrb[140].mxu0 %vm782_vm2, %v3984_v31  ;;  %v13211_v52 = vsel %vm3533_vm10, %v5762_v57, %v5761_v51  ;;  %v5836_v44 = vsel %vm3527_vm8, %v5835_v18, %v12715_v36  ;;  %v5913_v0 = vrot.slane %v12926_v27, 1  ;;  %v6002_v11 = vrot.slane %v12917_v17, 3  ;;  %v14530_v18 = vld [vmem:[#allocation38_spill] sm:$0xff] }
 0x5f7   :  { %9647 = vmatmul.mubr.msk.bf16.vlgmr.msra.gmra.mrb[136].mxu1 %vm782_vm2, %v3908_v60  ;;  %9667 = vmatpush3.bf16.msra.mxu0 %v10202_v2  ;;  %v10204_v60 = vld [vmem:[#allocation2 + $0x88] sm:$0xff]   ;;  %v5837_v31 = vsel %vm3530_vm9, %v12926_v27, %v5836_v44  ;;  %v5912_v62 = vsel %vm3527_vm8, %v5911_v6, %v12719_v54  ;;  %v6078_v2 = vrot.slane %v12917_v17, 4  ;;  %v14528_v12 = vrot.slane %v14527_v10, 2  ;;  %v14531_v44 = vld [vmem:[#allocation37_spill] sm:$0xff]  ;;  %v14535_v6 = vld [vmem:[#allocation28_spill] sm:$0xff] }
 0x5f8   :  { %9659 = vmatpush3.bf16.msra.mxu1 %v10201_v49  ;;  %9668 = vmatprep.subr.bf16.mxu0 %v14522_v40  ;;  %v13226_v36 = vsel %vm3533_vm10, %v5838_v63, %v5837_v31  ;;  %v5914_v49 = vsel %vm3530_vm9, %v5913_v0, %v5912_v62  ;;  %v14529_v27 = vrot.slane %v12310_v38, 1  ;;  %v13247_v51 = vsel %vm3527_vm8, %v6002_v11, %v14530_v18  ;;  %v14532_v31 = vld [vmem:[#allocation11_spill] sm:$0xff]  ;;  %v14533_v11 = vld [vmem:[#allocation24_spill] sm:$0xff] }
 0x5f9   :  { %9660 = vmatprep.subr.bf16.mxu1 %v14522_v40  ;;  %9662 = vmatprep.mubr.msk.bf16.mxu1 %vm10600_vm11, %v14522_v40  ;;  %v13243_v57 = vsel %vm3533_vm10, %v12969_v7, %v5914_v49  ;;  %v6154_v63 = vrot.slane %v12917_v17, 5  ;;  %v13254_v0 = vsel %vm3527_vm8, %v6078_v2, %v14531_v44  ;;  %v10205_v7 = vld [vmem:[#allocation2 + $0x90] sm:$0xff]   ;;  %v10206_v49 = vld [vmem:[#allocation2 + $0xa0] sm:$0xff]   ;;  %v6225_v54 = vrot.slane %v14532_v31, 1 }
 0x5fa   :  { %v6148_v34 = vsel %vm3515_vm4, %v14529_v27, %v14528_v12  ;;  %9670 = vmatprep.mubr.msk.bf16.mxu0 %vm10600_vm11, %v14522_v40  ;;  %v6223_v12 = vrot.slane %v12310_v38, 2  ;;  %v14534_v27 = vrot.slane %v14533_v11, 7  ;;  %v6228_v37 = vrot.slane %v14535_v6, 7 }
 0x5fb   :  { %v6149_v62 = vsel %vm3518_vm5, %v14532_v31, %v6148_v34  ;;  %9669 = vmatpush3.bf16.msra.mxu0 %v10204_v60  ;;  %v6230_v2 = vrot.slane %v12917_v17, 6  ;;  %v14536_v34 = vrot.slane %v14535_v6, 6  ;;  %v14537_v60 = vrot.slane %v14527_v10, 3 }
 0x5fc   :  { %9661 = vmatpush3.bf16.msra.mxu1 %v10203_v24  ;;  %v6151_v18 = vsel %vm3521_vm6, %v14534_v27, %v6149_v62  ;;  %9682 = vmatprep.subr.bf16.mxu0 %v14522_v40  ;;  %v6299_v62 = vrot.slane %v12310_v38, 3  ;;  %v6301_v27 = vrot.slane %v14532_v31, 2  ;;  %v6303_v50 = vrot.slane %v14533_v11, 1 }
 0x5fd   :  { %9674 = vmatprep.subr.bf16.mxu1 %v14522_v40  ;;  %v6153_v24 = vsel %vm3524_vm7, %v14536_v34, %v6151_v18  ;;  %v6224_v44 = vsel %vm3515_vm4, %v6223_v12, %v14537_v60  ;;  %v6306_v33 = vrot.slane %v12917_v17, 7  ;;  %v14538_v12 = vrot.slane %v14527_v10, 4 }
 0x5fe   :  { %v13276_v19 = vsel %vm3527_vm8, %v6154_v63, %v6153_v24  ;;  %v6226_v35 = vsel %vm3518_vm5, %v6225_v54, %v6224_v44  ;;  %9671 = vmatmul.mubr.msk.bf16.vlgmr.msra.gmra.mrb[144].mxu0 %vm782_vm2, %v4144_v46  ;;  %v6375_v18 = vrot.slane %v12310_v38, 4  ;;  %v6377_v34 = vrot.slane %v14532_v31, 3 }
 0x5ff   :  { %9663 = vmatmul.mubr.msk.bf16.vlgmr.msra.gmra.mrb[140].mxu1 %vm782_vm2, %v4060_v14  ;;  %v6227_v63 = vsel %vm3521_vm6, %v14533_v11, %v6226_v35  ;;  %v6300_v54 = vsel %vm3515_vm4, %v6299_v62, %v14538_v12  ;;  %9683 = vmatpush3.bf16.msra.mxu0 %v10206_v49  ;;  %v10208_v14 = vld [vmem:[#allocation2 + $0xa8] sm:$0xff]   ;;  %v6379_v46 = vrot.slane %v14533_v11, 2  ;;  %v6381_v35 = vrot.slane %v14535_v6, 1 }
 0x600   :  { %9675 = vmatpush3.bf16.msra.mxu1 %v10205_v7  ;;  %v6229_v24 = vsel %vm3524_vm7, %v6228_v37, %v6227_v63  ;;  %v6302_v13 = vsel %vm3518_vm5, %v6301_v27, %v6300_v54  ;;  %9684 = vmatprep.subr.bf16.mxu0 %v14522_v40  ;;  %v14539_v49 = vrot.slane %v14527_v10, 5  ;;  %v6450_v37 = vrot.slane %v14527_v10, 6 }
 0x601   :  { %9676 = vmatprep.subr.bf16.mxu1 %v14522_v40  ;;  %v13303_v60 = vsel %vm3527_vm8, %v6230_v2, %v6229_v24  ;;  %v6304_v7 = vsel %vm3521_vm6, %v6303_v50, %v6302_v13  ;;  %9678 = vmatprep.mubr.msk.bf16.mxu1 %vm10600_vm11, %v14522_v40  ;;  %v6451_v27 = vrot.slane %v12310_v38, 5  ;;  %v6453_v50 = vrot.slane %v14532_v31, 4  ;;  %v10209_v24 = vld [vmem:[#allocation2 + $0xb0] sm:$0xff]   ;;  %v10210_v13 = vld [vmem:[#allocation2 + $0xc0] sm:$0xff]  }
 0x602   :  { %v6376_v44 = vsel %vm3515_vm4, %v6375_v18, %v14539_v49  ;;  %9686 = vmatprep.mubr.msk.bf16.mxu0 %vm10600_vm11, %v14522_v40  ;;  %v6305_v62 = vsel %vm3524_vm7, %v14535_v6, %v6304_v7  ;;  %v6455_v54 = vrot.slane %v14533_v11, 3  ;;  %v6457_v18 = vrot.slane %v14535_v6, 2 }
 0x603   :  { %v6378_v2 = vsel %vm3518_vm5, %v6377_v34, %v6376_v44  ;;  %v13320_v63 = vsel %vm3527_vm8, %v6306_v33, %v6305_v62  ;;  %9685 = vmatpush3.bf16.msra.mxu0 %v10208_v14  ;;  %v6452_v34 = vsel %vm3515_vm4, %v6451_v27, %v6450_v37  ;;  %v6459_v49 = vrot.slane %v12917_v17, 1  ;;  %v14541_v27 = vld [vmem:[#allocation20_spill] sm:$0xff] }
 0x604   :  { %v6380_v12 = vsel %vm3521_vm6, %v6379_v46, %v6378_v2  ;;  %9677 = vmatpush3.bf16.msra.mxu1 %v10207_v59  ;;  %v6526_v44 = vrot.slane %v14527_v10, 7  ;;  %9698 = vmatprep.subr.bf16.mxu0 %v14522_v40  ;;  %v6454_v59 = vsel %vm3518_vm5, %v6453_v50, %v6452_v34  ;;  %v6527_v14 = vrot.slane %v12310_v38, 6  ;;  %v14540_v2 = vld [vmem:[#allocation22_spill] sm:$0xff] }
 0x605   :  { %v6382_v7 = vsel %vm3524_vm7, %v6381_v35, %v6380_v12  ;;  %9690 = vmatprep.subr.bf16.mxu1 %v14522_v40  ;;  %v6529_v46 = vrot.slane %v14532_v31, 5  ;;  %v6456_v35 = vsel %vm3521_vm6, %v6455_v54, %v6454_v59  ;;  %v6531_v37 = vrot.slane %v14533_v11, 4  ;;  %v10212_v50 = vld [vmem:[#allocation2 + $0xc8] sm:$0xff]  }
 0x606   :  { %v13333_v33 = vsel %vm3527_vm8, %v12917_v17, %v6382_v7  ;;  %v6533_v10 = vrot.slane %v14535_v6, 3  ;;  %v6535_v62 = vrot.slane %v12917_v17, 2  ;;  %9687 = vmatmul.mubr.msk.bf16.vlgmr.msra.gmra.mrb[148].mxu0 %vm782_vm2, %v4296_v47  ;;  %v6458_v38 = vsel %vm3524_vm7, %v6457_v18, %v6456_v35  ;;  %v10211_v17 = vld [vmem:[#allocation2 + $0xb8] sm:$0xff]   ;;  %v14543_v47 = vld [vmem:[#allocation42_spill] sm:$0xff] }
 0x607   :  { %9679 = vmatmul.mubr.msk.bf16.vlgmr.msra.gmra.mrb[144].mxu1 %vm782_vm2, %v4220_v29  ;;  %v6528_v31 = vsel %vm3515_vm4, %v6527_v14, %v6526_v44  ;;  %v6610_v11 = vrot.slane %v14540_v2, 7  ;;  %v6612_v6 = vrot.slane %v14541_v27, 6  ;;  %9699 = vmatpush3.bf16.msra.mxu0 %v10210_v13  ;;  %v13355_v20 = vsel %vm3527_vm8, %v6459_v49, %v6458_v38  ;;  %v14544_v7 = vld [vmem:[#allocation8_spill] sm:$0xff] }
 0x608   :  { %9691 = vmatpush3.bf16.msra.mxu1 %v10209_v24  ;;  %v6530_v29 = vsel %vm3518_vm5, %v6529_v46, %v6528_v31  ;;  %v6614_v12 = vrot.slane %v14542_v28, 5  ;;  %v6616_v54 = vrot.slane %v14543_v47, 4  ;;  %9700 = vmatprep.subr.bf16.mxu0 %v14522_v40  ;;  %v14545_v13 = vld [vmem:[#allocation44_spill] sm:$0xff]  ;;  %v6686_v49 = vrot.slane %v14544_v7, 1 }
 0x609   :  { %9692 = vmatprep.subr.bf16.mxu1 %v14522_v40  ;;  %v6532_v18 = vsel %vm3521_vm6, %v6531_v37, %v6530_v29  ;;  %v6611_v24 = vsel %vm3515_vm4, %v6610_v11, %v14544_v7  ;;  %v6618_v34 = vrot.slane %v14545_v13, 3  ;;  %9694 = vmatprep.mubr.msk.bf16.mxu1 %vm10600_vm11, %v14522_v40  ;;  %v6688_v14 = vrot.slane %v14541_v27, 7  ;;  %v10213_v11 = vld [vmem:[#allocation2 + $0xd0] sm:$0xff]  }
 0x60a   :  { %9702 = vmatprep.mubr.msk.bf16.mxu0 %vm10600_vm11, %v14522_v40  ;;  %v6534_v44 = vsel %vm3524_vm7, %v6533_v10, %v6532_v18  ;;  %v6613_v59 = vsel %vm3518_vm5, %v6612_v6, %v6611_v24  ;;  %v6690_v46 = vrot.slane %v14542_v28, 6  ;;  %v6687_v38 = vsel %vm3515_vm4, %v14540_v2, %v6686_v49  ;;  %v10214_v10 = vld [vmem:[#allocation2 + $0xe0] sm:$0xff]  }
 0x60b   :  { %v13376_v35 = vsel %vm3527_vm8, %v6535_v62, %v6534_v44  ;;  %v6615_v37 = vsel %vm3521_vm6, %v6614_v12, %v6613_v59  ;;  %v6692_v31 = vrot.slane %v14543_v47, 5  ;;  %9701 = vmatpush3.bf16.msra.mxu0 %v10212_v50  ;;  %v6689_v29 = vsel %vm3518_vm5, %v6688_v14, %v6687_v38  ;;  %v10215_v38 = vld [vmem:[#allocation2 + $0xd8] sm:$0xff]  }
 0x60c   :  { %9693 = vmatpush3.bf16.msra.mxu1 %v10211_v17  ;;  %v6617_v6 = vsel %vm3524_vm7, %v6616_v54, %v6615_v37  ;;  %v6694_v18 = vrot.slane %v14545_v13, 4  ;;  %v6762_v62 = vrot.slane %v14544_v7, 2  ;;  %9714 = vmatprep.subr.bf16.mxu0 %v14522_v40  ;;  %v6691_v17 = vsel %vm3521_vm6, %v6690_v46, %v6689_v29 }
 0x60d   :  { %9706 = vmatprep.subr.bf16.mxu1 %v14522_v40  ;;  %v13389_v12 = vsel %vm3527_vm8, %v6618_v34, %v6617_v6  ;;  %v6763_v50 = vrot.slane %v14540_v2, 1  ;;  %v6766_v24 = vrot.slane %v14542_v28, 7  ;;  %v6693_v54 = vsel %vm3524_vm7, %v6692_v31, %v6691_v17 }
 0x60e   :  { %v6768_v49 = vrot.slane %v14543_v47, 6  ;;  %v6770_v44 = vrot.slane %v14545_v13, 5  ;;  %v6838_v59 = vrot.slane %v14544_v7, 3  ;;  %9703 = vmatmul.mubr.msk.bf16.vlgmr.msra.gmra.mrb[152].mxu0 %vm782_vm2, %v4448_v22  ;;  %v13407_v34 = vsel %vm3527_vm8, %v6694_v18, %v6693_v54 }
 0x60f   :  { %9695 = vmatmul.mubr.msk.bf16.vlgmr.msra.gmra.mrb[148].mxu1 %vm782_vm2, %v4372_v58  ;;  %v6764_v14 = vsel %vm3515_vm4, %v6763_v50, %v6762_v62  ;;  %v6839_v46 = vrot.slane %v14540_v2, 2  ;;  %v6841_v37 = vrot.slane %v14541_v27, 1  ;;  %9715 = vmatpush3.bf16.msra.mxu0 %v10214_v10  ;;  %v6844_v32 = vrot.slane %v14543_v47, 7 }
 0x610   :  { %9707 = vmatpush3.bf16.msra.mxu1 %v10213_v11  ;;  %v6765_v58 = vsel %vm3518_vm5, %v14541_v27, %v6764_v14  ;;  %v6846_v22 = vrot.slane %v14545_v13, 6  ;;  %v6914_v31 = vrot.slane %v14544_v7, 4  ;;  %9716 = vmatprep.subr.bf16.mxu0 %v14522_v40  ;;  %v6915_v10 = vrot.slane %v14540_v2, 3 }
 0x611   :  { %9708 = vmatprep.subr.bf16.mxu1 %v14522_v40  ;;  %v6767_v6 = vsel %vm3521_vm6, %v6766_v24, %v6765_v58  ;;  %v6840_v11 = vsel %vm3515_vm4, %v6839_v46, %v6838_v59  ;;  %v6917_v29 = vrot.slane %v14541_v27, 2  ;;  %9710 = vmatprep.mubr.msk.bf16.mxu1 %vm10600_vm11, %v14522_v40  ;;  %v6919_v17 = vrot.slane %v14542_v28, 1  ;;  %v10217_v46 = vld [vmem:[#allocation2 + $0xf0] sm:$0xff]  }
 0x612   :  { %9718 = vmatprep.mubr.msk.bf16.mxu0 %vm10600_vm11, %v14522_v40  ;;  %v6769_v18 = vsel %vm3524_vm7, %v6768_v49, %v6767_v6  ;;  %v6842_v62 = vsel %vm3518_vm5, %v6841_v37, %v6840_v11  ;;  %v6922_v50 = vrot.slane %v14545_v13, 7  ;;  %v6916_v59 = vsel %vm3515_vm4, %v6915_v10, %v6914_v31  ;;  %v10218_v49 = vld [vmem:[#allocation2 + $0x100] sm:$0xff]  }
 0x613   :  { %v13432_v24 = vsel %vm3527_vm8, %v6770_v44, %v6769_v18  ;;  %v6843_v54 = vsel %vm3521_vm6, %v14542_v28, %v6842_v62  ;;  %v6990_v14 = vrot.slane %v14544_v7, 5  ;;  %9717 = vmatpush3.bf16.msra.mxu0 %v10216_v56  ;;  %v6918_v58 = vsel %vm3518_vm5, %v6917_v29, %v6916_v59  ;;  %v10219_v59 = vld [vmem:[#allocation2 + $0xf8] sm:$0xff]  }
 0x614   :  { %9709 = vmatpush3.bf16.msra.mxu1 %v10215_v38  ;;  %v6845_v37 = vsel %vm3524_vm7, %v6844_v32, %v6843_v54  ;;  %v6991_v6 = vrot.slane %v14540_v2, 4  ;;  %v6993_v44 = vrot.slane %v14541_v27, 3  ;;  %9730 = vmatprep.subr.bf16.mxu0 %v14522_v40  ;;  %v6920_v38 = vsel %vm3521_vm6, %v6919_v17, %v6918_v58 }
 0x615   :  { %9722 = vmatprep.subr.bf16.mxu1 %v14522_v40  ;;  %v13445_v31 = vsel %vm3527_vm8, %v6846_v22, %v6845_v37  ;;  %v6995_v56 = vrot.slane %v14542_v28, 2  ;;  %v6997_v11 = vrot.slane %v14543_v47, 1  ;;  %v6921_v32 = vsel %vm3524_vm7, %v14543_v47, %v6920_v38 }
 0x616   :  { %v6992_v10 = vsel %vm3515_vm4, %v6991_v6, %v6990_v14  ;;  %v7066_v29 = vrot.slane %v14544_v7, 6  ;;  %v7067_v18 = vrot.slane %v14540_v2, 5  ;;  %9719 = vmatmul.mubr.msk.bf16.vlgmr.msra.gmra.mrb[156].mxu0 %vm782_vm2, %v4600_v8  ;;  %v13464_v22 = vsel %vm3527_vm8, %v6922_v50, %v6921_v32  ;;  %v10221_v32 = vld [vmem:[#allocation2 + $0x110] sm:$0xff]  }
 0x617   :  { %9711 = vmatmul.mubr.msk.bf16.vlgmr.msra.gmra.mrb[152].mxu1 %vm782_vm2, %v4524_v21  ;;  %v6994_v62 = vsel %vm3518_vm5, %v6993_v44, %v6992_v10  ;;  %v7069_v17 = vrot.slane %v14541_v27, 4  ;;  %v7071_v54 = vrot.slane %v14542_v28, 3  ;;  %9731 = vmatpush3.bf16.msra.mxu0 %v10218_v49  ;;  %v7073_v48 = vrot.slane %v14543_v47, 2  ;;  %v10222_v10 = vld [vmem:[#allocation2 + $0x120] sm:$0xff]  }
 0x618   :  { %9723 = vmatpush3.bf16.msra.mxu1 %v10217_v46  ;;  %v6996_v21 = vsel %vm3521_vm6, %v6995_v56, %v6994_v62  ;;  %v7068_v14 = vsel %vm3515_vm4, %v7067_v18, %v7066_v29  ;;  %v7075_v8 = vrot.slane %v14545_v13, 1  ;;  %9732 = vmatprep.subr.bf16.mxu0 %v14522_v40  ;;  %v7142_v46 = vrot.slane %v14544_v7, 7 }
 0x619   :  { %9724 = vmatprep.subr.bf16.mxu1 %v14522_v40  ;;  %v6998_v50 = vsel %vm3524_vm7, %v6997_v11, %v6996_v21  ;;  %v7070_v37 = vsel %vm3518_vm5, %v7069_v17, %v7068_v14  ;;  %v7143_v49 = vrot.slane %v14540_v2, 6  ;;  %9726 = vmatprep.mubr.msk.bf16.mxu1 %vm10600_vm11, %v14522_v40  ;;  %v7145_v44 = vrot.slane %v14541_v27, 5  ;;  %v14546_v27 = vld [vmem:[#allocation18_spill] sm:$0xff]  ;;  %v14550_v21 = vld [vmem:[#allocation41_spill] sm:$0xff] }
 0x61a   :  { %9734 = vmatprep.mubr.msk.bf16.mxu0 %vm10600_vm11, %v14522_v40  ;;  %v13485_v58 = vsel %vm3527_vm8, %v14545_v13, %v6998_v50  ;;  %v7072_v6 = vsel %vm3521_vm6, %v7071_v54, %v7070_v37  ;;  %v7147_v38 = vrot.slane %v14542_v28, 4  ;;  %v7149_v56 = vrot.slane %v14543_v47, 3  ;;  %v14547_v28 = vld [vmem:[#allocation35_spill] sm:$0xff] }
 0x61b   :  { %v7074_v7 = vsel %vm3524_vm7, %v7073_v48, %v7072_v6  ;;  %v7144_v2 = vsel %vm3515_vm4, %v7143_v49, %v7142_v46  ;;  %v7151_v11 = vrot.slane %v14545_v13, 2  ;;  %9733 = vmatpush3.bf16.msra.mxu0 %v10220_v61  ;;  %v7234_v62 = vrot.slane %v14546_v27, 7  ;;  %v14548_v13 = vld [vmem:[#allocation36_spill] sm:$0xff] }
 0x61c   :  { %9725 = vmatpush3.bf16.msra.mxu1 %v10219_v59  ;;  %v13495_v29 = vsel %vm3527_vm8, %v7075_v8, %v7074_v7  ;;  %v7146_v18 = vsel %vm3518_vm5, %v7145_v44, %v7144_v2  ;;  %v7236_v17 = vrot.slane %v14547_v28, 6  ;;  %9746 = vmatprep.subr.bf16.mxu0 %v14522_v40  ;;  %v7238_v54 = vrot.slane %v14548_v13, 5  ;;  %v14549_v59 = vld [vmem:[#allocation39_spill] sm:$0xff]  ;;  %v14551_v8 = vld [vmem:[#allocation12_spill] sm:$0xff] }
 0x61d   :  { %9738 = vmatprep.subr.bf16.mxu1 %v14522_v40  ;;  %v7148_v47 = vsel %vm3521_vm6, %v7147_v38, %v7146_v18  ;;  %v7240_v61 = vrot.slane %v14549_v59, 4  ;;  %v7242_v14 = vrot.slane %v14550_v21, 3  ;;  %v7235_v50 = vsel %vm3515_vm4, %v7234_v62, %v14551_v8  ;;  %v10223_v7 = vld [vmem:[#allocation2 + $0x118] sm:$0xff]  }
 0x61e   :  { %v7150_v48 = vsel %vm3524_vm7, %v7149_v56, %v7148_v47  ;;  %v7310_v37 = vrot.slane %v14551_v8, 1  ;;  %v7312_v46 = vrot.slane %v14547_v28, 7  ;;  %9735 = vmatmul.mubr.msk.bf16.vlgmr.msra.gmra.mrb[160].mxu0 %vm782_vm2, %v4768_v26  ;;  %v7237_v6 = vsel %vm3518_vm5, %v7236_v17, %v7235_v50 }
 0x61f   :  { %9727 = vmatmul.mubr.msk.bf16.vlgmr.msra.gmra.mrb[156].mxu1 %vm782_vm2, %v4676_v5  ;;  %v13520_v49 = vsel %vm3527_vm8, %v7151_v11, %v7150_v48  ;;  %v7314_v44 = vrot.slane %v14548_v13, 6  ;;  %v7316_v38 = vrot.slane %v14549_v59, 5  ;;  %9747 = vmatpush3.bf16.msra.mxu0 %v10222_v10  ;;  %v7239_v5 = vsel %vm3521_vm6, %v7238_v54, %v7237_v6 }
 0x620   :  { %9739 = vmatpush3.bf16.msra.mxu1 %v10221_v32  ;;  %v7311_v55 = vsel %vm3515_vm4, %v14546_v27, %v7310_v37  ;;  %v7318_v26 = vrot.slane %v14550_v21, 4  ;;  %v7386_v2 = vrot.slane %v14551_v8, 2  ;;  %9748 = vmatprep.subr.bf16.mxu0 %v14522_v40  ;;  %v7241_v56 = vsel %vm3524_vm7, %v7240_v61, %v7239_v5  ;;  %v10225_v37 = vld [vmem:[#allocation2 + $0x130] sm:$0xff]  }
 0x621   :  { %9740 = vmatprep.subr.bf16.mxu1 %v14522_v40  ;;  %v7313_v11 = vsel %vm3518_vm5, %v7312_v46, %v7311_v55  ;;  %v7387_v32 = vrot.slane %v14546_v27, 1  ;;  %v7390_v10 = vrot.slane %v14548_v13, 7  ;;  %9742 = vmatprep.mubr.msk.bf16.mxu1 %vm10600_vm11, %v14522_v40  ;;  %v13541_v18 = vsel %vm3527_vm8, %v7242_v14, %v7241_v56  ;;  %v10226_v46 = vld [vmem:[#allocation2 + $0x140] sm:$0xff]  }
 0x622   :  { %9750 = vmatprep.mubr.msk.bf16.mxu0 %vm10600_vm11, %v14522_v40  ;;  %v7315_v62 = vsel %vm3521_vm6, %v7314_v44, %v7313_v11  ;;  %v7392_v17 = vrot.slane %v14549_v59, 6  ;;  %v7394_v47 = vrot.slane %v14550_v21, 5  ;;  %v7462_v48 = vrot.slane %v14551_v8, 3 }
 0x623   :  { %v7317_v54 = vsel %vm3524_vm7, %v7316_v38, %v7315_v62  ;;  %v7388_v61 = vsel %vm3515_vm4, %v7387_v32, %v7386_v2  ;;  %v7463_v50 = vrot.slane %v14546_v27, 2  ;;  %9749 = vmatpush3.bf16.msra.mxu0 %v10224_v42  ;;  %v7465_v44 = vrot.slane %v14547_v28, 1 }
 0x624   :  { %9741 = vmatpush3.bf16.msra.mxu1 %v10223_v7  ;;  %v13551_v14 = vsel %vm3527_vm8, %v7318_v26, %v7317_v54  ;;  %v7389_v6 = vsel %vm3518_vm5, %v14547_v28, %v7388_v61  ;;  %v7468_v38 = vrot.slane %v14549_v59, 7  ;;  %9762 = vmatprep.subr.bf16.mxu0 %v14522_v40  ;;  %v7470_v42 = vrot.slane %v14550_v21, 6  ;;  %v10228_v54 = vld [vmem:[#allocation2 + $0x148] sm:$0xff]  }
 0x625   :  { %9754 = vmatprep.subr.bf16.mxu1 %v14522_v40  ;;  %v7391_v5 = vsel %vm3521_vm6, %v7390_v10, %v7389_v6  ;;  %v7464_v7 = vsel %vm3515_vm4, %v7463_v50, %v7462_v48  ;;  %v7538_v55 = vrot.slane %v14551_v8, 4  ;;  %v7539_v56 = vrot.slane %v14546_v27, 3 }
 0x626   :  { %v7393_v26 = vsel %vm3524_vm7, %v7392_v17, %v7391_v5  ;;  %v7466_v2 = vsel %vm3518_vm5, %v7465_v44, %v7464_v7  ;;  %v7541_v11 = vrot.slane %v14547_v28, 2  ;;  %9751 = vmatmul.mubr.msk.bf16.vlgmr.msra.gmra.mrb[164].mxu0 %vm782_vm2, %v4920_v23  ;;  %v7543_v62 = vrot.slane %v14548_v13, 1 }
 0x627   :  { %9743 = vmatmul.mubr.msk.bf16.vlgmr.msra.gmra.mrb[160].mxu1 %vm782_vm2, %v4844_v53  ;;  %v13576_v32 = vsel %vm3527_vm8, %v7394_v47, %v7393_v26  ;;  %v7467_v10 = vsel %vm3521_vm6, %v14548_v13, %v7466_v2  ;;  %v7546_v17 = vrot.slane %v14550_v21, 7  ;;  %9763 = vmatpush3.bf16.msra.mxu0 %v10226_v46  ;;  %v7540_v3 = vsel %vm3515_vm4, %v7539_v56, %v7538_v55  ;;  %v10229_v26 = vld [vmem:[#allocation2 + $0x150] sm:$0xff]   ;;  %v10230_v2 = vld [vmem:[#allocation2 + $0x160] sm:$0xff]  }
 0x628   :  { %9755 = vmatpush3.bf16.msra.mxu1 %v10225_v37  ;;  %v7469_v53 = vsel %vm3524_vm7, %v7468_v38, %v7467_v10  ;;  %v7614_v23 = vrot.slane %v14551_v8, 5  ;;  %v7615_v47 = vrot.slane %v14546_v27, 4  ;;  %9764 = vmatprep.subr.bf16.mxu0 %v14522_v40  ;;  %v7542_v48 = vsel %vm3518_vm5, %v7541_v11, %v7540_v3 }
 0x629   :  { %9756 = vmatprep.subr.bf16.mxu1 %v14522_v40  ;;  %v13589_v61 = vsel %vm3527_vm8, %v7470_v42, %v7469_v53  ;;  %v7617_v50 = vrot.slane %v14547_v28, 3  ;;  %v7619_v37 = vrot.slane %v14548_v13, 2  ;;  %9758 = vmatprep.mubr.msk.bf16.mxu1 %vm10600_vm11, %v14522_v40  ;;  %v7544_v46 = vsel %vm3521_vm6, %v7543_v62, %v7542_v48 }
 0x62a   :  { %9766 = vmatprep.mubr.msk.bf16.mxu0 %vm10600_vm11, %v14522_v40  ;;  %v7616_v6 = vsel %vm3515_vm4, %v7615_v47, %v7614_v23  ;;  %v7621_v44 = vrot.slane %v14549_v59, 1  ;;  %v7690_v38 = vrot.slane %v14551_v8, 6  ;;  %v7545_v5 = vsel %vm3524_vm7, %v14549_v59, %v7544_v46 }
 0x62b   :  { %v7618_v7 = vsel %vm3518_vm5, %v7617_v50, %v7616_v6  ;;  %v7691_v42 = vrot.slane %v14546_v27, 5  ;;  %v7693_v55 = vrot.slane %v14547_v28, 4  ;;  %9765 = vmatpush3.bf16.msra.mxu0 %v10228_v54  ;;  %v13608_v56 = vsel %vm3527_vm8, %v7546_v17, %v7545_v5  ;;  %v14554_v5 = vld [vmem:[#allocation19_spill] sm:$0xff] }
 0x62c   :  { %9757 = vmatpush3.bf16.msra.mxu1 %v10227_v45  ;;  %v7620_v11 = vsel %vm3521_vm6, %v7619_v37, %v7618_v7  ;;  %v7695_v10 = vrot.slane %v14548_v13, 3  ;;  %v7697_v62 = vrot.slane %v14549_v59, 2  ;;  %9778 = vmatprep.subr.bf16.mxu0 %v14522_v40  ;;  %v7699_v54 = vrot.slane %v14550_v21, 1  ;;  %v14555_v7 = vld [vmem:[#allocation34_spill] sm:$0xff] }
 0x62d   :  { %9770 = vmatprep.subr.bf16.mxu1 %v14522_v40  ;;  %v7622_v53 = vsel %vm3524_vm7, %v7621_v44, %v7620_v11  ;;  %v7692_v45 = vsel %vm3515_vm4, %v7691_v42, %v7690_v38  ;;  %v7766_v3 = vrot.slane %v14551_v8, 7  ;;  %v7767_v47 = vrot.slane %v14546_v27, 6  ;;  %v10232_v44 = vld [vmem:[#allocation2 + $0x168] sm:$0xff]  }
 0x62e   :  { %v13621_v17 = vsel %vm3527_vm8, %v14550_v21, %v7622_v53  ;;  %v7694_v23 = vsel %vm3518_vm5, %v7693_v55, %v7692_v45  ;;  %v7769_v48 = vrot.slane %v14547_v28, 5  ;;  %v14552_v50 = vpack.c.b16 %v13095_v15, %v13095_v15  ;;  %v10231_v28 = vld [vmem:[#allocation2 + $0x158] sm:$0xff]   ;;  %v14559_v53 = vld [vmem:[#allocation14_spill] sm:$0xff] }
 0x62f   :  { %v14553_v37 = vpack.c.b16 %v13103_v25, %v13103_v25  ;;  %v7696_v8 = vsel %vm3521_vm6, %v7695_v10, %v7694_v23  ;;  %v7771_v46 = vrot.slane %v14548_v13, 4  ;;  %v7773_v6 = vrot.slane %v14549_v59, 3  ;;  %v14558_v10 = vld [vmem:[#allocation13_spill] sm:$0xff] }
 0x630   :  { %9759 = vmatmul.mubr.msk.bf16.vlgmr.msra.gmra.mrb[164].mxu1 %vm782_vm2, %v14552_v50  ;;  %v7775_v27 = vrot.slane %v14550_v21, 2  ;;  %v7698_v15 = vsel %vm3524_vm7, %v7697_v62, %v7696_v8  ;;  %v7768_v38 = vsel %vm3515_vm4, %v7767_v47, %v7766_v3  ;;  %v7850_v25 = vrot.slane %v14554_v5, 7  ;;  %v14556_v21 = vld [vmem:[#allocation30_spill] sm:$0xff]  ;;  %v10233_v50 = vld [vmem:[#allocation2 + $0x170] sm:$0xff]  }
 0x631   :  { %9767 = vmatmul.mubr.msk.bf16.vlgmr.msra.gmra.mrb[168].mxu0 %vm782_vm2, %v14553_v37  ;;  %9771 = vmatpush3.bf16.msra.mxu1 %v10229_v26  ;;  %v7852_v42 = vrot.slane %v14555_v7, 6  ;;  %v13645_v13 = vsel %vm3527_vm8, %v7699_v54, %v7698_v15  ;;  %v7770_v59 = vsel %vm3518_vm5, %v7769_v48, %v7768_v38  ;;  %v7854_v55 = vrot.slane %v14556_v21, 5  ;;  %v14557_v26 = vld [vmem:[#allocation40_spill] sm:$0xff]  ;;  %v10234_v37 = vld [vmem:[#allocation2 + $0x180] sm:$0xff]  }
 0x632   :  { %9779 = vmatpush3.bf16.msra.mxu0 %v10230_v2  ;;  %9772 = vmatprep.subr.bf16.mxu1 %v14522_v40  ;;  %v7856_v2 = vrot.slane %v14557_v26, 4  ;;  %v7772_v11 = vsel %vm3521_vm6, %v7771_v46, %v7770_v59  ;;  %v7851_v62 = vsel %vm3515_vm4, %v7850_v25, %v14558_v10  ;;  %v7858_v45 = vrot.slane %v14559_v53, 3 }
 0x633   :  { %9780 = vmatprep.subr.bf16.mxu0 %v14522_v40  ;;  %9774 = vmatprep.mubr.msk.bf16.mxu1 %vm10600_vm11, %v14522_v40  ;;  %v7926_v54 = vrot.slane %v14558_v10, 1  ;;  %v7774_v3 = vsel %vm3524_vm7, %v7773_v6, %v7772_v11  ;;  %v7853_v23 = vsel %vm3518_vm5, %v7852_v42, %v7851_v62  ;;  %v7928_v47 = vrot.slane %v14555_v7, 7 }
 0x634   :  { %9782 = vmatprep.mubr.msk.bf16.mxu0 %vm10600_vm11, %v14522_v40  ;;  %v7930_v48 = vrot.slane %v14556_v21, 6  ;;  %v13664_v8 = vsel %vm3527_vm8, %v7775_v27, %v7774_v3  ;;  %v7855_v46 = vsel %vm3521_vm6, %v7854_v55, %v7853_v23  ;;  %v7932_v6 = vrot.slane %v14557_v26, 5  ;;  %v10235_v23 = vld [vmem:[#allocation2 + $0x178] sm:$0xff]  }
 0x635   :  { %9773 = vmatpush3.bf16.msra.mxu1 %v10231_v28  ;;  %v7927_v15 = vsel %vm3515_vm4, %v14554_v5, %v7926_v54  ;;  %v7857_v38 = vsel %vm3524_vm7, %v7856_v2, %v7855_v46  ;;  %v8002_v27 = vrot.slane %v14558_v10, 2  ;;  %v8003_v59 = vrot.slane %v14554_v5, 1 }
 0x636   :  { %9781 = vmatpush3.bf16.msra.mxu0 %v10232_v44  ;;  %9786 = vmatprep.subr.bf16.mxu1 %v14522_v40  ;;  %v7929_v28 = vsel %vm3518_vm5, %v7928_v47, %v7927_v15  ;;  %v7934_v44 = vrot.slane %v14559_v53, 4  ;;  %v13677_v25 = vsel %vm3527_vm8, %v7858_v45, %v7857_v38  ;;  %v8006_v55 = vrot.slane %v14556_v21, 7  ;;  %v10236_v47 = vld [vmem:[#allocation2 + $0x188] sm:$0xff]  }
 0x637   :  { %9794 = vmatprep.subr.bf16.mxu0 %v14522_v40  ;;  %v7931_v42 = vsel %vm3521_vm6, %v7930_v48, %v7929_v28  ;;  %v14560_v11 = vpack.c.b16 %v13113_v1, %v13113_v1  ;;  %v14561_v2 = vpack.c.b16 %v13122_v16, %v13122_v16  ;;  %v8008_v45 = vrot.slane %v14557_v26, 6 }
 0x638   :  { %v7933_v62 = vsel %vm3524_vm7, %v7932_v6, %v7931_v42  ;;  %v8010_v54 = vrot.slane %v14559_v53, 5  ;;  %v8078_v3 = vrot.slane %v14558_v10, 3  ;;  %v8004_v48 = vsel %vm3515_vm4, %v8003_v59, %v8002_v27 }
 0x639   :  { %9775 = vmatmul.mubr.msk.bf16.vlgmr.msra.gmra.mrb[168].mxu1 %vm782_vm2, %v14560_v11  ;;  %9783 = vmatmul.mubr.msk.bf16.vlgmr.msra.gmra.mrb[172].mxu0 %vm782_vm2, %v14561_v2  ;;  %v13695_v1 = vsel %vm3527_vm8, %v7934_v44, %v7933_v62  ;;  %v8079_v16 = vrot.slane %v14554_v5, 2  ;;  %v8081_v46 = vrot.slane %v14555_v7, 1  ;;  %v8005_v15 = vsel %vm3518_vm5, %v14555_v7, %v8004_v48  ;;  %v10237_v62 = vld [vmem:[#allocation2 + $0x190] sm:$0xff]   ;;  %v10238_v48 = vld [vmem:[#allocation2 + $0x1a0] sm:$0xff]  }
 0x63a   :  { %9787 = vmatpush3.bf16.msra.mxu1 %v10233_v50  ;;  %9795 = vmatpush3.bf16.msra.mxu0 %v10234_v37  ;;  %v8084_v50 = vrot.slane %v14557_v26, 7  ;;  %v8086_v37 = vrot.slane %v14559_v53, 6  ;;  %v8154_v6 = vrot.slane %v14558_v10, 4  ;;  %v8007_v38 = vsel %vm3521_vm6, %v8006_v55, %v8005_v15 }
 0x63b   :  { %9788 = vmatprep.subr.bf16.mxu1 %v14522_v40  ;;  %9796 = vmatprep.subr.bf16.mxu0 %v14522_v40  ;;  %v8080_v28 = vsel %vm3515_vm4, %v8079_v16, %v8078_v3  ;;  %v8155_v44 = vrot.slane %v14554_v5, 3  ;;  %v8157_v27 = vrot.slane %v14555_v7, 2  ;;  %v8009_v42 = vsel %vm3524_vm7, %v8008_v45, %v8007_v38 }
 0x63c   :  { %9790 = vmatprep.mubr.msk.bf16.mxu1 %vm10600_vm11, %v14522_v40  ;;  %9798 = vmatprep.mubr.msk.bf16.mxu0 %vm10600_vm11, %v14522_v40  ;;  %v8082_v59 = vsel %vm3518_vm5, %v8081_v46, %v8080_v28  ;;  %v8159_v11 = vrot.slane %v14556_v21, 1  ;;  %v8162_v2 = vrot.slane %v14559_v53, 7  ;;  %v13720_v55 = vsel %vm3527_vm8, %v8010_v54, %v8009_v42 }
 0x63d   :  { %v8083_v3 = vsel %vm3521_vm6, %v14556_v21, %v8082_v59  ;;  %v8156_v16 = vsel %vm3515_vm4, %v8155_v44, %v8154_v6  ;;  %v8230_v45 = vrot.slane %v14558_v10, 5  ;;  %v8233_v54 = vrot.slane %v14555_v7, 3 }
 0x63e   :  { %9789 = vmatpush3.bf16.msra.mxu1 %v10235_v23  ;;  %9797 = vmatpush3.bf16.msra.mxu0 %v10236_v47  ;;  %v8085_v46 = vsel %vm3524_vm7, %v8084_v50, %v8083_v3  ;;  %v8158_v23 = vsel %vm3518_vm5, %v8157_v27, %v8156_v16  ;;  %v8231_v47 = vrot.slane %v14554_v5, 4  ;;  %v8235_v6 = vrot.slane %v14556_v21, 2 }
 0x63f   :  { %9802 = vmatprep.subr.bf16.mxu1 %v14522_v40  ;;  %9810 = vmatprep.subr.bf16.mxu0 %v14522_v40  ;;  %v13733_v15 = vsel %vm3527_vm8, %v8086_v37, %v8085_v46  ;;  %v8160_v38 = vsel %vm3521_vm6, %v8159_v11, %v8158_v23  ;;  %v8237_v28 = vrot.slane %v14557_v26, 1  ;;  %v14562_v44 = vpack.c.b16 %v13142_v30, %v13142_v30  ;;  %v10239_v11 = vld [vmem:[#allocation2 + $0x198] sm:$0xff]   ;;  %v10240_v30 = vld [vmem:[#allocation2 + $0x1a8] sm:$0xff]  }
 0x640   :  { %v14563_v50 = vpack.c.b16 %v13153_v43, %v13153_v43  ;;  %v8161_v37 = vsel %vm3524_vm7, %v14557_v26, %v8160_v38  ;;  %v8232_v27 = vsel %vm3515_vm4, %v8231_v47, %v8230_v45  ;;  %v8306_v42 = vrot.slane %v14558_v10, 6 }
 0x641   :  { %9791 = vmatmul.mubr.msk.bf16.vlgmr.msra.gmra.mrb[172].mxu1 %vm782_vm2, %v14562_v44  ;;  %v8307_v59 = vrot.slane %v14554_v5, 5  ;;  %v13752_v3 = vsel %vm3527_vm8, %v8162_v2, %v8161_v37  ;;  %v8234_v43 = vsel %vm3518_vm5, %v8233_v54, %v8232_v27  ;;  %v8309_v16 = vrot.slane %v14555_v7, 4  ;;  %v10241_v27 = vld [vmem:[#allocation2 + $0x1b0] sm:$0xff]  }
 0x642   :  { %9799 = vmatmul.mubr.msk.bf16.vlgmr.msra.gmra.mrb[176].mxu0 %vm782_vm2, %v14563_v50  ;;  %9803 = vmatpush3.bf16.msra.mxu1 %v10237_v62  ;;  %v8311_v46 = vrot.slane %v14556_v21, 3  ;;  %v8236_v45 = vsel %vm3521_vm6, %v8235_v6, %v8234_v43  ;;  %v8315_v23 = vrot.slane %v14559_v53, 1  ;;  %v8382_v54 = vrot.slane %v14558_v10, 7 }
 0x643   :  { %9811 = vmatpush3.bf16.msra.mxu0 %v10238_v48  ;;  %9804 = vmatprep.subr.bf16.mxu1 %v14522_v40  ;;  %v8308_v62 = vsel %vm3515_vm4, %v8307_v59, %v8306_v42  ;;  %v8313_v48 = vrot.slane %v14557_v26, 2  ;;  %v8238_v2 = vsel %vm3524_vm7, %v8237_v28, %v8236_v45  ;;  %v8383_v38 = vrot.slane %v14554_v5, 6  ;;  %v10242_v28 = vld [vmem:[#allocation2 + $0x1c0] sm:$0xff]  }
 0x644   :  { %9812 = vmatprep.subr.bf16.mxu0 %v14522_v40  ;;  %9806 = vmatprep.mubr.msk.bf16.mxu1 %vm10600_vm11, %v14522_v40  ;;  %v8310_v47 = vsel %vm3518_vm5, %v8309_v16, %v8308_v62  ;;  %v13773_v6 = vsel %vm3527_vm8, %v14559_v53, %v8238_v2  ;;  %v8385_v50 = vrot.slane %v14555_v7, 5  ;;  %v8387_v37 = vrot.slane %v14556_v21, 4 }
 0x645   :  { %9814 = vmatprep.mubr.msk.bf16.mxu0 %vm10600_vm11, %v14522_v40  ;;  %v8312_v44 = vsel %vm3521_vm6, %v8311_v46, %v8310_v47  ;;  %v8384_v10 = vsel %vm3515_vm4, %v8383_v38, %v8382_v54  ;;  %v8389_v5 = vrot.slane %v14557_v26, 3  ;;  %v8391_v59 = vrot.slane %v14559_v53, 2  ;;  %v10243_v26 = vld [vmem:[#allocation2 + $0x1b8] sm:$0xff]   ;;  %v10244_v53 = vld [vmem:[#allocation2 + $0x1c8] sm:$0xff]   ;;  %v10246_v46 = vld [vmem:[#allocation2 + $0x1e0] sm:$0xff]  }
 0x646   :  { %9805 = vmatpush3.bf16.msra.mxu1 %v10239_v11  ;;  %v8314_v42 = vsel %vm3524_vm7, %v8313_v48, %v8312_v44  ;;  %v5536_v43 = vpack.c.b16 %v13173_v4, %v13173_v4  ;;  %v8386_v21 = vsel %vm3518_vm5, %v8385_v50, %v8384_v10  ;;  %v5612_v45 = vpack.c.b16 %v13181_v39, %v13181_v39  ;;  %v10247_v48 = vld [vmem:[#allocation2 + $0x1d8] sm:$0xff]   ;;  %v10249_v39 = vld [vmem:[#allocation2 + $0x1f0] sm:$0xff]   ;;  %v10251_v47 = vld [vmem:[#allocation2 + $0x200] sm:$0xff]  }
 0x647   :  { %9813 = vmatpush3.bf16.msra.mxu0 %v10240_v30  ;;  %9818 = vmatprep.subr.bf16.mxu1 %v14522_v40  ;;  %v13787_v7 = vsel %vm3527_vm8, %v8315_v23, %v8314_v42  ;;  %v8388_v11 = vsel %vm3521_vm6, %v8387_v37, %v8386_v21  ;;  %v14564_v30 = vpack.c.b16 %v13165_v41, %v13165_v41  ;;  %v10245_v41 = vld [vmem:[#allocation2 + $0x1d0] sm:$0xff]   ;;  %v10248_v23 = vld [vmem:[#allocation2 + $0x1e8] sm:$0xff]   ;;  %v10250_v54 = vld [vmem:[#allocation2 + $0x1f8] sm:$0xff]  }
 0x648   :  { %9826 = vmatprep.subr.bf16.mxu0 %v14522_v40  ;;  %v8390_v4 = vsel %vm3524_vm7, %v8389_v5, %v8388_v11  ;;  %v5688_v62 = vpack.c.b16 %v13194_v9, %v13194_v9  ;;  %v5764_v9 = vpack.c.b16 %v13211_v52, %v13211_v52  ;;  %v5840_v2 = vpack.c.b16 %v13226_v36, %v13226_v36  ;;  %v10253_v52 = vld [vmem:[#allocation2 + $0x208] sm:$0xff]   ;;  %v10252_v36 = vld [vmem:[#allocation2 + $0x210] sm:$0xff]   ;;  %v10254_v44 = vld [vmem:[#allocation2 + $0x218] sm:$0xff]  }
 0x649   :  { %9807 = vmatmul.mubr.msk.bf16.vlgmr.msra.gmra.mrb[176].mxu1 %vm782_vm2, %v14564_v30  ;;  %v13798_v16 = vsel %vm3527_vm8, %v8391_v59, %v8390_v4  ;;  %v5916_v38 = vpack.c.b16 %v13243_v57, %v13243_v57 }
 0x64a   :  { %9815 = vmatmul.mubr.msk.bf16.vlgmr.msra.gmra.mrb[180].mxu0 %vm782_vm2, %v5536_v43  ;;  %9819 = vmatpush3.bf16.msra.mxu1 %v10241_v27 }
 0x64b   :  { %9827 = vmatpush3.bf16.msra.mxu0 %v10242_v28  ;;  %9820 = vmatprep.subr.bf16.mxu1 %v14522_v40 }
 0x64c   :  { %9828 = vmatprep.subr.bf16.mxu0 %v14522_v40  ;;  %9822 = vmatprep.mubr.msk.bf16.mxu1 %vm10600_vm11, %v14522_v40 }
 0x64d   :  { %9830 = vmatprep.mubr.msk.bf16.mxu0 %vm10600_vm11, %v14522_v40 }
 0x64e   :  { %9821 = vmatpush3.bf16.msra.mxu1 %v10243_v26 }
 0x64f   :  { %9829 = vmatpush3.bf16.msra.mxu0 %v10244_v53  ;;  %9834 = vmatprep.subr.bf16.mxu1 %v14522_v40 }
 0x650   :  { %9842 = vmatprep.subr.bf16.mxu0 %v14522_v40 }
 0x651   :  { %9823 = vmatmul.mubr.msk.bf16.vlgmr.msra.gmra.mrb[180].mxu1 %vm782_vm2, %v5612_v45 }
 0x652   :  { %9831 = vmatmul.mubr.msk.bf16.vlgmr.msra.gmra.mrb[184].mxu0 %vm782_vm2, %v5688_v62  ;;  %9835 = vmatpush3.bf16.msra.mxu1 %v10245_v41 }
 0x653   :  { %9843 = vmatpush3.bf16.msra.mxu0 %v10246_v46  ;;  %9836 = vmatprep.subr.bf16.mxu1 %v14522_v40 }
 0x654   :  { %9844 = vmatprep.subr.bf16.mxu0 %v14522_v40  ;;  %9838 = vmatprep.mubr.msk.bf16.mxu1 %vm10600_vm11, %v14522_v40 }
 0x655   :  { %9846 = vmatprep.mubr.msk.bf16.mxu0 %vm10600_vm11, %v14522_v40 }
 0x656   :  { %9837 = vmatpush3.bf16.msra.mxu1 %v10247_v48 }
 0x657   :  { %9845 = vmatpush3.bf16.msra.mxu0 %v10248_v23  ;;  %9850 = vmatprep.subr.bf16.mxu1 %v14522_v40 }
 0x658   :  { %9858 = vmatprep.subr.bf16.mxu0 %v14522_v40 }
 0x659   :  { %9839 = vmatmul.mubr.msk.bf16.vlgmr.msra.gmra.mrb[184].mxu1 %vm782_vm2, %v5764_v9 }
 0x65a   :  { %9847 = vmatmul.mubr.msk.bf16.vlgmr.msra.gmra.mrb[188].mxu0 %vm782_vm2, %v5840_v2  ;;  %9851 = vmatpush3.bf16.msra.mxu1 %v10249_v39 }
 0x65b   :  { %9854 = vmatprep.mubr.msk.bf16.mxu1 %vm10600_vm11, %v14522_v40  ;;  %9852 = vmatprep.subr.bf16.mxu1 %v14522_v40 }
 0x65c   :  { %9859 = vmatpush3.bf16.msra.mxu0 %v10251_v47  ;;  %9862 = vmatprep.mubr.msk.bf16.mxu0 %vm10600_vm11, %v14522_v40 }
 0x65d   :  { %9860 = vmatprep.subr.bf16.mxu0 %v14522_v40 }
 0x65e   :  { %9853 = vmatpush3.bf16.msra.mxu1 %v10250_v54 }
 0x65f   :  { %9866 = vmatprep.subr.bf16.mxu1 %v14522_v40 }
 0x660   :  { %9861 = vmatpush3.bf16.msra.mxu0 %v10253_v52 }
 0x661   :  { %9874 = vmatprep.subr.bf16.mxu0 %v14522_v40  ;;  %9855 = vmatmul.mubr.msk.bf16.vlgmr.msra.gmra.mrb[188].mxu1 %vm782_vm2, %v5916_v38 }
 0x662   :  { %9867 = vmatpush3.bf16.msra.mxu1 %v10252_v36  ;;  %9870 = vmatprep.mubr.msk.bf16.mxu1 %vm10600_vm11, %v14522_v40 }
 0x663   :  { %9868 = vmatprep.subr.bf16.mxu1 %v14522_v40 }
 0x666   :  { %9869 = vmatpush3.bf16.msra.mxu1 %v10254_v44 }
 0x667   :  { %9882 = vmatprep.subr.bf16.mxu1 %v14522_v40 }
 0x6a9   :  { %v9584_v50 = vpop.f32.mrb[124].mxu0 }
 0x6aa   :  { %v3353_v37 = vpop.f32.mrb[125].mxu0 }
 0x6ab   :  { %v9585_v57 = vpop.f32.mrb[126].mxu0 }
 0x6ac   :  { %v13843_v27 = vpack.c.bf16 %v9585_v57, %v9584_v50  ;;  %v3356_v28 = vpop.f32.mrb[127].mxu0 }
 0x6ad   :  { %v3483_v42 = vpack.c.bf16 %v3356_v28, %v3353_v37 }
 0x6ae   :  { %v13871_v57 = vunpack.c.l.b16 %v13843_v27 }
 0x6af   :  { %v5992_v10 = vunpack.c.l.b16 %v3483_v42  ;;  %v13845_v5 = vunpack.c.h.b16 %v3483_v42 }
 0x6b1   :  { %v3585_v43 = vpop.f32.mrb[128].mxu0  ;;  %v6004_v21 = vrot.slane %v5992_v10, 2  ;;  %v6080_v11 = vrot.slane %v5992_v10, 3  ;;  %v6156_v30 = vrot.slane %v5992_v10, 4  ;;  %v6232_v4 = vrot.slane %v5992_v10, 5 }
 0x6b2   :  { %v9600_v59 = vpop.f32.mrb[124].mxu1  ;;  %v9608_v53 = vpop.f32.mrb[129].mxu0  ;;  %v6308_v41 = vrot.slane %v5992_v10, 6  ;;  %v6384_v46 = vrot.slane %v5992_v10, 7  ;;  %v6461_v45 = vsel %vm3530_vm9, %v5992_v10, %v13355_v20  ;;  %v6537_v62 = vrot.slane %v5992_v10, 1 }
 0x6b3   :  { %v3442_v26 = vpop.f32.mrb[125].mxu1  ;;  %v3588_v23 = vpop.f32.mrb[130].mxu0  ;;  %v6005_v39 = vsel %vm3530_vm9, %v6004_v21, %v13247_v51  ;;  %v6081_v9 = vsel %vm3530_vm9, %v6080_v11, %v13254_v0  ;;  %v6157_v2 = vsel %vm3530_vm9, %v6156_v30, %v13276_v19  ;;  %v6233_v47 = vsel %vm3530_vm9, %v6232_v4, %v13303_v60 }
 0x6b4   :  { %v9601_v48 = vpop.f32.mrb[126].mxu1  ;;  %v9609_v36 = vpop.f32.mrb[131].mxu0  ;;  %v6309_v20 = vsel %vm3530_vm9, %v6308_v41, %v13320_v63  ;;  %v6385_v38 = vsel %vm3530_vm9, %v6384_v46, %v13333_v33  ;;  %v6538_v51 = vsel %vm3530_vm9, %v6537_v62, %v13376_v35  ;;  %v6620_v44 = vrot.slane %v13845_v5, 2 }
 0x6b5   :  { %v13857_v54 = vpack.c.bf16 %v9601_v48, %v9600_v59  ;;  %v3445_v52 = vpop.f32.mrb[127].mxu1  ;;  %v6696_v19 = vrot.slane %v13845_v5, 3  ;;  %v6772_v60 = vrot.slane %v13845_v5, 4  ;;  %v6848_v50 = vrot.slane %v13845_v5, 5  ;;  %v10256_v36 = vld [vmem:[#allocation2 + $0x230] sm:$0xff]  }
 0x6b6   :  { %v3487_v0 = vpack.c.bf16 %v3445_v52, %v3442_v26  ;;  %v6924_v37 = vrot.slane %v13845_v5, 6  ;;  %v6621_v33 = vsel %vm3530_vm9, %v6620_v44, %v13389_v12 }
 0x6b7   :  { %v6697_v35 = vsel %vm3530_vm9, %v6696_v19, %v13407_v34  ;;  %v6773_v42 = vsel %vm3530_vm9, %v6772_v60, %v13432_v24  ;;  %v6849_v10 = vsel %vm3530_vm9, %v6848_v50, %v13445_v31 }
 0x6b8   :  { %v5993_v63 = vunpack.c.l.b16 %v3487_v0  ;;  %v13877_v28 = vunpack.c.h.b16 %v3487_v0  ;;  %v13885_v59 = vsel %vm3530_vm9, %v6924_v37, %v13464_v22  ;;  %v10255_v22 = vld [vmem:[#allocation2 + $0x220] sm:$0xff]  }
 0x6b9   :  { %v3730_v11 = vpop.f32.mrb[132].mxu0 }
 0x6ba   :  { %v3655_v21 = vpop.f32.mrb[128].mxu1  ;;  %v6006_v30 = vrot.slane %v5993_v63, 1  ;;  %v6082_v4 = vrot.slane %v5993_v63, 2  ;;  %v6158_v12 = vrot.slane %v5993_v63, 3  ;;  %v6234_v26 = vrot.slane %v5993_v63, 4  ;;  %v9624_v41 = vpop.f32.mrb[133].mxu0 }
 0x6bb   :  { %v3656_v53 = vadd.f32 %v3655_v21, %v3585_v43  ;;  %v9616_v34 = vpop.f32.mrb[129].mxu1  ;;  %v6310_v46 = vrot.slane %v5993_v63, 5  ;;  %v6386_v62 = vrot.slane %v5993_v63, 6  ;;  %v6462_v48 = vrot.slane %v5993_v63, 7  ;;  %v3733_v23 = vpop.f32.mrb[134].mxu0 }
 0x6bc   :  { %v3658_v24 = vpop.f32.mrb[130].mxu1  ;;  %v6007_v31 = vsel %vm3533_vm10, %v6006_v30, %v6005_v39  ;;  %v6083_v52 = vsel %vm3533_vm10, %v6082_v4, %v6081_v9  ;;  %v13890_v0 = vsel %vm3533_vm10, %v6158_v12, %v6157_v2  ;;  %v13893_v44 = vsel %vm3533_vm10, %v6234_v26, %v6233_v47  ;;  %v9625_v60 = vpop.f32.mrb[135].mxu0  ;;  %v10258_v30 = vld [vmem:[#allocation2 + $0x238] sm:$0xff]  }
 0x6bd   :  { %v3736_v43 = vadd.f32 %v3730_v11, %v3656_v53  ;;  %v9617_v19 = vpop.f32.mrb[131].mxu1  ;;  %v6008_v50 = vpack.c.b16 %v6007_v31, %v6007_v31  ;;  %v6084_v37 = vpack.c.b16 %v6083_v52, %v6083_v52  ;;  %v7000_v21 = vrot.slane %v13845_v5, 7  ;;  %v10257_v11 = vld [vmem:[#allocation2 + $0x228] sm:$0xff]  }
 0x6be   :  { %v13897_v34 = vsel %vm3533_vm10, %v6310_v46, %v6309_v20  ;;  %v13900_v39 = vsel %vm3533_vm10, %v6386_v62, %v6385_v38  ;;  %v13903_v9 = vsel %vm3533_vm10, %v6462_v48, %v6461_v45  ;;  %v6622_v2 = vrot.slane %v13877_v28, 1  ;;  %v10259_v19 = vld [vmem:[#allocation2 + $0x240] sm:$0xff]  }
 0x6bf   :  { %9863 = vmatmul.mubr.msk.bf16.vlgmr.msra.gmra.mrb[192].mxu0 %vm782_vm2, %v6008_v50  ;;  %9871 = vmatmul.mubr.msk.bf16.vlgmr.msra.gmra.mrb[192].mxu1 %vm782_vm2, %v6084_v37  ;;  %v7244_v47 = vrot.slane %v13871_v57, 2  ;;  %v13910_v20 = vsel %vm3533_vm10, %v5993_v63, %v6538_v51  ;;  %v6698_v38 = vrot.slane %v13877_v28, 2  ;;  %v6774_v45 = vrot.slane %v13877_v28, 3 }
 0x6c0   :  { %9875 = vmatpush3.bf16.msra.mxu0 %v10255_v22  ;;  %9883 = vmatpush3.bf16.msra.mxu1 %v10256_v36  ;;  %v6850_v4 = vrot.slane %v13877_v28, 4  ;;  %v13918_v12 = vsel %vm3533_vm10, %v6622_v2, %v6621_v33  ;;  %v6926_v26 = vrot.slane %v13877_v28, 5  ;;  %v7001_v53 = vsel %vm3530_vm9, %v7000_v21, %v13485_v58 }
 0x6c1   :  { %9876 = vmatprep.subr.bf16.mxu0 %v14522_v40  ;;  %9884 = vmatprep.subr.bf16.mxu1 %v14522_v40  ;;  %v7320_v51 = vrot.slane %v13871_v57, 3  ;;  %v13925_v63 = vunpack.c.l.b16 %v13857_v54  ;;  %v3882_v46 = vpop.f32.mrb[136].mxu0  ;;  %v13932_v33 = vsel %vm3533_vm10, %v6698_v38, %v6697_v35  ;;  %v13935_v62 = vsel %vm3533_vm10, %v6774_v45, %v6773_v42  ;;  %v10260_v35 = vld [vmem:[#allocation2 + $0x250] sm:$0xff]  }
 0x6c2   :  { %v3806_v41 = vpop.f32.mrb[132].mxu1  ;;  %9878 = vmatprep.mubr.msk.bf16.mxu0 %vm10600_vm11, %v14522_v40  ;;  %9886 = vmatprep.mubr.msk.bf16.mxu1 %vm10600_vm11, %v14522_v40  ;;  %v7002_v58 = vrot.slane %v13877_v28, 6  ;;  %v9640_v23 = vpop.f32.mrb[137].mxu0  ;;  %v13939_v31 = vsel %vm3533_vm10, %v6850_v4, %v6849_v10  ;;  %v7396_v52 = vrot.slane %v13871_v57, 4  ;;  %v13944_v42 = vsel %vm3533_vm10, %v6926_v26, %v13885_v59 }
 0x6c3   :  { %v3812_v48 = vadd.f32 %v3806_v41, %v3736_v43  ;;  %v9632_v24 = vpop.f32.mrb[133].mxu1  ;;  %v3885_v36 = vpop.f32.mrb[138].mxu0  ;;  %v7078_v43 = vrot.slane %v13877_v28, 7  ;;  %v7472_v10 = vrot.slane %v13871_v57, 5  ;;  %v6160_v2 = vpack.c.b16 %v13890_v0, %v13890_v0 }
 0x6c4   :  { %v3809_v22 = vpop.f32.mrb[134].mxu1  ;;  %9877 = vmatpush3.bf16.msra.mxu0 %v10257_v11  ;;  %9885 = vmatpush3.bf16.msra.mxu1 %v10258_v30  ;;  %v13947_v60 = vsel %vm3533_vm10, %v7002_v58, %v7001_v53  ;;  %v9641_v21 = vpop.f32.mrb[139].mxu0  ;;  %v6236_v11 = vpack.c.b16 %v13893_v44, %v13893_v44  ;;  %v7153_v59 = vrot.slane %v13845_v5, 1  ;;  %v7077_v30 = vsel %vm3530_vm9, %v13845_v5, %v13495_v29  ;;  %v10261_v5 = vld [vmem:[#allocation2 + $0x248] sm:$0xff]  }
 0x6c5   :  { %v3888_v50 = vadd.f32 %v3882_v46, %v3812_v48  ;;  %v9633_v37 = vpop.f32.mrb[135].mxu1  ;;  %9890 = vmatprep.subr.bf16.mxu0 %v14522_v40  ;;  %9898 = vmatprep.subr.bf16.mxu1 %v14522_v40  ;;  %v7245_v38 = vsel %vm3530_vm9, %v7244_v47, %v13541_v18  ;;  %v7246_v45 = vrot.slane %v13925_v63, 1  ;;  %v7321_v0 = vsel %vm3530_vm9, %v7320_v51, %v13551_v14  ;;  %v10262_v47 = vld [vmem:[#allocation2 + $0x258] sm:$0xff]  }
 0x6c6   :  { %v13969_v44 = vsel %vm3533_vm10, %v7078_v43, %v7077_v30  ;;  %v7154_v4 = vsel %vm3530_vm9, %v7153_v59, %v13520_v49  ;;  %v7322_v29 = vrot.slane %v13925_v63, 2  ;;  %v7397_v18 = vsel %vm3530_vm9, %v7396_v52, %v13576_v32  ;;  %v10263_v43 = vld [vmem:[#allocation2 + $0x260] sm:$0xff]  }
 0x6c7   :  { %9879 = vmatmul.mubr.msk.bf16.vlgmr.msra.gmra.mrb[196].mxu0 %vm782_vm2, %v6160_v2  ;;  %9887 = vmatmul.mubr.msk.bf16.vlgmr.msra.gmra.mrb[196].mxu1 %vm782_vm2, %v6236_v11  ;;  %v13978_v14 = vsel %vm3533_vm10, %v13877_v28, %v7154_v4  ;;  %v13981_v26 = vsel %vm3533_vm10, %v7246_v45, %v7245_v38  ;;  %v7398_v53 = vrot.slane %v13925_v63, 3  ;;  %v13985_v49 = vunpack.c.h.b16 %v13843_v27 }
 0x6c8   :  { %9891 = vmatpush3.bf16.msra.mxu0 %v10259_v19  ;;  %9899 = vmatpush3.bf16.msra.mxu1 %v10260_v35  ;;  %v13990_v32 = vsel %vm3533_vm10, %v7322_v29, %v7321_v0  ;;  %v7474_v51 = vrot.slane %v13925_v63, 4  ;;  %v13994_v28 = vunpack.c.h.b16 %v13857_v54  ;;  %v7473_v58 = vsel %vm3530_vm9, %v7472_v10, %v13589_v61  ;;  %v10264_v10 = vld [vmem:[#allocation2 + $0x270] sm:$0xff]  }
 0x6c9   :  { %9892 = vmatprep.subr.bf16.mxu0 %v14522_v40  ;;  %9900 = vmatprep.subr.bf16.mxu1 %v14522_v40  ;;  %v4034_v46 = vpop.f32.mrb[140].mxu0  ;;  %v14001_v27 = vsel %vm3533_vm10, %v7398_v53, %v7397_v18  ;;  %v7548_v48 = vrot.slane %v13871_v57, 6  ;;  %v6312_v52 = vpack.c.b16 %v13897_v34, %v13897_v34  ;;  %v7550_v36 = vrot.slane %v13925_v63, 5 }
 0x6ca   :  { %v3958_v41 = vpop.f32.mrb[136].mxu1  ;;  %9894 = vmatprep.mubr.msk.bf16.mxu0 %vm10600_vm11, %v14522_v40  ;;  %9902 = vmatprep.mubr.msk.bf16.mxu1 %vm10600_vm11, %v14522_v40  ;;  %v9656_v54 = vpop.f32.mrb[141].mxu0  ;;  %v14009_v22 = vsel %vm3533_vm10, %v7474_v51, %v7473_v58  ;;  %v6388_v61 = vpack.c.b16 %v13900_v39, %v13900_v39  ;;  %v7624_v37 = vrot.slane %v13871_v57, 7  ;;  %v7626_v34 = vrot.slane %v13925_v63, 6 }
 0x6cb   :  { %v3964_v24 = vadd.f32 %v3958_v41, %v3888_v50  ;;  %v9648_v23 = vpop.f32.mrb[137].mxu1  ;;  %v4037_v35 = vpop.f32.mrb[142].mxu0  ;;  %v7549_v50 = vsel %vm3530_vm9, %v7548_v48, %v13608_v56  ;;  %v7701_v39 = vsel %vm3530_vm9, %v13871_v57, %v13645_v13  ;;  %v7702_v56 = vrot.slane %v13925_v63, 7  ;;  %v10267_v54 = vld [vmem:[#allocation2 + $0x280] sm:$0xff]  }
 0x6cc   :  { %v3961_v19 = vpop.f32.mrb[138].mxu1  ;;  %9893 = vmatpush3.bf16.msra.mxu0 %v10261_v5  ;;  %9901 = vmatpush3.bf16.msra.mxu1 %v10262_v47  ;;  %v9657_v11 = vpop.f32.mrb[143].mxu0  ;;  %v14021_v59 = vsel %vm3533_vm10, %v7550_v36, %v7549_v50  ;;  %v7625_v30 = vsel %vm3530_vm9, %v7624_v37, %v13621_v17  ;;  %v7777_v38 = vrot.slane %v13871_v57, 1  ;;  %v7860_v45 = vrot.slane %v13985_v49, 2  ;;  %v10265_v17 = vld [vmem:[#allocation2 + $0x268] sm:$0xff]   ;;  %v10266_v57 = vld [vmem:[#allocation2 + $0x278] sm:$0xff]  }
 0x6cd   :  { %v4040_v21 = vadd.f32 %v4034_v46, %v3964_v24  ;;  %v9649_v2 = vpop.f32.mrb[139].mxu1  ;;  %9906 = vmatprep.subr.bf16.mxu0 %v14522_v40  ;;  %9914 = vmatprep.subr.bf16.mxu1 %v14522_v40  ;;  %v14034_v0 = vsel %vm3533_vm10, %v7626_v34, %v7625_v30  ;;  %v14037_v4 = vsel %vm3533_vm10, %v7702_v56, %v7701_v39  ;;  %v7862_v13 = vrot.slane %v13994_v28, 1  ;;  %v10268_v35 = vld [vmem:[#allocation2 + $0x290] sm:$0xff]  }
 0x6ce   :  { %v7936_v29 = vrot.slane %v13985_v49, 3  ;;  %v7778_v18 = vsel %vm3530_vm9, %v7777_v38, %v13664_v8  ;;  %v7938_v5 = vrot.slane %v13994_v28, 2  ;;  %v7861_v53 = vsel %vm3530_vm9, %v7860_v45, %v13677_v25  ;;  %v10269_v45 = vld [vmem:[#allocation2 + $0x288] sm:$0xff]  }
 0x6cf   :  { %9895 = vmatmul.mubr.msk.bf16.vlgmr.msra.gmra.mrb[200].mxu0 %vm782_vm2, %v6312_v52  ;;  %9903 = vmatmul.mubr.msk.bf16.vlgmr.msra.gmra.mrb[200].mxu1 %vm782_vm2, %v6388_v61  ;;  %v14048_v47 = vsel %vm3533_vm10, %v13925_v63, %v7778_v18  ;;  %v8012_v41 = vrot.slane %v13985_v49, 4  ;;  %v14060_v58 = vsel %vm3533_vm10, %v7862_v13, %v7861_v53  ;;  %v8014_v25 = vrot.slane %v13994_v28, 3  ;;  %v10270_v13 = vld [vmem:[#allocation2 + $0x298] sm:$0xff]  }
 0x6d0   :  { %9907 = vmatpush3.bf16.msra.mxu0 %v10263_v43  ;;  %9915 = vmatpush3.bf16.msra.mxu1 %v10264_v10  ;;  %v7937_v51 = vsel %vm3530_vm9, %v7936_v29, %v13695_v1  ;;  %v6464_v23 = vpack.c.b16 %v13903_v9, %v13903_v9  ;;  %v8088_v43 = vrot.slane %v13985_v49, 5  ;;  %v8090_v10 = vrot.slane %v13994_v28, 4 }
 0x6d1   :  { %9908 = vmatprep.subr.bf16.mxu0 %v14522_v40  ;;  %9916 = vmatprep.subr.bf16.mxu1 %v14522_v40  ;;  %v4194_v8 = vpop.f32.mrb[144].mxu0  ;;  %v14063_v63 = vsel %vm3533_vm10, %v7938_v5, %v7937_v51  ;;  %v8013_v52 = vsel %vm3530_vm9, %v8012_v41, %v13720_v55  ;;  %v8164_v50 = vrot.slane %v13985_v49, 6  ;;  %v6540_v55 = vpack.c.b16 %v13910_v20, %v13910_v20 }
 0x6d2   :  { %v4110_v46 = vpop.f32.mrb[140].mxu1  ;;  %9910 = vmatprep.mubr.msk.bf16.mxu0 %vm10600_vm11, %v14522_v40  ;;  %9918 = vmatprep.mubr.msk.bf16.mxu1 %vm10600_vm11, %v14522_v40  ;;  %v9672_v24 = vpop.f32.mrb[145].mxu0  ;;  %v14071_v61 = vsel %vm3533_vm10, %v8014_v25, %v8013_v52  ;;  %v8240_v2 = vrot.slane %v13985_v49, 7  ;;  %v8089_v11 = vsel %vm3530_vm9, %v8088_v43, %v13733_v15  ;;  %v8242_v56 = vrot.slane %v13994_v28, 6  ;;  %v10272_v25 = vld [vmem:[#allocation2 + $0x2b0] sm:$0xff]  }
 0x6d3   :  { %v4116_v48 = vadd.f32 %v4110_v46, %v4040_v21  ;;  %v9664_v1 = vpop.f32.mrb[141].mxu1  ;;  %v4197_v19 = vpop.f32.mrb[146].mxu0  ;;  %v8166_v21 = vrot.slane %v13994_v28, 5  ;;  %v8165_v39 = vsel %vm3530_vm9, %v8164_v50, %v13752_v3  ;;  %v8317_v20 = vsel %vm3530_vm9, %v13985_v49, %v13787_v7  ;;  %v10276_v50 = vld [vmem:[#allocation2 + $0x2d0] sm:$0xff]  }
 0x6d4   :  { %v4113_v36 = vpop.f32.mrb[142].mxu1  ;;  %9909 = vmatpush3.bf16.msra.mxu0 %v10265_v17  ;;  %9917 = vmatpush3.bf16.msra.mxu1 %v10266_v57  ;;  %v9673_v34 = vpop.f32.mrb[147].mxu0  ;;  %v14093_v30 = vsel %vm3533_vm10, %v8090_v10, %v8089_v11  ;;  %v8241_v15 = vsel %vm3530_vm9, %v8240_v2, %v13773_v6  ;;  %v8318_v3 = vrot.slane %v13994_v28, 7  ;;  %v8393_v29 = vrot.slane %v13985_v49, 1  ;;  %v10275_v10 = vld [vmem:[#allocation2 + $0x2c0] sm:$0xff]   ;;  %v10277_v2 = vld [vmem:[#allocation2 + $0x2c8] sm:$0xff]  }
 0x6d5   :  { %v4200_v37 = vadd.f32 %v4194_v8, %v4116_v48  ;;  %v9665_v9 = vpop.f32.mrb[143].mxu1  ;;  %9922 = vmatprep.subr.bf16.mxu0 %v14522_v40  ;;  %9930 = vmatprep.subr.bf16.mxu1 %v14522_v40  ;;  %v14096_v38 = vsel %vm3533_vm10, %v8166_v21, %v8165_v39  ;;  %v14102_v7 = vsel %vm3533_vm10, %v8242_v56, %v8241_v15  ;;  %v10271_v8 = vld [vmem:[#allocation2 + $0x2a0] sm:$0xff]   ;;  %v10278_v11 = vld [vmem:[#allocation2 + $0x2d8] sm:$0xff]  }
 0x6d6   :  { %v14108_v17 = vsel %vm3533_vm10, %v8318_v3, %v8317_v20  ;;  %v8394_v18 = vsel %vm3530_vm9, %v8393_v29, %v13798_v16  ;;  %v6700_v16 = vpack.c.b16 %v13932_v33, %v13932_v33  ;;  %v6852_v21 = vpack.c.b16 %v13939_v31, %v13939_v31 }
 0x6d7   :  { %9911 = vmatmul.mubr.msk.bf16.vlgmr.msra.gmra.mrb[204].mxu0 %vm782_vm2, %v6464_v23  ;;  %9919 = vmatmul.mubr.msk.bf16.vlgmr.msra.gmra.mrb[204].mxu1 %vm782_vm2, %v6540_v55  ;;  %v14118_v51 = vsel %vm3533_vm10, %v13994_v28, %v8394_v18  ;;  %v6624_v23 = vpack.c.b16 %v13918_v12, %v13918_v12  ;;  %v10273_v28 = vld [vmem:[#allocation2 + $0x2a8] sm:$0xff]   ;;  %v6776_v55 = vpack.c.b16 %v13935_v62, %v13935_v62 }
 0x6d8   :  { %9923 = vmatpush3.bf16.msra.mxu0 %v10267_v54  ;;  %9931 = vmatpush3.bf16.msra.mxu1 %v10268_v35  ;;  %v10274_v54 = vld [vmem:[#allocation2 + $0x2b8] sm:$0xff]   ;;  %v6928_v18 = vpack.c.b16 %v13944_v42, %v13944_v42 }
 0x6d9   :  { %9924 = vmatprep.subr.bf16.mxu0 %v14522_v40  ;;  %9932 = vmatprep.subr.bf16.mxu1 %v14522_v40  ;;  %v4346_v6 = vpop.f32.mrb[148].mxu0 }
 0x6da   :  { %v4270_v57 = vpop.f32.mrb[144].mxu1  ;;  %9926 = vmatprep.mubr.msk.bf16.mxu0 %vm10600_vm11, %v14522_v40  ;;  %9934 = vmatprep.mubr.msk.bf16.mxu1 %vm10600_vm11, %v14522_v40  ;;  %v9688_v53 = vpop.f32.mrb[149].mxu0 }
 0x6db   :  { %v4276_v5 = vadd.f32 %v4270_v57, %v4200_v37  ;;  %v9680_v49 = vpop.f32.mrb[145].mxu1  ;;  %v4349_v46 = vpop.f32.mrb[150].mxu0  ;;  %v10282_v53 = vld [vmem:[#allocation2 + $0x2f8] sm:$0xff]  }
 0x6dc   :  { %v4273_v41 = vpop.f32.mrb[146].mxu1  ;;  %9925 = vmatpush3.bf16.msra.mxu0 %v10269_v45  ;;  %9933 = vmatpush3.bf16.msra.mxu1 %v10270_v13  ;;  %v9689_v24 = vpop.f32.mrb[151].mxu0  ;;  %v10279_v45 = vld [vmem:[#allocation2 + $0x2e0] sm:$0xff]   ;;  %v10280_v13 = vld [vmem:[#allocation2 + $0x2f0] sm:$0xff]   ;;  %v10281_v49 = vld [vmem:[#allocation2 + $0x2e8] sm:$0xff]  }
 0x6dd   :  { %v4352_v48 = vadd.f32 %v4346_v6, %v4276_v5  ;;  %v9681_v1 = vpop.f32.mrb[147].mxu1  ;;  %9938 = vmatprep.subr.bf16.mxu0 %v14522_v40  ;;  %9946 = vmatprep.subr.bf16.mxu1 %v14522_v40  ;;  %v7004_v5 = vpack.c.b16 %v13947_v60, %v13947_v60  ;;  %v10284_v24 = vld [vmem:[#allocation2 + $0x310] sm:$0xff]  }
 0x6de   :  { %v10283_v1 = vld [vmem:[#allocation2 + $0x300] sm:$0xff]  }
 0x6df   :  { %9927 = vmatmul.mubr.msk.bf16.vlgmr.msra.gmra.mrb[208].mxu0 %vm782_vm2, %v6624_v23  ;;  %9935 = vmatmul.mubr.msk.bf16.vlgmr.msra.gmra.mrb[208].mxu1 %vm782_vm2, %v6700_v16 }
 0x6e0   :  { %9939 = vmatpush3.bf16.msra.mxu0 %v10271_v8  ;;  %9947 = vmatpush3.bf16.msra.mxu1 %v10272_v25 }
 0x6e1   :  { %9940 = vmatprep.subr.bf16.mxu0 %v14522_v40  ;;  %9948 = vmatprep.subr.bf16.mxu1 %v14522_v40  ;;  %v4498_v52 = vpop.f32.mrb[152].mxu0 }
 0x6e2   :  { %v4422_v12 = vpop.f32.mrb[148].mxu1  ;;  %9942 = vmatprep.mubr.msk.bf16.mxu0 %vm10600_vm11, %v14522_v40  ;;  %9950 = vmatprep.mubr.msk.bf16.mxu1 %vm10600_vm11, %v14522_v40  ;;  %v9704_v19 = vpop.f32.mrb[153].mxu0 }
 0x6e3   :  { %v4428_v33 = vadd.f32 %v4422_v12, %v4352_v48  ;;  %v9696_v36 = vpop.f32.mrb[149].mxu1  ;;  %v4501_v43 = vpop.f32.mrb[154].mxu0  ;;  %v7156_v12 = vpack.c.b16 %v13978_v14, %v13978_v14 }
 0x6e4   :  { %v4425_v35 = vpop.f32.mrb[150].mxu1  ;;  %9941 = vmatpush3.bf16.msra.mxu0 %v10273_v28  ;;  %9949 = vmatpush3.bf16.msra.mxu1 %v10274_v54  ;;  %v9705_v34 = vpop.f32.mrb[155].mxu0  ;;  %v7080_v54 = vpack.c.b16 %v13969_v44, %v13969_v44 }
 0x6e5   :  { %v4504_v37 = vadd.f32 %v4498_v52, %v4428_v33  ;;  %v9697_v9 = vpop.f32.mrb[151].mxu1  ;;  %9954 = vmatprep.subr.bf16.mxu0 %v14522_v40  ;;  %9962 = vmatprep.subr.bf16.mxu1 %v14522_v40  ;;  %v10285_v52 = vld [vmem:[#allocation2 + $0x308] sm:$0xff]   ;;  %v10286_v33 = vld [vmem:[#allocation2 + $0x318] sm:$0xff]  }
 0x6e7   :  { %9943 = vmatmul.mubr.msk.bf16.vlgmr.msra.gmra.mrb[212].mxu0 %vm782_vm2, %v6776_v55  ;;  %9951 = vmatmul.mubr.msk.bf16.vlgmr.msra.gmra.mrb[212].mxu1 %vm782_vm2, %v6852_v21  ;;  %v7248_v21 = vpack.c.b16 %v13981_v26, %v13981_v26 }
 0x6e8   :  { %9955 = vmatpush3.bf16.msra.mxu0 %v10275_v10  ;;  %9963 = vmatpush3.bf16.msra.mxu1 %v10276_v50  ;;  %v10287_v50 = vld [vmem:[#allocation2 + $0x320] sm:$0xff]  }
 0x6e9   :  { %9956 = vmatprep.subr.bf16.mxu0 %v14522_v40  ;;  %9964 = vmatprep.subr.bf16.mxu1 %v14522_v40  ;;  %v4650_v39 = vpop.f32.mrb[156].mxu0 }
 0x6ea   :  { %v4574_v62 = vpop.f32.mrb[152].mxu1  ;;  %9958 = vmatprep.mubr.msk.bf16.mxu0 %vm10600_vm11, %v14522_v40  ;;  %9966 = vmatprep.mubr.msk.bf16.mxu1 %vm10600_vm11, %v14522_v40  ;;  %v9720_v20 = vpop.f32.mrb[157].mxu0 }
 0x6eb   :  { %v4580_v31 = vadd.f32 %v4574_v62, %v4504_v37  ;;  %v9712_v56 = vpop.f32.mrb[153].mxu1  ;;  %v4653_v3 = vpop.f32.mrb[158].mxu0  ;;  %v10288_v37 = vld [vmem:[#allocation2 + $0x330] sm:$0xff]   ;;  %v10290_v62 = vld [vmem:[#allocation2 + $0x338] sm:$0xff]  }
 0x6ec   :  { %v4577_v15 = vpop.f32.mrb[154].mxu1  ;;  %9957 = vmatpush3.bf16.msra.mxu0 %v10277_v2  ;;  %9965 = vmatpush3.bf16.msra.mxu1 %v10278_v11  ;;  %v9721_v6 = vpop.f32.mrb[159].mxu0  ;;  %v7324_v2 = vpack.c.b16 %v13990_v32, %v13990_v32  ;;  %v10289_v11 = vld [vmem:[#allocation2 + $0x328] sm:$0xff]   ;;  %v10291_v3 = vld [vmem:[#allocation2 + $0x340] sm:$0xff]  }
 0x6ed   :  { %v4656_v29 = vadd.f32 %v4650_v39, %v4580_v31  ;;  %v9713_v57 = vpop.f32.mrb[155].mxu1  ;;  %9970 = vmatprep.subr.bf16.mxu0 %v14522_v40  ;;  %9978 = vmatprep.subr.bf16.mxu1 %v14522_v40  ;;  %v7400_v6 = vpack.c.b16 %v14001_v27, %v14001_v27 }
 0x6ef   :  { %9959 = vmatmul.mubr.msk.bf16.vlgmr.msra.gmra.mrb[216].mxu0 %vm782_vm2, %v6928_v18  ;;  %9967 = vmatmul.mubr.msk.bf16.vlgmr.msra.gmra.mrb[216].mxu1 %vm782_vm2, %v7004_v5  ;;  %v7476_v18 = vpack.c.b16 %v14009_v22, %v14009_v22  ;;  %v10293_v5 = vld [vmem:[#allocation2 + $0x348] sm:$0xff]  }
 0x6f0   :  { %9971 = vmatpush3.bf16.msra.mxu0 %v10279_v45  ;;  %9979 = vmatpush3.bf16.msra.mxu1 %v10280_v13  ;;  %v10292_v45 = vld [vmem:[#allocation2 + $0x350] sm:$0xff]  }
 0x6f1   :  { %9972 = vmatprep.subr.bf16.mxu0 %v14522_v40  ;;  %9980 = vmatprep.subr.bf16.mxu1 %v14522_v40  ;;  %v4818_v41 = vpop.f32.mrb[160].mxu0 }
 0x6f2   :  { %v4726_v42 = vpop.f32.mrb[156].mxu1  ;;  %9974 = vmatprep.mubr.msk.bf16.mxu0 %vm10600_vm11, %v14522_v40  ;;  %9982 = vmatprep.mubr.msk.bf16.mxu1 %vm10600_vm11, %v14522_v40  ;;  %v9736_v8 = vpop.f32.mrb[161].mxu0 }
 0x6f3   :  { %v4732_v60 = vadd.f32 %v4726_v42, %v4656_v29  ;;  %v9728_v46 = vpop.f32.mrb[157].mxu1  ;;  %v4821_v48 = vpop.f32.mrb[162].mxu0  ;;  %v10295_v8 = vld [vmem:[#allocation2 + $0x360] sm:$0xff]  }
 0x6f4   :  { %v4729_v25 = vpop.f32.mrb[158].mxu1  ;;  %9973 = vmatpush3.bf16.msra.mxu0 %v10281_v49  ;;  %9981 = vmatpush3.bf16.msra.mxu1 %v10282_v53  ;;  %v9737_v28 = vpop.f32.mrb[163].mxu0  ;;  %v10294_v49 = vld [vmem:[#allocation2 + $0x358] sm:$0xff]  }
 0x6f5   :  { %v4824_v23 = vadd.f32 %v4818_v41, %v4732_v60  ;;  %v9729_v16 = vpop.f32.mrb[159].mxu1  ;;  %9986 = vmatprep.subr.bf16.mxu0 %v14522_v40  ;;  %9994 = vmatprep.subr.bf16.mxu1 %v14522_v40  ;;  %v10296_v25 = vld [vmem:[#allocation2 + $0x370] sm:$0xff]   ;;  %v10297_v28 = vld [vmem:[#allocation2 + $0x368] sm:$0xff]  }
 0x6f6   :  { %v7628_v16 = vpack.c.b16 %v14034_v0, %v14034_v0 }
 0x6f7   :  { %9975 = vmatmul.mubr.msk.bf16.vlgmr.msra.gmra.mrb[220].mxu0 %vm782_vm2, %v7080_v54  ;;  %9983 = vmatmul.mubr.msk.bf16.vlgmr.msra.gmra.mrb[220].mxu1 %vm782_vm2, %v7156_v12  ;;  %v10298_v54 = vld [vmem:[#allocation2 + $0x378] sm:$0xff]  }
 0x6f8   :  { %9987 = vmatpush3.bf16.msra.mxu0 %v10283_v1  ;;  %9995 = vmatpush3.bf16.msra.mxu1 %v10284_v24 }
 0x6f9   :  { %9988 = vmatprep.subr.bf16.mxu0 %v14522_v40  ;;  %9996 = vmatprep.subr.bf16.mxu1 %v14522_v40  ;;  %v4970_v36 = vpop.f32.mrb[164].mxu0 }
 0x6fa   :  { %v4894_v44 = vpop.f32.mrb[160].mxu1  ;;  %9990 = vmatprep.mubr.msk.bf16.mxu0 %vm10600_vm11, %v14522_v40  ;;  %9998 = vmatprep.mubr.msk.bf16.mxu1 %vm10600_vm11, %v14522_v40  ;;  %v9752_v35 = vpop.f32.mrb[165].mxu0 }
 0x6fb   :  { %v4900_v14 = vadd.f32 %v4894_v44, %v4824_v23  ;;  %v9744_v19 = vpop.f32.mrb[161].mxu1  ;;  %v4973_v10 = vpop.f32.mrb[166].mxu0  ;;  %v7552_v23 = vpack.c.b16 %v14021_v59, %v14021_v59 }
 0x6fc   :  { %v4897_v43 = vpop.f32.mrb[162].mxu1  ;;  %9989 = vmatpush3.bf16.msra.mxu0 %v10285_v52  ;;  %9997 = vmatpush3.bf16.msra.mxu1 %v10286_v33  ;;  %v9753_v55 = vpop.f32.mrb[167].mxu0  ;;  %v10300_v19 = vld [vmem:[#allocation2 + $0x390] sm:$0xff]  }
 0x6fd   :  { %v4976_v9 = vadd.f32 %v4970_v36, %v4900_v14  ;;  %v9745_v34 = vpop.f32.mrb[163].mxu1  ;;  %10002 = vmatprep.subr.bf16.mxu0 %v14522_v40  ;;  %10010 = vmatprep.subr.bf16.mxu1 %v14522_v40  ;;  %v10299_v14 = vld [vmem:[#allocation2 + $0x380] sm:$0xff]  }
 0x6fe   :  { %v10302_v34 = vld [vmem:[#allocation2 + $0x398] sm:$0xff]  }
 0x6ff   :  { %9991 = vmatmul.mubr.msk.bf16.vlgmr.msra.gmra.mrb[224].mxu0 %vm782_vm2, %v7248_v21  ;;  %9999 = vmatmul.mubr.msk.bf16.vlgmr.msra.gmra.mrb[224].mxu1 %vm782_vm2, %v7324_v2 }
 0x700   :  { %10003 = vmatpush3.bf16.msra.mxu0 %v10287_v50  ;;  %10011 = vmatpush3.bf16.msra.mxu1 %v10288_v37  ;;  %v7704_v50 = vpack.c.b16 %v14037_v4, %v14037_v4  ;;  %v7780_v37 = vpack.c.b16 %v14048_v47, %v14048_v47 }
 0x701   :  { %10004 = vmatprep.subr.bf16.mxu0 %v14522_v40  ;;  %10012 = vmatprep.subr.bf16.mxu1 %v14522_v40 }
 0x702   :  { %10006 = vmatprep.mubr.msk.bf16.mxu0 %vm10600_vm11, %v14522_v40  ;;  %10014 = vmatprep.mubr.msk.bf16.mxu1 %vm10600_vm11, %v14522_v40 }
 0x703   :  { %v5046_v26 = vpop.f32.mrb[164].mxu1 }
 0x704   :  { %v5122_v39 = vpop.f32.mrb[168].mxu0  ;;  %v5052_v32 = vadd.f32 %v5046_v26, %v4976_v9  ;;  %v9760_v31 = vpop.f32.mrb[165].mxu1  ;;  %10005 = vmatpush3.bf16.msra.mxu0 %v10289_v11  ;;  %10013 = vmatpush3.bf16.msra.mxu1 %v10290_v62  ;;  %v10301_v9 = vld [vmem:[#allocation2 + $0x388] sm:$0xff]   ;;  %v10303_v26 = vld [vmem:[#allocation2 + $0x3a0] sm:$0xff]  }
 0x705   :  { %v9768_v56 = vpop.f32.mrb[169].mxu0  ;;  %v5049_v20 = vpop.f32.mrb[166].mxu1  ;;  %10018 = vmatprep.subr.bf16.mxu0 %v14522_v40  ;;  %10026 = vmatprep.subr.bf16.mxu1 %v14522_v40 }
 0x706   :  { %v5125_v15 = vpop.f32.mrb[170].mxu0  ;;  %v5128_v13 = vadd.f32 %v5122_v39, %v5052_v32  ;;  %v9761_v29 = vpop.f32.mrb[167].mxu1  ;;  %v10304_v39 = vld [vmem:[#allocation2 + $0x3b0] sm:$0xff]   ;;  %v7864_v20 = vpack.c.b16 %v14060_v58, %v14060_v58 }
 0x707   :  { %v9769_v57 = vpop.f32.mrb[171].mxu0  ;;  %10007 = vmatmul.mubr.msk.bf16.vlgmr.msra.gmra.mrb[228].mxu0 %vm782_vm2, %v7400_v6  ;;  %10015 = vmatmul.mubr.msk.bf16.vlgmr.msra.gmra.mrb[228].mxu1 %vm782_vm2, %v7476_v18  ;;  %v7940_v15 = vpack.c.b16 %v14063_v63, %v14063_v63 }
 0x708   :  { %10019 = vmatpush3.bf16.msra.mxu0 %v10291_v3  ;;  %10027 = vmatpush3.bf16.msra.mxu1 %v10292_v45  ;;  %v10305_v3 = vld [vmem:[#allocation2 + $0x3a8] sm:$0xff]   ;;  %v10306_v45 = vld [vmem:[#allocation2 + $0x3b8] sm:$0xff]  }
 0x709   :  { %10020 = vmatprep.subr.bf16.mxu0 %v14522_v40  ;;  %10028 = vmatprep.subr.bf16.mxu1 %v14522_v40 }
 0x70a   :  { %10022 = vmatprep.mubr.msk.bf16.mxu0 %vm10600_vm11, %v14522_v40  ;;  %10030 = vmatprep.mubr.msk.bf16.mxu1 %vm10600_vm11, %v14522_v40 }
 0x70c   :  { %v5198_v27 = vpop.f32.mrb[168].mxu1  ;;  %v5274_v53 = vpop.f32.mrb[172].mxu0  ;;  %10021 = vmatpush3.bf16.msra.mxu0 %v10293_v5  ;;  %10029 = vmatpush3.bf16.msra.mxu1 %v10294_v49  ;;  %v10307_v5 = vld [vmem:[#allocation2 + $0x3c0] sm:$0xff]   ;;  %v10308_v49 = vld [vmem:[#allocation2 + $0x3d0] sm:$0xff]  }
 0x70d   :  { %v5204_v22 = vadd.f32 %v5198_v27, %v5128_v13  ;;  %v9776_v42 = vpop.f32.mrb[169].mxu1  ;;  %v9784_v41 = vpop.f32.mrb[173].mxu0  ;;  %10034 = vmatprep.subr.bf16.mxu0 %v14522_v40  ;;  %10042 = vmatprep.subr.bf16.mxu1 %v14522_v40 }
 0x70e   :  { %v5201_v60 = vpop.f32.mrb[170].mxu1  ;;  %v5277_v46 = vpop.f32.mrb[174].mxu0  ;;  %v8016_v42 = vpack.c.b16 %v14071_v61, %v14071_v61  ;;  %v8092_v41 = vpack.c.b16 %v14093_v30, %v14093_v30 }
 0x70f   :  { %v5280_v48 = vadd.f32 %v5274_v53, %v5204_v22  ;;  %v9777_v1 = vpop.f32.mrb[171].mxu1  ;;  %v9785_v24 = vpop.f32.mrb[175].mxu0  ;;  %10023 = vmatmul.mubr.msk.bf16.vlgmr.msra.gmra.mrb[232].mxu0 %vm782_vm2, %v7552_v23  ;;  %10031 = vmatmul.mubr.msk.bf16.vlgmr.msra.gmra.mrb[232].mxu1 %vm782_vm2, %v7628_v16  ;;  %v10309_v60 = vld [vmem:[#allocation2 + $0x3c8] sm:$0xff]   ;;  %v10310_v46 = vld [vmem:[#allocation2 + $0x3d8] sm:$0xff]   ;;  %v10311_v23 = vld [vmem:[#allocation2 + $0x3e0] sm:$0xff]  }
 0x710   :  { %10035 = vmatpush3.bf16.msra.mxu0 %v10295_v8  ;;  %10043 = vmatpush3.bf16.msra.mxu1 %v10296_v25  ;;  %v10312_v16 = vld [vmem:[#allocation2 + $0x3f0] sm:$0xff]  }
 0x711   :  { %10036 = vmatprep.subr.bf16.mxu0 %v14522_v40  ;;  %10044 = vmatprep.subr.bf16.mxu1 %v14522_v40 }
 0x712   :  { %10038 = vmatprep.mubr.msk.bf16.mxu0 %vm10600_vm11, %v14522_v40  ;;  %10046 = vmatprep.mubr.msk.bf16.mxu1 %vm10600_vm11, %v14522_v40 }
 0x714   :  { %v5350_v59 = vpop.f32.mrb[172].mxu1  ;;  %10037 = vmatpush3.bf16.msra.mxu0 %v10297_v28  ;;  %10045 = vmatpush3.bf16.msra.mxu1 %v10298_v54 }
 0x715   :  { %v5434_v12 = vpop.f32.mrb[176].mxu0  ;;  %v5356_v0 = vadd.f32 %v5350_v59, %v5280_v48  ;;  %v9792_v52 = vpop.f32.mrb[173].mxu1  ;;  %10050 = vmatprep.subr.bf16.mxu0 %v14522_v40  ;;  %10058 = vmatprep.subr.bf16.mxu1 %v14522_v40 }
 0x716   :  { %v9800_v33 = vpop.f32.mrb[177].mxu0  ;;  %v5353_v44 = vpop.f32.mrb[174].mxu1  ;;  %v10313_v52 = vld [vmem:[#allocation2 + $0x3e8] sm:$0xff]  }
 0x717   :  { %v5437_v36 = vpop.f32.mrb[178].mxu0  ;;  %v5440_v35 = vadd.f32 %v5434_v12, %v5356_v0  ;;  %v9793_v43 = vpop.f32.mrb[175].mxu1  ;;  %10039 = vmatmul.mubr.msk.bf16.vlgmr.msra.gmra.mrb[236].mxu0 %vm782_vm2, %v7704_v50  ;;  %10047 = vmatmul.mubr.msk.bf16.vlgmr.msra.gmra.mrb[236].mxu1 %vm782_vm2, %v7780_v37  ;;  %v8168_v12 = vpack.c.b16 %v14096_v38, %v14096_v38  ;;  %v8244_v0 = vpack.c.b16 %v14102_v7, %v14102_v7  ;;  %v10314_v33 = vld [vmem:[#allocation2 + $0x3f8] sm:$0xff]  }
 0x718   :  { %v9801_v10 = vpop.f32.mrb[179].mxu0  ;;  %10051 = vmatpush3.bf16.msra.mxu0 %v10299_v14  ;;  %10059 = vmatpush3.bf16.msra.mxu1 %v10300_v19  ;;  %v8320_v19 = vpack.c.b16 %v14108_v17, %v14108_v17 }
 0x719   :  { %10052 = vmatprep.subr.bf16.mxu0 %v14522_v40  ;;  %10060 = vmatprep.subr.bf16.mxu1 %v14522_v40 }
 0x71a   :  { %10054 = vmatprep.mubr.msk.bf16.mxu0 %vm10600_vm11, %v14522_v40  ;;  %10062 = vmatprep.mubr.msk.bf16.mxu1 %vm10600_vm11, %v14522_v40 }
 0x71c   :  { %v5510_v4 = vpop.f32.mrb[176].mxu1  ;;  %10053 = vmatpush3.bf16.msra.mxu0 %v10301_v9  ;;  %10061 = vmatpush3.bf16.msra.mxu1 %v10302_v34 }
 0x71d   :  { %v5586_v55 = vpop.f32.mrb[180].mxu0  ;;  %v5516_v47 = vadd.f32 %v5510_v4, %v5440_v35  ;;  %v9808_v21 = vpop.f32.mrb[177].mxu1  ;;  %10066 = vmatprep.subr.bf16.mxu0 %v14522_v40  ;;  %10074 = vmatprep.subr.bf16.mxu1 %v14522_v40  ;;  %v8396_v35 = vpack.c.b16 %v14118_v51, %v14118_v51 }
 0x71e   :  { %v9816_v2 = vpop.f32.mrb[181].mxu0  ;;  %v5513_v11 = vpop.f32.mrb[178].mxu1 }
 0x71f   :  { %v5589_v62 = vpop.f32.mrb[182].mxu0  ;;  %v5592_v32 = vadd.f32 %v5586_v55, %v5516_v47  ;;  %v9809_v31 = vpop.f32.mrb[179].mxu1  ;;  %10055 = vmatmul.mubr.msk.bf16.vlgmr.msra.gmra.mrb[240].mxu0 %vm782_vm2, %v7864_v20  ;;  %10063 = vmatmul.mubr.msk.bf16.vlgmr.msra.gmra.mrb[240].mxu1 %vm782_vm2, %v7940_v15 }
 0x720   :  { %v9817_v56 = vpop.f32.mrb[183].mxu0  ;;  %10067 = vmatpush3.bf16.msra.mxu0 %v10303_v26  ;;  %10075 = vmatpush3.bf16.msra.mxu1 %v10304_v39 }
 0x721   :  { %10068 = vmatprep.subr.bf16.mxu0 %v14522_v40  ;;  %10076 = vmatprep.subr.bf16.mxu1 %v14522_v40 }
 0x722   :  { %10070 = vmatprep.mubr.msk.bf16.mxu0 %vm10600_vm11, %v14522_v40  ;;  %10078 = vmatprep.mubr.msk.bf16.mxu1 %vm10600_vm11, %v14522_v40 }
 0x724   :  { %v5662_v58 = vpop.f32.mrb[180].mxu1  ;;  %10069 = vmatpush3.bf16.msra.mxu0 %v10305_v3  ;;  %10077 = vmatpush3.bf16.msra.mxu1 %v10306_v45 }
 0x725   :  { %v5738_v13 = vpop.f32.mrb[184].mxu0  ;;  %v5668_v63 = vadd.f32 %v5662_v58, %v5592_v32  ;;  %v9824_v29 = vpop.f32.mrb[181].mxu1  ;;  %10082 = vmatprep.subr.bf16.mxu0 %v14522_v40  ;;  %10090 = vmatprep.subr.bf16.mxu1 %v14522_v40 }
 0x726   :  { %v9832_v57 = vpop.f32.mrb[185].mxu0  ;;  %v5665_v6 = vpop.f32.mrb[182].mxu1 }
 0x727   :  { %v5741_v18 = vpop.f32.mrb[186].mxu0  ;;  %v5744_v27 = vadd.f32 %v5738_v13, %v5668_v63  ;;  %v9825_v53 = vpop.f32.mrb[183].mxu1  ;;  %10071 = vmatmul.mubr.msk.bf16.vlgmr.msra.gmra.mrb[244].mxu0 %vm782_vm2, %v8016_v42  ;;  %10079 = vmatmul.mubr.msk.bf16.vlgmr.msra.gmra.mrb[244].mxu1 %vm782_vm2, %v8092_v41 }
 0x728   :  { %v9833_v22 = vpop.f32.mrb[187].mxu0  ;;  %10083 = vmatpush3.bf16.msra.mxu0 %v10307_v5  ;;  %10091 = vmatpush3.bf16.msra.mxu1 %v10308_v49 }
 0x729   :  { %10084 = vmatprep.subr.bf16.mxu0 %v14522_v40  ;;  %10092 = vmatprep.subr.bf16.mxu1 %v14522_v40 }
 0x72a   :  { %10086 = vmatprep.mubr.msk.bf16.mxu0 %vm10600_vm11, %v14522_v40  ;;  %10094 = vmatprep.mubr.msk.bf16.mxu1 %vm10600_vm11, %v14522_v40 }
 0x72c   :  { %v5814_v61 = vpop.f32.mrb[184].mxu1  ;;  %10085 = vmatpush3.bf16.msra.mxu0 %v10309_v60  ;;  %10093 = vmatpush3.bf16.msra.mxu1 %v10310_v46 }
 0x72d   :  { %v5890_v8 = vpop.f32.mrb[188].mxu0  ;;  %v5820_v30 = vadd.f32 %v5814_v61, %v5744_v27  ;;  %v9840_v25 = vpop.f32.mrb[185].mxu1  ;;  %10098 = vmatprep.subr.bf16.mxu0 %v14522_v40  ;;  %10106 = vmatprep.subr.bf16.mxu1 %v14522_v40 }
 0x72e   :  { %v9848_v48 = vpop.f32.mrb[189].mxu0  ;;  %v5817_v1 = vpop.f32.mrb[186].mxu1 }
 0x72f   :  { %v5893_v24 = vpop.f32.mrb[190].mxu0  ;;  %v5896_v28 = vadd.f32 %v5890_v8, %v5820_v30  ;;  %v9841_v54 = vpop.f32.mrb[187].mxu1  ;;  %10087 = vmatmul.mubr.msk.bf16.vlgmr.msra.gmra.mrb[248].mxu0 %vm782_vm2, %v8168_v12  ;;  %10095 = vmatmul.mubr.msk.bf16.vlgmr.msra.gmra.mrb[248].mxu1 %vm782_vm2, %v8244_v0 }
 0x730   :  { %v9849_v59 = vpop.f32.mrb[191].mxu0  ;;  %10099 = vmatpush3.bf16.msra.mxu0 %v10311_v23  ;;  %10107 = vmatpush3.bf16.msra.mxu1 %v10312_v16 }
 0x731   :  { %10100 = vmatprep.subr.bf16.mxu0 %v14522_v40  ;;  %10108 = vmatprep.subr.bf16.mxu1 %v14522_v40 }
 0x732   :  { %10102 = vmatprep.mubr.msk.bf16.mxu0 %vm10600_vm11, %v14522_v40  ;;  %10110 = vmatprep.mubr.msk.bf16.mxu1 %vm10600_vm11, %v14522_v40 }
 0x734   :  { %v5966_v38 = vpop.f32.mrb[188].mxu1  ;;  %10101 = vmatpush3.bf16.msra.mxu0 %v10313_v52  ;;  %10109 = vmatpush3.bf16.msra.mxu1 %v10314_v33 }
 0x735   :  { %v5972_v7 = vadd.f32 %v5966_v38, %v5896_v28  ;;  %v9856_v44 = vpop.f32.mrb[189].mxu1 }
 0x736   :  { %v5969_v36 = vpop.f32.mrb[190].mxu1 }
 0x737   :  { %v9857_v14 = vpop.f32.mrb[191].mxu1  ;;  %10103 = vmatmul.mubr.msk.bf16.vlgmr.msra.gmra.mrb[252].mxu0 %vm782_vm2, %v8320_v19  ;;  %10111 = vmatmul.mubr.msk.bf16.vlgmr.msra.gmra.mrb[252].mxu1 %vm782_vm2, %v8396_v35 }
 0x792   :  { %v6058_v43 = vpop.f32.mrb[192].mxu0  ;;  %v6134_v10 = vpop.f32.mrb[192].mxu1 }
 0x793   :  { %v6064_v50 = vadd.f32 %v6058_v43, %v5972_v7  ;;  %v9864_v40 = vpop.f32.mrb[193].mxu0  ;;  %v9872_v37 = vpop.f32.mrb[193].mxu1 }
 0x794   :  { %v6061_v9 = vpop.f32.mrb[194].mxu0  ;;  %v6137_v34 = vpop.f32.mrb[194].mxu1 }
 0x795   :  { %v6140_v4 = vadd.f32 %v6134_v10, %v6064_v50  ;;  %v9865_v55 = vpop.f32.mrb[195].mxu0  ;;  %v9873_v47 = vpop.f32.mrb[195].mxu1 }
 0x79a   :  { %v6210_v21 = vpop.f32.mrb[196].mxu0  ;;  %v6286_v2 = vpop.f32.mrb[196].mxu1 }
 0x79b   :  { %v6216_v17 = vadd.f32 %v6210_v21, %v6140_v4  ;;  %v9880_v11 = vpop.f32.mrb[197].mxu0  ;;  %v9888_v62 = vpop.f32.mrb[197].mxu1 }
 0x79c   :  { %v6213_v51 = vpop.f32.mrb[198].mxu0  ;;  %v6289_v26 = vpop.f32.mrb[198].mxu1 }
 0x79d   :  { %v6292_v39 = vadd.f32 %v6286_v2, %v6216_v17  ;;  %v9881_v32 = vpop.f32.mrb[199].mxu0  ;;  %v9889_v31 = vpop.f32.mrb[199].mxu1 }
 0x7a2   :  { %v6362_v56 = vpop.f32.mrb[200].mxu0  ;;  %v6438_v20 = vpop.f32.mrb[200].mxu1 }
 0x7a3   :  { %v6368_v15 = vadd.f32 %v6362_v56, %v6292_v39  ;;  %v9896_v3 = vpop.f32.mrb[201].mxu0  ;;  %v9904_v45 = vpop.f32.mrb[201].mxu1 }
 0x7a4   :  { %v6365_v58 = vpop.f32.mrb[202].mxu0  ;;  %v6441_v13 = vpop.f32.mrb[202].mxu1 }
 0x7a5   :  { %v6444_v63 = vadd.f32 %v6438_v20, %v6368_v15  ;;  %v9897_v29 = vpop.f32.mrb[203].mxu0  ;;  %v9905_v57 = vpop.f32.mrb[203].mxu1 }
 0x7aa   :  { %v6514_v6 = vpop.f32.mrb[204].mxu0  ;;  %v6590_v18 = vpop.f32.mrb[204].mxu1 }
 0x7ab   :  { %v6520_v5 = vadd.f32 %v6514_v6, %v6444_v63  ;;  %v9912_v49 = vpop.f32.mrb[205].mxu0  ;;  %v9920_v27 = vpop.f32.mrb[205].mxu1 }
 0x7ac   :  { %v6517_v53 = vpop.f32.mrb[206].mxu0  ;;  %v6593_v22 = vpop.f32.mrb[206].mxu1 }
 0x7ad   :  { %v6596_v42 = vadd.f32 %v6590_v18, %v6520_v5  ;;  %v9913_v41 = vpop.f32.mrb[207].mxu0  ;;  %v9921_v60 = vpop.f32.mrb[207].mxu1 }
 0x7b2   :  { %v6674_v46 = vpop.f32.mrb[208].mxu0  ;;  %v6750_v61 = vpop.f32.mrb[208].mxu1 }
 0x7b3   :  { %v6680_v8 = vadd.f32 %v6674_v46, %v6596_v42  ;;  %v9928_v30 = vpop.f32.mrb[209].mxu0  ;;  %v9936_v25 = vpop.f32.mrb[209].mxu1 }
 0x7b4   :  { %v6677_v48 = vpop.f32.mrb[210].mxu0  ;;  %v6753_v1 = vpop.f32.mrb[210].mxu1 }
 0x7b5   :  { %v6756_v24 = vadd.f32 %v6750_v61, %v6680_v8  ;;  %v9929_v23 = vpop.f32.mrb[211].mxu0  ;;  %v9937_v16 = vpop.f32.mrb[211].mxu1 }
 0x7ba   :  { %v6826_v28 = vpop.f32.mrb[212].mxu0  ;;  %v6902_v54 = vpop.f32.mrb[212].mxu1 }
 0x7bb   :  { %v6832_v59 = vadd.f32 %v6826_v28, %v6756_v24  ;;  %v9944_v12 = vpop.f32.mrb[213].mxu0  ;;  %v9952_v0 = vpop.f32.mrb[213].mxu1 }
 0x7bc   :  { %v6829_v52 = vpop.f32.mrb[214].mxu0  ;;  %v6905_v33 = vpop.f32.mrb[214].mxu1 }
 0x7bd   :  { %v6908_v38 = vadd.f32 %v6902_v54, %v6832_v59  ;;  %v9945_v7 = vpop.f32.mrb[215].mxu0  ;;  %v9953_v44 = vpop.f32.mrb[215].mxu1 }
 0x7c2   :  { %v6978_v36 = vpop.f32.mrb[216].mxu0  ;;  %v7054_v14 = vpop.f32.mrb[216].mxu1 }
 0x7c3   :  { %v6984_v19 = vadd.f32 %v6978_v36, %v6908_v38  ;;  %v9960_v35 = vpop.f32.mrb[217].mxu0  ;;  %v9968_v43 = vpop.f32.mrb[217].mxu1 }
 0x7c4   :  { %v6981_v10 = vpop.f32.mrb[218].mxu0  ;;  %v7057_v50 = vpop.f32.mrb[218].mxu1 }
 0x7c5   :  { %v7060_v40 = vadd.f32 %v7054_v14, %v6984_v19  ;;  %v9961_v37 = vpop.f32.mrb[219].mxu0  ;;  %v9969_v9 = vpop.f32.mrb[219].mxu1 }
 0x7ca   :  { %v7130_v34 = vpop.f32.mrb[220].mxu0  ;;  %v7206_v4 = vpop.f32.mrb[220].mxu1 }
 0x7cb   :  { %v7136_v55 = vadd.f32 %v7130_v34, %v7060_v40  ;;  %v9976_v47 = vpop.f32.mrb[221].mxu0  ;;  %v9984_v21 = vpop.f32.mrb[221].mxu1 }
 0x7cc   :  { %v7133_v2 = vpop.f32.mrb[222].mxu0  ;;  %v7209_v17 = vpop.f32.mrb[222].mxu1 }
 0x7cd   :  { %v7212_v11 = vadd.f32 %v7206_v4, %v7136_v55  ;;  %v9977_v62 = vpop.f32.mrb[223].mxu0  ;;  %v9985_v51 = vpop.f32.mrb[223].mxu1 }
 0x7d2   :  { %v7298_v26 = vpop.f32.mrb[224].mxu0  ;;  %v7374_v39 = vpop.f32.mrb[224].mxu1 }
 0x7d3   :  { %v7304_v32 = vadd.f32 %v7298_v26, %v7212_v11  ;;  %v9992_v31 = vpop.f32.mrb[225].mxu0  ;;  %v10000_v56 = vpop.f32.mrb[225].mxu1 }
 0x7d4   :  { %v7301_v20 = vpop.f32.mrb[226].mxu0  ;;  %v7377_v15 = vpop.f32.mrb[226].mxu1 }
 0x7d5   :  { %v7380_v3 = vadd.f32 %v7374_v39, %v7304_v32  ;;  %v9993_v45 = vpop.f32.mrb[227].mxu0  ;;  %v10001_v58 = vpop.f32.mrb[227].mxu1 }
 0x7da   :  { %v7450_v13 = vpop.f32.mrb[228].mxu0  ;;  %v7526_v63 = vpop.f32.mrb[228].mxu1 }
 0x7db   :  { %v7456_v29 = vadd.f32 %v7450_v13, %v7380_v3  ;;  %v10008_v57 = vpop.f32.mrb[229].mxu0  ;;  %v10016_v6 = vpop.f32.mrb[229].mxu1 }
 0x7dc   :  { %v7453_v18 = vpop.f32.mrb[230].mxu0  ;;  %v7529_v5 = vpop.f32.mrb[230].mxu1 }
 0x7dd   :  { %v7532_v49 = vadd.f32 %v7526_v63, %v7456_v29  ;;  %v10009_v27 = vpop.f32.mrb[231].mxu0  ;;  %v10017_v53 = vpop.f32.mrb[231].mxu1  ;;  %v8824_v63 = vld [vmem:[%s14293_s6] ss:$0 sm:$0xff] }
 0x7e2   :  { %v7602_v22 = vpop.f32.mrb[232].mxu0  ;;  %v7678_v42 = vpop.f32.mrb[232].mxu1 }
 0x7e3   :  { %v7608_v41 = vadd.f32 %v7602_v22, %v7532_v49  ;;  %v10024_v60 = vpop.f32.mrb[233].mxu0  ;;  %v10032_v46 = vpop.f32.mrb[233].mxu1 }
 0x7e4   :  { %v7605_v61 = vpop.f32.mrb[234].mxu0  ;;  %v7681_v8 = vpop.f32.mrb[234].mxu1 }
 0x7e5   :  { %v7684_v30 = vadd.f32 %v7678_v42, %v7608_v41  ;;  %v10025_v25 = vpop.f32.mrb[235].mxu0  ;;  %v10033_v48 = vpop.f32.mrb[235].mxu1 }
 0x7ea   :  { %v7754_v1 = vpop.f32.mrb[236].mxu0  ;;  %v7830_v24 = vpop.f32.mrb[236].mxu1 }
 0x7eb   :  { %v7760_v23 = vadd.f32 %v7754_v1, %v7684_v30  ;;  %v10040_v16 = vpop.f32.mrb[237].mxu0  ;;  %v10048_v28 = vpop.f32.mrb[237].mxu1 }
 0x7ec   :  { %v7757_v54 = vpop.f32.mrb[238].mxu0  ;;  %v7833_v59 = vpop.f32.mrb[238].mxu1 }
 0x7ed   :  { %v7836_v12 = vadd.f32 %v7830_v24, %v7760_v23  ;;  %v10041_v0 = vpop.f32.mrb[239].mxu0  ;;  %v10049_v52 = vpop.f32.mrb[239].mxu1 }
 0x7f2   :  { %v7914_v33 = vpop.f32.mrb[240].mxu0  ;;  %v7990_v38 = vpop.f32.mrb[240].mxu1 }
 0x7f3   :  { %v7920_v7 = vadd.f32 %v7914_v33, %v7836_v12  ;;  %v10056_v44 = vpop.f32.mrb[241].mxu0  ;;  %v10064_v36 = vpop.f32.mrb[241].mxu1 }
 0x7f4   :  { %v7917_v14 = vpop.f32.mrb[242].mxu0  ;;  %v7993_v19 = vpop.f32.mrb[242].mxu1 }
 0x7f5   :  { %v7996_v35 = vadd.f32 %v7990_v38, %v7920_v7  ;;  %v10057_v43 = vpop.f32.mrb[243].mxu0  ;;  %v10065_v10 = vpop.f32.mrb[243].mxu1 }
 0x7fa   :  { %v8066_v50 = vpop.f32.mrb[244].mxu0  ;;  %v8142_v40 = vpop.f32.mrb[244].mxu1 }
 0x7fb   :  { %v8072_v37 = vadd.f32 %v8066_v50, %v7996_v35  ;;  %v10072_v9 = vpop.f32.mrb[245].mxu0  ;;  %v10080_v34 = vpop.f32.mrb[245].mxu1 }
 0x7fc   :  { %v8069_v4 = vpop.f32.mrb[246].mxu0  ;;  %v8145_v55 = vpop.f32.mrb[246].mxu1 }
 0x7fd   :  { %v8148_v47 = vadd.f32 %v8142_v40, %v8072_v37  ;;  %v10073_v21 = vpop.f32.mrb[247].mxu0  ;;  %v10081_v2 = vpop.f32.mrb[247].mxu1 }
 0x802   :  { %v8218_v17 = vpop.f32.mrb[248].mxu0  ;;  %v8294_v11 = vpop.f32.mrb[248].mxu1 }
 0x803   :  { %v8224_v62 = vadd.f32 %v8218_v17, %v8148_v47  ;;  %v10088_v51 = vpop.f32.mrb[249].mxu0  ;;  %v10096_v26 = vpop.f32.mrb[249].mxu1 }
 0x804   :  { %v8221_v39 = vpop.f32.mrb[250].mxu0  ;;  %v8297_v32 = vpop.f32.mrb[250].mxu1 }
 0x805   :  { %v8300_v31 = vadd.f32 %v8294_v11, %v8224_v62  ;;  %v10089_v56 = vpop.f32.mrb[251].mxu0  ;;  %v10097_v20 = vpop.f32.mrb[251].mxu1 }
 0x80a   :  { %v8370_v15 = vpop.f32.mrb[252].mxu0  ;;  %v8446_v3 = vpop.f32.mrb[252].mxu1 }
 0x80b   :  { %v8376_v45 = vadd.f32 %v8370_v15, %v8300_v31  ;;  %v10104_v58 = vpop.f32.mrb[253].mxu0  ;;  %v10112_v13 = vpop.f32.mrb[253].mxu1 }
 0x80c   :  { %v8373_v29 = vpop.f32.mrb[254].mxu0  ;;  %v8449_v57 = vpop.f32.mrb[254].mxu1 }
 0x80d   :  { %v8452_v6 = vadd.f32 %v8446_v3, %v8376_v45  ;;  %v10105_v18 = vpop.f32.mrb[255].mxu0  ;;  %v10113_v5 = vpop.f32.mrb[255].mxu1 }
 0x80f   :  { %v8460_v49 = vadd.f32 %v8824_v63, %v8452_v6 }
 0x811   :  { %v8461_v27 = vmax.f32 %v8460_v49, 0.0 }
 0x813   :  { %8462 = vst.msk [vmem:[%s14294_s7] sm:$0xff] %vm2008_vm3, %v8461_v27 }
 0x814   :  { %8467 = vsyncpa [#allocation3], 1 }

</bundles_post_ra>
